<compile_context>
chip_gen: v5e
topology: v5e:2x2
jax: 0.10.0
libtpu: 0.0.40
codegen_flags: <defaults>
</compile_context>

<pallas_src>
import functools

import jax
import jax.numpy as jnp
from jax.experimental import pallas as pl
from jax.experimental.pallas import tpu as pltpu


# ---------------------------------------------------------------------------
# Kernel
# ---------------------------------------------------------------------------
def _window_attention_kernel(x_ref, wqkv_ref, bqkv_ref, wproj_ref, bproj_ref,
                             bias_ref, mask_ref, o_ref,
                             q_scr, k_scr, v_scr, y_scr, *,
                             num_heads, head_dim, n, c, nw, tile_b,
                             has_mask, dyn_mask):
    tb, H, hd = tile_b, num_heads, head_dim

    # ---- Fused QKV projection (bf16 operands on the MXU, f32 accumulate). ----
    x2 = x_ref[...].reshape(tb * n, c)                       # bf16 (tb*n, c)
    qkv = jnp.dot(x2, wqkv_ref[...], preferred_element_type=jnp.float32)
    qkv = qkv + bqkv_ref[...]                                # f32 (tb*n, 3c); q-scale folded

    # ---- Split heads into a leading batch axis via VMEM scratch. ------------
    # Only cheap lane slices + stores are unrolled per head; all matmuls and
    # the softmax below are single batched ops over (head, window).
    for h in range(H):
        lo = h * hd
        q_scr[h * tb:(h + 1) * tb] = (
            qkv[:, lo:lo + hd].reshape(tb, n, hd).astype(jnp.bfloat16))
        k_scr[h * tb:(h + 1) * tb] = (
            qkv[:, c + lo:c + lo + hd].reshape(tb, n, hd).astype(jnp.bfloat16))
        v_scr[h * tb:(h + 1) * tb] = (
            qkv[:, 2 * c + lo:2 * c + lo + hd].reshape(tb, n, hd).astype(jnp.bfloat16))

    q = q_scr[...]                                           # (H*tb, n, hd) bf16
    k = k_scr[...]
    v = v_scr[...]

    # ---- Scores for all (head, window) pairs in one batched MXU call. -------
    s = jax.lax.dot_general(q, k, (((2,), (2,)), ((0,), (0,))),
                            preferred_element_type=jnp.float32)   # (H*tb, n, n)

    s4 = s.reshape(H, tb, n, n)
    s4 = s4 + bias_ref[...].astype(jnp.float32)[:, None]          # rel-pos bias
    if has_mask:
        if dyn_mask:
            # nw % tile_b == 0: consecutive mask rows starting at (t*tb) % nw.
            start = (pl.program_id(0) % (nw // tb)) * tb
            m = mask_ref[pl.ds(start, tb)].astype(jnp.float32)    # (tb, n, n)
        else:
            # tile_b % nw == 0: mask already tiled to (tb, n, n) in the wrapper.
            m = mask_ref[...].astype(jnp.float32)
        s4 = s4 + m[None]
    s = s4.reshape(H * tb, n, n)

    # ---- Numerically stable softmax in f32 (exp/recip on the EUP). ----------
    s_max = jnp.max(s, axis=-1, keepdims=True)
    p = jnp.exp(s - s_max)
    denom = jnp.sum(p, axis=-1, keepdims=True)
    p = p * pl.reciprocal(denom, approx=True)

    # ---- Attention-weighted values, batched (bf16 operands, f32 accum). -----
    o = jax.lax.dot_general(p.astype(jnp.bfloat16), v,
                            (((2,), (1,)), ((0,), (0,))),
                            preferred_element_type=jnp.float32)   # (H*tb, n, hd)

    # ---- Re-assemble heads into (tb*n, c) and do ONE full-c projection. -----
    for h in range(H):
        y_scr[:, h * hd:(h + 1) * hd] = (
            o[h * tb:(h + 1) * tb].reshape(tb * n, hd).astype(jnp.bfloat16))

    y = jnp.dot(y_scr[...], wproj_ref[...], preferred_element_type=jnp.float32)
    y = y + bproj_ref[...]                                        # (tb*n, c) f32
    o_ref[...] = y.reshape(tb, n, c).astype(o_ref.dtype)


# ---------------------------------------------------------------------------
# VMEM budgeting / tile selection (layout-padding aware)
# ---------------------------------------------------------------------------
def _round_up(v, m):
    return -(-v // m) * m


def _vmem_bytes(shape, itemsize):
    """VMEM footprint of one buffer: lane dim pads to 128, sublane to 8*(4/itemsize)."""
    s = list(shape)
    s[-1] = _round_up(s[-1], 128)
    if len(s) >= 2:
        sub = 8 * max(1, 4 // itemsize)
        s[-2] = _round_up(s[-2], sub)
    total = 1
    for d in s:
        total *= d
    return total * itemsize


def _default_vmem_limit_bytes():
    """Per-generation scoped-VMEM limit (half-sized on v7x's 64 MiB)."""
    kind = ""
    try:
        kind = jax.devices()[0].device_kind.lower()
    except Exception:
        pass
    if "v7" in kind:
        return 44 * 1024 * 1024
    if "v5" in kind or "v6" in kind:
        return 96 * 1024 * 1024
    return 44 * 1024 * 1024            # unknown: fits every generation


def _tile_vmem_bytes(tb, n, c, num_heads, nw, out_itemsize):
    hd = c // num_heads
    mask_rows = tb if tb % nw == 0 else nw
    # Resident (constant index_map) operands — default double-buffering counted.
    fixed = 2 * (_vmem_bytes((c, 3 * c), 2) + _vmem_bytes((1, 3 * c), 4)
                 + _vmem_bytes((c, c), 2) + _vmem_bytes((1, c), 4)
                 + _vmem_bytes((num_heads, n, n), 2)
                 + _vmem_bytes((mask_rows, n, n), 2))
    # Pipelined x / out blocks (double-buffered).
    blocks = 2 * (_vmem_bytes((tb, n, c), 2)
                  + _vmem_bytes((tb, n, c), out_itemsize))
    # Kernel scratch.
    scratch = (3 * _vmem_bytes((num_heads * tb, n, hd), 2)
               + _vmem_bytes((tb * n, c), 2))
    # Live intermediates (qkv f32, scores + exp f32, probs bf16, PV f32, proj f32).
    live = (_vmem_bytes((tb * n, 3 * c), 4)
            + 2 * _vmem_bytes((num_heads * tb, n, n), 4)
            + _vmem_bytes((num_heads * tb, n, n), 2)
            + _vmem_bytes((num_heads * tb, n, hd), 4)
            + _vmem_bytes((tb * n, c), 4))
    return fixed + blocks + scratch + int(1.25 * live)


def _pick_tile_b(b, n, c, num_heads, nw, out_itemsize, budget):
    """Largest divisor of b, aligned with the mask period nw, fitting `budget`,
    capped so the grid keeps >= 2 steps (both v7x TensorCores stay busy)."""
    cap = b if b == 1 else b // 2
    for t in range(cap, 0, -1):
        if b % t:
            continue
        if (t % nw) and (nw % t):
            continue
        if _tile_vmem_bytes(t, n, c, num_heads, nw, out_itemsize) <= budget:
            return t
    return 1


# ---------------------------------------------------------------------------
# Wrapper
# ---------------------------------------------------------------------------
def window_attention(x, wqkv, bqkv, wproj, bproj, rel_bias_table,
                     rel_pos_index, mask, *, num_heads, tile_b=None):
    """WindowAttention.forward.

    x             : (b, n, c)   windows-of-tokens input (b = batch * num_windows,
                                 window index = batch index % num_windows)
    wqkv          : (3c, c)     nn.Linear(dim, 3*dim).weight layout
    bqkv          : (3c,) or None
    wproj, bproj  : (c, c), (c,)
    rel_bias_table: ((2Wd-1)(2Wh-1)(2Ww-1), num_heads)
    rel_pos_index : (Wd*Wh*Ww, Wd*Wh*Ww) int
    mask          : (nw, n, n) or None
    """
    b, n, c = x.shape
    assert c % num_heads == 0
    head_dim = c // num_heads
    scale = head_dim ** (-0.5)
    out_itemsize = jnp.dtype(x.dtype).itemsize

    # Relative-position bias gathered from the table (tiny; XLA side), bf16 resident.
    idx = rel_pos_index[:n, :n].reshape(-1)
    bias = rel_bias_table[idx].reshape(n, n, num_heads)
    bias = jnp.transpose(bias, (2, 0, 1)).astype(jnp.bfloat16)          # (H, n, n)

    # Weights: fold the q-scale in f32, then cast matmul operands to bf16.
    wqkv_t = jnp.transpose(wqkv).astype(jnp.float32)                    # (c, 3c)
    wqkv_t = wqkv_t.at[:, :c].multiply(scale)
    if bqkv is None:
        bqkv_row = jnp.zeros((1, 3 * c), jnp.float32)
    else:
        bqkv_row = bqkv.reshape(1, 3 * c).astype(jnp.float32)
        bqkv_row = bqkv_row.at[:, :c].multiply(scale)
    wqkv_bf = wqkv_t.astype(jnp.bfloat16)
    wproj_bf = jnp.transpose(wproj).astype(jnp.bfloat16)                # (c, c)
    bproj_row = bproj.reshape(1, c).astype(jnp.float32)

    nw = 1 if mask is None else mask.shape[0]
    if mask is not None:
        assert b % nw == 0, "batch must be a multiple of num_windows (mask rows)"

    vmem_limit = _default_vmem_limit_bytes()
    if tile_b is None:
        tile_b = _pick_tile_b(b, n, c, num_heads, nw, out_itemsize,
                              int(0.65 * vmem_limit))
    assert b % tile_b == 0
    assert (tile_b % nw == 0) or (nw % tile_b == 0), \
        "tile_b must align with the mask period nw"

    has_mask = mask is not None
    if not has_mask:
        mask_in = jnp.zeros((1, n, n), jnp.bfloat16)
        dyn_mask = False
        mask_rows = 1
    elif tile_b % nw == 0:
        mask_in = jnp.tile(mask.astype(jnp.bfloat16), (tile_b // nw, 1, 1))
        dyn_mask = False
        mask_rows = tile_b
    else:  # nw % tile_b == 0
        mask_in = mask.astype(jnp.bfloat16)
        dyn_mask = True
        mask_rows = nw

    x_bf = x.astype(jnp.bfloat16)
    grid = (b // tile_b,)

    flops = b * (2 * n * c * 3 * c                      # QKV projection
                 + 4 * num_heads * n * n * head_dim     # QK^T + PV
                 + 2 * n * c * c)                       # output projection
    transcendentals = b * num_heads * n * n
    bytes_accessed = (x_bf.size * 2 + b * n * c * out_itemsize
                      + wqkv_bf.size * 2 + bqkv_row.size * 4
                      + wproj_bf.size * 2 + bproj_row.size * 4
                      + bias.size * 2 + mask_in.size * 2)

    kernel = functools.partial(
        _window_attention_kernel,
        num_heads=num_heads, head_dim=head_dim, n=n, c=c, nw=nw,
        tile_b=tile_b, has_mask=has_mask, dyn_mask=dyn_mask)

    out = pl.pallas_call(
        kernel,
        out_shape=jax.ShapeDtypeStruct((b, n, c), x.dtype),
        grid_spec=pltpu.PrefetchScalarGridSpec(
            num_scalar_prefetch=0,
            grid=grid,
            in_specs=[
                pl.BlockSpec((tile_b, n, c), lambda t: (t, 0, 0)),         # x (bf16)
                pl.BlockSpec((c, 3 * c), lambda t: (0, 0)),                # Wqkv^T
                pl.BlockSpec((1, 3 * c), lambda t: (0, 0)),                # bqkv
                pl.BlockSpec((c, c), lambda t: (0, 0)),                    # Wproj^T
                pl.BlockSpec((1, c), lambda t: (0, 0)),                    # bproj
                pl.BlockSpec((num_heads, n, n), lambda t: (0, 0, 0)),      # rel-pos bias
                pl.BlockSpec((mask_rows, n, n), lambda t: (0, 0, 0)),      # window mask
            ],
            out_specs=pl.BlockSpec((tile_b, n, c), lambda t: (t, 0, 0)),
            scratch_shapes=[
                pltpu.VMEM((num_heads * tile_b, n, head_dim), jnp.bfloat16),  # q
                pltpu.VMEM((num_heads * tile_b, n, head_dim), jnp.bfloat16),  # k
                pltpu.VMEM((num_heads * tile_b, n, head_dim), jnp.bfloat16),  # v
                pltpu.VMEM((tile_b * n, c), jnp.bfloat16),                    # head concat
            ],
        ),
        compiler_params=pltpu.CompilerParams(
            dimension_semantics=("parallel",),
            vmem_limit_bytes=vmem_limit,
        ),
        cost_estimate=pl.CostEstimate(
            flops=flops,
            transcendentals=transcendentals,
            bytes_accessed=bytes_accessed,
        ),
    )(x_bf, wqkv_bf, bqkv_row, wproj_bf, bproj_row, bias, mask_in)

    return out


# ---------------------------------------------------------------------------
# Relative-position index (matches the PyTorch 3-D construction)
# ---------------------------------------------------------------------------
def make_relative_position_index_3d(window_size):
    wd, wh, ww = window_size
    coords = jnp.stack(jnp.meshgrid(jnp.arange(wd), jnp.arange(wh),
                                    jnp.arange(ww), indexing="ij"))
    coords_flatten = coords.reshape(3, -1)                       # (3, n)
    rel = coords_flatten[:, :, None] - coords_flatten[:, None, :]
    rel = jnp.transpose(rel, (1, 2, 0))                          # (n, n, 3)
    r0 = (rel[..., 0] + wd - 1) * (2 * wh - 1) * (2 * ww - 1)
    r1 = (rel[..., 1] + wh - 1) * (2 * ww - 1)
    r2 = rel[..., 2] + ww - 1
    return r0 + r1 + r2                                          # (n, n) int


# ---------------------------------------------------------------------------
# Pure-JAX reference (mirrors the PyTorch forward, f32 HIGHEST precision)
# ---------------------------------------------------------------------------
def _reference(x, wqkv, bqkv, wproj, bproj, table, rel_index, mask, num_heads):
    hp = jax.lax.Precision.HIGHEST
    b, n, c = x.shape
    hd = c // num_heads
    scale = hd ** (-0.5)
    qkv = jnp.einsum("bnc,kc->bnk", x, wqkv, precision=hp)
    if bqkv is not None:
        qkv = qkv + bqkv
    qkv = qkv.reshape(b, n, 3, num_heads, hd).transpose(2, 0, 3, 1, 4)
    q, k, v = qkv[0] * scale, qkv[1], qkv[2]
    attn = jnp.einsum("bhqd,bhkd->bhqk", q, k, precision=hp)
    bias = table[rel_index[:n, :n].reshape(-1)].reshape(n, n, num_heads)
    bias = jnp.transpose(bias, (2, 0, 1))
    attn = attn + bias[None]
    if mask is not None:
        nw = mask.shape[0]
        attn = attn.reshape(b // nw, nw, num_heads, n, n) + mask[None, :, None]
        attn = attn.reshape(b, num_heads, n, n)
    attn = jax.nn.softmax(attn, axis=-1)
    out = jnp.einsum("bhqk,bhkd->bhqd", attn, v, precision=hp)
    out = jnp.transpose(out, (0, 2, 1, 3)).reshape(b, n, c)
    return jnp.einsum("bnc,oc->bno", out, wproj, precision=hp) + bproj


if __name__ == "__main__":
    key = jax.random.PRNGKey(0)
    ks = jax.random.split(key, 6)

    dim, num_heads = 32, 4
    window_size = (4, 4, 4)
    n = window_size[0] * window_size[1] * window_size[2]     # 64 tokens / window
    batch, nw = 2, 4                                          # 2 images x 4 windows
    b = batch * nw

    x = jax.random.normal(ks[0], (b, n, dim), dtype=jnp.float32)
    wqkv = 0.1 * jax.random.normal(ks[1], (3 * dim, dim), dtype=jnp.float32)
    wproj = 0.1 * jax.random.normal(ks[2], (dim, dim), dtype=jnp.float32)
    bproj = 0.1 * jax.random.normal(ks[3], (dim,), dtype=jnp.float32)
    table_rows = ((2 * window_size[0] - 1) * (2 * window_size[1] - 1)
                  * (2 * window_size[2] - 1))
    table = 0.02 * jax.random.normal(ks[4], (table_rows, num_heads),
                                     dtype=jnp.float32)
    mask = jax.random.normal(ks[5], (nw, n, n), dtype=jnp.float32)

    rel_index = make_relative_position_index_3d(window_size)

    out = window_attention(x, wqkv, None, wproj, bproj, table, rel_index, mask,
                           num_heads=num_heads)
    out = jax.block_until_ready(out)

    ref = _reference(x, wqkv, None, wproj, bproj, table, rel_index, mask,
                     num_heads)
    assert out.shape == (b, n, dim), out.shape
    max_err = float(jnp.max(jnp.abs(out - ref)))
    # bf16 MXU operands (f32 softmax/accumulation) -> looser tolerance than pure f32.
    assert jnp.allclose(out, ref, atol=2e-2, rtol=2e-2), f"max_err={max_err}"
    print("KERNEL_OK")
</pallas_src>

<mosaic_0001>
module attributes {stable_mosaic.version = 11 : i64} {
  func.func @_window_attention_kernel(%arg0: i32, %arg1: memref<4x64x32xbf16, #tpu.memory_space<vmem>>, %arg2: memref<32x96xbf16, #tpu.memory_space<vmem>>, %arg3: memref<1x96xf32, #tpu.memory_space<vmem>>, %arg4: memref<32x32xbf16, #tpu.memory_space<vmem>>, %arg5: memref<1x32xf32, #tpu.memory_space<vmem>>, %arg6: memref<4x64x64xbf16, #tpu.memory_space<vmem>>, %arg7: memref<4x64x64xbf16, #tpu.memory_space<vmem>>, %arg8: memref<4x64x32xf32, #tpu.memory_space<vmem>>, %arg9: memref<16x64x8xbf16, #tpu.memory_space<vmem>>, %arg10: memref<16x64x8xbf16, #tpu.memory_space<vmem>>, %arg11: memref<16x64x8xbf16, #tpu.memory_space<vmem>>, %arg12: memref<256x32xbf16, #tpu.memory_space<vmem>>) attributes {dimension_semantics = [#tpu.dimension_semantics<parallel>], iteration_bounds = array<i64: 2>, scalar_prefetch = 0 : i64, scratch_operands = 4 : i64, tpu.core_type = #tpu.core_type<tc>, window_params = [{transform_indices = @transform_0, window_bounds = array<i64: 4, 64, 32>}, {pipeline_mode = #tpu.pipeline_mode<synchronous>, transform_indices = @transform_1, window_bounds = array<i64: 32, 96>}, {pipeline_mode = #tpu.pipeline_mode<synchronous>, transform_indices = @transform_2, window_bounds = array<i64: 1, 96>}, {pipeline_mode = #tpu.pipeline_mode<synchronous>, transform_indices = @transform_3, window_bounds = array<i64: 32, 32>}, {pipeline_mode = #tpu.pipeline_mode<synchronous>, transform_indices = @transform_4, window_bounds = array<i64: 1, 32>}, {pipeline_mode = #tpu.pipeline_mode<synchronous>, transform_indices = @transform_5, window_bounds = array<i64: 4, 64, 64>}, {pipeline_mode = #tpu.pipeline_mode<synchronous>, transform_indices = @transform_6, window_bounds = array<i64: 4, 64, 64>}, {transform_indices = @transform_7, window_bounds = array<i64: 4, 64, 32>}]} {
    %c0 = arith.constant 0 : index
    %c0_0 = arith.constant 0 : index
    %c0_1 = arith.constant 0 : index
    %0 = vector.load %arg1[%c0, %c0_0, %c0_1] : memref<4x64x32xbf16, #tpu.memory_space<vmem>>, vector<4x64x32xbf16>
    %1 = vector.shape_cast %0 : vector<4x64x32xbf16> to vector<256x32xbf16>
    %c0_2 = arith.constant 0 : index
    %c0_3 = arith.constant 0 : index
    %2 = vector.load %arg2[%c0_2, %c0_3] : memref<32x96xbf16, #tpu.memory_space<vmem>>, vector<32x96xbf16>
    %cst = arith.constant dense<0.000000e+00> : vector<256x96xf32>
    %3 = tpu.matmul %1, %2, %cst {dimension_numbers = #tpu.dot_dimension_numbers<[1], [0], [0], [1], [0, 0, 1, 1], [], []>} : vector<256x32xbf16>, vector<32x96xbf16>, vector<256x96xf32> -> vector<256x96xf32>
    %c0_4 = arith.constant 0 : index
    %c0_5 = arith.constant 0 : index
    %4 = vector.load %arg3[%c0_4, %c0_5] : memref<1x96xf32, #tpu.memory_space<vmem>>, vector<1x96xf32>
    %5 = vector.broadcast %4 : vector<1x96xf32> to vector<256x96xf32>
    %6 = arith.addf %3, %5 : vector<256x96xf32>
    %7 = vector.extract_strided_slice %6 {offsets = [0, 0], sizes = [256, 8], strides = [1, 1]} : vector<256x96xf32> to vector<256x8xf32>
    %8 = vector.shape_cast %7 : vector<256x8xf32> to vector<4x64x8xf32>
    %9 = arith.truncf %8 : vector<4x64x8xf32> to vector<4x64x8xbf16>
    %c0_6 = arith.constant 0 : index
    %c0_7 = arith.constant 0 : index
    %c0_8 = arith.constant 0 : index
    %10 = vector.load %arg9[%c0_6, %c0_7, %c0_8] : memref<16x64x8xbf16, #tpu.memory_space<vmem>>, vector<4x64x8xbf16>
    tpu.vector_store %arg9[%c0_6, %c0_7, %c0_8], %9 {strides = array<i32>} : memref<16x64x8xbf16, #tpu.memory_space<vmem>>, vector<4x64x8xbf16>,
    %11 = vector.extract_strided_slice %6 {offsets = [0, 32], sizes = [256, 8], strides = [1, 1]} : vector<256x96xf32> to vector<256x8xf32>
    %12 = vector.shape_cast %11 : vector<256x8xf32> to vector<4x64x8xf32>
    %13 = arith.truncf %12 : vector<4x64x8xf32> to vector<4x64x8xbf16>
    %c0_9 = arith.constant 0 : index
    %c0_10 = arith.constant 0 : index
    %c0_11 = arith.constant 0 : index
    %14 = vector.load %arg10[%c0_9, %c0_10, %c0_11] : memref<16x64x8xbf16, #tpu.memory_space<vmem>>, vector<4x64x8xbf16>
    tpu.vector_store %arg10[%c0_9, %c0_10, %c0_11], %13 {strides = array<i32>} : memref<16x64x8xbf16, #tpu.memory_space<vmem>>, vector<4x64x8xbf16>,
    %15 = vector.extract_strided_slice %6 {offsets = [0, 64], sizes = [256, 8], strides = [1, 1]} : vector<256x96xf32> to vector<256x8xf32>
    %16 = vector.shape_cast %15 : vector<256x8xf32> to vector<4x64x8xf32>
    %17 = arith.truncf %16 : vector<4x64x8xf32> to vector<4x64x8xbf16>
    %c0_12 = arith.constant 0 : index
    %c0_13 = arith.constant 0 : index
    %c0_14 = arith.constant 0 : index
    %18 = vector.load %arg11[%c0_12, %c0_13, %c0_14] : memref<16x64x8xbf16, #tpu.memory_space<vmem>>, vector<4x64x8xbf16>
    tpu.vector_store %arg11[%c0_12, %c0_13, %c0_14], %17 {strides = array<i32>} : memref<16x64x8xbf16, #tpu.memory_space<vmem>>, vector<4x64x8xbf16>,
    %19 = vector.extract_strided_slice %6 {offsets = [0, 8], sizes = [256, 8], strides = [1, 1]} : vector<256x96xf32> to vector<256x8xf32>
    %20 = vector.shape_cast %19 : vector<256x8xf32> to vector<4x64x8xf32>
    %21 = arith.truncf %20 : vector<4x64x8xf32> to vector<4x64x8xbf16>
    %c4 = arith.constant 4 : index
    %c0_15 = arith.constant 0 : index
    %c0_16 = arith.constant 0 : index
    %22 = vector.load %arg9[%c4, %c0_15, %c0_16] : memref<16x64x8xbf16, #tpu.memory_space<vmem>>, vector<4x64x8xbf16>
    tpu.vector_store %arg9[%c4, %c0_15, %c0_16], %21 {strides = array<i32>} : memref<16x64x8xbf16, #tpu.memory_space<vmem>>, vector<4x64x8xbf16>,
    %23 = vector.extract_strided_slice %6 {offsets = [0, 40], sizes = [256, 8], strides = [1, 1]} : vector<256x96xf32> to vector<256x8xf32>
    %24 = vector.shape_cast %23 : vector<256x8xf32> to vector<4x64x8xf32>
    %25 = arith.truncf %24 : vector<4x64x8xf32> to vector<4x64x8xbf16>
    %c4_17 = arith.constant 4 : index
    %c0_18 = arith.constant 0 : index
    %c0_19 = arith.constant 0 : index
    %26 = vector.load %arg10[%c4_17, %c0_18, %c0_19] : memref<16x64x8xbf16, #tpu.memory_space<vmem>>, vector<4x64x8xbf16>
    tpu.vector_store %arg10[%c4_17, %c0_18, %c0_19], %25 {strides = array<i32>} : memref<16x64x8xbf16, #tpu.memory_space<vmem>>, vector<4x64x8xbf16>,
    %27 = vector.extract_strided_slice %6 {offsets = [0, 72], sizes = [256, 8], strides = [1, 1]} : vector<256x96xf32> to vector<256x8xf32>
    %28 = vector.shape_cast %27 : vector<256x8xf32> to vector<4x64x8xf32>
    %29 = arith.truncf %28 : vector<4x64x8xf32> to vector<4x64x8xbf16>
    %c4_20 = arith.constant 4 : index
    %c0_21 = arith.constant 0 : index
    %c0_22 = arith.constant 0 : index
    %30 = vector.load %arg11[%c4_20, %c0_21, %c0_22] : memref<16x64x8xbf16, #tpu.memory_space<vmem>>, vector<4x64x8xbf16>
    tpu.vector_store %arg11[%c4_20, %c0_21, %c0_22], %29 {strides = array<i32>} : memref<16x64x8xbf16, #tpu.memory_space<vmem>>, vector<4x64x8xbf16>,
    %31 = vector.extract_strided_slice %6 {offsets = [0, 16], sizes = [256, 8], strides = [1, 1]} : vector<256x96xf32> to vector<256x8xf32>
    %32 = vector.shape_cast %31 : vector<256x8xf32> to vector<4x64x8xf32>
    %33 = arith.truncf %32 : vector<4x64x8xf32> to vector<4x64x8xbf16>
    %c8 = arith.constant 8 : index
    %c0_23 = arith.constant 0 : index
    %c0_24 = arith.constant 0 : index
    %34 = vector.load %arg9[%c8, %c0_23, %c0_24] : memref<16x64x8xbf16, #tpu.memory_space<vmem>>, vector<4x64x8xbf16>
    tpu.vector_store %arg9[%c8, %c0_23, %c0_24], %33 {strides = array<i32>} : memref<16x64x8xbf16, #tpu.memory_space<vmem>>, vector<4x64x8xbf16>,
    %35 = vector.extract_strided_slice %6 {offsets = [0, 48], sizes = [256, 8], strides = [1, 1]} : vector<256x96xf32> to vector<256x8xf32>
    %36 = vector.shape_cast %35 : vector<256x8xf32> to vector<4x64x8xf32>
    %37 = arith.truncf %36 : vector<4x64x8xf32> to vector<4x64x8xbf16>
    %c8_25 = arith.constant 8 : index
    %c0_26 = arith.constant 0 : index
    %c0_27 = arith.constant 0 : index
    %38 = vector.load %arg10[%c8_25, %c0_26, %c0_27] : memref<16x64x8xbf16, #tpu.memory_space<vmem>>, vector<4x64x8xbf16>
    tpu.vector_store %arg10[%c8_25, %c0_26, %c0_27], %37 {strides = array<i32>} : memref<16x64x8xbf16, #tpu.memory_space<vmem>>, vector<4x64x8xbf16>,
    %39 = vector.extract_strided_slice %6 {offsets = [0, 80], sizes = [256, 8], strides = [1, 1]} : vector<256x96xf32> to vector<256x8xf32>
    %40 = vector.shape_cast %39 : vector<256x8xf32> to vector<4x64x8xf32>
    %41 = arith.truncf %40 : vector<4x64x8xf32> to vector<4x64x8xbf16>
    %c8_28 = arith.constant 8 : index
    %c0_29 = arith.constant 0 : index
    %c0_30 = arith.constant 0 : index
    %42 = vector.load %arg11[%c8_28, %c0_29, %c0_30] : memref<16x64x8xbf16, #tpu.memory_space<vmem>>, vector<4x64x8xbf16>
    tpu.vector_store %arg11[%c8_28, %c0_29, %c0_30], %41 {strides = array<i32>} : memref<16x64x8xbf16, #tpu.memory_space<vmem>>, vector<4x64x8xbf16>,
    %43 = vector.extract_strided_slice %6 {offsets = [0, 24], sizes = [256, 8], strides = [1, 1]} : vector<256x96xf32> to vector<256x8xf32>
    %44 = vector.shape_cast %43 : vector<256x8xf32> to vector<4x64x8xf32>
    %45 = arith.truncf %44 : vector<4x64x8xf32> to vector<4x64x8xbf16>
    %c12 = arith.constant 12 : index
    %c0_31 = arith.constant 0 : index
    %c0_32 = arith.constant 0 : index
    %46 = vector.load %arg9[%c12, %c0_31, %c0_32] : memref<16x64x8xbf16, #tpu.memory_space<vmem>>, vector<4x64x8xbf16>
    tpu.vector_store %arg9[%c12, %c0_31, %c0_32], %45 {strides = array<i32>} : memref<16x64x8xbf16, #tpu.memory_space<vmem>>, vector<4x64x8xbf16>,
    %47 = vector.extract_strided_slice %6 {offsets = [0, 56], sizes = [256, 8], strides = [1, 1]} : vector<256x96xf32> to vector<256x8xf32>
    %48 = vector.shape_cast %47 : vector<256x8xf32> to vector<4x64x8xf32>
    %49 = arith.truncf %48 : vector<4x64x8xf32> to vector<4x64x8xbf16>
    %c12_33 = arith.constant 12 : index
    %c0_34 = arith.constant 0 : index
    %c0_35 = arith.constant 0 : index
    %50 = vector.load %arg10[%c12_33, %c0_34, %c0_35] : memref<16x64x8xbf16, #tpu.memory_space<vmem>>, vector<4x64x8xbf16>
    tpu.vector_store %arg10[%c12_33, %c0_34, %c0_35], %49 {strides = array<i32>} : memref<16x64x8xbf16, #tpu.memory_space<vmem>>, vector<4x64x8xbf16>,
    %51 = vector.extract_strided_slice %6 {offsets = [0, 88], sizes = [256, 8], strides = [1, 1]} : vector<256x96xf32> to vector<256x8xf32>
    %52 = vector.shape_cast %51 : vector<256x8xf32> to vector<4x64x8xf32>
    %53 = arith.truncf %52 : vector<4x64x8xf32> to vector<4x64x8xbf16>
    %c12_36 = arith.constant 12 : index
    %c0_37 = arith.constant 0 : index
    %c0_38 = arith.constant 0 : index
    %54 = vector.load %arg11[%c12_36, %c0_37, %c0_38] : memref<16x64x8xbf16, #tpu.memory_space<vmem>>, vector<4x64x8xbf16>
    tpu.vector_store %arg11[%c12_36, %c0_37, %c0_38], %53 {strides = array<i32>} : memref<16x64x8xbf16, #tpu.memory_space<vmem>>, vector<4x64x8xbf16>,
    %c0_39 = arith.constant 0 : index
    %c0_40 = arith.constant 0 : index
    %c0_41 = arith.constant 0 : index
    %55 = vector.load %arg9[%c0_39, %c0_40, %c0_41] : memref<16x64x8xbf16, #tpu.memory_space<vmem>>, vector<16x64x8xbf16>
    %c0_42 = arith.constant 0 : index
    %c0_43 = arith.constant 0 : index
    %c0_44 = arith.constant 0 : index
    %56 = vector.load %arg10[%c0_42, %c0_43, %c0_44] : memref<16x64x8xbf16, #tpu.memory_space<vmem>>, vector<16x64x8xbf16>
    %c0_45 = arith.constant 0 : index
    %c0_46 = arith.constant 0 : index
    %c0_47 = arith.constant 0 : index
    %57 = vector.load %arg11[%c0_45, %c0_46, %c0_47] : memref<16x64x8xbf16, #tpu.memory_space<vmem>>, vector<16x64x8xbf16>
    %cst_48 = arith.constant dense<0.000000e+00> : vector<16x64x64xf32>
    %58 = tpu.matmul %55, %56, %cst_48 {dimension_numbers = #tpu.dot_dimension_numbers<[2], [2], [1], [1], [0, 0, 0, 1, 1, 1], [0], [0]>} : vector<16x64x8xbf16>, vector<16x64x8xbf16>, vector<16x64x64xf32> -> vector<16x64x64xf32>
    %59 = vector.shape_cast %58 : vector<16x64x64xf32> to vector<4x4x64x64xf32>
    %c0_49 = arith.constant 0 : index
    %c0_50 = arith.constant 0 : index
    %c0_51 = arith.constant 0 : index
    %60 = vector.load %arg6[%c0_49, %c0_50, %c0_51] : memref<4x64x64xbf16, #tpu.memory_space<vmem>>, vector<4x64x64xbf16>
    %61 = arith.extf %60 : vector<4x64x64xbf16> to vector<4x64x64xf32>
    %62 = vector.shape_cast %61 : vector<4x64x64xf32> to vector<4x1x64x64xf32>
    %63 = vector.broadcast %62 : vector<4x1x64x64xf32> to vector<4x4x64x64xf32>
    %64 = arith.addf %59, %63 : vector<4x4x64x64xf32>
    %c0_52 = arith.constant 0 : index
    %c0_53 = arith.constant 0 : index
    %c0_54 = arith.constant 0 : index
    %65 = vector.load %arg7[%c0_52, %c0_53, %c0_54] : memref<4x64x64xbf16, #tpu.memory_space<vmem>>, vector<4x64x64xbf16>
    %66 = arith.extf %65 : vector<4x64x64xbf16> to vector<4x64x64xf32>
    %67 = vector.shape_cast %66 : vector<4x64x64xf32> to vector<1x4x64x64xf32>
    %68 = vector.broadcast %67 : vector<1x4x64x64xf32> to vector<4x4x64x64xf32>
    %69 = arith.addf %64, %68 : vector<4x4x64x64xf32>
    %70 = vector.shape_cast %69 : vector<4x4x64x64xf32> to vector<16x64x64xf32>
    %cst_55 = arith.constant dense<0xFF800000> : vector<16x64xf32>
    %71 = vector.multi_reduction <maximumf>, %70, %cst_55 [2] : vector<16x64x64xf32> to vector<16x64xf32>
    %72 = vector.shape_cast %71 : vector<16x64xf32> to vector<16x64x1xf32>
    %73 = vector.broadcast %72 : vector<16x64x1xf32> to vector<16x64x64xf32>
    %74 = arith.subf %70, %73 : vector<16x64x64xf32>
    %75 = math.exp %74 : vector<16x64x64xf32>
    %cst_56 = arith.constant dense<0.000000e+00> : vector<16x64xf32>
    %76 = vector.multi_reduction <add>, %75, %cst_56 [2] : vector<16x64x64xf32> to vector<16x64xf32>
    %77 = vector.shape_cast %76 : vector<16x64xf32> to vector<16x64x1xf32>
    %78 = tpu.reciprocal %77 {approx = true} : vector<16x64x1xf32> -> vector<16x64x1xf32>
    %79 = vector.broadcast %78 : vector<16x64x1xf32> to vector<16x64x64xf32>
    %80 = arith.mulf %75, %79 : vector<16x64x64xf32>
    %81 = arith.truncf %80 : vector<16x64x64xf32> to vector<16x64x64xbf16>
    %cst_57 = arith.constant dense<0.000000e+00> : vector<16x64x8xf32>
    %82 = tpu.matmul %81, %57, %cst_57 {dimension_numbers = #tpu.dot_dimension_numbers<[2], [1], [1], [2], [0, 0, 0, 1, 1, 2], [0], [0]>} : vector<16x64x64xbf16>, vector<16x64x8xbf16>, vector<16x64x8xf32> -> vector<16x64x8xf32>
    %83 = vector.extract_strided_slice %82 {offsets = [0, 0, 0], sizes = [4, 64, 8], strides = [1, 1, 1]} : vector<16x64x8xf32> to vector<4x64x8xf32>
    %84 = vector.shape_cast %83 : vector<4x64x8xf32> to vector<256x8xf32>
    %85 = arith.truncf %84 : vector<256x8xf32> to vector<256x8xbf16>
    %c0_58 = arith.constant 0 : index
    %c0_59 = arith.constant 0 : index
    %86 = vector.load %arg12[%c0_58, %c0_59] : memref<256x32xbf16, #tpu.memory_space<vmem>>, vector<256x8xbf16>
    tpu.vector_store %arg12[%c0_58, %c0_59], %85 {strides = array<i32>} : memref<256x32xbf16, #tpu.memory_space<vmem>>, vector<256x8xbf16>,
    %87 = vector.extract_strided_slice %82 {offsets = [4, 0, 0], sizes = [4, 64, 8], strides = [1, 1, 1]} : vector<16x64x8xf32> to vector<4x64x8xf32>
    %88 = vector.shape_cast %87 : vector<4x64x8xf32> to vector<256x8xf32>
    %89 = arith.truncf %88 : vector<256x8xf32> to vector<256x8xbf16>
    %c0_60 = arith.constant 0 : index
    %c8_61 = arith.constant 8 : index
    %90 = vector.load %arg12[%c0_60, %c8_61] : memref<256x32xbf16, #tpu.memory_space<vmem>>, vector<256x8xbf16>
    tpu.vector_store %arg12[%c0_60, %c8_61], %89 {strides = array<i32>} : memref<256x32xbf16, #tpu.memory_space<vmem>>, vector<256x8xbf16>,
    %91 = vector.extract_strided_slice %82 {offsets = [8, 0, 0], sizes = [4, 64, 8], strides = [1, 1, 1]} : vector<16x64x8xf32> to vector<4x64x8xf32>
    %92 = vector.shape_cast %91 : vector<4x64x8xf32> to vector<256x8xf32>
    %93 = arith.truncf %92 : vector<256x8xf32> to vector<256x8xbf16>
    %c0_62 = arith.constant 0 : index
    %c16 = arith.constant 16 : index
    %94 = vector.load %arg12[%c0_62, %c16] : memref<256x32xbf16, #tpu.memory_space<vmem>>, vector<256x8xbf16>
    tpu.vector_store %arg12[%c0_62, %c16], %93 {strides = array<i32>} : memref<256x32xbf16, #tpu.memory_space<vmem>>, vector<256x8xbf16>,
    %95 = vector.extract_strided_slice %82 {offsets = [12, 0, 0], sizes = [4, 64, 8], strides = [1, 1, 1]} : vector<16x64x8xf32> to vector<4x64x8xf32>
    %96 = vector.shape_cast %95 : vector<4x64x8xf32> to vector<256x8xf32>
    %97 = arith.truncf %96 : vector<256x8xf32> to vector<256x8xbf16>
    %c0_63 = arith.constant 0 : index
    %c24 = arith.constant 24 : index
    %98 = vector.load %arg12[%c0_63, %c24] : memref<256x32xbf16, #tpu.memory_space<vmem>>, vector<256x8xbf16>
    tpu.vector_store %arg12[%c0_63, %c24], %97 {strides = array<i32>} : memref<256x32xbf16, #tpu.memory_space<vmem>>, vector<256x8xbf16>,
    %c0_64 = arith.constant 0 : index
    %c0_65 = arith.constant 0 : index
    %99 = vector.load %arg12[%c0_64, %c0_65] : memref<256x32xbf16, #tpu.memory_space<vmem>>, vector<256x32xbf16>
    %c0_66 = arith.constant 0 : index
    %c0_67 = arith.constant 0 : index
    %100 = vector.load %arg4[%c0_66, %c0_67] : memref<32x32xbf16, #tpu.memory_space<vmem>>, vector<32x32xbf16>
    %cst_68 = arith.constant dense<0.000000e+00> : vector<256x32xf32>
    %101 = tpu.matmul %99, %100, %cst_68 {dimension_numbers = #tpu.dot_dimension_numbers<[1], [0], [0], [1], [0, 0, 1, 1], [], []>} : vector<256x32xbf16>, vector<32x32xbf16>, vector<256x32xf32> -> vector<256x32xf32>
    %c0_69 = arith.constant 0 : index
    %c0_70 = arith.constant 0 : index
    %102 = vector.load %arg5[%c0_69, %c0_70] : memref<1x32xf32, #tpu.memory_space<vmem>>, vector<1x32xf32>
    %103 = vector.broadcast %102 : vector<1x32xf32> to vector<256x32xf32>
    %104 = arith.addf %101, %103 : vector<256x32xf32>
    %105 = vector.shape_cast %104 : vector<256x32xf32> to vector<4x64x32xf32>
    %c0_71 = arith.constant 0 : index
    %c0_72 = arith.constant 0 : index
    %c0_73 = arith.constant 0 : index
    %106 = vector.load %arg8[%c0_71, %c0_72, %c0_73] : memref<4x64x32xf32, #tpu.memory_space<vmem>>, vector<4x64x32xf32>
    tpu.vector_store %arg8[%c0_71, %c0_72, %c0_73], %105 {strides = array<i32>} : memref<4x64x32xf32, #tpu.memory_space<vmem>>, vector<4x64x32xf32>,
    return
  }
  func.func @transform_0(%arg0: i32) -> (i32, i32, i32) {
    %c0_i32 = arith.constant 0 : i32
    %c0_i32_0 = arith.constant 0 : i32
    %c0_i32_1 = arith.constant 0 : i32
    return %arg0, %c0_i32, %c0_i32_0 : i32, i32, i32
  }
  func.func @transform_1(%arg0: i32) -> (i32, i32) {
    %c0_i32 = arith.constant 0 : i32
    %c0_i32_0 = arith.constant 0 : i32
    %c0_i32_1 = arith.constant 0 : i32
    return %c0_i32, %c0_i32_0 : i32, i32
  }
  func.func @transform_2(%arg0: i32) -> (i32, i32) {
    %c0_i32 = arith.constant 0 : i32
    %c0_i32_0 = arith.constant 0 : i32
    %c0_i32_1 = arith.constant 0 : i32
    return %c0_i32, %c0_i32_0 : i32, i32
  }
  func.func @transform_3(%arg0: i32) -> (i32, i32) {
    %c0_i32 = arith.constant 0 : i32
    %c0_i32_0 = arith.constant 0 : i32
    %c0_i32_1 = arith.constant 0 : i32
    return %c0_i32, %c0_i32_0 : i32, i32
  }
  func.func @transform_4(%arg0: i32) -> (i32, i32) {
    %c0_i32 = arith.constant 0 : i32
    %c0_i32_0 = arith.constant 0 : i32
    %c0_i32_1 = arith.constant 0 : i32
    return %c0_i32, %c0_i32_0 : i32, i32
  }
  func.func @transform_5(%arg0: i32) -> (i32, i32, i32) {
    %c0_i32 = arith.constant 0 : i32
    %c0_i32_0 = arith.constant 0 : i32
    %c0_i32_1 = arith.constant 0 : i32
    %c0_i32_2 = arith.constant 0 : i32
    return %c0_i32, %c0_i32_0, %c0_i32_1 : i32, i32, i32
  }
  func.func @transform_6(%arg0: i32) -> (i32, i32, i32) {
    %c0_i32 = arith.constant 0 : i32
    %c0_i32_0 = arith.constant 0 : i32
    %c0_i32_1 = arith.constant 0 : i32
    %c0_i32_2 = arith.constant 0 : i32
    return %c0_i32, %c0_i32_0, %c0_i32_1 : i32, i32, i32
  }
  func.func @transform_7(%arg0: i32) -> (i32, i32, i32) {
    %c0_i32 = arith.constant 0 : i32
    %c0_i32_0 = arith.constant 0 : i32
    %c0_i32_1 = arith.constant 0 : i32
    return %arg0, %c0_i32, %c0_i32_0 : i32, i32, i32
  }
}

</mosaic_0001>

<bundles_post_ra>
// kernel: tpu_custom_call.1
= control target key start
LH: loop header
LB: loop body
LE: loop exit
PB: predicated region body
PF: predicated region fallthrough
CT: control target
= control target key end

     0   :  { %s10314_s24 = smov 0   ;;  %s14837_s0 = inlined_call_operand.vmem [shape: bf16[8,64,32], index: 0, kind: input, shape index: {}]   ;;  %s14838_s1 = inlined_call_operand.vmem [shape: bf16[32,96], index: 1, kind: input, shape index: {}]   ;;  %s14839_s2 = inlined_call_operand.vmem [shape: f32[1,96], index: 2, kind: input, shape index: {}]   ;;  %s14840_s3 = inlined_call_operand.vmem [shape: bf16[32,32], index: 3, kind: input, shape index: {}]   ;;  %s14841_s4 = inlined_call_operand.vmem [shape: f32[1,32], index: 4, kind: input, shape index: {}]   ;;  %s14842_s5 = inlined_call_operand.vmem [shape: bf16[4,64,64], index: 5, kind: input, shape index: {}]   ;;  %s14843_s6 = inlined_call_operand.vmem [shape: bf16[4,64,64], index: 6, kind: input, shape index: {}]   ;;  %s14844_s7 = inlined_call_operand.vmem [shape: f32[8,64,32], index: 7, kind: output, shape index: {}]  }
   0x1 LB: > { %s8228_s25 = sadd.s32 4294967295, %s10258_s24   ;;  %p8232_p0 = scmp.ge.s32.totalorder %s10258_s24, 1  ;;  %s10258_s24 = sphi %s10314_s24, %s17_s24  }
   0x2   : > { %p239_p1 = scmp.lt.s32.totalorder %s10258_s24, 3 }
   0x4   : > { %p240_p2 = pnand %p8232_p0, %p239_p1 }
   0x6   : > { %243 = sbr.rel (%p240_p2) target bundleno = 2648 (0xa58), region = 48 }
   0xb   : > { %v9332_v0 = vld [vmem:[%s14838_s1 + $0x8] sm:$0xff]  ;;  %s8233_s28 = sshll.u32 %s8228_s25, 2  ;;  %v9331_v1 = vld [vmem:[%s14838_s1] sm:$0xff]  ;;  %vm420_vm0 = vcmask 261120   ;;  %vm590_vm1 = vcmask 60416   ;;  %s10260_s14 = smov 96  }
   0xc   : > { %p274_p3 = scmp.lt.s32.totalorder %s8233_s28, 7  ;;  %475 = vmatpush.bf16.msra.mxu0 %v9332_v0  ;;  %9701 = vmatpush.bf16.msra.mxu1 %v9332_v0  ;;  %v10367_v16 = vld [vmem:[%s14839_s2] ss:$0 sm:$0xff]  ;;  %s10261_s15 = smov 64   ;;  %vm2496_vm2 = vcmask 64512   ;;  %vm4329_vm3 = vcmask 523264  }
   0xd   : > { %9702 = vmatpush.bf16.msra.mxu2 %v9332_v0  ;;  %9703 = vmatpush.bf16.msra.mxu3 %v9332_v0  ;;  %s10262_s16 = smov 120   ;;  %s10263_s17 = smov 88   ;;  %vm7450_vm4 = vcmask 126016   ;;  %vm7643_vm5 = vcmask 191616   ;;  %vm7836_vm6 = vcmask 257216  }
   0xe   : > { %s15456_s28 = smov (!%p274_p3, %s8233_s28), 7  ;;  %s10264_s18 = smov 56  }
   0xf   : > { %s9313_s8 = sshll.u32 %s15456_s28, 5  ;;  %s10265_s19 = smov 112  }
  0x10   : > { %476 = vmatpush.bf16.msra.mxu0 %v9331_v1  ;;  %9704 = vmatpush.bf16.msra.mxu1 %v9331_v1  ;;  %s10334_s11 = scalar_lea.vmem %s14837_s0, %s9313_s8  ;;  %s10266_s22 = smov 80  }
  0x11   : > { %9705 = vmatpush.bf16.msra.mxu2 %v9331_v1  ;;  %v9315_v2 = vld [vmem:[%s10334_s11] sm:$0xff]  ;;  %v9320_v3 = vld [vmem:[%s10334_s11 + $0x28] sm:$0xff]  ;;  %v9325_v4 = vld [vmem:[%s10334_s11 + $0x50] sm:$0xff]  ;;  %9706 = vmatpush.bf16.msra.mxu3 %v9331_v1  ;;  %s10267_s23 = smov 48   ;;  %s10268_s25 = smov 104  }
  0x12   : > { %v9327_v5 = vld [vmem:[%s10334_s11 + $0x60] sm:$0xff]  ;;  %v9316_v6 = vld [vmem:[%s10334_s11 + $0x8] sm:$0xff]  ;;  %v9321_v7 = vld [vmem:[%s10334_s11 + $0x30] sm:$0xff]  ;;  %s10269_s26 = smov 72   ;;  %s10270_s27 = smov 40  }
  0x13   : > { %8311 = vmatmul.msk.bf16.vlgmr.msra.gmra.mxu0 %vm420_vm0, %v9315_v2  ;;  %8316 = vmatmul.msk.bf16.vlgmr.msra.gmra.mxu1 %vm420_vm0, %v9320_v3  ;;  %v9328_v8 = vld [vmem:[%s10334_s11 + $0x68] sm:$0xff]  ;;  %v9326_v9 = vld [vmem:[%s10334_s11 + $0x58] sm:$0xff]  ;;  %v9317_v10 = vld [vmem:[%s10334_s11 + $0x10] sm:$0xff]  ;;  %s10271_s30 = smov 8   ;;  %s10272_s8 = smov 16  }
  0x14   : > { %8321 = vmatmul.msk.bf16.vlgmr.msra.gmra.mxu2 %vm420_vm0, %v9325_v4  ;;  %8323 = vmatmul.msk.bf16.vlgmr.msra.gmra.mxu3 %vm420_vm0, %v9327_v5  ;;  %v9322_v11 = vld [vmem:[%s10334_s11 + $0x38] sm:$0xff]  ;;  %v9329_v12 = vld [vmem:[%s10334_s11 + $0x70] sm:$0xff]  ;;  %v9323_v14 = vld [vmem:[%s10334_s11 + $0x40] sm:$0xff]  ;;  %s10273_s9 = smov 24  }
  0x15   : > { %v9318_v13 = vld [vmem:[%s10334_s11 + $0x18] sm:$0xff]  ;;  %v9319_v47 = vld [vmem:[%s10334_s11 + $0x20] sm:$0xff]  ;;  %v9324_v48 = vld [vmem:[%s10334_s11 + $0x48] sm:$0xff] }
  0x16   : > { %v9330_v15 = vld [vmem:[%s10334_s11 + $0x78] sm:$0xff] }
  0x23   : > { %8312 = vmatmul.msk.bf16.gmra.mxu0 %vm420_vm0, %v9316_v6  ;;  %8317 = vmatmul.msk.bf16.gmra.mxu1 %vm420_vm0, %v9321_v7 }
  0x24   : > { %8324 = vmatmul.msk.bf16.gmra.mxu3 %vm420_vm0, %v9328_v8  ;;  %8322 = vmatmul.msk.bf16.gmra.mxu2 %vm420_vm0, %v9326_v9 }
  0x33   : > { %8313 = vmatmul.msk.bf16.gmra.mxu0 %vm420_vm0, %v9317_v10  ;;  %8318 = vmatmul.msk.bf16.gmra.mxu1 %vm420_vm0, %v9322_v11 }
  0x34   : > { %8325 = vmatmul.msk.bf16.gmra.mxu3 %vm420_vm0, %v9329_v12 }
  0x43   : > { %8314 = vmatmul.msk.bf16.gmra.mxu0 %vm420_vm0, %v9318_v13  ;;  %8319 = vmatmul.msk.bf16.gmra.mxu1 %vm420_vm0, %v9323_v14 }
  0x44   : > { %8326 = vmatmul.msk.bf16.gmra.mxu3 %vm420_vm0, %v9330_v15 }
  0x53   : > { %8315 = vmatmul.msk.bf16.gmra.mxu0 %vm420_vm0, %v9319_v47  ;;  %8320 = vmatmul.msk.bf16.gmra.mxu1 %vm420_vm0, %v9324_v48 }
  0x90   : > { %v478_v17 = vpop.f32.mrf.mxu0  ;;  %v503_v18 = vpop.f32.mrf.mxu1 }
  0x91   : > { %v479_v19 = vadd.f32 %v10367_v16, %v478_v17  ;;  %v504_v20 = vadd.f32 %v10367_v16, %v503_v18 }
  0x93   : > { %v10371_v21 = vpack.c.bf16 %v479_v19, %v479_v19  ;;  %v10373_v22 = vpack.c.bf16 %v504_v20, %v504_v20 }
  0x95   : > { %675 = vrot.lane.b32.xlu1 %v10373_v22, %s10260_s14  ;;  %783 = vrot.lane.b32.xlu2 %v10371_v21, %s10261_s15  ;;  %591 = vst.msk [vmem:[#allocation2] sm:$0xf] %vm590_vm1, %v10371_v21 }
  0x96   : > { %655 = vrot.lane.b32.xlu0 %v10371_v21, %s10260_s14  ;;  %601 = vst.msk [vmem:[#allocation2 + $0x28] sm:$0xf] %vm590_vm1, %v10373_v22 }
  0x97   : > { %v528_v23 = vpop.f32.mrf.mxu2  ;;  %v538_v24 = vpop.f32.mrf.mxu3 }
  0x98   : > { %v480_v25 = vpop.f32.mrf.mxu0  ;;  %v505_v26 = vpop.f32.mrf.mxu1  ;;  %v529_v27 = vadd.f32 %v10367_v16, %v528_v23  ;;  %v539_v30 = vadd.f32 %v10367_v16, %v538_v24 }
  0x99   : > { %v481_v28 = vadd.f32 %v10367_v16, %v480_v25  ;;  %v506_v29 = vadd.f32 %v10367_v16, %v505_v26 }
  0x9a   : > { %v10389_v31 = vpack.c.bf16 %v529_v27, %v529_v27  ;;  %v10401_v34 = vpack.c.bf16 %v539_v30, %v539_v30 }
  0x9b   : > { %v10391_v32 = vpack.c.bf16 %v481_v28, %v481_v28  ;;  %v10393_v33 = vpack.c.bf16 %v506_v29, %v506_v29 }
  0x9c   : > { %611 = vst.msk [vmem:[#allocation2 + $0x50] sm:$0xf] %vm590_vm1, %v10389_v31 }
  0x9d   : > { %911 = vrot.lane.b32.xlu1 %v10371_v21, %s10262_s16  ;;  %931 = vrot.lane.b32.xlu2 %v10373_v22, %s10262_s16  ;;  %592 = vst.msk [vmem:[#allocation2 + $0x4] sm:$0xf] %vm590_vm1, %v10391_v32 }
  0x9e   : > { %803 = vrot.lane.b32.xlu0 %v10373_v22, %s10261_s15  ;;  %602 = vst.msk [vmem:[#allocation2 + $0x2c] sm:$0xf] %vm590_vm1, %v10393_v33 }
  0x9f   : > { %v530_v35 = vpop.f32.mrf.mxu2  ;;  %v540_v36 = vpop.f32.mrf.mxu3  ;;  %615 = vst.msk [vmem:[#allocation2 + $0x60] sm:$0xf] %vm590_vm1, %v10401_v34 }
  0xa0   : > { %v531_v37 = vadd.f32 %v10367_v16, %v530_v35  ;;  %v541_v38 = vadd.f32 %v10367_v16, %v540_v36  ;;  %v483_v39 = vpop.f32.mrf.mxu0  ;;  %v508_v40 = vpop.f32.mrf.mxu1 }
  0xa1   : > { %v484_v41 = vadd.f32 %v10367_v16, %v483_v39  ;;  %v509_v42 = vadd.f32 %v10367_v16, %v508_v40 }
  0xa2   : > { %v10415_v43 = vpack.c.bf16 %v531_v37, %v531_v37  ;;  %v10417_v44 = vpack.c.bf16 %v541_v38, %v541_v38 }
  0xa3   : > { %v10419_v45 = vpack.c.bf16 %v484_v41, %v484_v41  ;;  %v10421_v46 = vpack.c.bf16 %v509_v42, %v509_v42 }
  0xa4   : > { %612 = vst.msk [vmem:[#allocation2 + $0x54] sm:$0xf] %vm590_vm1, %v10415_v43 }
  0xa5   : > { %823 = vrot.lane.b32.xlu1 %v10389_v31, %s10261_s15  ;;  %695 = vrot.lane.b32.xlu2 %v10389_v31, %s10260_s14  ;;  %593 = vst.msk [vmem:[#allocation2 + $0x8] sm:$0xf] %vm590_vm1, %v10419_v45 }
  0xa6   : > { %703 = vrot.lane.b32.xlu0 %v10401_v34, %s10260_s14  ;;  %603 = vst.msk [vmem:[#allocation2 + $0x30] sm:$0xf] %vm590_vm1, %v10421_v46 }
  0xa7   : > { %v543_v49 = vpop.f32.mrf.mxu3  ;;  %616 = vst.msk [vmem:[#allocation2 + $0x64] sm:$0xf] %vm590_vm1, %v10417_v44  ;;  %v533_v56 = vpop.f32.mrf.mxu2 }
  0xa8   : > { %v510_v50 = vpop.f32.mrf.mxu1  ;;  %v544_v51 = vadd.f32 %v10367_v16, %v543_v49  ;;  %v485_v55 = vpop.f32.mrf.mxu0  ;;  %v534_v58 = vadd.f32 %v10367_v16, %v533_v56 }
  0xa9   : > { %v511_v52 = vadd.f32 %v10367_v16, %v510_v50  ;;  %v486_v57 = vadd.f32 %v10367_v16, %v485_v55 }
  0xaa   : > { %v10443_v53 = vpack.c.bf16 %v544_v51, %v544_v51  ;;  %v10462_v62 = vpack.c.bf16 %v534_v58, %v534_v58 }
  0xab   : > { %v10445_v54 = vpack.c.bf16 %v511_v52, %v511_v52  ;;  %v10460_v61 = vpack.c.bf16 %v486_v57, %v486_v57 }
  0xac   : > { %617 = vst.msk [vmem:[#allocation2 + $0x68] sm:$0xf] %vm590_vm1, %v10443_v53 }
  0xad   : > { %805 = vrot.lane.b32.xlu1 %v10393_v33, %s10261_s15  ;;  %831 = vrot.lane.b32.xlu2 %v10401_v34, %s10261_s15  ;;  %604 = vst.msk [vmem:[#allocation2 + $0x34] sm:$0xf] %vm590_vm1, %v10445_v54 }
  0xae   : > { %657 = vrot.lane.b32.xlu0 %v10391_v32, %s10260_s14  ;;  %594 = vst.msk [vmem:[#allocation2 + $0xc] sm:$0xf] %vm590_vm1, %v10460_v61 }
  0xaf   : > { %v545_v59 = vpop.f32.mrf.mxu3  ;;  %613 = vst.msk [vmem:[#allocation2 + $0x58] sm:$0xf] %vm590_vm1, %v10462_v62  ;;  %v535_v0 = vpop.f32.mrf.mxu2 }
  0xb0   : > { %v546_v60 = vadd.f32 %v10367_v16, %v545_v59  ;;  %v536_v1 = vadd.f32 %v10367_v16, %v535_v0  ;;  %v488_v3 = vpop.f32.mrf.mxu0  ;;  %v513_v7 = vpop.f32.mrf.mxu1 }
  0xb1   : > { %v489_v4 = vadd.f32 %v10367_v16, %v488_v3  ;;  %v514_v9 = vadd.f32 %v10367_v16, %v513_v7 }
  0xb2   : > { %v10464_v63 = vpack.c.bf16 %v546_v60, %v546_v60  ;;  %v10485_v2 = vpack.c.bf16 %v536_v1, %v536_v1 }
  0xb3   : > { %v10502_v5 = vpack.c.bf16 %v489_v4, %v489_v4  ;;  %v10516_v11 = vpack.c.bf16 %v514_v9, %v514_v9 }
  0xb4   : > { %618 = vst.msk [vmem:[#allocation2 + $0x6c] sm:$0xf] %vm590_vm1, %v10464_v63 }
  0xb5   : > { %705 = vrot.lane.b32.xlu1 %v10417_v44, %s10260_s14  ;;  %677 = vrot.lane.b32.xlu2 %v10393_v33, %s10260_s14  ;;  %614 = vst.msk [vmem:[#allocation2 + $0x5c] sm:$0xf] %vm590_vm1, %v10485_v2 }
  0xb6   : > { %785 = vrot.lane.b32.xlu0 %v10391_v32, %s10261_s15  ;;  %595 = vst.msk [vmem:[#allocation2 + $0x10] sm:$0xf] %vm590_vm1, %v10502_v5 }
  0xb7   : > { %605 = vst.msk [vmem:[#allocation2 + $0x38] sm:$0xf] %vm590_vm1, %v10516_v11  ;;  %v548_v15 = vpop.f32.mrf.mxu3 }
  0xb8   : > { %v490_v6 = vpop.f32.mrf.mxu0  ;;  %v515_v12 = vpop.f32.mrf.mxu1  ;;  %v549_v17 = vadd.f32 %v10367_v16, %v548_v15 }
  0xb9   : > { %v491_v8 = vadd.f32 %v10367_v16, %v490_v6  ;;  %v516_v13 = vadd.f32 %v10367_v16, %v515_v12 }
  0xba   : > { %v10544_v18 = vpack.c.bf16 %v549_v17, %v549_v17 }
  0xbb   : > { %v10514_v10 = vpack.c.bf16 %v491_v8, %v491_v8  ;;  %v10529_v14 = vpack.c.bf16 %v516_v13, %v516_v13 }
  0xbc   : > { %619 = vst.msk [vmem:[#allocation2 + $0x70] sm:$0xf] %vm590_vm1, %v10544_v18 }
  0xbd   : > { %659 = vrot.lane.b32.xlu1 %v10419_v45, %s10260_s14  ;;  %913 = vrot.lane.b32.xlu2 %v10391_v32, %s10262_s16  ;;  %596 = vst.msk [vmem:[#allocation2 + $0x14] sm:$0xf] %vm590_vm1, %v10514_v10 }
  0xbe   : > { %933 = vrot.lane.b32.xlu0 %v10393_v33, %s10262_s16  ;;  %606 = vst.msk [vmem:[#allocation2 + $0x3c] sm:$0xf] %vm590_vm1, %v10529_v14 }
  0xbf   : > { %v550_v23 = vpop.f32.mrf.mxu3 }
  0xc0   : > { %v551_v24 = vadd.f32 %v10367_v16, %v550_v23  ;;  %v493_v27 = vpop.f32.mrf.mxu0  ;;  %v518_v38 = vpop.f32.mrf.mxu1 }
  0xc1   : > { %v494_v28 = vadd.f32 %v10367_v16, %v493_v27  ;;  %v519_v41 = vadd.f32 %v10367_v16, %v518_v38 }
  0xc2   : > { %v10563_v25 = vpack.c.bf16 %v551_v24, %v551_v24 }
  0xc3   : > { %v10575_v29 = vpack.c.bf16 %v494_v28, %v494_v28  ;;  %v10598_v49 = vpack.c.bf16 %v519_v41, %v519_v41 }
  0xc4   : > { %620 = vst.msk [vmem:[#allocation2 + $0x74] sm:$0xf] %vm590_vm1, %v10563_v25 }
  0xc5   : > { %787 = vrot.lane.b32.xlu1 %v10419_v45, %s10261_s15  ;;  %825 = vrot.lane.b32.xlu2 %v10415_v43, %s10261_s15  ;;  %597 = vst.msk [vmem:[#allocation2 + $0x18] sm:$0xf] %vm590_vm1, %v10575_v29 }
  0xc6   : > { %697 = vrot.lane.b32.xlu0 %v10415_v43, %s10260_s14  ;;  %607 = vst.msk [vmem:[#allocation2 + $0x40] sm:$0xf] %vm590_vm1, %v10598_v49 }
  0xc7   : > { %v553_v51 = vpop.f32.mrf.mxu3 }
  0xc8   : > { %v495_v37 = vpop.f32.mrf.mxu0  ;;  %v520_v50 = vpop.f32.mrf.mxu1  ;;  %v554_v56 = vadd.f32 %v10367_v16, %v553_v51 }
  0xc9   : > { %v496_v39 = vadd.f32 %v10367_v16, %v495_v37  ;;  %v521_v52 = vadd.f32 %v10367_v16, %v520_v50 }
  0xca   : > { %v10617_v60 = vpack.c.bf16 %v554_v56, %v554_v56 }
  0xcb   : > { %v10589_v40 = vpack.c.bf16 %v496_v39, %v496_v39  ;;  %v10608_v55 = vpack.c.bf16 %v521_v52, %v521_v52 }
  0xcc   : > { %621 = vst.msk [vmem:[#allocation2 + $0x78] sm:$0xf] %vm590_vm1, %v10617_v60 }
  0xcd   : > { %935 = vrot.lane.b32.xlu1 %v10421_v46, %s10262_s16  ;;  %807 = vrot.lane.b32.xlu2 %v10421_v46, %s10261_s15  ;;  %598 = vst.msk [vmem:[#allocation2 + $0x1c] sm:$0xf] %vm590_vm1, %v10589_v40 }
  0xce   : > { %833 = vrot.lane.b32.xlu0 %v10417_v44, %s10261_s15  ;;  %608 = vst.msk [vmem:[#allocation2 + $0x44] sm:$0xf] %vm590_vm1, %v10608_v55 }
  0xcf   : > { %v555_v0 = vpop.f32.mrf.mxu3 }
  0xd0   : > { %v556_v1 = vadd.f32 %v10367_v16, %v555_v0  ;;  %v498_v13 = vpop.f32.mrf.mxu0  ;;  %v523_v15 = vpop.f32.mrf.mxu1 }
  0xd1   : > { %v499_v17 = vadd.f32 %v10367_v16, %v498_v13 }
  0xd2   : > { %v10627_v3 = vpack.c.bf16 %v556_v1, %v556_v1 }
  0xd4   : > { %622 = vst.msk [vmem:[#allocation2 + $0x7c] sm:$0xf] %vm590_vm1, %v10627_v3 }
  0xd5   : > { %699 = vrot.lane.b32.xlu1 %v10462_v62, %s10260_s14  ;;  %707 = vrot.lane.b32.xlu2 %v10443_v53, %s10260_s14 }
  0xd6   : > { %679 = vrot.lane.b32.xlu0 %v10421_v46, %s10260_s14 }
  0xd8   : > { %v500_v28 = vpop.f32.mrf.mxu0  ;;  %v525_v39 = vpop.f32.mrf.mxu1 }
  0xd9   : > { %v526_v41 = vadd.f32 %v10367_v16, %v525_v39 }
  0xdd   : > { %835 = vrot.lane.b32.xlu1 %v10443_v53, %s10261_s15  ;;  %789 = vrot.lane.b32.xlu2 %v10460_v61, %s10261_s15 }
  0xde   : > { %915 = vrot.lane.b32.xlu0 %v10419_v45, %s10262_s16 }
  0xe5   : > { %661 = vrot.lane.b32.xlu1 %v10460_v61, %s10260_s14  ;;  %937 = vrot.lane.b32.xlu2 %v10445_v54, %s10262_s16 }
  0xe6   : > { %827 = vrot.lane.b32.xlu0 %v10462_v62, %s10261_s15 }
  0xed   : > { %681 = vrot.lane.b32.xlu1 %v10445_v54, %s10260_s14  ;;  %701 = vrot.lane.b32.xlu2 %v10485_v2, %s10260_s14 }
  0xee   : > { %809 = vrot.lane.b32.xlu0 %v10445_v54, %s10261_s15 }
  0xef   : > { %v784_v19 = vpop.permute.xlu2 %783 }
  0xf0   : > { %879 = vst.msk [vmem:[#allocation4] sm:$0xf] %vm590_vm1, %v784_v19  ;;  %v10650_v19 = vpack.c.bf16 %v499_v17, %v499_v17 }
  0xf2   : > { %599 = vst.msk [vmem:[#allocation2 + $0x20] sm:$0xf] %vm590_vm1, %v10650_v19 }
  0xf5   : > { %917 = vrot.lane.b32.xlu1 %v10460_v61, %s10262_s16  ;;  %837 = vrot.lane.b32.xlu2 %v10464_v63, %s10261_s15 }
  0xf6   : > { %709 = vrot.lane.b32.xlu0 %v10464_v63, %s10260_s14 }
  0xf7   : > { %v932_v20 = vpop.permute.xlu2 %931 }
  0xf8   : > { %1018 = vst.msk [vmem:[#allocation2 + $0xa8] sm:$0xf] %vm590_vm1, %v932_v20  ;;  %v524_v20 = vadd.f32 %v10367_v16, %v523_v15 }
  0xfa   : > { %v10659_v27 = vpack.c.bf16 %v524_v20, %v524_v20 }
  0xfc   : > { %609 = vst.msk [vmem:[#allocation2 + $0x48] sm:$0xf] %vm590_vm1, %v10659_v27 }
  0xfd   : > { %829 = vrot.lane.b32.xlu1 %v10485_v2, %s10261_s15  ;;  %663 = vrot.lane.b32.xlu2 %v10502_v5, %s10260_s14 }
  0xfe   : > { %791 = vrot.lane.b32.xlu0 %v10502_v5, %s10261_s15 }
  0xff   : > { %v696_v26 = vpop.permute.xlu2 %695 }
 0x100   : > { %771 = vst.msk [vmem:[#allocation3 + $0x50] sm:$0xf] %vm590_vm1, %v696_v26 }
 0x105   : > { %811 = vrot.lane.b32.xlu1 %v10516_v11, %s10261_s15  ;;  %683 = vrot.lane.b32.xlu2 %v10516_v11, %s10260_s14 }
 0x106   : > { %939 = vrot.lane.b32.xlu0 %v10516_v11, %s10262_s16 }
 0x107   : > { %v676_v30 = vpop.permute.xlu1 %675  ;;  %v832_v35 = vpop.permute.xlu2 %831 }
 0x108   : > { %761 = vst.msk [vmem:[#allocation3 + $0x28] sm:$0xf] %vm590_vm1, %v676_v30  ;;  %v656_v36 = vpop.permute.xlu0 %655  ;;  %v501_v30 = vadd.f32 %v10367_v16, %v500_v28 }
 0x109   : > { %903 = vst.msk [vmem:[#allocation4 + $0x60] sm:$0xf] %vm590_vm1, %v832_v35 }
 0x10a   : > { %751 = vst.msk [vmem:[#allocation3] sm:$0xf] %vm590_vm1, %v656_v36  ;;  %v10669_v35 = vpack.c.bf16 %v501_v30, %v501_v30 }
 0x10c   : > { %600 = vst.msk [vmem:[#allocation2 + $0x24] sm:$0xf] %vm590_vm1, %v10669_v35 }
 0x10d   : > { %711 = vrot.lane.b32.xlu1 %v10544_v18, %s10260_s14  ;;  %919 = vrot.lane.b32.xlu2 %v10502_v5, %s10262_s16 }
 0x10e   : > { %839 = vrot.lane.b32.xlu0 %v10544_v18, %s10261_s15 }
 0x10f   : > { %v912_v42 = vpop.permute.xlu1 %911  ;;  %v678_v47 = vpop.permute.xlu2 %677 }
 0x110   : > { %1008 = vst.msk [vmem:[#allocation2 + $0x80] sm:$0xf] %vm590_vm1, %v912_v42  ;;  %v804_v48 = vpop.permute.xlu0 %803  ;;  %v10683_v42 = vpack.c.bf16 %v526_v41, %v526_v41 }
 0x111   : > { %762 = vst.msk [vmem:[#allocation3 + $0x2c] sm:$0xf] %vm590_vm1, %v678_v47 }
 0x112   : > { %889 = vst.msk [vmem:[#allocation4 + $0x28] sm:$0xf] %vm590_vm1, %v804_v48 }
 0x113   : > { %610 = vst.msk [vmem:[#allocation2 + $0x4c] sm:$0xf] %vm590_vm1, %v10683_v42 }
 0x115   : > { %793 = vrot.lane.b32.xlu1 %v10514_v10, %s10261_s15  ;;  %665 = vrot.lane.b32.xlu2 %v10514_v10, %s10260_s14 }
 0x116   : > { %685 = vrot.lane.b32.xlu0 %v10529_v14, %s10260_s14 }
 0x117   : > { %v824_v57 = vpop.permute.xlu1 %823  ;;  %v914_v58 = vpop.permute.xlu2 %913 }
 0x118   : > { %899 = vst.msk [vmem:[#allocation4 + $0x50] sm:$0xf] %vm590_vm1, %v824_v57  ;;  %v704_v59 = vpop.permute.xlu0 %703 }
 0x119   : > { %1009 = vst.msk [vmem:[#allocation2 + $0x84] sm:$0xf] %vm590_vm1, %v914_v58 }
 0x11a   : > { %775 = vst.msk [vmem:[#allocation3 + $0x60] sm:$0xf] %vm590_vm1, %v704_v59 }
 0x11d   : > { %941 = vrot.lane.b32.xlu1 %v10529_v14, %s10262_s16  ;;  %813 = vrot.lane.b32.xlu2 %v10529_v14, %s10261_s15 }
 0x11e   : > { %921 = vrot.lane.b32.xlu0 %v10514_v10, %s10262_s16 }
 0x11f   : > { %v806_v4 = vpop.permute.xlu1 %805  ;;  %v826_v6 = vpop.permute.xlu2 %825 }
 0x120   : > { %890 = vst.msk [vmem:[#allocation4 + $0x2c] sm:$0xf] %vm590_vm1, %v806_v4  ;;  %v658_v7 = vpop.permute.xlu0 %657 }
 0x121   : > { %900 = vst.msk [vmem:[#allocation4 + $0x54] sm:$0xf] %vm590_vm1, %v826_v6 }
 0x122   : > { %752 = vst.msk [vmem:[#allocation3 + $0x4] sm:$0xf] %vm590_vm1, %v658_v7 }
 0x125   : > { %841 = vrot.lane.b32.xlu1 %v10563_v25, %s10261_s15  ;;  %713 = vrot.lane.b32.xlu2 %v10563_v25, %s10260_s14 }
 0x126   : > { %667 = vrot.lane.b32.xlu0 %v10575_v29, %s10260_s14 }
 0x127   : > { %v706_v8 = vpop.permute.xlu1 %705  ;;  %v808_v9 = vpop.permute.xlu2 %807 }
 0x128   : > { %776 = vst.msk [vmem:[#allocation3 + $0x64] sm:$0xf] %vm590_vm1, %v706_v8  ;;  %v786_v12 = vpop.permute.xlu0 %785 }
 0x129   : > { %891 = vst.msk [vmem:[#allocation4 + $0x30] sm:$0xf] %vm590_vm1, %v808_v9 }
 0x12a   : > { %880 = vst.msk [vmem:[#allocation4 + $0x4] sm:$0xf] %vm590_vm1, %v786_v12 }
 0x12d   : > { %687 = vrot.lane.b32.xlu1 %v10598_v49, %s10260_s14  ;;  %795 = vrot.lane.b32.xlu2 %v10575_v29, %s10261_s15 }
 0x12e   : > { %815 = vrot.lane.b32.xlu0 %v10598_v49, %s10261_s15 }
 0x12f   : > { %v660_v23 = vpop.permute.xlu1 %659  ;;  %v708_v24 = vpop.permute.xlu2 %707 }
 0x130   : > { %753 = vst.msk [vmem:[#allocation3 + $0x8] sm:$0xf] %vm590_vm1, %v660_v23  ;;  %v934_v26 = vpop.permute.xlu0 %933 }
 0x131   : > { %777 = vst.msk [vmem:[#allocation3 + $0x68] sm:$0xf] %vm590_vm1, %v708_v24 }
 0x132   : > { %1019 = vst.msk [vmem:[#allocation2 + $0xac] sm:$0xf] %vm590_vm1, %v934_v26 }
 0x135   : > { %923 = vrot.lane.b32.xlu1 %v10575_v29, %s10262_s16  ;;  %943 = vrot.lane.b32.xlu2 %v10598_v49, %s10262_s16 }
 0x136   : > { %715 = vrot.lane.b32.xlu0 %v10617_v60, %s10260_s14 }
 0x137   : > { %v788_v36 = vpop.permute.xlu1 %787  ;;  %v790_v37 = vpop.permute.xlu2 %789 }
 0x138   : > { %881 = vst.msk [vmem:[#allocation4 + $0x8] sm:$0xf] %vm590_vm1, %v788_v36  ;;  %v698_v38 = vpop.permute.xlu0 %697 }
 0x139   : > { %882 = vst.msk [vmem:[#allocation4 + $0xc] sm:$0xf] %vm590_vm1, %v790_v37 }
 0x13a   : > { %772 = vst.msk [vmem:[#allocation3 + $0x54] sm:$0xf] %vm590_vm1, %v698_v38 }
 0x13d   : > { %669 = vrot.lane.b32.xlu1 %v10589_v40, %s10260_s14  ;;  %843 = vrot.lane.b32.xlu2 %v10617_v60, %s10261_s15 }
 0x13e   : > { %797 = vrot.lane.b32.xlu0 %v10589_v40, %s10261_s15 }
 0x13f   : > { %v936_v47 = vpop.permute.xlu1 %935  ;;  %v938_v48 = vpop.permute.xlu2 %937 }
 0x140   : > { %1020 = vst.msk [vmem:[#allocation2 + $0xb0] sm:$0xf] %vm590_vm1, %v936_v47  ;;  %v834_v50 = vpop.permute.xlu0 %833 }
 0x141   : > { %1021 = vst.msk [vmem:[#allocation2 + $0xb4] sm:$0xf] %vm590_vm1, %v938_v48  ;;  %v9407_v1 = vld [vmem:[#allocation3 + $0x50] sm:$0xff] }
 0x142   : > { %904 = vst.msk [vmem:[#allocation4 + $0x64] sm:$0xf] %vm590_vm1, %v834_v50  ;;  %v2702_v8 = vsel %vm2496_vm2, %v9407_v1, 0 }
 0x145   : > { %817 = vrot.lane.b32.xlu1 %v10608_v55, %s10261_s15  ;;  %689 = vrot.lane.b32.xlu2 %v10608_v55, %s10260_s14 }
 0x146   : > { %845 = vrot.lane.b32.xlu0 %v10627_v3, %s10261_s15 }
 0x147   : > { %v700_v16 = vpop.permute.xlu1 %699  ;;  %v702_v51 = vpop.permute.xlu2 %701 }
 0x148   : > { %773 = vst.msk [vmem:[#allocation3 + $0x58] sm:$0xf] %vm590_vm1, %v700_v16  ;;  %v680_v52 = vpop.permute.xlu0 %679 }
 0x149   : > { %774 = vst.msk [vmem:[#allocation3 + $0x5c] sm:$0xf] %vm590_vm1, %v702_v51 }
 0x14a   : > { %763 = vst.msk [vmem:[#allocation3 + $0x30] sm:$0xf] %vm590_vm1, %v680_v52 }
 0x14d   : > { %717 = vrot.lane.b32.xlu1 %v10627_v3, %s10260_s14  ;;  %925 = vrot.lane.b32.xlu2 %v10589_v40, %s10262_s16 }
 0x14e   : > { %691 = vrot.lane.b32.xlu0 %v10659_v27, %s10260_s14 }
 0x14f   : > { %v836_v56 = vpop.permute.xlu1 %835  ;;  %v838_v57 = vpop.permute.xlu2 %837 }
 0x150   : > { %905 = vst.msk [vmem:[#allocation4 + $0x68] sm:$0xf] %vm590_vm1, %v836_v56  ;;  %v916_v58 = vpop.permute.xlu0 %915  ;;  %v9408_v59 = vld [vmem:[#allocation3 + $0x58] sm:$0xff] }
 0x151   : > { %906 = vst.msk [vmem:[#allocation4 + $0x6c] sm:$0xf] %vm590_vm1, %v838_v57  ;;  %v2705_v0 = vsel %vm2496_vm2, %v9408_v59, 0 }
 0x152   : > { %1010 = vst.msk [vmem:[#allocation2 + $0x88] sm:$0xf] %vm590_vm1, %v916_v58  ;;  %2711 = vmatpush.bf16.xpose.msrb.mxu3 %v2705_v0 }
 0x155   : > { %799 = vrot.lane.b32.xlu1 %v10650_v19, %s10261_s15  ;;  %671 = vrot.lane.b32.xlu2 %v10650_v19, %s10260_s14 }
 0x156   : > { %927 = vrot.lane.b32.xlu0 %v10650_v19, %s10262_s16 }
 0x157   : > { %v662_v4 = vpop.permute.xlu1 %661  ;;  %v664_v6 = vpop.permute.xlu2 %663 }
 0x158   : > { %754 = vst.msk [vmem:[#allocation3 + $0xc] sm:$0xf] %vm590_vm1, %v662_v4  ;;  %v828_v7 = vpop.permute.xlu0 %827 }
 0x159   : > { %755 = vst.msk [vmem:[#allocation3 + $0x10] sm:$0xf] %vm590_vm1, %v664_v6 }
 0x15a   : > { %901 = vst.msk [vmem:[#allocation4 + $0x58] sm:$0xf] %vm590_vm1, %v828_v7  ;;  %2712 = vmatpush.bf16.xpose.msrb.mxu3 %v2702_v8  ;;  %v9402_v7 = vld [vmem:[#allocation3 + $0x28] sm:$0xff] }
 0x15d   : > { %693 = vrot.lane.b32.xlu1 %v10683_v42, %s10260_s14  ;;  %819 = vrot.lane.b32.xlu2 %v10659_v27, %s10261_s15 }
 0x15e   : > { %673 = vrot.lane.b32.xlu0 %v10669_v35, %s10260_s14  ;;  %s9314_s14 = sshll.u32 %s15456_s28, 6 }
 0x15f   : > { %v682_v9 = vpop.permute.xlu1 %681  ;;  %v684_v12 = vpop.permute.xlu2 %683 }
 0x160   : > { %764 = vst.msk [vmem:[#allocation3 + $0x34] sm:$0xf] %vm590_vm1, %v682_v9  ;;  %v810_v13 = vpop.permute.xlu0 %809  ;;  %v2606_v9 = vsel %vm2496_vm2, %v9402_v7, 0 }
 0x161   : > { %765 = vst.msk [vmem:[#allocation3 + $0x38] sm:$0xf] %vm590_vm1, %v684_v12 }
 0x162   : > { %892 = vst.msk [vmem:[#allocation4 + $0x34] sm:$0xf] %vm590_vm1, %v810_v13 }
 0x165   : > { %929 = vrot.lane.b32.xlu1 %v10669_v35, %s10262_s16  ;;  %801 = vrot.lane.b32.xlu2 %v10669_v35, %s10261_s15 }
 0x166   : > { %821 = vrot.lane.b32.xlu0 %v10683_v42, %s10261_s15 }
 0x167   : > { %v918_v15 = vpop.permute.xlu1 %917  ;;  %v920_v17 = vpop.permute.xlu2 %919  ;;  %v9403_v59 = vld [vmem:[#allocation3 + $0x30] sm:$0xff] }
 0x168   : > { %1011 = vst.msk [vmem:[#allocation2 + $0x8c] sm:$0xf] %vm590_vm1, %v918_v15  ;;  %v710_v20 = vpop.permute.xlu0 %709  ;;  %v2609_v1 = vsel %vm2496_vm2, %v9403_v59, 0 }
 0x169   : > { %1012 = vst.msk [vmem:[#allocation2 + $0x90] sm:$0xf] %vm590_vm1, %v920_v17 }
 0x16a   : > { %778 = vst.msk [vmem:[#allocation3 + $0x6c] sm:$0xf] %vm590_vm1, %v710_v20 }
 0x16d   : > { %947 = vrot.lane.b32.xlu1 %v10659_v27, %s10262_s16  ;;  %949 = vrot.lane.b32.xlu2 %v10683_v42, %s10262_s16 }
 0x16e   : > { %945 = vrot.lane.b32.xlu0 %v10608_v55, %s10262_s16 }
 0x16f   : > { %v830_v23 = vpop.permute.xlu1 %829  ;;  %v666_v24 = vpop.permute.xlu2 %665 }
 0x170   : > { %902 = vst.msk [vmem:[#allocation4 + $0x5c] sm:$0xf] %vm590_vm1, %v830_v23  ;;  %v792_v26 = vpop.permute.xlu0 %791 }
 0x171   : > { %756 = vst.msk [vmem:[#allocation3 + $0x14] sm:$0xf] %vm590_vm1, %v666_v24 }
 0x172   : > { %883 = vst.msk [vmem:[#allocation4 + $0x10] sm:$0xf] %vm590_vm1, %v792_v26 }
 0x175   : > { %953 = vrot.lane.b32.xlu1 %v10415_v43, %s10262_s16  ;;  %955 = vrot.lane.b32.xlu2 %v10462_v62, %s10262_s16 }
 0x176   : > { %951 = vrot.lane.b32.xlu0 %v10389_v31, %s10262_s16 }
 0x177   : > { %v812_v28 = vpop.permute.xlu1 %811  ;;  %v814_v30 = vpop.permute.xlu2 %813 }
 0x178   : > { %893 = vst.msk [vmem:[#allocation4 + $0x38] sm:$0xf] %vm590_vm1, %v812_v28  ;;  %v940_v36 = vpop.permute.xlu0 %939 }
 0x179   : > { %894 = vst.msk [vmem:[#allocation4 + $0x3c] sm:$0xf] %vm590_vm1, %v814_v30 }
 0x17a   : > { %1022 = vst.msk [vmem:[#allocation2 + $0xb8] sm:$0xf] %vm590_vm1, %v940_v36 }
 0x17d   : > { %959 = vrot.lane.b32.xlu1 %v10401_v34, %s10262_s16  ;;  %961 = vrot.lane.b32.xlu2 %v10417_v44, %s10262_s16 }
 0x17e   : > { %957 = vrot.lane.b32.xlu0 %v10485_v2, %s10262_s16 }
 0x17f   : > { %v712_v37 = vpop.permute.xlu1 %711  ;;  %v714_v38 = vpop.permute.xlu2 %713 }
 0x180   : > { %779 = vst.msk [vmem:[#allocation3 + $0x70] sm:$0xf] %vm590_vm1, %v712_v37  ;;  %v840_v39 = vpop.permute.xlu0 %839  ;;  %v9399_v37 = vld [vmem:[#allocation3 + $0x10] sm:$0xff] }
 0x181   : > { %780 = vst.msk [vmem:[#allocation3 + $0x74] sm:$0xf] %vm590_vm1, %v714_v38 }
 0x182   : > { %907 = vst.msk [vmem:[#allocation4 + $0x70] sm:$0xf] %vm590_vm1, %v840_v39 }
 0x185   : > { %965 = vrot.lane.b32.xlu1 %v10464_v63, %s10262_s16  ;;  %967 = vrot.lane.b32.xlu2 %v10544_v18, %s10262_s16 }
 0x186   : > { %963 = vrot.lane.b32.xlu0 %v10443_v53, %s10262_s16 }
 0x187   : > { %v794_v41 = vpop.permute.xlu1 %793  ;;  %v796_v47 = vpop.permute.xlu2 %795 }
 0x188   : > { %884 = vst.msk [vmem:[#allocation4 + $0x14] sm:$0xf] %vm590_vm1, %v794_v41  ;;  %v686_v48 = vpop.permute.xlu0 %685 }
 0x189   : > { %885 = vst.msk [vmem:[#allocation4 + $0x18] sm:$0xf] %vm590_vm1, %v796_v47  ;;  %v2516_v47 = vsel %vm2496_vm2, %v9399_v37, 0  ;;  %v9337_v37 = vld [vmem:[#allocation2 + $0x20] sm:$0xff] }
 0x18a   : > { %766 = vst.msk [vmem:[#allocation3 + $0x3c] sm:$0xf] %vm590_vm1, %v686_v48  ;;  %v9398_v48 = vld [vmem:[#allocation3 + $0x8] sm:$0xff] }
 0x18d   : > { %971 = vrot.lane.b32.xlu1 %v10617_v60, %s10262_s16  ;;  %973 = vrot.lane.b32.xlu2 %v10627_v3, %s10262_s16 }
 0x18e   : > { %969 = vrot.lane.b32.xlu0 %v10563_v25, %s10262_s16 }
 0x18f   : > { %v942_v50 = vpop.permute.xlu1 %941  ;;  %v944_v16 = vpop.permute.xlu2 %943 }
 0x190   : > { %1023 = vst.msk [vmem:[#allocation2 + $0xbc] sm:$0xf] %vm590_vm1, %v942_v50  ;;  %v922_v51 = vpop.permute.xlu0 %921 }
 0x191   : > { %1024 = vst.msk [vmem:[#allocation2 + $0xc0] sm:$0xf] %vm590_vm1, %v944_v16  ;;  %v9404_v52 = vld [vmem:[#allocation3 + $0x38] sm:$0xff] }
 0x192   : > { %1013 = vst.msk [vmem:[#allocation2 + $0x94] sm:$0xf] %vm590_vm1, %v922_v51  ;;  %v2612_v56 = vsel %vm2496_vm2, %v9404_v52, 0  ;;  %v2513_v52 = vsel %vm2496_vm2, %v9398_v48, 0 }
 0x193   : > { %2618 = vmatpush.bf16.xpose.msrb.mxu2 %v2612_v56  ;;  %v9397_v56 = vld [vmem:[#allocation3] sm:$0xff] }
 0x195   : > { %1042 = vrot.lane.b32.xlu1 %v10391_v32, %s10263_s17  ;;  %1044 = vrot.lane.b32.xlu2 %v10419_v45, %s10263_s17 }
 0x196   : > { %1040 = vrot.lane.b32.xlu0 %v10371_v21, %s10263_s17 }
 0x197   : > { %v842_v57 = vpop.permute.xlu1 %841  ;;  %v844_v58 = vpop.permute.xlu2 %843 }
 0x198   : > { %908 = vst.msk [vmem:[#allocation4 + $0x74] sm:$0xf] %vm590_vm1, %v842_v57  ;;  %v668_v0 = vpop.permute.xlu0 %667 }
 0x199   : > { %909 = vst.msk [vmem:[#allocation4 + $0x78] sm:$0xf] %vm590_vm1, %v844_v58 }
 0x19a   : > { %757 = vst.msk [vmem:[#allocation3 + $0x18] sm:$0xf] %vm590_vm1, %v668_v0 }
 0x19b   : > { %2619 = vmatpush.bf16.xpose.msrb.mxu2 %v2609_v1  ;;  %v2510_v1 = vsel %vm2496_vm2, %v9397_v56, 0 }
 0x19d   : > { %1048 = vrot.lane.b32.xlu1 %v10502_v5, %s10263_s17  ;;  %1050 = vrot.lane.b32.xlu2 %v10514_v10, %s10263_s17 }
 0x19e   : > { %1046 = vrot.lane.b32.xlu0 %v10460_v61, %s10263_s17 }
 0x19f   : > { %v688_v4 = vpop.permute.xlu1 %687  ;;  %v690_v6 = vpop.permute.xlu2 %689 }
 0x1a0   : > { %767 = vst.msk [vmem:[#allocation3 + $0x40] sm:$0xf] %vm590_vm1, %v688_v4  ;;  %v816_v8 = vpop.permute.xlu0 %815 }
 0x1a1   : > { %768 = vst.msk [vmem:[#allocation3 + $0x44] sm:$0xf] %vm590_vm1, %v690_v6  ;;  %v9411_v6 = vld [vmem:[#allocation3 + $0x70] sm:$0xff] }
 0x1a2   : > { %895 = vst.msk [vmem:[#allocation4 + $0x40] sm:$0xf] %vm590_vm1, %v816_v8 }
 0x1a3   : > { %2620 = vmatpush.bf16.xpose.msrb.mxu2 %v2606_v9  ;;  %v9333_v9 = vld [vmem:[#allocation2] sm:$0xff] }
 0x1a5   : > { %1054 = vrot.lane.b32.xlu1 %v10589_v40, %s10263_s17  ;;  %1056 = vrot.lane.b32.xlu2 %v10650_v19, %s10263_s17 }
 0x1a6   : > { %1052 = vrot.lane.b32.xlu0 %v10575_v29, %s10263_s17 }
 0x1a7   : > { %v924_v12 = vpop.permute.xlu1 %923  ;;  %v926_v13 = vpop.permute.xlu2 %925 }
 0x1a8   : > { %1014 = vst.msk [vmem:[#allocation2 + $0x98] sm:$0xf] %vm590_vm1, %v924_v12  ;;  %v716_v15 = vpop.permute.xlu0 %715 }
 0x1a9   : > { %1015 = vst.msk [vmem:[#allocation2 + $0x9c] sm:$0xf] %vm590_vm1, %v926_v13 }
 0x1aa   : > { %781 = vst.msk [vmem:[#allocation3 + $0x78] sm:$0xf] %vm590_vm1, %v716_v15 }
 0x1ad   : > { %1060 = vrot.lane.b32.xlu1 %v10373_v22, %s10263_s17  ;;  %1062 = vrot.lane.b32.xlu2 %v10393_v33, %s10263_s17 }
 0x1ae   : > { %1058 = vrot.lane.b32.xlu0 %v10669_v35, %s10263_s17 }
 0x1af   : > { %v670_v17 = vpop.permute.xlu1 %669  ;;  %v672_v20 = vpop.permute.xlu2 %671 }
 0x1b0   : > { %758 = vst.msk [vmem:[#allocation3 + $0x1c] sm:$0xf] %vm590_vm1, %v670_v17  ;;  %v798_v23 = vpop.permute.xlu0 %797 }
 0x1b1   : > { %759 = vst.msk [vmem:[#allocation3 + $0x20] sm:$0xf] %vm590_vm1, %v672_v20  ;;  %v2795_v20 = vsel %vm2496_vm2, %v9411_v6, 0  ;;  %v9342_v6 = vld [vmem:[#allocation2 + $0x48] sm:$0xff] }
 0x1b2   : > { %886 = vst.msk [vmem:[#allocation4 + $0x1c] sm:$0xf] %vm590_vm1, %v798_v23 }
 0x1b5   : > { %1066 = vrot.lane.b32.xlu1 %v10445_v54, %s10263_s17  ;;  %1068 = vrot.lane.b32.xlu2 %v10516_v11, %s10263_s17 }
 0x1b6   : > { %1064 = vrot.lane.b32.xlu0 %v10421_v46, %s10263_s17 }
 0x1b7   : > { %v818_v24 = vpop.permute.xlu1 %817  ;;  %v820_v26 = vpop.permute.xlu2 %819  ;;  %v9400_v28 = vld [vmem:[#allocation3 + $0x18] sm:$0xff] }
 0x1b8   : > { %896 = vst.msk [vmem:[#allocation4 + $0x44] sm:$0xf] %vm590_vm1, %v818_v24  ;;  %v846_v30 = vpop.permute.xlu0 %845  ;;  %v2519_v36 = vsel %vm2496_vm2, %v9400_v28, 0  ;;  %v9405_v24 = vld [vmem:[#allocation3 + $0x40] sm:$0xff] }
 0x1b9   : > { %897 = vst.msk [vmem:[#allocation4 + $0x48] sm:$0xf] %vm590_vm1, %v820_v26  ;;  %2525 = vmatpush.bf16.xpose.msrb.mxu1 %v2519_v36  ;;  %v9410_v26 = vld [vmem:[#allocation3 + $0x68] sm:$0xff] }
 0x1ba   : > { %910 = vst.msk [vmem:[#allocation4 + $0x7c] sm:$0xf] %vm590_vm1, %v846_v30 }
 0x1bd   : > { %1072 = vrot.lane.b32.xlu1 %v10598_v49, %s10263_s17  ;;  %1074 = vrot.lane.b32.xlu2 %v10608_v55, %s10263_s17 }
 0x1be   : > { %1070 = vrot.lane.b32.xlu0 %v10529_v14, %s10263_s17 }
 0x1bf   : > { %v718_v38 = vpop.permute.xlu1 %717  ;;  %v802_v39 = vpop.permute.xlu2 %801 }
 0x1c0   : > { %782 = vst.msk [vmem:[#allocation3 + $0x7c] sm:$0xf] %vm590_vm1, %v718_v38  ;;  %v692_v41 = vpop.permute.xlu0 %691  ;;  %v2696_v38 = vsel %vm2496_vm2, %v9405_v24, 0 }
 0x1c1   : > { %888 = vst.msk [vmem:[#allocation4 + $0x24] sm:$0xf] %vm590_vm1, %v802_v39  ;;  %2526 = vmatpush.bf16.xpose.msrb.mxu1 %v2516_v47  ;;  %v2792_v39 = vsel %vm2496_vm2, %v9410_v26, 0 }
 0x1c2   : > { %769 = vst.msk [vmem:[#allocation3 + $0x48] sm:$0xf] %vm590_vm1, %v692_v41  ;;  %v9409_v41 = vld [vmem:[#allocation3 + $0x60] sm:$0xff] }
 0x1c5   : > { %1078 = vrot.lane.b32.xlu1 %v10683_v42, %s10263_s17  ;;  %1080 = vrot.lane.b32.xlu2 %v10389_v31, %s10263_s17 }
 0x1c6   : > { %1076 = vrot.lane.b32.xlu0 %v10659_v27, %s10263_s17 }
 0x1c7   : > { %v800_v50 = vpop.permute.xlu1 %799  ;;  %v950_v16 = vpop.permute.xlu2 %949  ;;  %v9412_v57 = vld [vmem:[#allocation3 + $0x78] sm:$0xff] }
 0x1c8   : > { %887 = vst.msk [vmem:[#allocation4 + $0x20] sm:$0xf] %vm590_vm1, %v800_v50  ;;  %v928_v51 = vpop.permute.xlu0 %927  ;;  %v2798_v4 = vsel %vm2496_vm2, %v9412_v57, 0  ;;  %v9334_v50 = vld [vmem:[#allocation2 + $0x8] sm:$0xff] }
 0x1c9   : > { %1027 = vst.msk [vmem:[#allocation2 + $0xcc] sm:$0xf] %vm590_vm1, %v950_v16  ;;  %2527 = vmatpush.bf16.xpose.msrb.mxu1 %v2513_v52  ;;  %v9341_v16 = vld [vmem:[#allocation2 + $0x40] sm:$0xff]  ;;  %v2789_v52 = vsel %vm2496_vm2, %v9409_v41, 0 }
 0x1ca   : > { %1016 = vst.msk [vmem:[#allocation2 + $0xa0] sm:$0xf] %vm590_vm1, %v928_v51  ;;  %v9345_v41 = vld [vmem:[#allocation2 + $0x60] sm:$0xff] }
 0x1cd   : > { %1084 = vrot.lane.b32.xlu1 %v10462_v62, %s10263_s17  ;;  %1086 = vrot.lane.b32.xlu2 %v10485_v2, %s10263_s17 }
 0x1ce   : > { %1082 = vrot.lane.b32.xlu0 %v10415_v43, %s10263_s17 }
 0x1cf   : > { %v694_v58 = vpop.permute.xlu1 %693  ;;  %v956_v59 = vpop.permute.xlu2 %955 }
 0x1d0   : > { %770 = vst.msk [vmem:[#allocation3 + $0x4c] sm:$0xf] %vm590_vm1, %v694_v58  ;;  %v674_v0 = vpop.permute.xlu0 %673 }
 0x1d1   : > { %1030 = vst.msk [vmem:[#allocation2 + $0xd8] sm:$0xf] %vm590_vm1, %v956_v59  ;;  %2528 = vmatpush.bf16.xpose.msrb.mxu1 %v2510_v1  ;;  %v9338_v59 = vld [vmem:[#allocation2 + $0x28] sm:$0xff] }
 0x1d2   : > { %760 = vst.msk [vmem:[#allocation3 + $0x24] sm:$0xf] %vm590_vm1, %v674_v0 }
 0x1d5   : > { %1090 = vrot.lane.b32.xlu1 %v10417_v44, %s10263_s17  ;;  %1092 = vrot.lane.b32.xlu2 %v10443_v53, %s10263_s17 }
 0x1d6   : > { %1088 = vrot.lane.b32.xlu0 %v10401_v34, %s10263_s17 }
 0x1d7   : > { %v930_v7 = vpop.permute.xlu1 %929  ;;  %v962_v8 = vpop.permute.xlu2 %961  ;;  %v9406_v12 = vld [vmem:[#allocation3 + $0x48] sm:$0xff] }
 0x1d8   : > { %1017 = vst.msk [vmem:[#allocation2 + $0xa4] sm:$0xf] %vm590_vm1, %v930_v7  ;;  %v822_v13 = vpop.permute.xlu0 %821  ;;  %8359 = vmatmul.msk.bf16.vlgmr.msrb.gmra.mxu1 %vm2496_vm2, %v9333_v9  ;;  %v2699_v17 = vsel %vm2496_vm2, %v9406_v12, 0 }
 0x1d9   : > { %2804 = vmatpush.bf16.xpose.msra.mxu1 %v2798_v4  ;;  %1033 = vst.msk [vmem:[#allocation2 + $0xe4] sm:$0xf] %vm590_vm1, %v962_v8  ;;  %v9401_v15 = vld [vmem:[#allocation3 + $0x20] sm:$0xff]  ;;  %2713 = vmatpush.bf16.xpose.msrb.mxu3 %v2699_v17  ;;  %v9335_v4 = vld [vmem:[#allocation2 + $0x10] sm:$0xff] }
 0x1da   : > { %898 = vst.msk [vmem:[#allocation4 + $0x4c] sm:$0xf] %vm590_vm1, %v822_v13  ;;  %v2603_v23 = vsel %vm2496_vm2, %v9401_v15, 0  ;;  %v9339_v13 = vld [vmem:[#allocation2 + $0x30] sm:$0xff] }
 0x1db   : > { %2621 = vmatpush.bf16.xpose.msrb.mxu2 %v2603_v23  ;;  %v9343_v23 = vld [vmem:[#allocation2 + $0x50] sm:$0xff] }
 0x1dd   : > { %1096 = vrot.lane.b32.xlu1 %v10544_v18, %s10263_s17  ;;  %1098 = vrot.lane.b32.xlu2 %v10563_v25, %s10263_s17 }
 0x1de   : > { %1094 = vrot.lane.b32.xlu0 %v10464_v63, %s10263_s17 }
 0x1df   : > { %v948_v28 = vpop.permute.xlu1 %947  ;;  %v968_v30 = vpop.permute.xlu2 %967 }
 0x1e0   : > { %1026 = vst.msk [vmem:[#allocation2 + $0xc8] sm:$0xf] %vm590_vm1, %v948_v28  ;;  %v946_v36 = vpop.permute.xlu0 %945 }
 0x1e1   : > { %2805 = vmatpush.bf16.xpose.msra.mxu1 %v2795_v20  ;;  %1036 = vst.msk [vmem:[#allocation2 + $0xf0] sm:$0xf] %vm590_vm1, %v968_v30  ;;  %2714 = vmatpush.bf16.xpose.msrb.mxu3 %v2696_v38  ;;  %v9336_v20 = vld [vmem:[#allocation2 + $0x18] sm:$0xff] }
 0x1e2   : > { %1025 = vst.msk [vmem:[#allocation2 + $0xc4] sm:$0xf] %vm590_vm1, %v946_v36  ;;  %8395 = vmatmul.msk.bf16.vlgmr.msrb.gmra.mxu2 %vm2496_vm2, %v9337_v37  ;;  %v9340_v36 = vld [vmem:[#allocation2 + $0x38] sm:$0xff] }
 0x1e5   : > { %1102 = vrot.lane.b32.xlu1 %v10627_v3, %s10263_s17  ;;  %1169 = vrot.lane.b32.xlu2 %v10371_v21, %s10264_s18 }
 0x1e6   : > { %1100 = vrot.lane.b32.xlu0 %v10617_v60, %s10263_s17 }
 0x1e7   : > { %v954_v47 = vpop.permute.xlu1 %953  ;;  %v974_v48 = vpop.permute.xlu2 %973 }
 0x1e8   : > { %1029 = vst.msk [vmem:[#allocation2 + $0xd4] sm:$0xf] %vm590_vm1, %v954_v47  ;;  %v952_v51 = vpop.permute.xlu0 %951  ;;  %8360 = vmatmul.msk.bf16.gmra.mxu1 %vm2496_vm2, %v9334_v50  ;;  %8431 = vmatmul.msk.bf16.vlgmr.msrb.gmra.mxu3 %vm2496_vm2, %v9341_v16 }
 0x1e9   : > { %2806 = vmatpush.bf16.xpose.msra.mxu1 %v2792_v39  ;;  %1039 = vst.msk [vmem:[#allocation2 + $0xfc] sm:$0xf] %vm590_vm1, %v974_v48  ;;  %v9344_v39 = vld [vmem:[#allocation2 + $0x58] sm:$0xff] }
 0x1ea   : > { %1028 = vst.msk [vmem:[#allocation2 + $0xd0] sm:$0xf] %vm590_vm1, %v952_v51 }
 0x1ed   : > { %1173 = vrot.lane.b32.xlu1 %v10419_v45, %s10264_s18  ;;  %1175 = vrot.lane.b32.xlu2 %v10460_v61, %s10264_s18 }
 0x1ee   : > { %1171 = vrot.lane.b32.xlu0 %v10391_v32, %s10264_s18 }
 0x1ef   : > { %v960_v56 = vpop.permute.xlu1 %959  ;;  %v1045_v57 = vpop.permute.xlu2 %1044 }
 0x1f0   : > { %1032 = vst.msk [vmem:[#allocation2 + $0xe0] sm:$0xf] %vm590_vm1, %v960_v56  ;;  %v958_v58 = vpop.permute.xlu0 %957 }
 0x1f1   : > { %2807 = vmatpush.bf16.xpose.msra.mxu1 %v2789_v52  ;;  %1139 = vst.msk [vmem:[#allocation3 + $0x88] sm:$0xf] %vm590_vm1, %v1045_v57 }
 0x1f2   : > { %1031 = vst.msk [vmem:[#allocation2 + $0xdc] sm:$0xf] %vm590_vm1, %v958_v58  ;;  %8396 = vmatmul.msk.bf16.gmra.mxu2 %vm2496_vm2, %v9338_v59  ;;  %v9346_v58 = vld [vmem:[#allocation2 + $0x68] sm:$0xff] }
 0x1f5   : > { %1179 = vrot.lane.b32.xlu1 %v10514_v10, %s10264_s18  ;;  %1181 = vrot.lane.b32.xlu2 %v10575_v29, %s10264_s18 }
 0x1f6   : > { %1177 = vrot.lane.b32.xlu0 %v10502_v5, %s10264_s18 }
 0x1f7   : > { %v966_v0 = vpop.permute.xlu1 %965  ;;  %v1051_v1 = vpop.permute.xlu2 %1050 }
 0x1f8   : > { %1035 = vst.msk [vmem:[#allocation2 + $0xec] sm:$0xf] %vm590_vm1, %v966_v0  ;;  %v964_v7 = vpop.permute.xlu0 %963  ;;  %8361 = vmatmul.msk.bf16.gmra.mxu1 %vm2496_vm2, %v9335_v4  ;;  %8432 = vmatmul.msk.bf16.gmra.mxu3 %vm2496_vm2, %v9342_v6 }
 0x1f9   : > { %1142 = vst.msk [vmem:[#allocation3 + $0x94] sm:$0xf] %vm590_vm1, %v1051_v1 }
 0x1fa   : > { %1034 = vst.msk [vmem:[#allocation2 + $0xe8] sm:$0xf] %vm590_vm1, %v964_v7 }
 0x1fd   : > { %1185 = vrot.lane.b32.xlu1 %v10650_v19, %s10264_s18  ;;  %1187 = vrot.lane.b32.xlu2 %v10669_v35, %s10264_s18 }
 0x1fe   : > { %1183 = vrot.lane.b32.xlu0 %v10589_v40, %s10264_s18 }
 0x1ff   : > { %v972_v8 = vpop.permute.xlu1 %971  ;;  %v1057_v9 = vpop.permute.xlu2 %1056 }
 0x200   : > { %1038 = vst.msk [vmem:[#allocation2 + $0xf8] sm:$0xf] %vm590_vm1, %v972_v8  ;;  %v970_v12 = vpop.permute.xlu0 %969 }
 0x201   : > { %1145 = vst.msk [vmem:[#allocation3 + $0xa0] sm:$0xf] %vm590_vm1, %v1057_v9 }
 0x202   : > { %1037 = vst.msk [vmem:[#allocation2 + $0xf4] sm:$0xf] %vm590_vm1, %v970_v12  ;;  %8397 = vmatmul.msk.bf16.gmra.mxu2 %vm2496_vm2, %v9339_v13 }
 0x205   : > { %1191 = vrot.lane.b32.xlu1 %v10393_v33, %s10264_s18  ;;  %1193 = vrot.lane.b32.xlu2 %v10421_v46, %s10264_s18 }
 0x206   : > { %1189 = vrot.lane.b32.xlu0 %v10373_v22, %s10264_s18 }
 0x207   : > { %v1043_v15 = vpop.permute.xlu1 %1042  ;;  %v1063_v17 = vpop.permute.xlu2 %1062 }
 0x208   : > { %1138 = vst.msk [vmem:[#allocation3 + $0x84] sm:$0xf] %vm590_vm1, %v1043_v15  ;;  %v1041_v24 = vpop.permute.xlu0 %1040  ;;  %8362 = vmatmul.msk.bf16.gmra.mxu1 %vm2496_vm2, %v9336_v20  ;;  %8433 = vmatmul.msk.bf16.gmra.mxu3 %vm2496_vm2, %v9343_v23  ;;  %v9347_v15 = vld [vmem:[#allocation2 + $0x70] sm:$0xff] }
 0x209   : > { %1148 = vst.msk [vmem:[#allocation3 + $0xac] sm:$0xf] %vm590_vm1, %v1063_v17 }
 0x20a   : > { %1137 = vst.msk [vmem:[#allocation3 + $0x80] sm:$0xf] %vm590_vm1, %v1041_v24 }
 0x20d   : > { %1197 = vrot.lane.b32.xlu1 %v10516_v11, %s10264_s18  ;;  %1199 = vrot.lane.b32.xlu2 %v10529_v14, %s10264_s18 }
 0x20e   : > { %1195 = vrot.lane.b32.xlu0 %v10445_v54, %s10264_s18 }
 0x20f   : > { %v1049_v26 = vpop.permute.xlu1 %1048  ;;  %v1069_v28 = vpop.permute.xlu2 %1068 }
 0x210   : > { %1141 = vst.msk [vmem:[#allocation3 + $0x90] sm:$0xf] %vm590_vm1, %v1049_v26  ;;  %v1047_v30 = vpop.permute.xlu0 %1046 }
 0x211   : > { %1151 = vst.msk [vmem:[#allocation3 + $0xb8] sm:$0xf] %vm590_vm1, %v1069_v28  ;;  %v9413_v17 = vld [vmem:[#allocation3 + $0x80] sm:$0xff] }
 0x212   : > { %1140 = vst.msk [vmem:[#allocation3 + $0x8c] sm:$0xf] %vm590_vm1, %v1047_v30  ;;  %8398 = vmatmul.msk.bf16.gmra.mxu2 %vm2496_vm2, %v9340_v36  ;;  %v2882_v24 = vsel %vm2496_vm2, %v9413_v17, 0  ;;  %v9353_v17 = vld [vmem:[#allocation2 + $0xa0] sm:$0xff] }
 0x215   : > { %1203 = vrot.lane.b32.xlu1 %v10608_v55, %s10264_s18  ;;  %1205 = vrot.lane.b32.xlu2 %v10659_v27, %s10264_s18 }
 0x216   : > { %1201 = vrot.lane.b32.xlu0 %v10598_v49, %s10264_s18 }
 0x217   : > { %v1055_v37 = vpop.permute.xlu1 %1054  ;;  %v1075_v38 = vpop.permute.xlu2 %1074  ;;  %v9415_v59 = vld [vmem:[#allocation3 + $0x90] sm:$0xff] }
 0x218   : > { %1144 = vst.msk [vmem:[#allocation3 + $0x9c] sm:$0xf] %vm590_vm1, %v1055_v37  ;;  %v1053_v47 = vpop.permute.xlu0 %1052  ;;  %8434 = vmatmul.msk.bf16.gmra.mxu3 %vm2496_vm2, %v9344_v39  ;;  %8467 = vmatmul.msk.bf16.vlgmr.msra.gmra.mxu1 %vm2496_vm2, %v9345_v41  ;;  %v2888_v1 = vsel %vm2496_vm2, %v9415_v59, 0 }
 0x219   : > { %1154 = vst.msk [vmem:[#allocation3 + $0xc4] sm:$0xf] %vm590_vm1, %v1075_v38  ;;  %v9414_v7 = vld [vmem:[#allocation3 + $0x88] sm:$0xff]  ;;  %v9349_v38 = vld [vmem:[#allocation2 + $0x80] sm:$0xff] }
 0x21a   : > { %1143 = vst.msk [vmem:[#allocation3 + $0x98] sm:$0xf] %vm590_vm1, %v1053_v47  ;;  %v2885_v9 = vsel %vm2496_vm2, %v9414_v7, 0 }
 0x21d   : > { %1209 = vrot.lane.b32.xlu1 %v10389_v31, %s10264_s18  ;;  %1211 = vrot.lane.b32.xlu2 %v10415_v43, %s10264_s18 }
 0x21e   : > { %1207 = vrot.lane.b32.xlu0 %v10683_v42, %s10264_s18 }
 0x21f   : > { %v1061_v48 = vpop.permute.xlu1 %1060  ;;  %v1081_v50 = vpop.permute.xlu2 %1080 }
 0x220   : > { %1147 = vst.msk [vmem:[#allocation3 + $0xa8] sm:$0xf] %vm590_vm1, %v1061_v48  ;;  %v1059_v16 = vpop.permute.xlu0 %1058  ;;  %v9348_v48 = vld [vmem:[#allocation2 + $0x78] sm:$0xff] }
 0x221   : > { %1157 = vst.msk [vmem:[#allocation3 + $0xd0] sm:$0xf] %vm590_vm1, %v1081_v50  ;;  %v9416_v51 = vld [vmem:[#allocation3 + $0x98] sm:$0xff] }
 0x222   : > { %1146 = vst.msk [vmem:[#allocation3 + $0xa4] sm:$0xf] %vm590_vm1, %v1059_v16  ;;  %v2891_v52 = vsel %vm2496_vm2, %v9416_v51, 0 }
 0x223   : > { %2897 = vmatpush.bf16.xpose.msra.mxu2 %v2891_v52 }
 0x225   : > { %1215 = vrot.lane.b32.xlu1 %v10485_v2, %s10264_s18  ;;  %1217 = vrot.lane.b32.xlu2 %v10401_v34, %s10264_s18 }
 0x226   : > { %1213 = vrot.lane.b32.xlu0 %v10462_v62, %s10264_s18 }
 0x227   : > { %v1067_v56 = vpop.permute.xlu1 %1066  ;;  %v1087_v57 = vpop.permute.xlu2 %1086  ;;  %v9418_v50 = vld [vmem:[#allocation3 + $0xa8] sm:$0xff] }
 0x228   : > { %1150 = vst.msk [vmem:[#allocation3 + $0xb4] sm:$0xf] %vm590_vm1, %v1067_v56  ;;  %v1065_v0 = vpop.permute.xlu0 %1064  ;;  %8468 = vmatmul.msk.bf16.gmra.mxu1 %vm2496_vm2, %v9346_v58  ;;  %v2978_v56 = vsel %vm2496_vm2, %v9418_v50, 0  ;;  %v9357_v50 = vld [vmem:[#allocation2 + $0xc0] sm:$0xff] }
 0x229   : > { %1160 = vst.msk [vmem:[#allocation3 + $0xdc] sm:$0xf] %vm590_vm1, %v1087_v57 }
 0x22a   : > { %1149 = vst.msk [vmem:[#allocation3 + $0xb0] sm:$0xf] %vm590_vm1, %v1065_v0  ;;  %v9417_v0 = vld [vmem:[#allocation3 + $0xa0] sm:$0xff] }
 0x22b   : > { %2898 = vmatpush.bf16.xpose.msra.mxu2 %v2888_v1  ;;  %v2975_v7 = vsel %vm2496_vm2, %v9417_v0, 0 }
 0x22d   : > { %1221 = vrot.lane.b32.xlu1 %v10443_v53, %s10264_s18  ;;  %1223 = vrot.lane.b32.xlu2 %v10464_v63, %s10264_s18 }
 0x22e   : > { %1219 = vrot.lane.b32.xlu0 %v10417_v44, %s10264_s18 }
 0x22f   : > { %v1073_v4 = vpop.permute.xlu1 %1072  ;;  %v1093_v6 = vpop.permute.xlu2 %1092 }
 0x230   : > { %1153 = vst.msk [vmem:[#allocation3 + $0xc0] sm:$0xf] %vm590_vm1, %v1073_v4  ;;  %v1071_v8 = vpop.permute.xlu0 %1070  ;;  %v9350_v4 = vld [vmem:[#allocation2 + $0x88] sm:$0xff] }
 0x231   : > { %1163 = vst.msk [vmem:[#allocation3 + $0xe8] sm:$0xf] %vm590_vm1, %v1093_v6  ;;  %v9419_v36 = vld [vmem:[#allocation3 + $0xb0] sm:$0xff] }
 0x232   : > { %1152 = vst.msk [vmem:[#allocation3 + $0xbc] sm:$0xf] %vm590_vm1, %v1071_v8  ;;  %v2981_v39 = vsel %vm2496_vm2, %v9419_v36, 0  ;;  %v9351_v36 = vld [vmem:[#allocation2 + $0x90] sm:$0xff] }
 0x233   : > { %2899 = vmatpush.bf16.xpose.msra.mxu2 %v2885_v9 }
 0x235   : > { %1227 = vrot.lane.b32.xlu1 %v10563_v25, %s10264_s18  ;;  %1229 = vrot.lane.b32.xlu2 %v10617_v60, %s10264_s18 }
 0x236   : > { %1225 = vrot.lane.b32.xlu0 %v10544_v18, %s10264_s18 }
 0x237   : > { %v1079_v12 = vpop.permute.xlu1 %1078  ;;  %v1099_v13 = vpop.permute.xlu2 %1098 }
 0x238   : > { %1156 = vst.msk [vmem:[#allocation3 + $0xcc] sm:$0xf] %vm590_vm1, %v1079_v12  ;;  %v1077_v20 = vpop.permute.xlu0 %1076  ;;  %8469 = vmatmul.msk.bf16.gmra.mxu1 %vm2496_vm2, %v9347_v15 }
 0x239   : > { %1166 = vst.msk [vmem:[#allocation3 + $0xf4] sm:$0xf] %vm590_vm1, %v1099_v13  ;;  %v9420_v23 = vld [vmem:[#allocation3 + $0xb8] sm:$0xff] }
 0x23a   : > { %1155 = vst.msk [vmem:[#allocation3 + $0xc8] sm:$0xf] %vm590_vm1, %v1077_v20  ;;  %v2984_v26 = vsel %vm2496_vm2, %v9420_v23, 0  ;;  %v9421_v23 = vld [vmem:[#allocation3 + $0xc0] sm:$0xff] }
 0x23b   : > { %2900 = vmatpush.bf16.xpose.msra.mxu2 %v2882_v24  ;;  %2990 = vmatpush.bf16.xpose.msra.mxu3 %v2984_v26 }
 0x23d   : > { %1298 = vrot.lane.b32.xlu1 %v10371_v21, %s10265_s19  ;;  %1300 = vrot.lane.b32.xlu2 %v10391_v32, %s10265_s19 }
 0x23e   : > { %1231 = vrot.lane.b32.xlu0 %v10627_v3, %s10264_s18 }
 0x23f   : > { %v1085_v28 = vpop.permute.xlu1 %1084  ;;  %v1170_v30 = vpop.permute.xlu2 %1169 }
 0x240   : > { %1159 = vst.msk [vmem:[#allocation3 + $0xd8] sm:$0xf] %vm590_vm1, %v1085_v28  ;;  %v1083_v37 = vpop.permute.xlu0 %1082 }
 0x241   : > { %1266 = vst.msk [vmem:[#allocation4 + $0x80] sm:$0xf] %vm590_vm1, %v1170_v30  ;;  %v9422_v8 = vld [vmem:[#allocation3 + $0xc8] sm:$0xff] }
 0x242   : > { %1158 = vst.msk [vmem:[#allocation3 + $0xd4] sm:$0xf] %vm590_vm1, %v1083_v37  ;;  %8503 = vmatmul.msk.bf16.vlgmr.msra.gmra.mxu2 %vm2496_vm2, %v9349_v38  ;;  %v3071_v20 = vsel %vm2496_vm2, %v9422_v8, 0  ;;  %v3068_v37 = vsel %vm2496_vm2, %v9421_v23, 0 }
 0x243   : > { %2991 = vmatpush.bf16.xpose.msra.mxu3 %v2981_v39 }
 0x245   : > { %1304 = vrot.lane.b32.xlu1 %v10460_v61, %s10265_s19  ;;  %1306 = vrot.lane.b32.xlu2 %v10502_v5, %s10265_s19 }
 0x246   : > { %1302 = vrot.lane.b32.xlu0 %v10419_v45, %s10265_s19 }
 0x247   : > { %v1091_v41 = vpop.permute.xlu1 %1090  ;;  %v1176_v47 = vpop.permute.xlu2 %1175  ;;  %v9424_v16 = vld [vmem:[#allocation3 + $0xd8] sm:$0xff] }
 0x248   : > { %1162 = vst.msk [vmem:[#allocation3 + $0xe4] sm:$0xf] %vm590_vm1, %v1091_v41  ;;  %v1089_v51 = vpop.permute.xlu0 %1088  ;;  %8470 = vmatmul.msk.bf16.gmra.mxu1 %vm2496_vm2, %v9348_v48  ;;  %v3077_v52 = vsel %vm2496_vm2, %v9424_v16, 0 }
 0x249   : > { %1269 = vst.msk [vmem:[#allocation4 + $0x8c] sm:$0xf] %vm590_vm1, %v1176_v47  ;;  %3083 = vmatpush.bf16.xpose.msrb.mxu1 %v3077_v52  ;;  %v9423_v57 = vld [vmem:[#allocation3 + $0xd0] sm:$0xff]  ;;  %v9354_v52 = vld [vmem:[#allocation2 + $0xa8] sm:$0xff] }
 0x24a   : > { %1161 = vst.msk [vmem:[#allocation3 + $0xe0] sm:$0xf] %vm590_vm1, %v1089_v51  ;;  %v3074_v6 = vsel %vm2496_vm2, %v9423_v57, 0 }
 0x24b   : > { %2992 = vmatpush.bf16.xpose.msra.mxu3 %v2978_v56 }
 0x24d   : > { %1310 = vrot.lane.b32.xlu1 %v10575_v29, %s10265_s19  ;;  %1312 = vrot.lane.b32.xlu2 %v10589_v40, %s10265_s19 }
 0x24e   : > { %1308 = vrot.lane.b32.xlu0 %v10514_v10, %s10265_s19 }
 0x24f   : > { %v1097_v58 = vpop.permute.xlu1 %1096  ;;  %v1182_v59 = vpop.permute.xlu2 %1181 }
 0x250   : > { %1165 = vst.msk [vmem:[#allocation3 + $0xf0] sm:$0xf] %vm590_vm1, %v1097_v58  ;;  %v1095_v1 = vpop.permute.xlu0 %1094 }
 0x251   : > { %1272 = vst.msk [vmem:[#allocation4 + $0x98] sm:$0xf] %vm590_vm1, %v1182_v59  ;;  %3084 = vmatpush.bf16.xpose.msrb.mxu1 %v3074_v6 }
 0x252   : > { %1164 = vst.msk [vmem:[#allocation3 + $0xec] sm:$0xf] %vm590_vm1, %v1095_v1  ;;  %8504 = vmatmul.msk.bf16.gmra.mxu2 %vm2496_vm2, %v9350_v4  ;;  %v9352_v4 = vld [vmem:[#allocation2 + $0x98] sm:$0xff] }
 0x253   : > { %2993 = vmatpush.bf16.xpose.msra.mxu3 %v2975_v7 }
 0x255   : > { %1316 = vrot.lane.b32.xlu1 %v10669_v35, %s10265_s19  ;;  %1318 = vrot.lane.b32.xlu2 %v10373_v22, %s10265_s19  ;;  %v11048_v9 = vpop.f32.mrf.mxu1 }
 0x256   : > { %1314 = vrot.lane.b32.xlu0 %v10650_v19, %s10265_s19 }
 0x257   : > { %v1103_v12 = vpop.permute.xlu1 %1102  ;;  %v1188_v13 = vpop.permute.xlu2 %1187  ;;  %v9427_v16 = vld [vmem:[#allocation3 + $0xf0] sm:$0xff] }
 0x258   : > { %1168 = vst.msk [vmem:[#allocation3 + $0xfc] sm:$0xf] %vm590_vm1, %v1103_v12  ;;  %v1101_v15 = vpop.permute.xlu0 %1100  ;;  %v3167_v56 = vsel %vm2496_vm2, %v9427_v16, 0  ;;  %v9356_v16 = vld [vmem:[#allocation2 + $0xb8] sm:$0xff] }
 0x259   : > { %1275 = vst.msk [vmem:[#allocation4 + $0xa4] sm:$0xf] %vm590_vm1, %v1188_v13  ;;  %3085 = vmatpush.bf16.xpose.msrb.mxu1 %v3071_v20  ;;  %v9426_v0 = vld [vmem:[#allocation3 + $0xe8] sm:$0xff]  ;;  %v9355_v20 = vld [vmem:[#allocation2 + $0xb0] sm:$0xff] }
 0x25a   : > { %1167 = vst.msk [vmem:[#allocation3 + $0xf8] sm:$0xf] %vm590_vm1, %v1101_v15  ;;  %8539 = vmatmul.msk.bf16.vlgmr.msra.gmra.mxu3 %vm2496_vm2, %v9353_v17  ;;  %v3164_v6 = vsel %vm2496_vm2, %v9426_v0, 0  ;;  %v9358_v13 = vld [vmem:[#allocation2 + $0xc8] sm:$0xff]  ;;  %v9425_v15 = vld [vmem:[#allocation3 + $0xe0] sm:$0xff] }
 0x25b   : > { %v3161_v23 = vsel %vm2496_vm2, %v9425_v15, 0  ;;  %v9544_v0 = vld [vmem:[%s14842_s5] sm:$0xff]  }
 0x25d   : > { %1322 = vrot.lane.b32.xlu1 %v10421_v46, %s10265_s19  ;;  %1324 = vrot.lane.b32.xlu2 %v10445_v54, %s10265_s19  ;;  %v11061_v24 = vpop.f32.mrf.mxu1 }
 0x25e   : > { %1320 = vrot.lane.b32.xlu0 %v10393_v33, %s10265_s19 }
 0x25f   : > { %v1174_v26 = vpop.permute.xlu1 %1173  ;;  %v1194_v28 = vpop.permute.xlu2 %1193 }
 0x260   : > { %1268 = vst.msk [vmem:[#allocation4 + $0x88] sm:$0xf] %vm590_vm1, %v1174_v26  ;;  %v1172_v30 = vpop.permute.xlu0 %1171 }
 0x261   : > { %1278 = vst.msk [vmem:[#allocation4 + $0xb0] sm:$0xf] %vm590_vm1, %v1194_v28  ;;  %v9428_v38 = vld [vmem:[#allocation3 + $0xf8] sm:$0xff]  ;;  %3086 = vmatpush.bf16.xpose.msrb.mxu1 %v3068_v37  ;;  %v9361_v37 = vld [vmem:[#allocation2 + $0xe0] sm:$0xff] }
 0x262   : > { %1267 = vst.msk [vmem:[#allocation4 + $0x84] sm:$0xf] %vm590_vm1, %v1172_v30  ;;  %8505 = vmatmul.msk.bf16.gmra.mxu2 %vm2496_vm2, %v9351_v36  ;;  %v3170_v39 = vsel %vm2496_vm2, %v9428_v38, 0 }
 0x263   : > { %3176 = vmatpush.bf16.xpose.msrb.mxu2 %v3170_v39 }
 0x265   : > { %1328 = vrot.lane.b32.xlu1 %v10529_v14, %s10265_s19  ;;  %1330 = vrot.lane.b32.xlu2 %v10598_v49, %s10265_s19  ;;  %v11075_v41 = vpop.f32.mrf.mxu1 }
 0x266   : > { %1326 = vrot.lane.b32.xlu0 %v10516_v11, %s10265_s19 }
 0x267   : > { %v1180_v47 = vpop.permute.xlu1 %1179  ;;  %v1200_v48 = vpop.permute.xlu2 %1199 }
 0x268   : > { %1271 = vst.msk [vmem:[#allocation4 + $0x94] sm:$0xf] %vm590_vm1, %v1180_v47  ;;  %v1178_v51 = vpop.permute.xlu0 %1177  ;;  %8575 = vmatmul.msk.bf16.vlgmr.msrb.gmra.mxu1 %vm2496_vm2, %v9357_v50 }
 0x269   : > { %1281 = vst.msk [vmem:[#allocation4 + $0xbc] sm:$0xf] %vm590_vm1, %v1200_v48  ;;  %v9359_v48 = vld [vmem:[#allocation2 + $0xd0] sm:$0xff] }
 0x26a   : > { %1270 = vst.msk [vmem:[#allocation4 + $0x90] sm:$0xf] %vm590_vm1, %v1178_v51  ;;  %8540 = vmatmul.msk.bf16.gmra.mxu3 %vm2496_vm2, %v9354_v52 }
 0x26b   : > { %3177 = vmatpush.bf16.xpose.msrb.mxu2 %v3167_v56 }
 0x26d   : > { %1334 = vrot.lane.b32.xlu1 %v10659_v27, %s10265_s19  ;;  %1336 = vrot.lane.b32.xlu2 %v10683_v42, %s10265_s19  ;;  %v11089_v57 = vpop.f32.mrf.mxu1 }
 0x26e   : > { %1332 = vrot.lane.b32.xlu0 %v10608_v55, %s10265_s19 }
 0x26f   : > { %v1186_v58 = vpop.permute.xlu1 %1185  ;;  %v1206_v59 = vpop.permute.xlu2 %1205 }
 0x270   : > { %1274 = vst.msk [vmem:[#allocation4 + $0xa0] sm:$0xf] %vm590_vm1, %v1186_v58  ;;  %v1184_v1 = vpop.permute.xlu0 %1183 }
 0x271   : > { %1284 = vst.msk [vmem:[#allocation4 + $0xc8] sm:$0xf] %vm590_vm1, %v1206_v59  ;;  %v9362_v59 = vld [vmem:[#allocation2 + $0xe8] sm:$0xff] }
 0x272   : > { %1273 = vst.msk [vmem:[#allocation4 + $0x9c] sm:$0xf] %vm590_vm1, %v1184_v1  ;;  %8506 = vmatmul.msk.bf16.gmra.mxu2 %vm2496_vm2, %v9352_v4  ;;  %v11150_v1 = vunpack.c.l.bf16 %v9544_v0 }
 0x273   : > { %3178 = vmatpush.bf16.xpose.msrb.mxu2 %v3164_v6 }
 0x275   : > { %1340 = vrot.lane.b32.xlu1 %v10415_v43, %s10265_s19  ;;  %1342 = vrot.lane.b32.xlu2 %v10462_v62, %s10265_s19  ;;  %v11102_v7 = vpop.f32.mrf.mxu1 }
 0x276   : > { %1338 = vrot.lane.b32.xlu0 %v10389_v31, %s10265_s19 }
 0x277   : > { %v1192_v8 = vpop.permute.xlu1 %1191  ;;  %v1212_v12 = vpop.permute.xlu2 %1211 }
 0x278   : > { %1277 = vst.msk [vmem:[#allocation4 + $0xac] sm:$0xf] %vm590_vm1, %v1192_v8  ;;  %v1190_v17 = vpop.permute.xlu0 %1189  ;;  %8576 = vmatmul.msk.bf16.gmra.mxu1 %vm2496_vm2, %v9358_v13  ;;  %v9360_v13 = vld [vmem:[#allocation2 + $0xd8] sm:$0xff] }
 0x279   : > { %1287 = vst.msk [vmem:[#allocation4 + $0xd4] sm:$0xf] %vm590_vm1, %v1212_v12 }
 0x27a   : > { %1276 = vst.msk [vmem:[#allocation4 + $0xa8] sm:$0xf] %vm590_vm1, %v1190_v17  ;;  %8541 = vmatmul.msk.bf16.gmra.mxu3 %vm2496_vm2, %v9355_v20 }
 0x27b   : > { %3179 = vmatpush.bf16.xpose.msrb.mxu2 %v3161_v23 }
 0x27d   : > { %1346 = vrot.lane.b32.xlu1 %v10401_v34, %s10265_s19  ;;  %1348 = vrot.lane.b32.xlu2 %v10417_v44, %s10265_s19  ;;  %v11116_v26 = vpop.f32.mrf.mxu1 }
 0x27e   : > { %1344 = vrot.lane.b32.xlu0 %v10485_v2, %s10265_s19 }
 0x27f   : > { %v1198_v28 = vpop.permute.xlu1 %1197  ;;  %v1218_v30 = vpop.permute.xlu2 %1217 }
 0x280   : > { %1280 = vst.msk [vmem:[#allocation4 + $0xb8] sm:$0xf] %vm590_vm1, %v1198_v28  ;;  %v1196_v36 = vpop.permute.xlu0 %1195  ;;  %v9363_v28 = vld [vmem:[#allocation2 + $0xf0] sm:$0xff] }
 0x281   : > { %1290 = vst.msk [vmem:[#allocation4 + $0xe0] sm:$0xf] %vm590_vm1, %v1218_v30 }
 0x282   : > { %1279 = vst.msk [vmem:[#allocation4 + $0xb4] sm:$0xf] %vm590_vm1, %v1196_v36  ;;  %8611 = vmatmul.msk.bf16.vlgmr.msrb.gmra.mxu2 %vm2496_vm2, %v9361_v37 }
 0x285   : > { %1352 = vrot.lane.b32.xlu1 %v10464_v63, %s10265_s19  ;;  %1354 = vrot.lane.b32.xlu2 %v10544_v18, %s10265_s19  ;;  %v11128_v38 = vpop.f32.mrf.mxu1 }
 0x286   : > { %1350 = vrot.lane.b32.xlu0 %v10443_v53, %s10265_s19 }
 0x287   : > { %v1204_v39 = vpop.permute.xlu1 %1203  ;;  %v1224_v47 = vpop.permute.xlu2 %1223 }
 0x288   : > { %1283 = vst.msk [vmem:[#allocation4 + $0xc4] sm:$0xf] %vm590_vm1, %v1204_v39  ;;  %v1202_v50 = vpop.permute.xlu0 %1201  ;;  %8577 = vmatmul.msk.bf16.gmra.mxu1 %vm2496_vm2, %v9359_v48 }
 0x289   : > { %1293 = vst.msk [vmem:[#allocation4 + $0xec] sm:$0xf] %vm590_vm1, %v1224_v47 }
 0x28a   : > { %1282 = vst.msk [vmem:[#allocation4 + $0xc0] sm:$0xf] %vm590_vm1, %v1202_v50  ;;  %8542 = vmatmul.msk.bf16.gmra.mxu3 %vm2496_vm2, %v9356_v16  ;;  %v9364_v50 = vld [vmem:[#allocation2 + $0xf8] sm:$0xff] }
 0x28d   : > { %1358 = vrot.lane.b32.xlu1 %v10617_v60, %s10265_s19  ;;  %1360 = vrot.lane.b32.xlu2 %v10627_v3, %s10265_s19  ;;  %v11141_v51 = vpop.f32.mrf.mxu1 }
 0x28e   : > { %1356 = vrot.lane.b32.xlu0 %v10563_v25, %s10265_s19  ;;  %s14617_s19 = scalar_lea.vmem %s14844_s7, %s9314_s14 }
 0x28f   : > { %v1210_v52 = vpop.permute.xlu1 %1209  ;;  %v1230_v56 = vpop.permute.xlu2 %1229 }
 0x290   : > { %1286 = vst.msk [vmem:[#allocation4 + $0xd0] sm:$0xf] %vm590_vm1, %v1210_v52  ;;  %v1208_v58 = vpop.permute.xlu0 %1207 }
 0x291   : > { %1296 = vst.msk [vmem:[#allocation4 + $0xf8] sm:$0xf] %vm590_vm1, %v1230_v56 }
 0x292   : > { %1285 = vst.msk [vmem:[#allocation4 + $0xcc] sm:$0xf] %vm590_vm1, %v1208_v58  ;;  %8612 = vmatmul.msk.bf16.gmra.mxu2 %vm2496_vm2, %v9362_v59 }
 0x295   : > { %1429 = vrot.lane.b32.xlu1 %v10391_v32, %s10266_s22  ;;  %1431 = vrot.lane.b32.xlu2 %v10419_v45, %s10266_s22  ;;  %v2809_v4 = vpop.f32.mrf.mxu1 }
 0x296   : > { %1427 = vrot.lane.b32.xlu0 %v10371_v21, %s10266_s22  ;;  %v11159_v12 = vadd.f32 %v11150_v1, %v2809_v4 }
 0x297   : > { %v1216_v6 = vpop.permute.xlu1 %1215  ;;  %v1301_v8 = vpop.permute.xlu2 %1300 }
 0x298   : > { %1289 = vst.msk [vmem:[#allocation4 + $0xdc] sm:$0xf] %vm590_vm1, %v1216_v6  ;;  %v1214_v15 = vpop.permute.xlu0 %1213  ;;  %8578 = vmatmul.msk.bf16.gmra.mxu1 %vm2496_vm2, %v9360_v13 }
 0x299   : > { %1396 = vst.msk [vmem:[#allocation2 + $0x104] sm:$0xf] %vm590_vm1, %v1301_v8 }
 0x29a   : > { %1288 = vst.msk [vmem:[#allocation4 + $0xd8] sm:$0xf] %vm590_vm1, %v1214_v15 }
 0x29d   : > { %1435 = vrot.lane.b32.xlu1 %v10502_v5, %s10266_s22  ;;  %1437 = vrot.lane.b32.xlu2 %v10514_v10, %s10266_s22 }
 0x29e   : > { %1433 = vrot.lane.b32.xlu0 %v10460_v61, %s10266_s22 }
 0x29f   : > { %v1222_v17 = vpop.permute.xlu1 %1221  ;;  %v1307_v20 = vpop.permute.xlu2 %1306 }
 0x2a0   : > { %1292 = vst.msk [vmem:[#allocation4 + $0xe8] sm:$0xf] %vm590_vm1, %v1222_v17  ;;  %v1220_v23 = vpop.permute.xlu0 %1219 }
 0x2a1   : > { %1399 = vst.msk [vmem:[#allocation2 + $0x110] sm:$0xf] %vm590_vm1, %v1307_v20 }
 0x2a2   : > { %1291 = vst.msk [vmem:[#allocation4 + $0xe4] sm:$0xf] %vm590_vm1, %v1220_v23  ;;  %8613 = vmatmul.msk.bf16.gmra.mxu2 %vm2496_vm2, %v9363_v28 }
 0x2a5   : > { %1441 = vrot.lane.b32.xlu1 %v10589_v40, %s10266_s22  ;;  %1443 = vrot.lane.b32.xlu2 %v10650_v19, %s10266_s22 }
 0x2a6   : > { %1439 = vrot.lane.b32.xlu0 %v10575_v29, %s10266_s22 }
 0x2a7   : > { %v1228_v30 = vpop.permute.xlu1 %1227  ;;  %v1313_v36 = vpop.permute.xlu2 %1312 }
 0x2a8   : > { %1295 = vst.msk [vmem:[#allocation4 + $0xf4] sm:$0xf] %vm590_vm1, %v1228_v30  ;;  %v1226_v37 = vpop.permute.xlu0 %1225 }
 0x2a9   : > { %1402 = vst.msk [vmem:[#allocation2 + $0x11c] sm:$0xf] %vm590_vm1, %v1313_v36 }
 0x2aa   : > { %1294 = vst.msk [vmem:[#allocation4 + $0xf0] sm:$0xf] %vm590_vm1, %v1226_v37 }
 0x2ad   : > { %1447 = vrot.lane.b32.xlu1 %v10373_v22, %s10266_s22  ;;  %1449 = vrot.lane.b32.xlu2 %v10393_v33, %s10266_s22 }
 0x2ae   : > { %1445 = vrot.lane.b32.xlu0 %v10669_v35, %s10266_s22 }
 0x2af   : > { %v1299_v39 = vpop.permute.xlu1 %1298  ;;  %v1319_v47 = vpop.permute.xlu2 %1318 }
 0x2b0   : > { %1395 = vst.msk [vmem:[#allocation2 + $0x100] sm:$0xf] %vm590_vm1, %v1299_v39  ;;  %v1232_v48 = vpop.permute.xlu0 %1231 }
 0x2b1   : > { %1405 = vst.msk [vmem:[#allocation2 + $0x128] sm:$0xf] %vm590_vm1, %v1319_v47 }
 0x2b2   : > { %1297 = vst.msk [vmem:[#allocation4 + $0xfc] sm:$0xf] %vm590_vm1, %v1232_v48  ;;  %8614 = vmatmul.msk.bf16.gmra.mxu2 %vm2496_vm2, %v9364_v50 }
 0x2b5   : > { %1453 = vrot.lane.b32.xlu1 %v10445_v54, %s10266_s22  ;;  %1455 = vrot.lane.b32.xlu2 %v10516_v11, %s10266_s22 }
 0x2b6   : > { %1451 = vrot.lane.b32.xlu0 %v10421_v46, %s10266_s22 }
 0x2b7   : > { %v1305_v16 = vpop.permute.xlu1 %1304  ;;  %v1325_v52 = vpop.permute.xlu2 %1324 }
 0x2b8   : > { %1398 = vst.msk [vmem:[#allocation2 + $0x10c] sm:$0xf] %vm590_vm1, %v1305_v16  ;;  %v1303_v56 = vpop.permute.xlu0 %1302 }
 0x2b9   : > { %1408 = vst.msk [vmem:[#allocation2 + $0x134] sm:$0xf] %vm590_vm1, %v1325_v52 }
 0x2ba   : > { %1397 = vst.msk [vmem:[#allocation2 + $0x108] sm:$0xf] %vm590_vm1, %v1303_v56 }
 0x2bd   : > { %1459 = vrot.lane.b32.xlu1 %v10598_v49, %s10266_s22  ;;  %1461 = vrot.lane.b32.xlu2 %v10608_v55, %s10266_s22 }
 0x2be   : > { %1457 = vrot.lane.b32.xlu0 %v10529_v14, %s10266_s22 }
 0x2bf   : > { %v1311_v58 = vpop.permute.xlu1 %1310  ;;  %v1331_v59 = vpop.permute.xlu2 %1330 }
 0x2c0   : > { %1401 = vst.msk [vmem:[#allocation2 + $0x118] sm:$0xf] %vm590_vm1, %v1311_v58  ;;  %v1309_v0 = vpop.permute.xlu0 %1308 }
 0x2c1   : > { %1411 = vst.msk [vmem:[#allocation2 + $0x140] sm:$0xf] %vm590_vm1, %v1331_v59 }
 0x2c2   : > { %1400 = vst.msk [vmem:[#allocation2 + $0x114] sm:$0xf] %vm590_vm1, %v1309_v0 }
 0x2c5   : > { %1465 = vrot.lane.b32.xlu1 %v10683_v42, %s10266_s22  ;;  %1467 = vrot.lane.b32.xlu2 %v10389_v31, %s10266_s22 }
 0x2c6   : > { %1463 = vrot.lane.b32.xlu0 %v10659_v27, %s10266_s22 }
 0x2c7   : > { %v1317_v4 = vpop.permute.xlu1 %1316  ;;  %v1337_v6 = vpop.permute.xlu2 %1336 }
 0x2c8   : > { %1404 = vst.msk [vmem:[#allocation2 + $0x124] sm:$0xf] %vm590_vm1, %v1317_v4  ;;  %v1315_v8 = vpop.permute.xlu0 %1314 }
 0x2c9   : > { %1414 = vst.msk [vmem:[#allocation2 + $0x14c] sm:$0xf] %vm590_vm1, %v1337_v6 }
 0x2ca   : > { %1403 = vst.msk [vmem:[#allocation2 + $0x120] sm:$0xf] %vm590_vm1, %v1315_v8 }
 0x2cd   : > { %1471 = vrot.lane.b32.xlu1 %v10462_v62, %s10266_s22  ;;  %1473 = vrot.lane.b32.xlu2 %v10485_v2, %s10266_s22 }
 0x2ce   : > { %1469 = vrot.lane.b32.xlu0 %v10415_v43, %s10266_s22 }
 0x2cf   : > { %v1323_v13 = vpop.permute.xlu1 %1322  ;;  %v1343_v15 = vpop.permute.xlu2 %1342 }
 0x2d0   : > { %1407 = vst.msk [vmem:[#allocation2 + $0x130] sm:$0xf] %vm590_vm1, %v1323_v13  ;;  %v1321_v17 = vpop.permute.xlu0 %1320 }
 0x2d1   : > { %1417 = vst.msk [vmem:[#allocation2 + $0x158] sm:$0xf] %vm590_vm1, %v1343_v15 }
 0x2d2   : > { %1406 = vst.msk [vmem:[#allocation2 + $0x12c] sm:$0xf] %vm590_vm1, %v1321_v17 }
 0x2d5   : > { %1477 = vrot.lane.b32.xlu1 %v10417_v44, %s10266_s22  ;;  %1479 = vrot.lane.b32.xlu2 %v10443_v53, %s10266_s22 }
 0x2d6   : > { %1475 = vrot.lane.b32.xlu0 %v10401_v34, %s10266_s22 }
 0x2d7   : > { %v1329_v20 = vpop.permute.xlu1 %1328  ;;  %v1349_v23 = vpop.permute.xlu2 %1348 }
 0x2d8   : > { %1410 = vst.msk [vmem:[#allocation2 + $0x13c] sm:$0xf] %vm590_vm1, %v1329_v20  ;;  %v1327_v28 = vpop.permute.xlu0 %1326 }
 0x2d9   : > { %1420 = vst.msk [vmem:[#allocation2 + $0x164] sm:$0xf] %vm590_vm1, %v1349_v23 }
 0x2da   : > { %1409 = vst.msk [vmem:[#allocation2 + $0x138] sm:$0xf] %vm590_vm1, %v1327_v28 }
 0x2dd   : > { %1483 = vrot.lane.b32.xlu1 %v10544_v18, %s10266_s22  ;;  %1485 = vrot.lane.b32.xlu2 %v10563_v25, %s10266_s22 }
 0x2de   : > { %1481 = vrot.lane.b32.xlu0 %v10464_v63, %s10266_s22 }
 0x2df   : > { %v1335_v30 = vpop.permute.xlu1 %1334  ;;  %v1355_v36 = vpop.permute.xlu2 %1354 }
 0x2e0   : > { %1413 = vst.msk [vmem:[#allocation2 + $0x148] sm:$0xf] %vm590_vm1, %v1335_v30  ;;  %v1333_v37 = vpop.permute.xlu0 %1332 }
 0x2e1   : > { %1423 = vst.msk [vmem:[#allocation2 + $0x170] sm:$0xf] %vm590_vm1, %v1355_v36 }
 0x2e2   : > { %1412 = vst.msk [vmem:[#allocation2 + $0x144] sm:$0xf] %vm590_vm1, %v1333_v37 }
 0x2e5   : > { %1489 = vrot.lane.b32.xlu1 %v10627_v3, %s10266_s22  ;;  %1556 = vrot.lane.b32.xlu2 %v10371_v21, %s10267_s23 }
 0x2e6   : > { %1487 = vrot.lane.b32.xlu0 %v10617_v60, %s10266_s22 }
 0x2e7   : > { %v1341_v39 = vpop.permute.xlu1 %1340  ;;  %v1361_v47 = vpop.permute.xlu2 %1360 }
 0x2e8   : > { %1416 = vst.msk [vmem:[#allocation2 + $0x154] sm:$0xf] %vm590_vm1, %v1341_v39  ;;  %v1339_v48 = vpop.permute.xlu0 %1338 }
 0x2e9   : > { %1426 = vst.msk [vmem:[#allocation2 + $0x17c] sm:$0xf] %vm590_vm1, %v1361_v47 }
 0x2ea   : > { %1415 = vst.msk [vmem:[#allocation2 + $0x150] sm:$0xf] %vm590_vm1, %v1339_v48 }
 0x2ed   : > { %1560 = vrot.lane.b32.xlu1 %v10419_v45, %s10267_s23  ;;  %1562 = vrot.lane.b32.xlu2 %v10460_v61, %s10267_s23 }
 0x2ee   : > { %1558 = vrot.lane.b32.xlu0 %v10391_v32, %s10267_s23 }
 0x2ef   : > { %v1347_v50 = vpop.permute.xlu1 %1346  ;;  %v1432_v16 = vpop.permute.xlu2 %1431 }
 0x2f0   : > { %1419 = vst.msk [vmem:[#allocation2 + $0x160] sm:$0xf] %vm590_vm1, %v1347_v50  ;;  %v1345_v52 = vpop.permute.xlu0 %1344 }
 0x2f1   : > { %1526 = vst.msk [vmem:[#allocation3 + $0x108] sm:$0xf] %vm590_vm1, %v1432_v16 }
 0x2f2   : > { %1418 = vst.msk [vmem:[#allocation2 + $0x15c] sm:$0xf] %vm590_vm1, %v1345_v52 }
 0x2f5   : > { %1566 = vrot.lane.b32.xlu1 %v10514_v10, %s10267_s23  ;;  %1568 = vrot.lane.b32.xlu2 %v10575_v29, %s10267_s23 }
 0x2f6   : > { %1564 = vrot.lane.b32.xlu0 %v10502_v5, %s10267_s23 }
 0x2f7   : > { %v1353_v56 = vpop.permute.xlu1 %1352  ;;  %v1438_v58 = vpop.permute.xlu2 %1437 }
 0x2f8   : > { %1422 = vst.msk [vmem:[#allocation2 + $0x16c] sm:$0xf] %vm590_vm1, %v1353_v56  ;;  %v1351_v59 = vpop.permute.xlu0 %1350 }
 0x2f9   : > { %1529 = vst.msk [vmem:[#allocation3 + $0x114] sm:$0xf] %vm590_vm1, %v1438_v58 }
 0x2fa   : > { %1421 = vst.msk [vmem:[#allocation2 + $0x168] sm:$0xf] %vm590_vm1, %v1351_v59 }
 0x2fd   : > { %1572 = vrot.lane.b32.xlu1 %v10650_v19, %s10267_s23  ;;  %1574 = vrot.lane.b32.xlu2 %v10669_v35, %s10267_s23 }
 0x2fe   : > { %1570 = vrot.lane.b32.xlu0 %v10589_v40, %s10267_s23 }
 0x2ff   : > { %v1359_v0 = vpop.permute.xlu1 %1358  ;;  %v1444_v4 = vpop.permute.xlu2 %1443 }
 0x300   : > { %1425 = vst.msk [vmem:[#allocation2 + $0x178] sm:$0xf] %vm590_vm1, %v1359_v0  ;;  %v1357_v6 = vpop.permute.xlu0 %1356 }
 0x301   : > { %1532 = vst.msk [vmem:[#allocation3 + $0x120] sm:$0xf] %vm590_vm1, %v1444_v4 }
 0x302   : > { %1424 = vst.msk [vmem:[#allocation2 + $0x174] sm:$0xf] %vm590_vm1, %v1357_v6 }
 0x305   : > { %1578 = vrot.lane.b32.xlu1 %v10393_v33, %s10267_s23  ;;  %1580 = vrot.lane.b32.xlu2 %v10421_v46, %s10267_s23 }
 0x306   : > { %1576 = vrot.lane.b32.xlu0 %v10373_v22, %s10267_s23 }
 0x307   : > { %v1430_v8 = vpop.permute.xlu1 %1429  ;;  %v1450_v13 = vpop.permute.xlu2 %1449 }
 0x308   : > { %1525 = vst.msk [vmem:[#allocation3 + $0x104] sm:$0xf] %vm590_vm1, %v1430_v8  ;;  %v1428_v15 = vpop.permute.xlu0 %1427 }
 0x309   : > { %1535 = vst.msk [vmem:[#allocation3 + $0x12c] sm:$0xf] %vm590_vm1, %v1450_v13 }
 0x30a   : > { %1524 = vst.msk [vmem:[#allocation3 + $0x100] sm:$0xf] %vm590_vm1, %v1428_v15 }
 0x30d   : > { %1584 = vrot.lane.b32.xlu1 %v10516_v11, %s10267_s23  ;;  %1586 = vrot.lane.b32.xlu2 %v10529_v14, %s10267_s23 }
 0x30e   : > { %1582 = vrot.lane.b32.xlu0 %v10445_v54, %s10267_s23 }
 0x30f   : > { %v1436_v17 = vpop.permute.xlu1 %1435  ;;  %v1456_v20 = vpop.permute.xlu2 %1455 }
 0x310   : > { %1528 = vst.msk [vmem:[#allocation3 + $0x110] sm:$0xf] %vm590_vm1, %v1436_v17  ;;  %v1434_v23 = vpop.permute.xlu0 %1433 }
 0x311   : > { %1538 = vst.msk [vmem:[#allocation3 + $0x138] sm:$0xf] %vm590_vm1, %v1456_v20  ;;  %v9429_v20 = vld [vmem:[#allocation3 + $0x100] sm:$0xff] }
 0x312   : > { %1527 = vst.msk [vmem:[#allocation3 + $0x10c] sm:$0xf] %vm590_vm1, %v1434_v23 }
 0x315   : > { %1590 = vrot.lane.b32.xlu1 %v10608_v55, %s10267_s23  ;;  %1592 = vrot.lane.b32.xlu2 %v10659_v27, %s10267_s23 }
 0x316   : > { %1588 = vrot.lane.b32.xlu0 %v10598_v49, %s10267_s23 }
 0x317   : > { %v1442_v28 = vpop.permute.xlu1 %1441  ;;  %v1462_v30 = vpop.permute.xlu2 %1461  ;;  %v9431_v56 = vld [vmem:[#allocation3 + $0x110] sm:$0xff] }
 0x318   : > { %1531 = vst.msk [vmem:[#allocation3 + $0x11c] sm:$0xf] %vm590_vm1, %v1442_v28  ;;  %v1440_v36 = vpop.permute.xlu0 %1439  ;;  %v3260_v59 = vsel %vm2496_vm2, %v9431_v56, 0 }
 0x319   : > { %1541 = vst.msk [vmem:[#allocation3 + $0x144] sm:$0xf] %vm590_vm1, %v1462_v30  ;;  %v9430_v6 = vld [vmem:[#allocation3 + $0x108] sm:$0xff]  ;;  %v3254_v30 = vsel %vm2496_vm2, %v9429_v20, 0 }
 0x31a   : > { %1530 = vst.msk [vmem:[#allocation3 + $0x118] sm:$0xf] %vm590_vm1, %v1440_v36  ;;  %v3257_v13 = vsel %vm2496_vm2, %v9430_v6, 0 }
 0x31d   : > { %1596 = vrot.lane.b32.xlu1 %v10389_v31, %s10267_s23  ;;  %1598 = vrot.lane.b32.xlu2 %v10415_v43, %s10267_s23 }
 0x31e   : > { %1594 = vrot.lane.b32.xlu0 %v10683_v42, %s10267_s23 }
 0x31f   : > { %v1448_v37 = vpop.permute.xlu1 %1447  ;;  %v1468_v39 = vpop.permute.xlu2 %1467 }
 0x320   : > { %1534 = vst.msk [vmem:[#allocation3 + $0x128] sm:$0xf] %vm590_vm1, %v1448_v37  ;;  %v1446_v47 = vpop.permute.xlu0 %1445 }
 0x321   : > { %1544 = vst.msk [vmem:[#allocation3 + $0x150] sm:$0xf] %vm590_vm1, %v1468_v39  ;;  %v9432_v48 = vld [vmem:[#allocation3 + $0x118] sm:$0xff] }
 0x322   : > { %1533 = vst.msk [vmem:[#allocation3 + $0x124] sm:$0xf] %vm590_vm1, %v1446_v47  ;;  %v3263_v50 = vsel %vm2496_vm2, %v9432_v48, 0 }
 0x323   : > { %3269 = vmatpush.bf16.xpose.msrb.mxu3 %v3263_v50  ;;  %v9365_v50 = vld [vmem:[#allocation2 + $0x100] sm:$0xff] }
 0x325   : > { %1602 = vrot.lane.b32.xlu1 %v10485_v2, %s10267_s23  ;;  %1604 = vrot.lane.b32.xlu2 %v10401_v34, %s10267_s23 }
 0x326   : > { %1600 = vrot.lane.b32.xlu0 %v10462_v62, %s10267_s23 }
 0x327   : > { %v1454_v16 = vpop.permute.xlu1 %1453  ;;  %v1474_v52 = vpop.permute.xlu2 %1473 }
 0x328   : > { %1537 = vst.msk [vmem:[#allocation3 + $0x134] sm:$0xf] %vm590_vm1, %v1454_v16  ;;  %v1452_v58 = vpop.permute.xlu0 %1451 }
 0x329   : > { %1547 = vst.msk [vmem:[#allocation3 + $0x15c] sm:$0xf] %vm590_vm1, %v1474_v52 }
 0x32a   : > { %1536 = vst.msk [vmem:[#allocation3 + $0x130] sm:$0xf] %vm590_vm1, %v1452_v58  ;;  %v9434_v58 = vld [vmem:[#allocation3 + $0x128] sm:$0xff] }
 0x32b   : > { %3270 = vmatpush.bf16.xpose.msrb.mxu3 %v3260_v59  ;;  %v3350_v6 = vsel %vm2496_vm2, %v9434_v58, 0 }
 0x32d   : > { %1608 = vrot.lane.b32.xlu1 %v10443_v53, %s10267_s23  ;;  %1610 = vrot.lane.b32.xlu2 %v10464_v63, %s10267_s23 }
 0x32e   : > { %1606 = vrot.lane.b32.xlu0 %v10417_v44, %s10267_s23 }
 0x32f   : > { %v1460_v0 = vpop.permute.xlu1 %1459  ;;  %v1480_v4 = vpop.permute.xlu2 %1479 }
 0x330   : > { %1540 = vst.msk [vmem:[#allocation3 + $0x140] sm:$0xf] %vm590_vm1, %v1460_v0  ;;  %v1458_v8 = vpop.permute.xlu0 %1457 }
 0x331   : > { %1550 = vst.msk [vmem:[#allocation3 + $0x168] sm:$0xf] %vm590_vm1, %v1480_v4  ;;  %v9435_v47 = vld [vmem:[#allocation3 + $0x130] sm:$0xff] }
 0x332   : > { %1539 = vst.msk [vmem:[#allocation3 + $0x13c] sm:$0xf] %vm590_vm1, %v1458_v8  ;;  %v3353_v16 = vsel %vm2496_vm2, %v9435_v47, 0 }
 0x333   : > { %3271 = vmatpush.bf16.xpose.msrb.mxu3 %v3257_v13 }
 0x335   : > { %1614 = vrot.lane.b32.xlu1 %v10563_v25, %s10267_s23  ;;  %1616 = vrot.lane.b32.xlu2 %v10617_v60, %s10267_s23 }
 0x336   : > { %1612 = vrot.lane.b32.xlu0 %v10544_v18, %s10267_s23 }
 0x337   : > { %v1466_v15 = vpop.permute.xlu1 %1465  ;;  %v1486_v17 = vpop.permute.xlu2 %1485 }
 0x338   : > { %1543 = vst.msk [vmem:[#allocation3 + $0x14c] sm:$0xf] %vm590_vm1, %v1466_v15  ;;  %v1464_v23 = vpop.permute.xlu0 %1463 }
 0x339   : > { %1553 = vst.msk [vmem:[#allocation3 + $0x174] sm:$0xf] %vm590_vm1, %v1486_v17  ;;  %v9436_v28 = vld [vmem:[#allocation3 + $0x138] sm:$0xff]  ;;  %v9433_v17 = vld [vmem:[#allocation3 + $0x120] sm:$0xff] }
 0x33a   : > { %1542 = vst.msk [vmem:[#allocation3 + $0x148] sm:$0xf] %vm590_vm1, %v1464_v23  ;;  %v3356_v36 = vsel %vm2496_vm2, %v9436_v28, 0  ;;  %v9366_v23 = vld [vmem:[#allocation2 + $0x108] sm:$0xff] }
 0x33b   : > { %3272 = vmatpush.bf16.xpose.msrb.mxu3 %v3254_v30  ;;  %3362 = vmatpush.bf16.xpose.msra.mxu1 %v3356_v36  ;;  %v11383_v30 = vpop.f32.mrf.mxu2  ;;  %v3347_v36 = vsel %vm2496_vm2, %v9433_v17, 0 }
 0x33d   : > { %1685 = vrot.lane.b32.xlu1 %v10371_v21, %s10268_s25  ;;  %1687 = vrot.lane.b32.xlu2 %v10391_v32, %s10268_s25 }
 0x33e   : > { %1618 = vrot.lane.b32.xlu0 %v10627_v3, %s10267_s23 }
 0x33f   : > { %v1472_v37 = vpop.permute.xlu1 %1471  ;;  %v1557_v39 = vpop.permute.xlu2 %1556 }
 0x340   : > { %1546 = vst.msk [vmem:[#allocation3 + $0x158] sm:$0xf] %vm590_vm1, %v1472_v37  ;;  %v1470_v48 = vpop.permute.xlu0 %1469 }
 0x341   : > { %1653 = vst.msk [vmem:[#allocation4 + $0x100] sm:$0xf] %vm590_vm1, %v1557_v39  ;;  %v9438_v37 = vld [vmem:[#allocation3 + $0x148] sm:$0xff] }
 0x342   : > { %1545 = vst.msk [vmem:[#allocation3 + $0x154] sm:$0xf] %vm590_vm1, %v1470_v48  ;;  %8647 = vmatmul.msk.bf16.vlgmr.msrb.gmra.mxu3 %vm2496_vm2, %v9365_v50  ;;  %v9369_v50 = vld [vmem:[#allocation2 + $0x120] sm:$0xff] }
 0x343   : > { %3363 = vmatpush.bf16.xpose.msra.mxu1 %v3353_v16  ;;  %v3443_v16 = vsel %vm2496_vm2, %v9438_v37, 0  ;;  %v9370_v37 = vld [vmem:[#allocation2 + $0x128] sm:$0xff] }
 0x345   : > { %1691 = vrot.lane.b32.xlu1 %v10460_v61, %s10268_s25  ;;  %1693 = vrot.lane.b32.xlu2 %v10502_v5, %s10268_s25 }
 0x346   : > { %1689 = vrot.lane.b32.xlu0 %v10419_v45, %s10268_s25 }
 0x347   : > { %v1478_v52 = vpop.permute.xlu1 %1477  ;;  %v1563_v56 = vpop.permute.xlu2 %1562  ;;  %v9440_v59 = vld [vmem:[#allocation3 + $0x158] sm:$0xff] }
 0x348   : > { %1549 = vst.msk [vmem:[#allocation3 + $0x164] sm:$0xf] %vm590_vm1, %v1478_v52  ;;  %v1476_v0 = vpop.permute.xlu0 %1475  ;;  %v3449_v4 = vsel %vm2496_vm2, %v9440_v59, 0  ;;  %v11399_v52 = vpop.f32.mrf.mxu2 }
 0x349   : > { %1656 = vst.msk [vmem:[#allocation4 + $0x10c] sm:$0xf] %vm590_vm1, %v1563_v56  ;;  %3455 = vmatpush.bf16.xpose.msra.mxu2 %v3449_v4  ;;  %v9439_v8 = vld [vmem:[#allocation3 + $0x150] sm:$0xff]  ;;  %v9437_v56 = vld [vmem:[#allocation3 + $0x140] sm:$0xff] }
 0x34a   : > { %1548 = vst.msk [vmem:[#allocation3 + $0x160] sm:$0xf] %vm590_vm1, %v1476_v0  ;;  %v3446_v28 = vsel %vm2496_vm2, %v9439_v8, 0  ;;  %v9367_v4 = vld [vmem:[#allocation2 + $0x110] sm:$0xff] }
 0x34b   : > { %3364 = vmatpush.bf16.xpose.msra.mxu1 %v3350_v6  ;;  %v3440_v6 = vsel %vm2496_vm2, %v9437_v56, 0 }
 0x34d   : > { %1697 = vrot.lane.b32.xlu1 %v10575_v29, %s10268_s25  ;;  %1699 = vrot.lane.b32.xlu2 %v10589_v40, %s10268_s25 }
 0x34e   : > { %1695 = vrot.lane.b32.xlu0 %v10514_v10, %s10268_s25 }
 0x34f   : > { %v1484_v13 = vpop.permute.xlu1 %1483  ;;  %v1569_v15 = vpop.permute.xlu2 %1568 }
 0x350   : > { %1552 = vst.msk [vmem:[#allocation3 + $0x170] sm:$0xf] %vm590_vm1, %v1484_v13  ;;  %v1482_v20 = vpop.permute.xlu0 %1481 }
 0x351   : > { %1659 = vst.msk [vmem:[#allocation4 + $0x118] sm:$0xf] %vm590_vm1, %v1569_v15  ;;  %3456 = vmatpush.bf16.xpose.msra.mxu2 %v3446_v28  ;;  %v11417_v15 = vpop.f32.mrf.mxu2 }
 0x352   : > { %1551 = vst.msk [vmem:[#allocation3 + $0x16c] sm:$0xf] %vm590_vm1, %v1482_v20  ;;  %8648 = vmatmul.msk.bf16.gmra.mxu3 %vm2496_vm2, %v9366_v23  ;;  %v9373_v23 = vld [vmem:[#allocation2 + $0x140] sm:$0xff] }
 0x353   : > { %3365 = vmatpush.bf16.xpose.msra.mxu1 %v3347_v36 }
 0x355   : > { %1703 = vrot.lane.b32.xlu1 %v10669_v35, %s10268_s25  ;;  %1705 = vrot.lane.b32.xlu2 %v10373_v22, %s10268_s25 }
 0x356   : > { %1701 = vrot.lane.b32.xlu0 %v10650_v19, %s10268_s25 }
 0x357   : > { %v1490_v39 = vpop.permute.xlu1 %1489  ;;  %v1575_v47 = vpop.permute.xlu2 %1574  ;;  %v9443_v28 = vld [vmem:[#allocation3 + $0x170] sm:$0xff] }
 0x358   : > { %1555 = vst.msk [vmem:[#allocation3 + $0x17c] sm:$0xf] %vm590_vm1, %v1490_v39  ;;  %v1488_v48 = vpop.permute.xlu0 %1487  ;;  %v3539_v39 = vsel %vm2496_vm2, %v9443_v28, 0 }
 0x359   : > { %1662 = vst.msk [vmem:[#allocation4 + $0x124] sm:$0xf] %vm590_vm1, %v1575_v47  ;;  %3457 = vmatpush.bf16.xpose.msra.mxu2 %v3443_v16  ;;  %v11427_v47 = vpop.f32.mrf.mxu3  ;;  %v9442_v16 = vld [vmem:[#allocation3 + $0x168] sm:$0xff]  ;;  %v11435_v56 = vpop.f32.mrf.mxu2 }
 0x35a   : > { %1554 = vst.msk [vmem:[#allocation3 + $0x178] sm:$0xf] %vm590_vm1, %v1488_v48  ;;  %8683 = vmatmul.msk.bf16.vlgmr.msra.gmra.mxu1 %vm2496_vm2, %v9369_v50 }
 0x35d   : > { %1709 = vrot.lane.b32.xlu1 %v10421_v46, %s10268_s25  ;;  %1711 = vrot.lane.b32.xlu2 %v10445_v54, %s10268_s25 }
 0x35e   : > { %1707 = vrot.lane.b32.xlu0 %v10393_v33, %s10268_s25 }
 0x35f   : > { %v1561_v58 = vpop.permute.xlu1 %1560  ;;  %v1581_v59 = vpop.permute.xlu2 %1580 }
 0x360   : > { %1655 = vst.msk [vmem:[#allocation4 + $0x108] sm:$0xf] %vm590_vm1, %v1561_v58  ;;  %v1559_v0 = vpop.permute.xlu0 %1558 }
 0x361   : > { %1665 = vst.msk [vmem:[#allocation4 + $0x130] sm:$0xf] %vm590_vm1, %v1581_v59  ;;  %v9444_v8 = vld [vmem:[#allocation3 + $0x178] sm:$0xff]  ;;  %3458 = vmatpush.bf16.xpose.msra.mxu2 %v3440_v6  ;;  %v11453_v28 = vpop.f32.mrf.mxu2 }
 0x362   : > { %1654 = vst.msk [vmem:[#allocation4 + $0x104] sm:$0xf] %vm590_vm1, %v1559_v0  ;;  %8649 = vmatmul.msk.bf16.gmra.mxu3 %vm2496_vm2, %v9367_v4  ;;  %v3542_v13 = vsel %vm2496_vm2, %v9444_v8, 0  ;;  %v9368_v59 = vld [vmem:[#allocation2 + $0x118] sm:$0xff]  ;;  %v3536_v0 = vsel %vm2496_vm2, %v9442_v16, 0  ;;  %v11446_v4 = vpop.f32.mrf.mxu3  ;;  %v9377_v16 = vld [vmem:[#allocation2 + $0x160] sm:$0xff] }
 0x363   : > { %3548 = vmatpush.bf16.xpose.msra.mxu3 %v3542_v13  ;;  %v9374_v13 = vld [vmem:[#allocation2 + $0x148] sm:$0xff] }
 0x365   : > { %1715 = vrot.lane.b32.xlu1 %v10529_v14, %s10268_s25  ;;  %1717 = vrot.lane.b32.xlu2 %v10598_v49, %s10268_s25 }
 0x366   : > { %1713 = vrot.lane.b32.xlu0 %v10516_v11, %s10268_s25 }
 0x367   : > { %v1567_v17 = vpop.permute.xlu1 %1566  ;;  %v1587_v20 = vpop.permute.xlu2 %1586 }
 0x368   : > { %1658 = vst.msk [vmem:[#allocation4 + $0x114] sm:$0xf] %vm590_vm1, %v1567_v17  ;;  %v1565_v36 = vpop.permute.xlu0 %1564  ;;  %8719 = vmatmul.msk.bf16.vlgmr.msra.gmra.mxu2 %vm2496_vm2, %v9373_v23  ;;  %v9441_v17 = vld [vmem:[#allocation3 + $0x160] sm:$0xff]  ;;  %v9371_v23 = vld [vmem:[#allocation2 + $0x130] sm:$0xff] }
 0x369   : > { %1668 = vst.msk [vmem:[#allocation4 + $0x13c] sm:$0xf] %vm590_vm1, %v1587_v20 }
 0x36a   : > { %1657 = vst.msk [vmem:[#allocation4 + $0x110] sm:$0xf] %vm590_vm1, %v1565_v36  ;;  %8684 = vmatmul.msk.bf16.gmra.mxu1 %vm2496_vm2, %v9370_v37  ;;  %v3533_v36 = vsel %vm2496_vm2, %v9441_v17, 0 }
 0x36b   : > { %3549 = vmatpush.bf16.xpose.msra.mxu3 %v3539_v39 }
 0x36d   : > { %1721 = vrot.lane.b32.xlu1 %v10659_v27, %s10268_s25  ;;  %1723 = vrot.lane.b32.xlu2 %v10683_v42, %s10268_s25 }
 0x36e   : > { %1719 = vrot.lane.b32.xlu0 %v10608_v55, %s10268_s25 }
 0x36f   : > { %v1573_v48 = vpop.permute.xlu1 %1572  ;;  %v1593_v50 = vpop.permute.xlu2 %1592 }
 0x370   : > { %1661 = vst.msk [vmem:[#allocation4 + $0x120] sm:$0xf] %vm590_vm1, %v1573_v48  ;;  %v1571_v58 = vpop.permute.xlu0 %1570  ;;  %v11464_v48 = vpop.f32.mrf.mxu3 }
 0x371   : > { %1671 = vst.msk [vmem:[#allocation4 + $0x148] sm:$0xf] %vm590_vm1, %v1593_v50 }
 0x372   : > { %1660 = vst.msk [vmem:[#allocation4 + $0x11c] sm:$0xf] %vm590_vm1, %v1571_v58  ;;  %8650 = vmatmul.msk.bf16.gmra.mxu3 %vm2496_vm2, %v9368_v59  ;;  %v11470_v58 = vpop.f32.mrf.mxu2 }
 0x373   : > { %3550 = vmatpush.bf16.xpose.msra.mxu3 %v3536_v0 }
 0x375   : > { %1727 = vrot.lane.b32.xlu1 %v10415_v43, %s10268_s25  ;;  %1729 = vrot.lane.b32.xlu2 %v10462_v62, %s10268_s25 }
 0x376   : > { %1725 = vrot.lane.b32.xlu0 %v10389_v31, %s10268_s25 }
 0x377   : > { %v1579_v6 = vpop.permute.xlu1 %1578  ;;  %v1599_v8 = vpop.permute.xlu2 %1598 }
 0x378   : > { %1664 = vst.msk [vmem:[#allocation4 + $0x12c] sm:$0xf] %vm590_vm1, %v1579_v6  ;;  %v1577_v20 = vpop.permute.xlu0 %1576  ;;  %8720 = vmatmul.msk.bf16.gmra.mxu2 %vm2496_vm2, %v9374_v13  ;;  %v9375_v6 = vld [vmem:[#allocation2 + $0x150] sm:$0xff]  ;;  %v9372_v13 = vld [vmem:[#allocation2 + $0x138] sm:$0xff]  ;;  %v11481_v17 = vpop.f32.mrf.mxu3 }
 0x379   : > { %1674 = vst.msk [vmem:[#allocation4 + $0x154] sm:$0xf] %vm590_vm1, %v1599_v8 }
 0x37a   : > { %1663 = vst.msk [vmem:[#allocation4 + $0x128] sm:$0xf] %vm590_vm1, %v1577_v20  ;;  %8685 = vmatmul.msk.bf16.gmra.mxu1 %vm2496_vm2, %v9371_v23  ;;  %v11489_v20 = vpop.f32.mrf.mxu2 }
 0x37b   : > { %3551 = vmatpush.bf16.xpose.msra.mxu3 %v3533_v36 }
 0x37d   : > { %1733 = vrot.lane.b32.xlu1 %v10401_v34, %s10268_s25  ;;  %1735 = vrot.lane.b32.xlu2 %v10417_v44, %s10268_s25 }
 0x37e   : > { %1731 = vrot.lane.b32.xlu0 %v10485_v2, %s10268_s25 }
 0x37f   : > { %v1585_v37 = vpop.permute.xlu1 %1584  ;;  %v1605_v39 = vpop.permute.xlu2 %1604 }
 0x380   : > { %1667 = vst.msk [vmem:[#allocation4 + $0x138] sm:$0xf] %vm590_vm1, %v1585_v37  ;;  %v1583_v50 = vpop.permute.xlu0 %1582 }
 0x381   : > { %1677 = vst.msk [vmem:[#allocation4 + $0x160] sm:$0xf] %vm590_vm1, %v1605_v39  ;;  %v9378_v39 = vld [vmem:[#allocation2 + $0x168] sm:$0xff] }
 0x382   : > { %1666 = vst.msk [vmem:[#allocation4 + $0x134] sm:$0xf] %vm590_vm1, %v1583_v50  ;;  %8755 = vmatmul.msk.bf16.vlgmr.msra.gmra.mxu3 %vm2496_vm2, %v9377_v16  ;;  %v11497_v50 = vpop.f32.mrf.mxu3 }
 0x385   : > { %1739 = vrot.lane.b32.xlu1 %v10464_v63, %s10268_s25  ;;  %1741 = vrot.lane.b32.xlu2 %v10544_v18, %s10268_s25 }
 0x386   : > { %1737 = vrot.lane.b32.xlu0 %v10443_v53, %s10268_s25 }
 0x387   : > { %v1591_v59 = vpop.permute.xlu1 %1590  ;;  %v1611_v0 = vpop.permute.xlu2 %1610 }
 0x388   : > { %1670 = vst.msk [vmem:[#allocation4 + $0x144] sm:$0xf] %vm590_vm1, %v1591_v59  ;;  %v1589_v8 = vpop.permute.xlu0 %1588  ;;  %8721 = vmatmul.msk.bf16.gmra.mxu2 %vm2496_vm2, %v9375_v6 }
 0x389   : > { %1680 = vst.msk [vmem:[#allocation4 + $0x16c] sm:$0xf] %vm590_vm1, %v1611_v0  ;;  %v9376_v0 = vld [vmem:[#allocation2 + $0x158] sm:$0xff] }
 0x38a   : > { %1669 = vst.msk [vmem:[#allocation4 + $0x140] sm:$0xf] %vm590_vm1, %v1589_v8  ;;  %8686 = vmatmul.msk.bf16.gmra.mxu1 %vm2496_vm2, %v9372_v13  ;;  %v11506_v8 = vpop.f32.mrf.mxu2  ;;  %v11515_v13 = vpop.f32.mrf.mxu3 }
 0x38d   : > { %1745 = vrot.lane.b32.xlu1 %v10617_v60, %s10268_s25  ;;  %1747 = vrot.lane.b32.xlu2 %v10627_v3, %s10268_s25 }
 0x38e   : > { %1743 = vrot.lane.b32.xlu0 %v10563_v25, %s10268_s25 }
 0x38f   : > { %v1597_v23 = vpop.permute.xlu1 %1596  ;;  %v1617_v36 = vpop.permute.xlu2 %1616 }
 0x390   : > { %1673 = vst.msk [vmem:[#allocation4 + $0x150] sm:$0xf] %vm590_vm1, %v1597_v23  ;;  %v1595_v37 = vpop.permute.xlu0 %1594 }
 0x391   : > { %1683 = vst.msk [vmem:[#allocation4 + $0x178] sm:$0xf] %vm590_vm1, %v1617_v36 }
 0x392   : > { %1672 = vst.msk [vmem:[#allocation4 + $0x14c] sm:$0xf] %vm590_vm1, %v1595_v37  ;;  %8756 = vmatmul.msk.bf16.gmra.mxu3 %vm2496_vm2, %v9378_v39  ;;  %v9379_v39 = vld [vmem:[#allocation2 + $0x170] sm:$0xff] }
 0x395   : > { %1816 = vrot.lane.b32.xlu1 %v10391_v32, %s10269_s26  ;;  %1818 = vrot.lane.b32.xlu2 %v10419_v45, %s10269_s26 }
 0x396   : > { %1814 = vrot.lane.b32.xlu0 %v10371_v21, %s10269_s26 }
 0x397   : > { %v1603_v16 = vpop.permute.xlu1 %1602  ;;  %v1688_v59 = vpop.permute.xlu2 %1687 }
 0x398   : > { %1676 = vst.msk [vmem:[#allocation4 + $0x15c] sm:$0xf] %vm590_vm1, %v1603_v16  ;;  %v1601_v6 = vpop.permute.xlu0 %1600  ;;  %8722 = vmatmul.msk.bf16.gmra.mxu2 %vm2496_vm2, %v9376_v0 }
 0x399   : > { %1783 = vst.msk [vmem:[#allocation2 + $0x184] sm:$0xf] %vm590_vm1, %v1688_v59 }
 0x39a   : > { %1675 = vst.msk [vmem:[#allocation4 + $0x158] sm:$0xf] %vm590_vm1, %v1601_v6  ;;  %v11530_v6 = vpop.f32.mrf.mxu3 }
 0x39d   : > { %1822 = vrot.lane.b32.xlu1 %v10502_v5, %s10269_s26  ;;  %1824 = vrot.lane.b32.xlu2 %v10514_v10, %s10269_s26 }
 0x39e   : > { %1820 = vrot.lane.b32.xlu0 %v10460_v61, %s10269_s26 }
 0x39f   : > { %v1609_v23 = vpop.permute.xlu1 %1608  ;;  %v1694_v36 = vpop.permute.xlu2 %1693 }
 0x3a0   : > { %1679 = vst.msk [vmem:[#allocation4 + $0x168] sm:$0xf] %vm590_vm1, %v1609_v23  ;;  %v1607_v37 = vpop.permute.xlu0 %1606 }
 0x3a1   : > { %1786 = vst.msk [vmem:[#allocation2 + $0x190] sm:$0xf] %vm590_vm1, %v1694_v36 }
 0x3a2   : > { %1678 = vst.msk [vmem:[#allocation4 + $0x164] sm:$0xf] %vm590_vm1, %v1607_v37  ;;  %8757 = vmatmul.msk.bf16.gmra.mxu3 %vm2496_vm2, %v9379_v39  ;;  %v9380_v39 = vld [vmem:[#allocation2 + $0x178] sm:$0xff] }
 0x3a5   : > { %1828 = vrot.lane.b32.xlu1 %v10589_v40, %s10269_s26  ;;  %1830 = vrot.lane.b32.xlu2 %v10650_v19, %s10269_s26 }
 0x3a6   : > { %1826 = vrot.lane.b32.xlu0 %v10575_v29, %s10269_s26 }
 0x3a7   : > { %v1615_v16 = vpop.permute.xlu1 %1614  ;;  %v1700_v59 = vpop.permute.xlu2 %1699 }
 0x3a8   : > { %1682 = vst.msk [vmem:[#allocation4 + $0x174] sm:$0xf] %vm590_vm1, %v1615_v16  ;;  %v1613_v0 = vpop.permute.xlu0 %1612  ;;  %v11543_v16 = vpop.f32.mrf.mxu3 }
 0x3a9   : > { %1789 = vst.msk [vmem:[#allocation2 + $0x19c] sm:$0xf] %vm590_vm1, %v1700_v59 }
 0x3aa   : > { %1681 = vst.msk [vmem:[#allocation4 + $0x170] sm:$0xf] %vm590_vm1, %v1613_v0 }
 0x3ad   : > { %1834 = vrot.lane.b32.xlu1 %v10373_v22, %s10269_s26  ;;  %1836 = vrot.lane.b32.xlu2 %v10393_v33, %s10269_s26 }
 0x3ae   : > { %1832 = vrot.lane.b32.xlu0 %v10669_v35, %s10269_s26 }
 0x3af   : > { %v1686_v23 = vpop.permute.xlu1 %1685  ;;  %v1706_v36 = vpop.permute.xlu2 %1705 }
 0x3b0   : > { %1782 = vst.msk [vmem:[#allocation2 + $0x180] sm:$0xf] %vm590_vm1, %v1686_v23  ;;  %v1619_v37 = vpop.permute.xlu0 %1618 }
 0x3b1   : > { %1792 = vst.msk [vmem:[#allocation2 + $0x1a8] sm:$0xf] %vm590_vm1, %v1706_v36 }
 0x3b2   : > { %1684 = vst.msk [vmem:[#allocation4 + $0x17c] sm:$0xf] %vm590_vm1, %v1619_v37  ;;  %8758 = vmatmul.msk.bf16.gmra.mxu3 %vm2496_vm2, %v9380_v39 }
 0x3b5   : > { %1840 = vrot.lane.b32.xlu1 %v10445_v54, %s10269_s26  ;;  %1842 = vrot.lane.b32.xlu2 %v10516_v11, %s10269_s26 }
 0x3b6   : > { %1838 = vrot.lane.b32.xlu0 %v10421_v46, %s10269_s26 }
 0x3b7   : > { %v1692_v59 = vpop.permute.xlu1 %1691  ;;  %v1712_v0 = vpop.permute.xlu2 %1711 }
 0x3b8   : > { %1785 = vst.msk [vmem:[#allocation2 + $0x18c] sm:$0xf] %vm590_vm1, %v1692_v59  ;;  %v1690_v23 = vpop.permute.xlu0 %1689 }
 0x3b9   : > { %1795 = vst.msk [vmem:[#allocation2 + $0x1b4] sm:$0xf] %vm590_vm1, %v1712_v0 }
 0x3ba   : > { %1784 = vst.msk [vmem:[#allocation2 + $0x188] sm:$0xf] %vm590_vm1, %v1690_v23 }
 0x3bd   : > { %1846 = vrot.lane.b32.xlu1 %v10598_v49, %s10269_s26  ;;  %1848 = vrot.lane.b32.xlu2 %v10608_v55, %s10269_s26 }
 0x3be   : > { %1844 = vrot.lane.b32.xlu0 %v10529_v14, %s10269_s26 }
 0x3bf   : > { %v1698_v36 = vpop.permute.xlu1 %1697  ;;  %v1718_v37 = vpop.permute.xlu2 %1717 }
 0x3c0   : > { %1788 = vst.msk [vmem:[#allocation2 + $0x198] sm:$0xf] %vm590_vm1, %v1698_v36  ;;  %v1696_v39 = vpop.permute.xlu0 %1695 }
 0x3c1   : > { %1798 = vst.msk [vmem:[#allocation2 + $0x1c0] sm:$0xf] %vm590_vm1, %v1718_v37 }
 0x3c2   : > { %1787 = vst.msk [vmem:[#allocation2 + $0x194] sm:$0xf] %vm590_vm1, %v1696_v39 }
 0x3c5   : > { %1852 = vrot.lane.b32.xlu1 %v10683_v42, %s10269_s26  ;;  %1854 = vrot.lane.b32.xlu2 %v10389_v31, %s10269_s26 }
 0x3c6   : > { %1850 = vrot.lane.b32.xlu0 %v10659_v27, %s10269_s26 }
 0x3c7   : > { %v1704_v59 = vpop.permute.xlu1 %1703  ;;  %v1724_v0 = vpop.permute.xlu2 %1723 }
 0x3c8   : > { %1791 = vst.msk [vmem:[#allocation2 + $0x1a4] sm:$0xf] %vm590_vm1, %v1704_v59  ;;  %v1702_v23 = vpop.permute.xlu0 %1701 }
 0x3c9   : > { %1801 = vst.msk [vmem:[#allocation2 + $0x1cc] sm:$0xf] %vm590_vm1, %v1724_v0 }
 0x3ca   : > { %1790 = vst.msk [vmem:[#allocation2 + $0x1a0] sm:$0xf] %vm590_vm1, %v1702_v23 }
 0x3cd   : > { %1858 = vrot.lane.b32.xlu1 %v10462_v62, %s10269_s26  ;;  %1860 = vrot.lane.b32.xlu2 %v10485_v2, %s10269_s26 }
 0x3ce   : > { %1856 = vrot.lane.b32.xlu0 %v10415_v43, %s10269_s26 }
 0x3cf   : > { %v1710_v36 = vpop.permute.xlu1 %1709  ;;  %v1730_v37 = vpop.permute.xlu2 %1729 }
 0x3d0   : > { %1794 = vst.msk [vmem:[#allocation2 + $0x1b0] sm:$0xf] %vm590_vm1, %v1710_v36  ;;  %v1708_v39 = vpop.permute.xlu0 %1707 }
 0x3d1   : > { %1804 = vst.msk [vmem:[#allocation2 + $0x1d8] sm:$0xf] %vm590_vm1, %v1730_v37 }
 0x3d2   : > { %1793 = vst.msk [vmem:[#allocation2 + $0x1ac] sm:$0xf] %vm590_vm1, %v1708_v39 }
 0x3d5   : > { %1864 = vrot.lane.b32.xlu1 %v10417_v44, %s10269_s26  ;;  %1866 = vrot.lane.b32.xlu2 %v10443_v53, %s10269_s26 }
 0x3d6   : > { %1862 = vrot.lane.b32.xlu0 %v10401_v34, %s10269_s26 }
 0x3d7   : > { %v1716_v59 = vpop.permute.xlu1 %1715  ;;  %v1736_v0 = vpop.permute.xlu2 %1735 }
 0x3d8   : > { %1797 = vst.msk [vmem:[#allocation2 + $0x1bc] sm:$0xf] %vm590_vm1, %v1716_v59  ;;  %v1714_v23 = vpop.permute.xlu0 %1713 }
 0x3d9   : > { %1807 = vst.msk [vmem:[#allocation2 + $0x1e4] sm:$0xf] %vm590_vm1, %v1736_v0 }
 0x3da   : > { %1796 = vst.msk [vmem:[#allocation2 + $0x1b8] sm:$0xf] %vm590_vm1, %v1714_v23 }
 0x3dd   : > { %1870 = vrot.lane.b32.xlu1 %v10544_v18, %s10269_s26  ;;  %1872 = vrot.lane.b32.xlu2 %v10563_v25, %s10269_s26 }
 0x3de   : > { %1868 = vrot.lane.b32.xlu0 %v10464_v63, %s10269_s26 }
 0x3df   : > { %v1722_v36 = vpop.permute.xlu1 %1721  ;;  %v1742_v37 = vpop.permute.xlu2 %1741 }
 0x3e0   : > { %1800 = vst.msk [vmem:[#allocation2 + $0x1c8] sm:$0xf] %vm590_vm1, %v1722_v36  ;;  %v1720_v39 = vpop.permute.xlu0 %1719 }
 0x3e1   : > { %1810 = vst.msk [vmem:[#allocation2 + $0x1f0] sm:$0xf] %vm590_vm1, %v1742_v37 }
 0x3e2   : > { %1799 = vst.msk [vmem:[#allocation2 + $0x1c4] sm:$0xf] %vm590_vm1, %v1720_v39 }
 0x3e5   : > { %1876 = vrot.lane.b32.xlu1 %v10627_v3, %s10269_s26  ;;  %1943 = vrot.lane.b32.xlu2 %v10371_v21, %s10270_s27 }
 0x3e6   : > { %1874 = vrot.lane.b32.xlu0 %v10617_v60, %s10269_s26 }
 0x3e7   : > { %v1728_v59 = vpop.permute.xlu1 %1727  ;;  %v1748_v0 = vpop.permute.xlu2 %1747 }
 0x3e8   : > { %1803 = vst.msk [vmem:[#allocation2 + $0x1d4] sm:$0xf] %vm590_vm1, %v1728_v59  ;;  %v1726_v23 = vpop.permute.xlu0 %1725 }
 0x3e9   : > { %1813 = vst.msk [vmem:[#allocation2 + $0x1fc] sm:$0xf] %vm590_vm1, %v1748_v0 }
 0x3ea   : > { %1802 = vst.msk [vmem:[#allocation2 + $0x1d0] sm:$0xf] %vm590_vm1, %v1726_v23 }
 0x3ed   : > { %1947 = vrot.lane.b32.xlu1 %v10419_v45, %s10270_s27  ;;  %1949 = vrot.lane.b32.xlu2 %v10460_v61, %s10270_s27 }
 0x3ee   : > { %1945 = vrot.lane.b32.xlu0 %v10391_v32, %s10270_s27 }
 0x3ef   : > { %v1734_v21 = vpop.permute.xlu1 %1733  ;;  %v1819_v36 = vpop.permute.xlu2 %1818 }
 0x3f0   : > { %1806 = vst.msk [vmem:[#allocation2 + $0x1e0] sm:$0xf] %vm590_vm1, %v1734_v21  ;;  %v1732_v37 = vpop.permute.xlu0 %1731 }
 0x3f1   : > { %1913 = vst.msk [vmem:[#allocation3 + $0x188] sm:$0xf] %vm590_vm1, %v1819_v36 }
 0x3f2   : > { %1805 = vst.msk [vmem:[#allocation2 + $0x1dc] sm:$0xf] %vm590_vm1, %v1732_v37 }
 0x3f5   : > { %1953 = vrot.lane.b32.xlu1 %v10514_v10, %s10270_s27  ;;  %1955 = vrot.lane.b32.xlu2 %v10575_v29, %s10270_s27 }
 0x3f6   : > { %1951 = vrot.lane.b32.xlu0 %v10502_v5, %s10270_s27 }
 0x3f7   : > { %v1740_v45 = vpop.permute.xlu1 %1739  ;;  %v1825_v32 = vpop.permute.xlu2 %1824 }
 0x3f8   : > { %1809 = vst.msk [vmem:[#allocation2 + $0x1ec] sm:$0xf] %vm590_vm1, %v1740_v45  ;;  %v1738_v61 = vpop.permute.xlu0 %1737 }
 0x3f9   : > { %1916 = vst.msk [vmem:[#allocation3 + $0x194] sm:$0xf] %vm590_vm1, %v1825_v32 }
 0x3fa   : > { %1808 = vst.msk [vmem:[#allocation2 + $0x1e8] sm:$0xf] %vm590_vm1, %v1738_v61  ;;  %v11704_v61 = vld [vmem:[#allocation4 + $0x18] sm:$0xff] }
 0x3fd   : > { %1959 = vrot.lane.b32.xlu1 %v10650_v19, %s10270_s27  ;;  %1961 = vrot.lane.b32.xlu2 %v10669_v35, %s10270_s27 }
 0x3fe   : > { %1957 = vrot.lane.b32.xlu0 %v10589_v40, %s10270_s27 }
 0x3ff   : > { %v1746_v10 = vpop.permute.xlu1 %1745  ;;  %v1831_v5 = vpop.permute.xlu2 %1830 }
 0x400   : > { %1812 = vst.msk [vmem:[#allocation2 + $0x1f8] sm:$0xf] %vm590_vm1, %v1746_v10  ;;  %v1744_v29 = vpop.permute.xlu0 %1743  ;;  %v11709_v10 = vld [vmem:[#allocation4 + $0x10] sm:$0xff] }
 0x401   : > { %1919 = vst.msk [vmem:[#allocation3 + $0x1a0] sm:$0xf] %vm590_vm1, %v1831_v5 }
 0x402   : > { %1811 = vst.msk [vmem:[#allocation2 + $0x1f4] sm:$0xf] %vm590_vm1, %v1744_v29 }
 0x405   : > { %1965 = vrot.lane.b32.xlu1 %v10393_v33, %s10270_s27  ;;  %1967 = vrot.lane.b32.xlu2 %v10421_v46, %s10270_s27 }
 0x406   : > { %1963 = vrot.lane.b32.xlu0 %v10373_v22, %s10270_s27 }
 0x407   : > { %v1817_v19 = vpop.permute.xlu1 %1816  ;;  %v1837_v40 = vpop.permute.xlu2 %1836 }
 0x408   : > { %1912 = vst.msk [vmem:[#allocation3 + $0x184] sm:$0xf] %vm590_vm1, %v1817_v19  ;;  %v1815_v35 = vpop.permute.xlu0 %1814  ;;  %v9381_v19 = vld [vmem:[#allocation2 + $0x180] sm:$0xff] }
 0x409   : > { %1922 = vst.msk [vmem:[#allocation3 + $0x1ac] sm:$0xf] %vm590_vm1, %v1837_v40 }
 0x40a   : > { %1911 = vst.msk [vmem:[#allocation3 + $0x180] sm:$0xf] %vm590_vm1, %v1815_v35 }
 0x40d   : > { %1971 = vrot.lane.b32.xlu1 %v10516_v11, %s10270_s27  ;;  %1973 = vrot.lane.b32.xlu2 %v10529_v14, %s10270_s27 }
 0x40e   : > { %1969 = vrot.lane.b32.xlu0 %v10445_v54, %s10270_s27 }
 0x40f   : > { %v1823_v33 = vpop.permute.xlu1 %1822  ;;  %v1843_v22 = vpop.permute.xlu2 %1842 }
 0x410   : > { %1915 = vst.msk [vmem:[#allocation3 + $0x190] sm:$0xf] %vm590_vm1, %v1823_v33  ;;  %v1821_v46 = vpop.permute.xlu0 %1820 }
 0x411   : > { %1925 = vst.msk [vmem:[#allocation3 + $0x1b8] sm:$0xf] %vm590_vm1, %v1843_v22  ;;  %v11720_v22 = vld [vmem:[#allocation4] sm:$0xff] }
 0x412   : > { %1914 = vst.msk [vmem:[#allocation3 + $0x18c] sm:$0xf] %vm590_vm1, %v1821_v46 }
 0x415   : > { %1977 = vrot.lane.b32.xlu1 %v10608_v55, %s10270_s27  ;;  %1979 = vrot.lane.b32.xlu2 %v10659_v27, %s10270_s27 }
 0x416   : > { %1975 = vrot.lane.b32.xlu0 %v10598_v49, %s10270_s27 }
 0x417   : > { %v1829_v11 = vpop.permute.xlu1 %1828  ;;  %v1849_v54 = vpop.permute.xlu2 %1848 }
 0x418   : > { %1918 = vst.msk [vmem:[#allocation3 + $0x19c] sm:$0xf] %vm590_vm1, %v1829_v11  ;;  %v1827_v14 = vpop.permute.xlu0 %1826 }
 0x419   : > { %1928 = vst.msk [vmem:[#allocation3 + $0x1c4] sm:$0xf] %vm590_vm1, %v1849_v54 }
 0x41a   : > { %1917 = vst.msk [vmem:[#allocation3 + $0x198] sm:$0xf] %vm590_vm1, %v1827_v14  ;;  %v9480_v14 = vld [vmem:[#allocation4 + $0x98] sm:$0xff] }
 0x41d   : > { %1983 = vrot.lane.b32.xlu1 %v10389_v31, %s10270_s27  ;;  %1985 = vrot.lane.b32.xlu2 %v10415_v43, %s10270_s27 }
 0x41e   : > { %1981 = vrot.lane.b32.xlu0 %v10683_v42, %s10270_s27  ;;  %v9447_v42 = vld [vmem:[#allocation3 + $0x190] sm:$0xff] }
 0x41f   : > { %v1835_v55 = vpop.permute.xlu1 %1834  ;;  %v1855_v49 = vpop.permute.xlu2 %1854  ;;  %v3632_v23 = vsel %vm2496_vm2, %v9447_v42, 0 }
 0x420   : > { %1921 = vst.msk [vmem:[#allocation3 + $0x1a8] sm:$0xf] %vm590_vm1, %v1835_v55  ;;  %v1833_v27 = vpop.permute.xlu0 %1832 }
 0x421   : > { %1931 = vst.msk [vmem:[#allocation3 + $0x1d0] sm:$0xf] %vm590_vm1, %v1855_v49  ;;  %v9448_v39 = vld [vmem:[#allocation3 + $0x198] sm:$0xff]  ;;  %v11726_v49 = vpop.f32.mrf.mxu1 }
 0x422   : > { %1920 = vst.msk [vmem:[#allocation3 + $0x1a4] sm:$0xf] %vm590_vm1, %v1833_v27  ;;  %v3635_v59 = vsel %vm2496_vm2, %v9448_v39, 0  ;;  %v9479_v39 = vld [vmem:[#allocation4 + $0x90] sm:$0xff] }
 0x423   : > { %3641 = vmatpush.bf16.xpose.msrb.mxu0 %v3635_v59 }
 0x425   : > { %1989 = vrot.lane.b32.xlu1 %v10485_v2, %s10270_s27  ;;  %1991 = vrot.lane.b32.xlu2 %v10401_v34, %s10270_s27  ;;  %v9446_v2 = vld [vmem:[#allocation3 + $0x188] sm:$0xff] }
 0x426   : > { %1987 = vrot.lane.b32.xlu0 %v10462_v62, %s10270_s27  ;;  %v3629_v36 = vsel %vm2496_vm2, %v9446_v2, 0  ;;  %v9382_v2 = vld [vmem:[#allocation2 + $0x188] sm:$0xff] }
 0x427   : > { %v1841_v31 = vpop.permute.xlu1 %1840  ;;  %v1861_v43 = vpop.permute.xlu2 %1860  ;;  %v9450_v46 = vld [vmem:[#allocation3 + $0x1a8] sm:$0xff] }
 0x428   : > { %1924 = vst.msk [vmem:[#allocation3 + $0x1b4] sm:$0xf] %vm590_vm1, %v1841_v31  ;;  %v1839_v0 = vpop.permute.xlu0 %1838  ;;  %v3722_v27 = vsel %vm2496_vm2, %v9450_v46, 0 }
 0x429   : > { %1934 = vst.msk [vmem:[#allocation3 + $0x1dc] sm:$0xf] %vm590_vm1, %v1861_v43  ;;  %v9449_v42 = vld [vmem:[#allocation3 + $0x1a0] sm:$0xff] }
 0x42a   : > { %1923 = vst.msk [vmem:[#allocation3 + $0x1b0] sm:$0xf] %vm590_vm1, %v1839_v0 }
 0x42b   : > { %3642 = vmatpush.bf16.xpose.msrb.mxu0 %v3632_v23  ;;  %v9478_v23 = vld [vmem:[#allocation4 + $0x88] sm:$0xff] }
 0x42d   : > { %1995 = vrot.lane.b32.xlu1 %v10443_v53, %s10270_s27  ;;  %1997 = vrot.lane.b32.xlu2 %v10464_v63, %s10270_s27  ;;  %v9445_v63 = vld [vmem:[#allocation3 + $0x180] sm:$0xff] }
 0x42e   : > { %1993 = vrot.lane.b32.xlu0 %v10417_v44, %s10270_s27  ;;  %v3626_v32 = vsel %vm2496_vm2, %v9445_v63, 0  ;;  %v11746_v63 = vld [vmem:[#allocation4 + $0x38] sm:$0xff] }
 0x42f   : > { %v1847_v34 = vpop.permute.xlu1 %1846  ;;  %v1867_v62 = vpop.permute.xlu2 %1866 }
 0x430   : > { %1927 = vst.msk [vmem:[#allocation3 + $0x1c0] sm:$0xf] %vm590_vm1, %v1847_v34  ;;  %v1845_v21 = vpop.permute.xlu0 %1844  ;;  %v10251_v34 = vld [vmem:[%s14842_s5] sm:$0xff]  }
 0x431   : > { %1937 = vst.msk [vmem:[#allocation3 + $0x1e8] sm:$0xf] %vm590_vm1, %v1867_v62  ;;  %v9451_v5 = vld [vmem:[#allocation3 + $0x1b0] sm:$0xff]  ;;  %v11734_v62 = vunpack.c.h.bf16 %v10251_v34 }
 0x432   : > { %1926 = vst.msk [vmem:[#allocation3 + $0x1bc] sm:$0xf] %vm590_vm1, %v1845_v21  ;;  %v3725_v40 = vsel %vm2496_vm2, %v9451_v5, 0 }
 0x433   : > { %3643 = vmatpush.bf16.xpose.msrb.mxu0 %v3629_v36  ;;  %v11738_v36 = vpop.f32.mrf.mxu2 }
 0x435   : > { %2001 = vrot.lane.b32.xlu1 %v10563_v25, %s10270_s27  ;;  %2003 = vrot.lane.b32.xlu2 %v10617_v60, %s10270_s27 }
 0x436   : > { %1999 = vrot.lane.b32.xlu0 %v10544_v18, %s10270_s27 }
 0x437   : > { %v1853_v44 = vpop.permute.xlu1 %1852  ;;  %v1873_v53 = vpop.permute.xlu2 %1872 }
 0x438   : > { %1930 = vst.msk [vmem:[#allocation3 + $0x1cc] sm:$0xf] %vm590_vm1, %v1853_v44  ;;  %v1851_v37 = vpop.permute.xlu0 %1850  ;;  %v9608_v44 = vld [vmem:[%s14843_s6] sm:$0xff]  }
 0x439   : > { %1940 = vst.msk [vmem:[#allocation3 + $0x1f4] sm:$0xf] %vm590_vm1, %v1873_v53  ;;  %v9452_v45 = vld [vmem:[#allocation3 + $0x1b8] sm:$0xff]  ;;  %v3719_v53 = vsel %vm2496_vm2, %v9449_v42, 0  ;;  %v11757_v5 = vunpack.c.l.bf16 %v9608_v44 }
 0x43a   : > { %1929 = vst.msk [vmem:[#allocation3 + $0x1c8] sm:$0xf] %vm590_vm1, %v1851_v37  ;;  %v3728_v25 = vsel %vm2496_vm2, %v9452_v45, 0  ;;  %v11748_v37 = vpop.f32.mrf.mxu1  ;;  %v9477_v45 = vld [vmem:[#allocation4 + $0x80] sm:$0xff] }
 0x43b   : > { %3644 = vmatpush.bf16.xpose.msrb.mxu0 %v3626_v32  ;;  %3734 = vmatpush.bf16.xpose.msrb.mxu1 %v3728_v25  ;;  %v4010_v32 = vadd.f32 %v11734_v62, %v11061_v24  ;;  %v9671_v24 = vld [vmem:[%s14842_s5 + $0x8] sm:$0xff]  }
 0x43c   : > { %v11768_v46 = vunpack.c.h.bf16 %v9671_v24 }
 0x43e   : > { %2005 = vrot.lane.b32.xlu0 %v10627_v3, %s10270_s27  ;;  %v11717_v3 = vld [vmem:[#allocation4 + $0x8] sm:$0xff]  ;;  %v4012_v42 = vadd.f32 %v11768_v46, %v11089_v57 }
 0x43f   : > { %v1859_v18 = vpop.permute.xlu1 %1858  ;;  %v1944_v60 = vpop.permute.xlu2 %1943 }
 0x440   : > { %1933 = vst.msk [vmem:[#allocation3 + $0x1d8] sm:$0xf] %vm590_vm1, %v1859_v18  ;;  %v1857_v29 = vpop.permute.xlu0 %1856  ;;  %v11753_v18 = vunpack.c.h.bf16 %v9608_v44 }
 0x441   : > { %2040 = vst.msk [vmem:[#allocation4 + $0x180] sm:$0xf] %vm590_vm1, %v1944_v60  ;;  %v9454_v25 = vld [vmem:[#allocation3 + $0x1c8] sm:$0xff]  ;;  %v4009_v60 = vadd.f32 %v11150_v1, %v11048_v9  ;;  %v9385_v9 = vld [vmem:[#allocation2 + $0x1a0] sm:$0xff] }
 0x442   : > { %1932 = vst.msk [vmem:[#allocation3 + $0x1d4] sm:$0xf] %vm590_vm1, %v1857_v29  ;;  %8791 = vmatmul.msk.bf16.vlgmr.msrb.gmra.mxu0 %vm2496_vm2, %v9381_v19  ;;  %v9672_v29 = vld [vmem:[%s14842_s5 + $0x10] sm:$0xff]   ;;  %v11806_v44 = vpop.f32.mrf.mxu1 }
 0x443   : > { %5926 = vmatpush.bf16.msra.mxu0 %v11704_v61  ;;  %3735 = vmatpush.bf16.xpose.msrb.mxu1 %v3725_v40 }
 0x447   : > { %5927 = vmatpush.bf16.msra.mxu0 %v11709_v10  ;;  %v1865_v35 = vpop.permute.xlu1 %1864  ;;  %v1950_v33 = vpop.permute.xlu2 %1949  ;;  %v9456_v11 = vld [vmem:[#allocation3 + $0x1d8] sm:$0xff] }
 0x448   : > { %1936 = vst.msk [vmem:[#allocation3 + $0x1e4] sm:$0xf] %vm590_vm1, %v1865_v35  ;;  %v1863_v54 = vpop.permute.xlu0 %1862  ;;  %v3821_v55 = vsel %vm2496_vm2, %v9456_v11, 0  ;;  %v11762_v35 = vld [vmem:[#allocation4 + $0x30] sm:$0xff]  ;;  %v3815_v11 = vsel %vm2496_vm2, %v9454_v25, 0 }
 0x449   : > { %2043 = vst.msk [vmem:[#allocation4 + $0x18c] sm:$0xf] %vm590_vm1, %v1950_v33  ;;  %3827 = vmatpush.bf16.xpose.msrb.mxu2 %v3821_v55  ;;  %v9455_v59 = vld [vmem:[#allocation3 + $0x1d0] sm:$0xff]  ;;  %v11779_v55 = vunpack.c.l.bf16 %v9672_v29 }
 0x44a   : > { %1935 = vst.msk [vmem:[#allocation3 + $0x1e0] sm:$0xf] %vm590_vm1, %v1863_v54  ;;  %v3818_v21 = vsel %vm2496_vm2, %v9455_v59, 0  ;;  %v11774_v54 = vadd.f32 %v11753_v18, %v4010_v32  ;;  %v11788_v59 = vld [vmem:[#allocation4 + $0x28] sm:$0xff] }
 0x44b   : > { %5928 = vmatpush.bf16.msra.mxu0 %v11717_v3  ;;  %3736 = vmatpush.bf16.xpose.msrb.mxu1 %v3722_v27  ;;  %v11782_v27 = vunpack.c.l.bf16 %v9671_v24  ;;  %v11820_v24 = vunpack.c.h.bf16 %v9672_v29 }
 0x44c   : > { %15014 = vst [vmem:[#allocation6_spill] sm:$0xff] %v11774_v54 }
 0x44d   : > { %v4011_v57 = vadd.f32 %v11782_v27, %v11075_v41  ;;  %v9383_v41 = vld [vmem:[#allocation2 + $0x190] sm:$0xff] }
 0x44f   : > { %5929 = vmatpush.bf16.msra.mxu0 %v11720_v22  ;;  %v1871_v31 = vpop.permute.xlu1 %1870  ;;  %v1956_v43 = vpop.permute.xlu2 %1955 }
 0x450   : > { %1939 = vst.msk [vmem:[#allocation3 + $0x1f0] sm:$0xf] %vm590_vm1, %v1871_v31  ;;  %v1869_v0 = vpop.permute.xlu0 %1868  ;;  %v9686_v31 = vld [vmem:[%s14843_s6 + $0x8] sm:$0xff]  }
 0x451   : > { %2046 = vst.msk [vmem:[#allocation4 + $0x198] sm:$0xf] %vm590_vm1, %v1956_v43  ;;  %3828 = vmatpush.bf16.xpose.msrb.mxu2 %v3818_v21  ;;  %v11793_v43 = vpop.f32.mrf.mxu2  ;;  %v11800_v34 = vunpack.c.h.bf16 %v9686_v31 }
 0x452   : > { %1938 = vst.msk [vmem:[#allocation3 + $0x1ec] sm:$0xf] %vm590_vm1, %v1869_v0  ;;  %8792 = vmatmul.msk.bf16.gmra.mxu0 %vm2496_vm2, %v9382_v2  ;;  %v4333_v0 = vsel %vm4329_vm3, %v11774_v54, -inf  ;;  %v4013_v2 = vadd.f32 %v11779_v55, %v11102_v7  ;;  %v9673_v7 = vld [vmem:[%s14842_s5 + $0x18] sm:$0xff]  }
 0x453   : > { %6266 = vmatpush.bf16.msrb.mxu0 %v9480_v14  ;;  %3737 = vmatpush.bf16.xpose.msrb.mxu1 %v3719_v53  ;;  %v11777_v14 = vadd.f32 %v11757_v5, %v4009_v60  ;;  %v11814_v60 = vld [vmem:[#allocation4 + $0x20] sm:$0xff] }
 0x455   : > { %15015 = vst [vmem:[#allocation7_spill] sm:$0xff] %v11777_v14  ;;  %v4330_v53 = vsel %vm4329_vm3, %v11777_v14, -inf  ;;  %v9388_v14 = vld [vmem:[#allocation2 + $0x1b8] sm:$0xff] }
 0x457   : > { %6267 = vmatpush.bf16.msrb.mxu0 %v9479_v39  ;;  %v1877_v19 = vpop.permute.xlu1 %1876  ;;  %v1962_v40 = vpop.permute.xlu2 %1961  ;;  %v9687_v39 = vld [vmem:[%s14843_s6 + $0x10] sm:$0xff]  }
 0x458   : > { %1942 = vst.msk [vmem:[#allocation3 + $0x1fc] sm:$0xf] %vm590_vm1, %v1877_v19  ;;  %v1875_v33 = vpop.permute.xlu0 %1874  ;;  %v11804_v21 = vunpack.c.l.bf16 %v9687_v39 }
 0x459   : > { %2049 = vst.msk [vmem:[#allocation4 + $0x1a4] sm:$0xf] %vm590_vm1, %v1962_v40  ;;  %3829 = vmatpush.bf16.xpose.msrb.mxu2 %v3815_v11  ;;  %v9484_v40 = vld [vmem:[#allocation4 + $0xb8] sm:$0xff]  ;;  %v11826_v11 = vadd.f32 %v11800_v34, %v4012_v42 }
 0x45a   : > { %1941 = vst.msk [vmem:[#allocation3 + $0x1f8] sm:$0xf] %vm590_vm1, %v1875_v33  ;;  %8827 = vmatmul.msk.bf16.vlgmr.msrb.gmra.mxu1 %vm2496_vm2, %v9385_v9  ;;  %v9688_v42 = vld [vmem:[%s14843_s6 + $0x18] sm:$0xff]  }
 0x45b   : > { %6268 = vmatpush.bf16.msrb.mxu0 %v9478_v23  ;;  %6011 = vmatpush.bf16.msra.mxu1 %v11746_v63  ;;  %v9453_v23 = vld [vmem:[#allocation3 + $0x1c0] sm:$0xff]  ;;  %15017 = vst [vmem:[#allocation9_spill] sm:$0xff] %v11826_v11 }
 0x45c   : > { %v3812_v33 = vsel %vm2496_vm2, %v9453_v23, 0 }
 0x45e   : > { %4334 = vmax.xlane.f32.xlu2 %v4333_v0  ;;  %v11831_v0 = vunpack.c.h.bf16 %v9673_v7 }
 0x45f   : > { %6269 = vmatpush.bf16.msrb.mxu0 %v9477_v45  ;;  %6012 = vmatpush.bf16.msra.mxu1 %v11762_v35  ;;  %v11812_v45 = vunpack.c.l.bf16 %v9686_v31  ;;  %v1948_v32 = vpop.permute.xlu1 %1947  ;;  %v1968_v25 = vpop.permute.xlu2 %1967  ;;  %v11829_v31 = vadd.f32 %v11804_v21, %v4013_v2  ;;  %v9483_v2 = vld [vmem:[#allocation4 + $0xb0] sm:$0xff] }
 0x460   : > { %4331 = vmax.xlane.f32.xlu1 %v4330_v53  ;;  %2042 = vst.msk [vmem:[#allocation4 + $0x188] sm:$0xf] %vm590_vm1, %v1948_v32  ;;  %v1946_v19 = vpop.permute.xlu0 %1945  ;;  %v11837_v53 = vunpack.c.l.bf16 %v9673_v7  ;;  %v4014_v32 = vadd.f32 %v11820_v24, %v11116_v26  ;;  %v4016_v7 = vadd.f32 %v11831_v0, %v11141_v51  ;;  %v9389_v51 = vld [vmem:[#allocation2 + $0x1c0] sm:$0xff] }
 0x461   : > { %15016 = vst [vmem:[#allocation8_spill] sm:$0xff] %v11812_v45  ;;  %v9460_v9 = vld [vmem:[#allocation3 + $0x1f8] sm:$0xff]  ;;  %3830 = vmatpush.bf16.xpose.msrb.mxu2 %v3812_v33  ;;  %v11835_v29 = vadd.f32 %v11812_v45, %v4011_v57  ;;  %v4339_v57 = vsel %vm4329_vm3, %v11826_v11, -inf }
 0x462   : > { %2052 = vst.msk [vmem:[#allocation4 + $0x1b0] sm:$0xf] %vm590_vm1, %v1968_v25  ;;  %8793 = vmatmul.msk.bf16.gmra.mxu0 %vm2496_vm2, %v9383_v41  ;;  %v3914_v23 = vsel %vm2496_vm2, %v9460_v9, 0  ;;  %v11849_v25 = vunpack.c.h.bf16 %v9687_v39  ;;  %v4015_v26 = vadd.f32 %v11837_v53, %v11128_v38  ;;  %v11861_v41 = vunpack.c.l.bf16 %v9688_v42  ;;  %v9386_v38 = vld [vmem:[#allocation2 + $0x1a8] sm:$0xff] }
 0x463   : > { %6013 = vmatpush.bf16.msra.mxu1 %v11788_v59  ;;  %15018 = vst [vmem:[#allocation10_spill] sm:$0xff] %v11829_v31  ;;  %3920 = vmatpush.bf16.xpose.msrb.mxu3 %v3914_v23  ;;  %v4336_v9 = vsel %vm4329_vm3, %v11835_v29, -inf  ;;  %v9459_v23 = vld [vmem:[#allocation3 + $0x1f0] sm:$0xff] }
 0x464   : > { %2041 = vst.msk [vmem:[#allocation4 + $0x184] sm:$0xf] %vm590_vm1, %v1946_v19  ;;  %v11853_v19 = vpop.f32.mrf.mxu2 }
 0x465   : > { %15019 = vst [vmem:[#allocation11_spill] sm:$0xff] %v11835_v29 }
 0x466   : > { %4340 = vmax.xlane.f32.xlu2 %v4339_v57 }
 0x467   : > { %6014 = vmatpush.bf16.msra.mxu1 %v11814_v60  ;;  %v1954_v33 = vpop.permute.xlu1 %1953  ;;  %v1974_v39 = vpop.permute.xlu2 %1973 }
 0x468   : > { %2045 = vst.msk [vmem:[#allocation4 + $0x194] sm:$0xf] %vm590_vm1, %v1954_v33  ;;  %v1952_v57 = vpop.permute.xlu0 %1951  ;;  %4337 = vmax.xlane.f32.xlu0 %v4336_v9  ;;  %8863 = vmatmul.msk.bf16.vlgmr.msrb.gmra.mxu2 %vm2496_vm2, %v9389_v51  ;;  %v9690_v33 = vld [vmem:[%s14843_s6 + $0x28] sm:$0xff]   ;;  %v11890_v9 = vpop.f32.mrf.mxu3 }
 0x469   : > { %9707 = vmatpush.bf16.msra.mxu2 %v11704_v61  ;;  %v4342_v61 = vsel %vm4329_vm3, %v11829_v31, -inf  ;;  %v9482_v31 = vld [vmem:[#allocation4 + $0xa8] sm:$0xff]  ;;  %2055 = vst.msk [vmem:[#allocation4 + $0x1bc] sm:$0xf] %vm590_vm1, %v1974_v39  ;;  %v11885_v39 = vadd.f32 %v11861_v41, %v4015_v26  ;;  %v4019_v26 = vadd.f32 %v11782_v27, %v11417_v15 }
 0x46a   : > { %4343 = vmax.xlane.f32.xlu1 %v4342_v61  ;;  %2044 = vst.msk [vmem:[#allocation4 + $0x190] sm:$0xf] %vm590_vm1, %v1952_v57  ;;  %8828 = vmatmul.msk.bf16.gmra.mxu1 %vm2496_vm2, %v9386_v38  ;;  %v11900_v38 = vunpack.c.l.bf16 %v9690_v33 }
 0x46b   : > { %6351 = vmatpush.bf16.msrb.mxu1 %v9484_v40  ;;  %v11857_v40 = vunpack.c.h.bf16 %v9688_v42  ;;  %v11872_v42 = vadd.f32 %v11849_v25, %v4014_v32  ;;  %15023 = vst [vmem:[#allocation15_spill] sm:$0xff] %v11885_v39  ;;  %v3911_v32 = vsel %vm2496_vm2, %v9459_v23, 0  ;;  %v4018_v23 = vadd.f32 %v11734_v62, %v11399_v52 }
 0x46c   : > { %3921 = vmatpush.bf16.xpose.msrb.mxu3 %v3911_v32  ;;  %15025 = vst [vmem:[#allocation17_spill] sm:$0xff] %v11900_v38  ;;  %v4348_v11 = vsel %vm4329_vm3, %v11885_v39, -inf  ;;  %v11911_v29 = vpop.f32.mrf.mxu2 }
 0x46d   : > { %15020 = vst [vmem:[#allocation12_spill] sm:$0xff] %v11857_v40  ;;  %9708 = vmatpush.bf16.msra.mxu2 %v11709_v10  ;;  %v9689_v10 = vld [vmem:[%s14843_s6 + $0x20] sm:$0xff]   ;;  %v11879_v61 = vadd.f32 %v11857_v40, %v4016_v7  ;;  %v4017_v7 = vadd.f32 %v11150_v1, %v11383_v30  ;;  %v4345_v57 = vsel %vm4329_vm3, %v11872_v42, -inf }
 0x46e   : > { %15021 = vst [vmem:[#allocation13_spill] sm:$0xff] %v11872_v42  ;;  %v11894_v51 = vunpack.c.l.bf16 %v9689_v10  ;;  %4346 = vmax.xlane.f32.xlu2 %v4345_v57  ;;  %v9458_v42 = vld [vmem:[#allocation3 + $0x1e8] sm:$0xff]  ;;  %v11909_v15 = vunpack.c.h.bf16 %v9689_v10  ;;  %v9384_v57 = vld [vmem:[#allocation2 + $0x198] sm:$0xff] }
 0x46f   : > { %6352 = vmatpush.bf16.msrb.mxu1 %v9483_v2  ;;  %v11866_v2 = vpop.f32.mrf.mxu1  ;;  %15022 = vst [vmem:[#allocation14_spill] sm:$0xff] %v11879_v61  ;;  %v1960_v32 = vpop.permute.xlu1 %1959  ;;  %v3908_v10 = vsel %vm2496_vm2, %v9458_v42, 0  ;;  %v4022_v42 = vadd.f32 %v11820_v24, %v11470_v58  ;;  %v9390_v58 = vld [vmem:[#allocation2 + $0x1c8] sm:$0xff] }
 0x470   : > { %15024 = vst [vmem:[#allocation16_spill] sm:$0xff] %v11894_v51  ;;  %v1980_v30 = vpop.permute.xlu2 %1979  ;;  %4349 = vmax.xlane.f32.xlu0 %v4348_v11  ;;  %v11916_v52 = vadd.f32 %v11894_v51, %v4017_v7  ;;  %v11928_v11 = vadd.f32 %v11909_v15, %v4018_v23  ;;  %v4020_v7 = vadd.f32 %v11768_v46, %v11435_v56  ;;  %v11942_v23 = vpop.f32.mrf.mxu3 }
 0x471   : > { %9709 = vmatpush.bf16.msra.mxu2 %v11717_v3  ;;  %v4351_v3 = vsel %vm4329_vm3, %v11879_v61, -inf  ;;  %15026 = vst [vmem:[#allocation18_spill] sm:$0xff] %v11909_v15  ;;  %v9457_v61 = vld [vmem:[#allocation3 + $0x1e0] sm:$0xff] }
 0x472   : > { %4352 = vmax.xlane.f32.xlu1 %v4351_v3  ;;  %2048 = vst.msk [vmem:[#allocation4 + $0x1a0] sm:$0xf] %vm590_vm1, %v1960_v32  ;;  %v11920_v3 = vadd.f32 %v11900_v38, %v4019_v26  ;;  %8794 = vmatmul.msk.bf16.gmra.mxu0 %vm2496_vm2, %v9384_v57  ;;  %v4354_v26 = vsel %vm4329_vm3, %v11916_v52, -inf  ;;  %v11938_v32 = vunpack.c.h.bf16 %v9690_v33  ;;  %v4357_v33 = vsel %vm4329_vm3, %v11928_v11, -inf }
 0x473   : > { %6353 = vmatpush.bf16.msrb.mxu1 %v9482_v31  ;;  %v9481_v31 = vld [vmem:[#allocation4 + $0xa0] sm:$0xff]  ;;  %15027 = vst [vmem:[#allocation19_spill] sm:$0xff] %v11916_v52  ;;  %v9475_v52 = vld [vmem:[#allocation4 + $0x70] sm:$0xff] }
 0x474   : > { %2058 = vst.msk [vmem:[#allocation4 + $0x1c8] sm:$0xf] %vm590_vm1, %v1980_v30  ;;  %3922 = vmatpush.bf16.xpose.msrb.mxu3 %v3908_v10  ;;  %v4360_v30 = vsel %vm4329_vm3, %v11920_v3, -inf }
 0x475   : > { %9710 = vmatpush.bf16.msra.mxu2 %v11720_v22  ;;  %15028 = vst [vmem:[#allocation20_spill] sm:$0xff] %v11920_v3  ;;  %v9387_v3 = vld [vmem:[#allocation2 + $0x1b0] sm:$0xff] }
 0x476   : > { %15029 = vst [vmem:[#allocation21_spill] sm:$0xff] %v11928_v11  ;;  %4355 = vmax.xlane.f32.xlu2 %v4354_v26  ;;  %v9391_v11 = vld [vmem:[#allocation2 + $0x1d0] sm:$0xff] }
 0x477   : > { %6354 = vmatpush.bf16.msrb.mxu1 %v9481_v31  ;;  %v1958_v31 = vpop.permute.xlu0 %1957  ;;  %v11922_v22 = vpop.f32.mrf.mxu1  ;;  %15030 = vst [vmem:[#allocation22_spill] sm:$0xff] %v11938_v32 }
 0x478   : > { %2047 = vst.msk [vmem:[#allocation4 + $0x19c] sm:$0xf] %vm590_vm1, %v1958_v31  ;;  %v1966_v57 = vpop.permute.xlu1 %1965  ;;  %v1986_v10 = vpop.permute.xlu2 %1985  ;;  %4358 = vmax.xlane.f32.xlu0 %v4357_v33  ;;  %8864 = vmatmul.msk.bf16.gmra.mxu2 %vm2496_vm2, %v9390_v58  ;;  %v9476_v33 = vld [vmem:[#allocation4 + $0x78] sm:$0xff] }
 0x479   : > { %9711 = vmatpush.bf16.msrb.mxu2 %v11746_v63  ;;  %v9691_v63 = vld [vmem:[%s14843_s6 + $0x30] sm:$0xff]   ;;  %2051 = vst.msk [vmem:[#allocation4 + $0x1ac] sm:$0xf] %vm590_vm1, %v1966_v57 }
 0x47a   : > { %v11946_v31 = vunpack.c.h.bf16 %v9691_v63  ;;  %v11950_v56 = vunpack.c.l.bf16 %v9691_v63  ;;  %4361 = vmax.xlane.f32.xlu1 %v4360_v30  ;;  %2061 = vst.msk [vmem:[#allocation4 + $0x1d4] sm:$0xf] %vm590_vm1, %v1986_v10  ;;  %v9692_v63 = vld [vmem:[%s14843_s6 + $0x38] sm:$0xff]   ;;  %v11964_v30 = vpop.f32.mrf.mxu2  ;;  %8829 = vmatmul.msk.bf16.gmra.mxu1 %vm2496_vm2, %v9387_v3  ;;  %v4025_v3 = vadd.f32 %v11150_v1, %v11427_v47 }
 0x47c   : > { %15031 = vst [vmem:[#allocation23_spill] sm:$0xff] %v11946_v31  ;;  %v11968_v57 = vadd.f32 %v11946_v31, %v4022_v42  ;;  %v4023_v42 = vadd.f32 %v11837_v53, %v11489_v20 }
 0x47d   : > { %9712 = vmatpush.bf16.msrb.mxu2 %v11762_v35  ;;  %v4021_v35 = vadd.f32 %v11779_v55, %v11453_v28  ;;  %15032 = vst [vmem:[#allocation24_spill] sm:$0xff] %v11950_v56  ;;  %v11959_v28 = vadd.f32 %v11938_v32, %v4020_v7  ;;  %v3905_v7 = vsel %vm2496_vm2, %v9457_v61, 0 }
 0x47e   : > { %15034 = vst [vmem:[#allocation26_spill] sm:$0xff] %v11968_v57  ;;  %3923 = vmatpush.bf16.xpose.msrb.mxu3 %v3905_v7  ;;  %v4369_v61 = vsel %vm4329_vm3, %v11968_v57, -inf }
 0x47f   : > { %v1964_v26 = vpop.permute.xlu0 %1963  ;;  %15033 = vst [vmem:[#allocation25_spill] sm:$0xff] %v11959_v28  ;;  %v11974_v10 = vadd.f32 %v11950_v56, %v4021_v35  ;;  %v11978_v58 = vpop.f32.mrf.mxu1  ;;  %v4363_v35 = vsel %vm4329_vm3, %v11959_v28, -inf  ;;  %v11997_v28 = vunpack.c.h.bf16 %v9692_v63 }
 0x480   : > { %2050 = vst.msk [vmem:[#allocation4 + $0x1a8] sm:$0xf] %vm590_vm1, %v1964_v26  ;;  %v11983_v26 = vunpack.c.l.bf16 %v9692_v63  ;;  %4364 = vmax.xlane.f32.xlu2 %v4363_v35  ;;  %v1972_v7 = vpop.permute.xlu1 %1971  ;;  %v1992_v20 = vpop.permute.xlu2 %1991  ;;  %v9474_v63 = vld [vmem:[#allocation4 + $0x68] sm:$0xff] }
 0x481   : > { %9713 = vmatpush.bf16.msrb.mxu2 %v11788_v59  ;;  %v9693_v59 = vld [vmem:[%s14843_s6 + $0x40] sm:$0xff]   ;;  %15035 = vst [vmem:[#allocation27_spill] sm:$0xff] %v11974_v10  ;;  %v12003_v35 = vpop.f32.mrf.mxu3 }
 0x482   : > { %15036 = vst [vmem:[#allocation28_spill] sm:$0xff] %v11983_v26  ;;  %v11989_v39 = vunpack.c.l.bf16 %v9693_v59  ;;  %4370 = vmax.xlane.f32.xlu1 %v4369_v61  ;;  %v12001_v47 = vadd.f32 %v11983_v26, %v4023_v42  ;;  %v9694_v42 = vld [vmem:[%s14843_s6 + $0x48] sm:$0xff]  }
 0x483   : > { %15038 = vst [vmem:[#allocation30_spill] sm:$0xff] %v11997_v28 }
 0x484   : > { %15037 = vst [vmem:[#allocation29_spill] sm:$0xff] %v11989_v39  ;;  %v12007_v57 = vadd.f32 %v11989_v39, %v4025_v3  ;;  %v4372_v3 = vsel %vm4329_vm3, %v12001_v47, -inf }
 0x485   : > { %9714 = vmatpush.bf16.msrb.mxu2 %v11814_v60  ;;  %v4024_v60 = vadd.f32 %v11831_v0, %v11506_v8  ;;  %2054 = vst.msk [vmem:[#allocation4 + $0x1b8] sm:$0xf] %vm590_vm1, %v1972_v7  ;;  %v9393_v8 = vld [vmem:[#allocation2 + $0x1e0] sm:$0xff]  ;;  %v12017_v7 = vpop.f32.mrf.mxu2 }
 0x486   : > { %6181 = vmatpush.bf16.msra.mxu3 %v9476_v33  ;;  %v4366_v33 = vsel %vm4329_vm3, %v11974_v10, -inf  ;;  %15039 = vst [vmem:[#allocation31_spill] sm:$0xff] %v12001_v47 }
 0x487   : > { %v1970_v1 = vpop.permute.xlu0 %1969  ;;  %4367 = vmax.xlane.f32.xlu0 %v4366_v33  ;;  %2064 = vst.msk [vmem:[#allocation4 + $0x1e0] sm:$0xf] %vm590_vm1, %v1992_v20  ;;  %8899 = vmatmul.msk.bf16.vlgmr.msrb.gmra.mxu3 %vm2496_vm2, %v9393_v8  ;;  %v12012_v61 = vadd.f32 %v11997_v28, %v4024_v60  ;;  %v12023_v20 = vunpack.c.h.bf16 %v9693_v59  ;;  %v4028_v33 = vadd.f32 %v11768_v46, %v11481_v17  ;;  %v12027_v60 = vpop.f32.mrf.mxu1  ;;  %v12031_v8 = vunpack.c.h.bf16 %v9694_v42  ;;  %v9473_v17 = vld [vmem:[#allocation4 + $0x60] sm:$0xff] }
 0x488   : > { %15040 = vst [vmem:[#allocation32_spill] sm:$0xff] %v12007_v57  ;;  %4373 = vmax.xlane.f32.xlu2 %v4372_v3  ;;  %v1978_v10 = vpop.permute.xlu1 %1977  ;;  %v1998_v47 = vpop.permute.xlu2 %1997  ;;  %8865 = vmatmul.msk.bf16.gmra.mxu2 %vm2496_vm2, %v9391_v11  ;;  %v9696_v11 = vld [vmem:[%s14843_s6 + $0x58] sm:$0xff]  }
 0x489   : > { %2053 = vst.msk [vmem:[#allocation4 + $0x1b4] sm:$0xf] %vm590_vm1, %v1970_v1  ;;  %v4378_v1 = vsel %vm4329_vm3, %v12007_v57, -inf  ;;  %v4375_v59 = vsel %vm4329_vm3, %v12012_v61, -inf  ;;  %v9492_v57 = vld [vmem:[#allocation4 + $0xf8] sm:$0xff] }
 0x48a   : > { %6182 = vmatpush.bf16.msra.mxu3 %v9475_v52  ;;  %15041 = vst [vmem:[#allocation33_spill] sm:$0xff] %v12012_v61  ;;  %v4026_v52 = vadd.f32 %v11734_v62, %v11446_v4  ;;  %v4027_v4 = vadd.f32 %v11782_v27, %v11464_v48  ;;  %4379 = vmax.xlane.f32.xlu1 %v4378_v1 }
 0x48b   : > { %15042 = vst [vmem:[#allocation34_spill] sm:$0xff] %v12023_v20  ;;  %8830 = vmatmul.msk.bf16.gmra.mxu1 %vm2496_vm2, %v9388_v14 }
 0x48c   : > { %15043 = vst [vmem:[#allocation35_spill] sm:$0xff] %v12031_v8  ;;  %v12043_v48 = vadd.f32 %v12023_v20, %v4026_v52  ;;  %v9491_v52 = vld [vmem:[#allocation4 + $0xf0] sm:$0xff] }
 0x48d   : > { %2057 = vst.msk [vmem:[#allocation4 + $0x1c4] sm:$0xf] %vm590_vm1, %v1978_v10  ;;  %v12050_v10 = vadd.f32 %v12031_v8, %v4028_v33  ;;  %v4031_v33 = vadd.f32 %v11837_v53, %v11530_v6  ;;  %v12073_v61 = vpop.f32.mrf.mxu2 }
 0x48e   : > { %6183 = vmatpush.bf16.msra.mxu3 %v9474_v63  ;;  %v12035_v63 = vunpack.c.l.bf16 %v9694_v42  ;;  %2067 = vst.msk [vmem:[#allocation4 + $0x1ec] sm:$0xf] %vm590_vm1, %v1998_v47  ;;  %v9695_v42 = vld [vmem:[%s14843_s6 + $0x50] sm:$0xff]   ;;  %v12058_v47 = vpop.f32.mrf.mxu3 }
 0x48f   : > { %v1976_v3 = vpop.permute.xlu0 %1975  ;;  %4376 = vmax.xlane.f32.xlu0 %v4375_v59  ;;  %15045 = vst [vmem:[#allocation37_spill] sm:$0xff] %v12043_v48  ;;  %v4029_v59 = vadd.f32 %v11779_v55, %v11497_v50  ;;  %v4387_v14 = vsel %vm4329_vm3, %v12050_v10, -inf  ;;  %v4030_v50 = vadd.f32 %v11820_v24, %v11515_v13  ;;  %v12081_v6 = vunpack.c.h.bf16 %v9695_v42 }
 0x490   : > { %15044 = vst [vmem:[#allocation36_spill] sm:$0xff] %v12035_v63  ;;  %v12053_v1 = vadd.f32 %v12035_v63, %v4027_v4  ;;  %v12069_v4 = vunpack.c.l.bf16 %v9696_v11  ;;  %v1984_v54 = vpop.permute.xlu1 %1983  ;;  %v2004_v8 = vpop.permute.xlu2 %2003 }
 0x491   : > { %2056 = vst.msk [vmem:[#allocation4 + $0x1c0] sm:$0xf] %vm590_vm1, %v1976_v3  ;;  %v12071_v3 = vpop.f32.mrf.mxu1 }
 0x492   : > { %6184 = vmatpush.bf16.msra.mxu3 %v9473_v17  ;;  %15046 = vst [vmem:[#allocation38_spill] sm:$0xff] %v12050_v10  ;;  %v12063_v17 = vunpack.c.l.bf16 %v9695_v42  ;;  %4388 = vmax.xlane.f32.xlu1 %v4387_v14  ;;  %v9394_v10 = vld [vmem:[#allocation2 + $0x1e8] sm:$0xff]  ;;  %v12089_v13 = vadd.f32 %v12069_v4, %v4031_v33  ;;  %v12094_v42 = vadd.f32 %v12081_v6, %v4030_v50 }
 0x493   : > { %15047 = vst [vmem:[#allocation39_spill] sm:$0xff] %v12053_v1 }
 0x494   : > { %15048 = vst [vmem:[#allocation40_spill] sm:$0xff] %v12063_v17  ;;  %v4396_v14 = vsel %vm4329_vm3, %v12089_v13, -inf }
 0x495   : > { %15049 = vst [vmem:[#allocation41_spill] sm:$0xff] %v12069_v4 }
 0x496   : > { %6521 = vmatpush.bf16.msrb.mxu3 %v9492_v57  ;;  %v4381_v57 = vsel %vm4329_vm3, %v12043_v48, -inf  ;;  %v4384_v48 = vsel %vm4329_vm3, %v12053_v1, -inf  ;;  %15050 = vst [vmem:[#allocation42_spill] sm:$0xff] %v12081_v6  ;;  %v4393_v1 = vsel %vm4329_vm3, %v12094_v42, -inf }
 0x497   : > { %4382 = vmax.xlane.f32.xlu2 %v4381_v57  ;;  %2060 = vst.msk [vmem:[#allocation4 + $0x1d0] sm:$0xf] %vm590_vm1, %v1984_v54  ;;  %v1982_v63 = vpop.permute.xlu0 %1981  ;;  %4385 = vmax.xlane.f32.xlu0 %v4384_v48  ;;  %v12085_v57 = vadd.f32 %v12063_v17, %v4029_v59  ;;  %v9697_v54 = vld [vmem:[%s14843_s6 + $0x60] sm:$0xff]   ;;  %v12101_v59 = vpop.f32.mrf.mxu3 }
 0x498   : > { %2070 = vst.msk [vmem:[#allocation4 + $0x1f8] sm:$0xf] %vm590_vm1, %v2004_v8  ;;  %8900 = vmatmul.msk.bf16.gmra.mxu3 %vm2496_vm2, %v9394_v10  ;;  %v9489_v48 = vld [vmem:[#allocation4 + $0xe0] sm:$0xff]  ;;  %v4032_v8 = vadd.f32 %v11831_v0, %v11543_v16  ;;  %v4034_v10 = vadd.f32 %v11734_v62, %v11726_v49  ;;  %v12111_v50 = vunpack.c.h.bf16 %v9697_v54  ;;  %v1990_v16 = vpop.permute.xlu1 %1989  ;;  %v12120_v62 = vpop.f32.mrf.mxu2 }
 0x499   : > { %15051 = vst [vmem:[#allocation43_spill] sm:$0xff] %v12085_v57  ;;  %v4390_v33 = vsel %vm4329_vm3, %v12085_v57, -inf  ;;  %v9392_v57 = vld [vmem:[#allocation2 + $0x1d8] sm:$0xff]  ;;  %v12118_v49 = vpop.f32.mrf.mxu1 }
 0x49a   : > { %6522 = vmatpush.bf16.msrb.mxu3 %v9491_v52  ;;  %v9490_v52 = vld [vmem:[#allocation4 + $0xe8] sm:$0xff]  ;;  %15052 = vst [vmem:[#allocation44_spill] sm:$0xff] %v12089_v13  ;;  %4397 = vmax.xlane.f32.xlu1 %v4396_v14  ;;  %v9699_v14 = vld [vmem:[%s14843_s6 + $0x70] sm:$0xff]   ;;  %v4036_v13 = vadd.f32 %v11768_v46, %v11806_v44 }
 0x49b   : > { %2059 = vst.msk [vmem:[#allocation4 + $0x1cc] sm:$0xf] %vm590_vm1, %v1982_v63  ;;  %v12105_v63 = vunpack.c.h.bf16 %v9696_v11  ;;  %8866 = vmatmul.msk.bf16.gmra.mxu2 %vm2496_vm2, %v9392_v57  ;;  %v4035_v57 = vadd.f32 %v11782_v27, %v11748_v37 }
 0x49c   : > { %15053 = vst [vmem:[#allocation45_spill] sm:$0xff] %v12094_v42 }
 0x49d   : > { %15054 = vst [vmem:[#allocation46_spill] sm:$0xff] %v12105_v63 }
 0x49e   : > { %6523 = vmatpush.bf16.msrb.mxu3 %v9490_v52  ;;  %15055 = vst [vmem:[#allocation47_spill] sm:$0xff] %v12111_v50  ;;  %v12113_v52 = vunpack.c.l.bf16 %v9697_v54  ;;  %v12125_v54 = vadd.f32 %v12105_v63, %v4032_v8 }
 0x49f   : > { %4391 = vmax.xlane.f32.xlu2 %v4390_v33  ;;  %2063 = vst.msk [vmem:[#allocation4 + $0x1dc] sm:$0xf] %vm590_vm1, %v1990_v16  ;;  %v1988_v11 = vpop.permute.xlu0 %1987  ;;  %4394 = vmax.xlane.f32.xlu0 %v4393_v1  ;;  %v12131_v33 = vadd.f32 %v12111_v50, %v4034_v10  ;;  %v4037_v10 = vadd.f32 %v11779_v55, %v11866_v2  ;;  %v12154_v42 = vpop.f32.mrf.mxu3 }
 0x4a0   : > { %15056 = vst [vmem:[#allocation48_spill] sm:$0xff] %v12113_v52  ;;  %v12135_v1 = vadd.f32 %v12113_v52, %v11159_v12  ;;  %v4399_v16 = vsel %vm4329_vm3, %v12125_v54, -inf  ;;  %v1996_v37 = vpop.permute.xlu1 %1995 }
 0x4a1   : > { %2062 = vst.msk [vmem:[#allocation4 + $0x1d8] sm:$0xf] %vm590_vm1, %v1988_v11  ;;  %v12148_v11 = vunpack.c.l.bf16 %v9699_v14  ;;  %v4405_v12 = vsel %vm4329_vm3, %v12131_v33, -inf  ;;  %v12168_v44 = vpop.f32.mrf.mxu1 }
 0x4a2   : > { %6524 = vmatpush.bf16.msrb.mxu3 %v9489_v48  ;;  %15057 = vst [vmem:[#allocation49_spill] sm:$0xff] %v12125_v54  ;;  %v9698_v48 = vld [vmem:[%s14843_s6 + $0x68] sm:$0xff]   ;;  %v4402_v27 = vsel %vm4329_vm3, %v12135_v1, -inf  ;;  %4406 = vmax.xlane.f32.xlu1 %v4405_v12  ;;  %v9700_v12 = vld [vmem:[%s14843_s6 + $0x78] sm:$0xff]  }
 0x4a3   : > { %15058 = vst [vmem:[#allocation50_spill] sm:$0xff] %v12131_v33  ;;  %v12142_v8 = vunpack.c.l.bf16 %v9698_v48  ;;  %v12158_v54 = vunpack.c.h.bf16 %v9698_v48  ;;  %v12166_v46 = vadd.f32 %v12148_v11, %v4037_v10  ;;  %v9674_v10 = vld [vmem:[%s14842_s5 + $0x20] sm:$0xff]  }
 0x4a4   : > { %15059 = vst [vmem:[#allocation51_spill] sm:$0xff] %v12135_v1 }
 0x4a5   : > { %15060 = vst [vmem:[#allocation52_spill] sm:$0xff] %v12142_v8  ;;  %v12162_v2 = vadd.f32 %v12142_v8, %v4035_v57  ;;  %v12172_v48 = vadd.f32 %v12158_v54, %v4036_v13  ;;  %v4038_v57 = vadd.f32 %v11820_v24, %v11922_v22  ;;  %v4040_v13 = vadd.f32 %v11831_v0, %v12027_v60  ;;  %v12201_v0 = vpop.f32.mrf.mxu2 }
 0x4a6   : > { %15061 = vst [vmem:[#allocation53_spill] sm:$0xff] %v12148_v11  ;;  %v4039_v24 = vadd.f32 %v11837_v53, %v11978_v58  ;;  %v12194_v22 = vunpack.c.l.bf16 %v9700_v12 }
 0x4a7   : > { %4400 = vmax.xlane.f32.xlu2 %v4399_v16  ;;  %15062 = vst [vmem:[#allocation54_spill] sm:$0xff] %v12158_v54  ;;  %v1994_v55 = vpop.permute.xlu0 %1993  ;;  %4403 = vmax.xlane.f32.xlu0 %v4402_v27  ;;  %v9395_v16 = vld [vmem:[#allocation2 + $0x1f0] sm:$0xff]  ;;  %v12181_v27 = vunpack.c.h.bf16 %v9699_v14  ;;  %v9675_v14 = vld [vmem:[%s14842_s5 + $0x28] sm:$0xff]   ;;  %v4411_v33 = vsel %vm4329_vm3, %v12172_v48, -inf  ;;  %v12206_v53 = vpop.f32.mrf.mxu3 }
 0x4a8   : > { %2066 = vst.msk [vmem:[#allocation4 + $0x1e8] sm:$0xf] %vm590_vm1, %v1996_v37  ;;  %8901 = vmatmul.msk.bf16.gmra.mxu3 %vm2496_vm2, %v9395_v16  ;;  %v4408_v37 = vsel %vm4329_vm3, %v12162_v2, -inf  ;;  %v12190_v16 = vunpack.c.h.bf16 %v9700_v12  ;;  %v12212_v12 = vunpack.c.l.bf16 %v9675_v14 }
 0x4a9   : > { %15063 = vst [vmem:[#allocation55_spill] sm:$0xff] %v12162_v2  ;;  %v2002_v2 = vpop.permute.xlu1 %2001  ;;  %v12210_v58 = vadd.f32 %v12181_v27, %v4038_v57 }
 0x4aa   : > { %2065 = vst.msk [vmem:[#allocation4 + $0x1e4] sm:$0xf] %vm590_vm1, %v1994_v55  ;;  %v4414_v55 = vsel %vm4329_vm3, %v12166_v46, -inf  ;;  %v4043_v57 = vadd.f32 %v12212_v12, %v11853_v19  ;;  %v12242_v19 = vunpack.c.h.bf16 %v9675_v14 }
 0x4ab   : > { %15064 = vst [vmem:[#allocation56_spill] sm:$0xff] %v12166_v46  ;;  %4415 = vmax.xlane.f32.xlu1 %v4414_v55  ;;  %v12215_v46 = vadd.f32 %v12190_v16, %v4040_v13  ;;  %v12218_v55 = vadd.f32 %v12194_v22, %v4039_v24 }
 0x4ac   : > { %15065 = vst [vmem:[#allocation57_spill] sm:$0xff] %v12172_v48  ;;  %v12224_v48 = vpop.f32.mrf.mxu1 }
 0x4ad   : > { %15066 = vst [vmem:[#allocation58_spill] sm:$0xff] %v12181_v27  ;;  %v4423_v13 = vsel %vm4329_vm3, %v12215_v46, -inf }
 0x4ae   : > { %15067 = vst [vmem:[#allocation59_spill] sm:$0xff] %v12190_v16 }
 0x4af   : > { %4409 = vmax.xlane.f32.xlu2 %v4408_v37  ;;  %15068 = vst [vmem:[#allocation60_spill] sm:$0xff] %v12194_v22  ;;  %v2000_v60 = vpop.permute.xlu0 %1999  ;;  %4412 = vmax.xlane.f32.xlu0 %v4411_v33  ;;  %v12204_v37 = vunpack.c.l.bf16 %v9674_v10  ;;  %v12254_v16 = vpop.f32.mrf.mxu3 }
 0x4b0   : > { %2069 = vst.msk [vmem:[#allocation4 + $0x1f4] sm:$0xf] %vm590_vm1, %v2002_v2  ;;  %v12220_v2 = vunpack.c.h.bf16 %v9674_v10  ;;  %v4420_v10 = vsel %vm4329_vm3, %v12218_v55, -inf }
 0x4b1   : > { %2068 = vst.msk [vmem:[#allocation4 + $0x1f0] sm:$0xf] %vm590_vm1, %v2000_v60  ;;  %v4041_v33 = vadd.f32 %v12204_v37, %v11738_v36  ;;  %v4417_v60 = vsel %vm4329_vm3, %v12210_v58, -inf  ;;  %v9676_v36 = vld [vmem:[%s14842_s5 + $0x30] sm:$0xff]  }
 0x4b2   : > { %15069 = vst [vmem:[#allocation61_spill] sm:$0xff] %v12210_v58  ;;  %v4042_v24 = vadd.f32 %v12220_v2, %v11793_v43  ;;  %v12246_v43 = vadd.f32 %v11812_v45, %v4043_v57 }
 0x4b3   : > { %15070 = vst [vmem:[#allocation62_spill] sm:$0xff] %v12215_v46  ;;  %4424 = vmax.xlane.f32.xlu1 %v4423_v13  ;;  %v12240_v58 = vadd.f32 %v11757_v5, %v4041_v33  ;;  %v12248_v46 = vunpack.c.h.bf16 %v9676_v36  ;;  %v12250_v13 = vpop.f32.mrf.mxu2 }
 0x4b4   : > { %15071 = vst [vmem:[#allocation63_spill] sm:$0xff] %v12218_v55  ;;  %v12252_v55 = vunpack.c.l.bf16 %v9676_v36  ;;  %v12258_v33 = vadd.f32 %v11753_v18, %v4042_v24  ;;  %v4432_v36 = vsel %vm4329_vm3, %v12246_v43, -inf }
 0x4b5   : > { %15072 = vst [vmem:[#allocation64_spill] sm:$0xff] %v12240_v58  ;;  %v4426_v14 = vsel %vm4329_vm3, %v12240_v58, -inf  ;;  %v4046_v57 = vadd.f32 %v12248_v46, %v12017_v7 }
 0x4b6   : > { %15073 = vst [vmem:[#allocation65_spill] sm:$0xff] %v12246_v43  ;;  %v4045_v24 = vadd.f32 %v12252_v55, %v11964_v30 }
 0x4b7   : > { %4418 = vmax.xlane.f32.xlu2 %v4417_v60  ;;  %v2006_v1 = vpop.permute.xlu0 %2005  ;;  %4421 = vmax.xlane.f32.xlu0 %v4420_v10  ;;  %v9396_v60 = vld [vmem:[#allocation2 + $0x1f8] sm:$0xff]  ;;  %15074 = vst [vmem:[#allocation66_spill] sm:$0xff] %v12258_v33 }
 0x4b8   : > { %2071 = vst.msk [vmem:[#allocation4 + $0x1fc] sm:$0xf] %vm590_vm1, %v2006_v1  ;;  %8902 = vmatmul.msk.bf16.gmra.mxu3 %vm2496_vm2, %v9396_v60  ;;  %v4044_v1 = vadd.f32 %v12242_v19, %v11911_v29  ;;  %v9677_v10 = vld [vmem:[%s14842_s5 + $0x38] sm:$0xff]   ;;  %v12273_v60 = vpop.f32.mrf.mxu1  ;;  %v4429_v29 = vsel %vm4329_vm3, %v12258_v33, -inf  ;;  %v12286_v43 = vadd.f32 %v11804_v21, %v4045_v24 }
 0x4b9   : > { %v12277_v58 = vunpack.c.l.bf16 %v9677_v10  ;;  %v12288_v45 = vunpack.c.h.bf16 %v9677_v10 }
 0x4ba   : > { %v12280_v7 = vadd.f32 %v11800_v34, %v4044_v1  ;;  %15077 = vst [vmem:[#allocation69_spill] sm:$0xff] %v12286_v43  ;;  %v4049_v1 = vadd.f32 %v12204_v37, %v11890_v9  ;;  %v4438_v10 = vsel %vm4329_vm3, %v12286_v43, -inf }
 0x4bb   : > { %4433 = vmax.xlane.f32.xlu1 %v4432_v36  ;;  %v12290_v30 = vpop.f32.mrf.mxu2  ;;  %v4047_v33 = vadd.f32 %v12277_v58, %v12073_v61  ;;  %v4048_v24 = vadd.f32 %v12288_v45, %v12120_v62  ;;  %v12317_v62 = vpop.f32.mrf.mxu3 }
 0x4bc   : > { %15075 = vst [vmem:[#allocation67_spill] sm:$0xff] %v12280_v7  ;;  %v4435_v36 = vsel %vm4329_vm3, %v12280_v7, -inf  ;;  %v12310_v7 = vadd.f32 %v11894_v51, %v4049_v1 }
 0x4bd   : > { %v12305_v61 = vadd.f32 %v11861_v41, %v4047_v33  ;;  %v12313_v9 = vadd.f32 %v11857_v40, %v4048_v24  ;;  %v4052_v33 = vadd.f32 %v12242_v19, %v12058_v47  ;;  %v4051_v24 = vadd.f32 %v12212_v12, %v12003_v35 }
 0x4be   : > { %15079 = vst [vmem:[#allocation71_spill] sm:$0xff] %v12310_v7  ;;  %v4450_v1 = vsel %vm4329_vm3, %v12310_v7, -inf  ;;  %v4053_v7 = vadd.f32 %v12252_v55, %v12101_v59 }
 0x4bf   : > { %4427 = vmax.xlane.f32.xlu2 %v4426_v14  ;;  %4430 = vmax.xlane.f32.xlu0 %v4429_v29  ;;  %v12283_v14 = vadd.f32 %v11849_v25, %v4046_v57  ;;  %15078 = vst [vmem:[#allocation70_spill] sm:$0xff] %v12305_v61  ;;  %v12338_v47 = vadd.f32 %v11900_v38, %v4051_v24 }
 0x4c0   : > { %v12307_v29 = vpop.f32.mrf.mxu1  ;;  %15080 = vst [vmem:[#allocation72_spill] sm:$0xff] %v12313_v9 }
 0x4c1   : > { %15076 = vst [vmem:[#allocation68_spill] sm:$0xff] %v12283_v14  ;;  %v4441_v57 = vsel %vm4329_vm3, %v12283_v14, -inf  ;;  %v4456_v24 = vsel %vm4329_vm3, %v12338_v47, -inf }
 0x4c2   : > { %15083 = vst [vmem:[#allocation75_spill] sm:$0xff] %v12338_v47  ;;  %v4056_v47 = vadd.f32 %v12288_v45, %v12254_v16 }
 0x4c3   : > { %4442 = vmax.xlane.f32.xlu1 %v4441_v57  ;;  %v4444_v57 = vsel %vm4329_vm3, %v12305_v61, -inf  ;;  %v12335_v61 = vadd.f32 %v11938_v32, %v4052_v33  ;;  %v4054_v33 = vadd.f32 %v12248_v46, %v12154_v42 }
 0x4c5   : > { %15082 = vst [vmem:[#allocation74_spill] sm:$0xff] %v12335_v61  ;;  %v12367_v42 = vadd.f32 %v11946_v31, %v4054_v33 }
 0x4c7   : > { %4436 = vmax.xlane.f32.xlu2 %v4435_v36  ;;  %4439 = vmax.xlane.f32.xlu0 %v4438_v10  ;;  %v4050_v36 = vadd.f32 %v12220_v2, %v11942_v23  ;;  %v12323_v10 = vpop.f32.mrf.mxu2  ;;  %v4447_v23 = vsel %vm4329_vm3, %v12313_v9, -inf  ;;  %15088 = vst [vmem:[#allocation80_spill] sm:$0xff] %v12367_v42  ;;  %v4057_v9 = vadd.f32 %v12204_v37, %v12071_v3  ;;  %v4465_v33 = vsel %vm4329_vm3, %v12367_v42, -inf }
 0x4c8   : > { %v4061_v42 = vadd.f32 %v12252_v55, %v12273_v60 }
 0x4c9   : > { %v12332_v14 = vadd.f32 %v11909_v15, %v4050_v36  ;;  %v4459_v36 = vsel %vm4329_vm3, %v12335_v61, -inf  ;;  %v12394_v3 = vadd.f32 %v11989_v39, %v4057_v9  ;;  %v4060_v9 = vadd.f32 %v12242_v19, %v12224_v48  ;;  %v15101_v48 = vld [vmem:[#allocation35_spill] sm:$0xff] }
 0x4cb   : > { %4451 = vmax.xlane.f32.xlu1 %v4450_v1  ;;  %15081 = vst [vmem:[#allocation73_spill] sm:$0xff] %v12332_v14  ;;  %v4453_v35 = vsel %vm4329_vm3, %v12332_v14, -inf  ;;  %v4055_v1 = vadd.f32 %v12277_v58, %v12206_v53  ;;  %v12357_v14 = vadd.f32 %v11950_v56, %v4053_v7  ;;  %v4058_v7 = vadd.f32 %v12220_v2, %v12118_v49 }
 0x4cc   : > { %15093 = vst [vmem:[#allocation85_spill] sm:$0xff] %v12394_v3 }
 0x4cd   : > { %15084 = vst [vmem:[#allocation76_spill] sm:$0xff] %v12357_v14 }
 0x4cf   : > { %4445 = vmax.xlane.f32.xlu2 %v4444_v57  ;;  %4448 = vmax.xlane.f32.xlu0 %v4447_v23  ;;  %v3103_v57 = vpop.f32.mrf.mxu1  ;;  %v12350_v23 = vpop.f32.mrf.mxu3 }
 0x4d0   : > { %v12354_v59 = vpop.f32.mrf.mxu2 }
 0x4d1   : > { %v12359_v53 = vpop.xlane.xlu2 %4334 }
 0x4d2   : > { %15085 = vst [vmem:[#allocation77_spill] sm:$0xff] %v12359_v53  ;;  %v12427_v53 = vadd.f32 %v15101_v48, %v4060_v9 }
 0x4d3   : > { %4460 = vmax.xlane.f32.xlu1 %v4459_v36  ;;  %v12364_v61 = vpop.xlane.xlu1 %4331 }
 0x4d4   : > { %15087 = vst [vmem:[#allocation79_spill] sm:$0xff] %v12364_v61  ;;  %v4483_v9 = vsel %vm4329_vm3, %v12427_v53, -inf }
 0x4d5   : > { %15102 = vst [vmem:[#allocation92_spill] sm:$0xff] %v12427_v53 }
 0x4d7   : > { %4454 = vmax.xlane.f32.xlu2 %v4453_v35  ;;  %4457 = vmax.xlane.f32.xlu0 %v4456_v24  ;;  %v12362_v35 = vadd.f32 %v11983_v26, %v4055_v1  ;;  %v3105_v36 = vpop.f32.mrf.mxu1  ;;  %v4462_v24 = vsel %vm4329_vm3, %v12357_v14, -inf  ;;  %v12381_v16 = vpop.f32.mrf.mxu3  ;;  %v12386_v14 = vadd.f32 %v11997_v28, %v4056_v47 }
 0x4d8   : > { %v3193_v49 = vpop.f32.mrf.mxu2 }
 0x4d9   : > { %15086 = vst [vmem:[#allocation78_spill] sm:$0xff] %v12362_v35  ;;  %v4468_v1 = vsel %vm4329_vm3, %v12362_v35, -inf  ;;  %v12383_v43 = vpop.xlane.xlu2 %4340  ;;  %v12391_v35 = vadd.f32 %v12023_v20, %v4058_v7  ;;  %v4471_v47 = vsel %vm4329_vm3, %v12386_v14, -inf }
 0x4da   : > { %15089 = vst [vmem:[#allocation81_spill] sm:$0xff] %v12383_v43 }
 0x4db   : > { %4469 = vmax.xlane.f32.xlu1 %v4468_v1  ;;  %15090 = vst [vmem:[#allocation82_spill] sm:$0xff] %v12386_v14  ;;  %v12396_v61 = vpop.xlane.xlu0 %4337  ;;  %v4059_v1 = vadd.f32 %v12212_v12, %v12168_v44  ;;  %v4477_v7 = vsel %vm4329_vm3, %v12391_v35, -inf  ;;  %v15095_v44 = vld [vmem:[#allocation36_spill] sm:$0xff]  ;;  %v12418_v14 = vadd.f32 %v12063_v17, %v4061_v42 }
 0x4dc   : > { %15092 = vst [vmem:[#allocation84_spill] sm:$0xff] %v12391_v35 }
 0x4dd   : > { %15094 = vst [vmem:[#allocation86_spill] sm:$0xff] %v12396_v61  ;;  %v12413_v43 = vadd.f32 %v15095_v44, %v4059_v1  ;;  %v4486_v42 = vsel %vm4329_vm3, %v12418_v14, -inf }
 0x4de   : > { %15098 = vst [vmem:[#allocation89_spill] sm:$0xff] %v12418_v14  ;;  %v4065_v14 = vadd.f32 %v12204_v37, %v12201_v0 }
 0x4df   : > { %4463 = vmax.xlane.f32.xlu2 %v4462_v24  ;;  %4466 = vmax.xlane.f32.xlu0 %v4465_v33  ;;  %v12388_v24 = vpop.xlane.xlu1 %4343  ;;  %v12400_v33 = vpop.f32.mrf.mxu1  ;;  %15096 = vst [vmem:[#allocation87_spill] sm:$0xff] %v12413_v43  ;;  %v4480_v1 = vsel %vm4329_vm3, %v12413_v43, -inf }
 0x4e0   : > { %15091 = vst [vmem:[#allocation83_spill] sm:$0xff] %v12388_v24  ;;  %v4474_v24 = vsel %vm4329_vm3, %v12394_v3, -inf  ;;  %v3196_v3 = vpop.f32.mrf.mxu2  ;;  %v12471_v0 = vadd.f32 %v12113_v52, %v4065_v14  ;;  %v4070_v14 = vadd.f32 %v12248_v46, %v3193_v49 }
 0x4e1   : > { %v12415_v61 = vpop.xlane.xlu2 %4346 }
 0x4e2   : > { %15097 = vst [vmem:[#allocation88_spill] sm:$0xff] %v12415_v61 }
 0x4e3   : > { %4478 = vmax.xlane.f32.xlu1 %v4477_v7  ;;  %v12424_v35 = vpop.xlane.xlu0 %4349  ;;  %v4064_v7 = vadd.f32 %v12288_v45, %v3105_v36  ;;  %15108 = vst [vmem:[#allocation98_spill] sm:$0xff] %v12471_v0 }
 0x4e4   : > { %15100 = vst [vmem:[#allocation91_spill] sm:$0xff] %v12424_v35 }
 0x4e5   : > { %v12449_v36 = vadd.f32 %v12105_v63, %v4064_v7 }
 0x4e7   : > { %4472 = vmax.xlane.f32.xlu2 %v4471_v47  ;;  %4475 = vmax.xlane.f32.xlu0 %v4474_v24  ;;  %v12420_v60 = vpop.xlane.xlu1 %4352  ;;  %v12422_v47 = vpop.f32.mrf.mxu3  ;;  %v4062_v24 = vadd.f32 %v12248_v46, %v12307_v29  ;;  %15106 = vst [vmem:[#allocation96_spill] sm:$0xff] %v12449_v36  ;;  %v4495_v7 = vsel %vm4329_vm3, %v12449_v36, -inf  ;;  %v4069_v36 = vadd.f32 %v12252_v55, %v12354_v59 }
 0x4e8   : > { %15099 = vst [vmem:[#allocation90_spill] sm:$0xff] %v12420_v60  ;;  %v4063_v60 = vadd.f32 %v12277_v58, %v3103_v57  ;;  %v12437_v61 = vpop.f32.mrf.mxu1  ;;  %v3198_v53 = vpop.f32.mrf.mxu2  ;;  %v12513_v55 = vadd.f32 %v12181_v27, %v4070_v14 }
 0x4e9   : > { %v12441_v35 = vpop.xlane.xlu2 %4355  ;;  %v12444_v29 = vadd.f32 %v12081_v6, %v4062_v24  ;;  %v4067_v24 = vadd.f32 %v12212_v12, %v12290_v30  ;;  %v12516_v59 = vadd.f32 %v12148_v11, %v4069_v36 }
 0x4ea   : > { %15103 = vst [vmem:[#allocation93_spill] sm:$0xff] %v12441_v35  ;;  %v4513_v14 = vsel %vm4329_vm3, %v12513_v55, -inf }
 0x4eb   : > { %4487 = vmax.xlane.f32.xlu1 %v4486_v42  ;;  %15104 = vst [vmem:[#allocation94_spill] sm:$0xff] %v12444_v29  ;;  %v12454_v57 = vpop.xlane.xlu0 %4358  ;;  %v12478_v12 = vadd.f32 %v12142_v8, %v4067_v24  ;;  %v4510_v36 = vsel %vm4329_vm3, %v12516_v59, -inf }
 0x4ec   : > { %15117 = vst [vmem:[#allocation107_spill] sm:$0xff] %v12513_v55 }
 0x4ed   : > { %15110 = vst [vmem:[#allocation100_spill] sm:$0xff] %v12478_v12  ;;  %v4504_v24 = vsel %vm4329_vm3, %v12478_v12, -inf }
 0x4ee   : > { %15118 = vst [vmem:[#allocation108_spill] sm:$0xff] %v12516_v59 }
 0x4ef   : > { %4481 = vmax.xlane.f32.xlu2 %v4480_v1  ;;  %4484 = vmax.xlane.f32.xlu0 %v4483_v9  ;;  %v12446_v43 = vpop.xlane.xlu1 %4361  ;;  %v12452_v1 = vadd.f32 %v12069_v4, %v4063_v60  ;;  %v12458_v42 = vpop.f32.mrf.mxu3  ;;  %v4489_v9 = vsel %vm4329_vm3, %v12444_v29, -inf  ;;  %v4066_v60 = vadd.f32 %v12220_v2, %v12250_v13  ;;  %v4498_v13 = vsel %vm4329_vm3, %v12471_v0, -inf }
 0x4f0   : > { %15105 = vst [vmem:[#allocation95_spill] sm:$0xff] %v12446_v43  ;;  %v12473_v37 = vpop.f32.mrf.mxu1  ;;  %v4072_v0 = vadd.f32 %v12288_v45, %v3198_v53 }
 0x4f1   : > { %15107 = vst [vmem:[#allocation97_spill] sm:$0xff] %v12452_v1  ;;  %v4492_v43 = vsel %vm4329_vm3, %v12452_v1, -inf  ;;  %v12485_v2 = vadd.f32 %v12111_v50, %v4066_v60  ;;  %v9678_v60 = vld [vmem:[%s14842_s5 + $0x40] sm:$0xff]  }
 0x4f2   : > { %v12508_v49 = vunpack.c.l.bf16 %v9678_v60 }
 0x4f3   : > { %4496 = vmax.xlane.f32.xlu1 %v4495_v7  ;;  %v12475_v29 = vpop.xlane.xlu2 %4364  ;;  %15113 = vst [vmem:[#allocation103_spill] sm:$0xff] %v12485_v2  ;;  %v12492_v7 = vpop.f32.mrf.mxu2 }
 0x4f4   : > { %15109 = vst [vmem:[#allocation99_spill] sm:$0xff] %v12475_v29 }
 0x4f7   : > { %4490 = vmax.xlane.f32.xlu2 %v4489_v9  ;;  %4493 = vmax.xlane.f32.xlu0 %v4492_v43  ;;  %v12480_v30 = vpop.xlane.xlu1 %4370  ;;  %v4068_v43 = vadd.f32 %v12242_v19, %v12323_v10  ;;  %v3286_v1 = vpop.f32.mrf.mxu3  ;;  %v4501_v19 = vsel %vm4329_vm3, %v12485_v2, -inf }
 0x4f8   : > { %15111 = vst [vmem:[#allocation101_spill] sm:$0xff] %v12480_v30  ;;  %v12518_v12 = vpop.f32.mrf.mxu1 }
 0x4f9   : > { %v12506_v10 = vadd.f32 %v12158_v54, %v4068_v43 }
 0x4fa   : > { %v12482_v9 = vpop.xlane.xlu0 %4367 }
 0x4fb   : > { %15112 = vst [vmem:[#allocation102_spill] sm:$0xff] %v12482_v9  ;;  %4505 = vmax.xlane.f32.xlu1 %v4504_v24  ;;  %v12503_v46 = vpop.xlane.xlu2 %4373  ;;  %v4071_v24 = vadd.f32 %v12277_v58, %v3196_v3  ;;  %v4507_v43 = vsel %vm4329_vm3, %v12506_v10, -inf  ;;  %v9679_v58 = vld [vmem:[%s14842_s5 + $0x48] sm:$0xff]   ;;  %v12535_v3 = vpop.f32.mrf.mxu2 }
 0x4fc   : > { %15114 = vst [vmem:[#allocation104_spill] sm:$0xff] %v12503_v46  ;;  %v12547_v53 = vunpack.c.h.bf16 %v9679_v58  ;;  %v12551_v59 = vunpack.c.l.bf16 %v9679_v58  ;;  %v9680_v58 = vld [vmem:[%s14842_s5 + $0x50] sm:$0xff]  }
 0x4fd   : > { %15115 = vst [vmem:[#allocation105_spill] sm:$0xff] %v12506_v10  ;;  %v12538_v10 = vadd.f32 %v12194_v22, %v4071_v24  ;;  %v15131_v46 = vld [vmem:[#allocation8_spill] sm:$0xff] }
 0x4ff   : > { %4499 = vmax.xlane.f32.xlu2 %v4498_v13  ;;  %4502 = vmax.xlane.f32.xlu0 %v4501_v19  ;;  %v12510_v13 = vpop.xlane.xlu1 %4379  ;;  %v4073_v19 = vadd.f32 %v12508_v49, %v12317_v62  ;;  %15120 = vst [vmem:[#allocation110_spill] sm:$0xff] %v12538_v10  ;;  %v12540_v62 = vunpack.c.h.bf16 %v9678_v60 }
 0x500   : > { %15116 = vst [vmem:[#allocation106_spill] sm:$0xff] %v12510_v13  ;;  %v3377_v24 = vpop.f32.mrf.mxu1 }
 0x501   : > { %v12545_v45 = vadd.f32 %v11757_v5, %v4073_v19  ;;  %v4074_v60 = vadd.f32 %v12540_v62, %v12350_v23  ;;  %v4076_v19 = vadd.f32 %v12547_v53, %v12422_v47  ;;  %v9681_v23 = vld [vmem:[%s14842_s5 + $0x58] sm:$0xff]   ;;  %v12576_v47 = vunpack.c.l.bf16 %v9680_v58 }
 0x502   : > { %v12520_v2 = vpop.xlane.xlu0 %4376 }
 0x503   : > { %15119 = vst [vmem:[#allocation109_spill] sm:$0xff] %v12520_v2  ;;  %4514 = vmax.xlane.f32.xlu1 %v4513_v14  ;;  %v12585_v30 = vpop.f32.mrf.mxu2  ;;  %v12590_v2 = vadd.f32 %v11800_v34, %v4076_v19 }
 0x504   : > { %15122 = vst [vmem:[#allocation112_spill] sm:$0xff] %v12545_v45 }
 0x505   : > { %15130 = vst [vmem:[#allocation119_spill] sm:$0xff] %v12590_v2  ;;  %v4531_v19 = vsel %vm4329_vm3, %v12590_v2, -inf }
 0x507   : > { %4508 = vmax.xlane.f32.xlu2 %v4507_v43  ;;  %4511 = vmax.xlane.f32.xlu0 %v4510_v36  ;;  %v3289_v43 = vpop.f32.mrf.mxu3  ;;  %v12549_v14 = vpop.xlane.xlu1 %4388  ;;  %v15125_v36 = vld [vmem:[#allocation59_spill] sm:$0xff] }
 0x508   : > { %15123 = vst [vmem:[#allocation113_spill] sm:$0xff] %v12549_v14  ;;  %v12556_v9 = vadd.f32 %v15125_v36, %v4072_v0  ;;  %v4522_v14 = vsel %vm4329_vm3, %v12545_v45, -inf  ;;  %v4075_v0 = vadd.f32 %v12551_v59, %v12381_v16  ;;  %v12583_v45 = vunpack.c.l.bf16 %v9681_v23 }
 0x50a   : > { %v12542_v55 = vpop.xlane.xlu2 %4382  ;;  %v12553_v13 = vpop.xlane.xlu0 %4385  ;;  %15126 = vst [vmem:[#allocation115_spill] sm:$0xff] %v12556_v9  ;;  %v4079_v35 = vadd.f32 %v12583_v45, %v3289_v43 }
 0x50b   : > { %15121 = vst [vmem:[#allocation111_spill] sm:$0xff] %v12542_v55  ;;  %v4516_v55 = vsel %vm4329_vm3, %v12538_v10, -inf  ;;  %v4519_v10 = vsel %vm4329_vm3, %v12556_v9, -inf  ;;  %4523 = vmax.xlane.f32.xlu1 %v4522_v14  ;;  %v12593_v9 = vadd.f32 %v15131_v46, %v4075_v0 }
 0x50c   : > { %15124 = vst [vmem:[#allocation114_spill] sm:$0xff] %v12553_v13 }
 0x50d   : > { %15132 = vst [vmem:[#allocation8_spill] sm:$0xff] %v12593_v9 }
 0x50f   : > { %4517 = vmax.xlane.f32.xlu2 %v4516_v55  ;;  %4520 = vmax.xlane.f32.xlu0 %v4519_v10  ;;  %v12581_v55 = vadd.f32 %v11753_v18, %v4074_v60  ;;  %v12587_v16 = vpop.xlane.xlu1 %4397  ;;  %v12595_v10 = vunpack.c.h.bf16 %v9680_v58  ;;  %v3291_v14 = vpop.f32.mrf.mxu3  ;;  %v4077_v60 = vadd.f32 %v12576_v47, %v12458_v42  ;;  %v4528_v58 = vsel %vm4329_vm3, %v12593_v9, -inf }
 0x510   : > { %15129 = vst [vmem:[#allocation118_spill] sm:$0xff] %v12587_v16  ;;  %v3379_v16 = vpop.f32.mrf.mxu1  ;;  %v12612_v42 = vunpack.c.h.bf16 %v9681_v23  ;;  %v12626_v9 = vpop.f32.mrf.mxu2 }
 0x511   : > { %15128 = vst [vmem:[#allocation117_spill] sm:$0xff] %v12581_v55  ;;  %v4078_v0 = vadd.f32 %v12595_v10, %v3286_v1 }
 0x512   : > { %v12578_v13 = vpop.xlane.xlu2 %4391  ;;  %v12597_v29 = vpop.xlane.xlu0 %4394 }
 0x513   : > { %15127 = vst [vmem:[#allocation116_spill] sm:$0xff] %v12578_v13  ;;  %v4525_v13 = vsel %vm4329_vm3, %v12581_v55, -inf  ;;  %4532 = vmax.xlane.f32.xlu1 %v4531_v19  ;;  %v12624_v1 = vadd.f32 %v11849_v25, %v4078_v0  ;;  %v4080_v19 = vadd.f32 %v12612_v42, %v3291_v14  ;;  %v4081_v0 = vadd.f32 %v12508_v49, %v12400_v33 }
 0x514   : > { %15133 = vst [vmem:[#allocation120_spill] sm:$0xff] %v12597_v29  ;;  %v12610_v29 = vadd.f32 %v11804_v21, %v4077_v60 }
 0x516   : > { %15134 = vst [vmem:[#allocation121_spill] sm:$0xff] %v12610_v29  ;;  %v4534_v23 = vsel %vm4329_vm3, %v12610_v29, -inf }
 0x517   : > { %4526 = vmax.xlane.f32.xlu2 %v4525_v13  ;;  %4529 = vmax.xlane.f32.xlu0 %v4528_v58  ;;  %v12617_v13 = vadd.f32 %v11861_v41, %v4079_v35  ;;  %v12619_v43 = vpop.xlane.xlu1 %4406  ;;  %v12629_v60 = vpop.f32.mrf.mxu3  ;;  %v4082_v35 = vadd.f32 %v12540_v62, %v12437_v61 }
 0x518   : > { %15136 = vst [vmem:[#allocation123_spill] sm:$0xff] %v12619_v43  ;;  %v4537_v43 = vsel %vm4329_vm3, %v12624_v1, -inf  ;;  %v3382_v14 = vpop.f32.mrf.mxu1 }
 0x519   : > { %v4540_v58 = vsel %vm4329_vm3, %v12617_v13, -inf  ;;  %v12649_v61 = vadd.f32 %v11909_v15, %v4082_v35  ;;  %v4084_v35 = vadd.f32 %v12547_v53, %v12518_v12 }
 0x51a   : > { %v12614_v55 = vpop.xlane.xlu2 %4400  ;;  %v12621_v2 = vpop.xlane.xlu0 %4403 }
 0x51b   : > { %15135 = vst [vmem:[#allocation122_spill] sm:$0xff] %v12614_v55  ;;  %4541 = vmax.xlane.f32.xlu1 %v4540_v58  ;;  %v12644_v55 = vadd.f32 %v11857_v40, %v4080_v19  ;;  %v4083_v58 = vadd.f32 %v12551_v59, %v12473_v37  ;;  %v3470_v19 = vpop.f32.mrf.mxu2  ;;  %v12682_v12 = vadd.f32 %v11938_v32, %v4084_v35 }
 0x51c   : > { %15137 = vst [vmem:[#allocation124_spill] sm:$0xff] %v12621_v2 }
 0x51d   : > { %v12670_v37 = vadd.f32 %v11900_v38, %v4083_v58  ;;  %v4087_v58 = vadd.f32 %v12583_v45, %v3382_v14 }
 0x51f   : > { %4535 = vmax.xlane.f32.xlu2 %v4534_v23  ;;  %4538 = vmax.xlane.f32.xlu0 %v4537_v43  ;;  %v12646_v29 = vpop.xlane.xlu1 %4415  ;;  %v12652_v23 = vadd.f32 %v11894_v51, %v4081_v0  ;;  %v4543_v43 = vsel %vm4329_vm3, %v12644_v55, -inf  ;;  %v12665_v0 = vpop.f32.mrf.mxu3  ;;  %v12706_v14 = vadd.f32 %v11983_v26, %v4087_v58 }
 0x520   : > { %15139 = vst [vmem:[#allocation126_spill] sm:$0xff] %v12646_v29  ;;  %v4549_v29 = vsel %vm4329_vm3, %v12649_v61, -inf }
 0x521   : > { %15140 = vst [vmem:[#allocation127_spill] sm:$0xff] %v12652_v23  ;;  %v4546_v15 = vsel %vm4329_vm3, %v12652_v23, -inf  ;;  %v4086_v23 = vadd.f32 %v12595_v10, %v3379_v16  ;;  %v4564_v58 = vsel %vm4329_vm3, %v12706_v14, -inf }
 0x522   : > { %v12641_v2 = vpop.xlane.xlu2 %4409  ;;  %v12654_v33 = vpop.xlane.xlu0 %4412  ;;  %15148 = vst [vmem:[#allocation135_spill] sm:$0xff] %v12706_v14 }
 0x523   : > { %15138 = vst [vmem:[#allocation125_spill] sm:$0xff] %v12641_v2  ;;  %v4085_v2 = vadd.f32 %v12576_v47, %v3377_v24  ;;  %4550 = vmax.xlane.f32.xlu1 %v4549_v29  ;;  %v12698_v32 = vadd.f32 %v11946_v31, %v4086_v23  ;;  %v4091_v23 = vadd.f32 %v12551_v59, %v12585_v30 }
 0x524   : > { %15141 = vst [vmem:[#allocation128_spill] sm:$0xff] %v12654_v33  ;;  %v3384_v33 = vpop.f32.mrf.mxu1 }
 0x525   : > { %v12675_v24 = vadd.f32 %v11950_v56, %v4085_v2  ;;  %v4088_v29 = vadd.f32 %v12612_v42, %v3384_v33  ;;  %v4555_v56 = vsel %vm4329_vm3, %v12682_v12, -inf  ;;  %15146 = vst [vmem:[#allocation133_spill] sm:$0xff] %v12698_v32  ;;  %v12728_v26 = vadd.f32 %v15095_v44, %v4091_v23 }
 0x526   : > { %v4093_v44 = vadd.f32 %v12576_v47, %v3470_v19 }
 0x527   : > { %4544 = vmax.xlane.f32.xlu2 %v4543_v43  ;;  %4547 = vmax.xlane.f32.xlu0 %v4546_v15  ;;  %15143 = vst [vmem:[#allocation130_spill] sm:$0xff] %v12675_v24  ;;  %v12677_v43 = vpop.xlane.xlu1 %4424  ;;  %v4552_v15 = vsel %vm4329_vm3, %v12670_v37, -inf  ;;  %v4558_v2 = vsel %vm4329_vm3, %v12675_v24, -inf  ;;  %v12693_v35 = vpop.f32.mrf.mxu3  ;;  %v4576_v23 = vsel %vm4329_vm3, %v12728_v26, -inf }
 0x528   : > { %15144 = vst [vmem:[#allocation131_spill] sm:$0xff] %v12677_v43 }
 0x529   : > { %15150 = vst [vmem:[#allocation137_spill] sm:$0xff] %v12728_v26 }
 0x52a   : > { %v12672_v51 = vpop.xlane.xlu2 %4418  ;;  %v12679_v40 = vpop.xlane.xlu0 %4421 }
 0x52b   : > { %15142 = vst [vmem:[#allocation129_spill] sm:$0xff] %v12672_v51  ;;  %4559 = vmax.xlane.f32.xlu1 %v4558_v2  ;;  %v4561_v2 = vsel %vm4329_vm3, %v12698_v32, -inf  ;;  %v15224_v51 = vld [vmem:[#allocation33_spill] sm:$0xff] }
 0x52c   : > { %15145 = vst [vmem:[#allocation132_spill] sm:$0xff] %v12679_v40  ;;  %v3472_v40 = vpop.f32.mrf.mxu2 }
 0x52f   : > { %4553 = vmax.xlane.f32.xlu2 %v4552_v15  ;;  %4556 = vmax.xlane.f32.xlu0 %v4555_v56  ;;  %v12700_v33 = vpop.xlane.xlu1 %4433  ;;  %v12703_v15 = vadd.f32 %v11997_v28, %v4088_v29  ;;  %v4089_v56 = vadd.f32 %v12508_v49, %v12492_v7  ;;  %v4090_v29 = vadd.f32 %v12540_v62, %v12535_v3 }
 0x531   : > { %15147 = vst [vmem:[#allocation134_spill] sm:$0xff] %v12703_v15  ;;  %v4567_v31 = vsel %vm4329_vm3, %v12703_v15, -inf  ;;  %v12723_v7 = vadd.f32 %v11989_v39, %v4089_v56  ;;  %v12732_v15 = vpop.f32.mrf.mxu3  ;;  %v12737_v3 = vadd.f32 %v12023_v20, %v4090_v29 }
 0x532   : > { %v12695_v16 = vpop.xlane.xlu2 %4427  ;;  %v12708_v38 = vpop.xlane.xlu0 %4430 }
 0x533   : > { %4568 = vmax.xlane.f32.xlu1 %v4567_v31  ;;  %15149 = vst [vmem:[#allocation136_spill] sm:$0xff] %v12723_v7  ;;  %v4092_v31 = vadd.f32 %v12547_v53, %v12626_v9  ;;  %v4570_v56 = vsel %vm4329_vm3, %v12723_v7, -inf  ;;  %v4573_v39 = vsel %vm4329_vm3, %v12737_v3, -inf }
 0x534   : > { %v3475_v30 = vpop.f32.mrf.mxu2  ;;  %15151 = vst [vmem:[#allocation138_spill] sm:$0xff] %v12737_v3  ;;  %v15156_v3 = vld [vmem:[#allocation6_spill] sm:$0xff] }
 0x535   : > { %v12752_v9 = vadd.f32 %v15101_v48, %v4092_v31  ;;  %v4095_v7 = vadd.f32 %v12583_v45, %v3475_v30  ;;  %v4097_v48 = vadd.f32 %v12508_v49, %v12629_v60 }
 0x537   : > { %4562 = vmax.xlane.f32.xlu2 %v4561_v2  ;;  %4565 = vmax.xlane.f32.xlu0 %v4564_v58  ;;  %v12730_v2 = vpop.xlane.xlu1 %4442  ;;  %v4094_v58 = vadd.f32 %v12595_v10, %v3472_v40  ;;  %15152 = vst [vmem:[#allocation139_spill] sm:$0xff] %v12752_v9  ;;  %v4579_v31 = vsel %vm4329_vm3, %v12752_v9, -inf  ;;  %v12786_v9 = vadd.f32 %v12113_v52, %v4097_v48  ;;  %v15164_v52 = vld [vmem:[#allocation11_spill] sm:$0xff] }
 0x539   : > { %v12757_v40 = vadd.f32 %v12081_v6, %v4094_v58  ;;  %v12771_v58 = vpop.f32.mrf.mxu0  ;;  %v15157_v6 = vld [vmem:[#allocation79_spill] sm:$0xff]  ;;  %15160 = vst [vmem:[#allocation6_spill] sm:$0xff] %v12786_v9  ;;  %v4594_v48 = vsel %vm4329_vm3, %v12786_v9, -inf  ;;  %v15163_v9 = vld [vmem:[#allocation86_spill] sm:$0xff] }
 0x53a   : > { %v12725_v28 = vpop.xlane.xlu2 %4436  ;;  %v12734_v43 = vpop.xlane.xlu0 %4439 }
 0x53b   : > { %4577 = vmax.xlane.f32.xlu1 %v4576_v23  ;;  %15153 = vst [vmem:[#allocation140_spill] sm:$0xff] %v12757_v40  ;;  %v3563_v23 = vpop.f32.mrf.mxu3  ;;  %v4585_v32 = vsel %vm4329_vm3, %v12757_v40, -inf }
 0x53c   : > { %v3477_v19 = vpop.f32.mrf.mxu2 }
 0x53d   : > { %v4096_v30 = vadd.f32 %v12612_v42, %v3477_v19 }
 0x53f   : > { %4571 = vmax.xlane.f32.xlu2 %v4570_v56  ;;  %4574 = vmax.xlane.f32.xlu0 %v4573_v39  ;;  %v12754_v20 = vpop.xlane.xlu1 %4451  ;;  %v12760_v56 = vadd.f32 %v12063_v17, %v4093_v44  ;;  %v15155_v39 = vld [vmem:[#allocation77_spill] sm:$0xff]  ;;  %v15158_v44 = vld [vmem:[#allocation7_spill] sm:$0xff]  ;;  %v12793_v19 = vadd.f32 %v12105_v63, %v4096_v30  ;;  %v4716_v63 = vsub.f32 %v15164_v52, %v15163_v9 }
 0x540   : > { %v4715_v14 = vsub.f32 %v15156_v3, %v15155_v39  ;;  %v4714_v17 = vsub.f32 %v15158_v44, %v15157_v6  ;;  %v12781_v39 = vadd.f32 %v12069_v4, %v4095_v7  ;;  %v15166_v4 = vld [vmem:[#allocation9_spill] sm:$0xff] }
 0x541   : > { %15154 = vst [vmem:[#allocation141_spill] sm:$0xff] %v12760_v56  ;;  %v4582_v3 = vsel %vm4329_vm3, %v12760_v56, -inf  ;;  %v4591_v7 = vsel %vm4329_vm3, %v12793_v19, -inf  ;;  %v4100_v56 = vadd.f32 %v12547_v53, %v12732_v15 }
 0x542   : > { %v12749_v29 = vpop.xlane.xlu2 %4445  ;;  %v12762_v26 = vpop.xlane.xlu0 %4448  ;;  %15159 = vst [vmem:[#allocation77_spill] sm:$0xff] %v12781_v39  ;;  %v4844_v49 = vmul.f32 1.442695, %v4715_v14  ;;  %v4842_v6 = vmul.f32 1.442695, %v4714_v17  ;;  %v4588_v14 = vsel %vm4329_vm3, %v12781_v39, -inf }
 0x543   : > { %4586 = vmax.xlane.f32.xlu1 %v4585_v32  ;;  %15161 = vst [vmem:[#allocation79_spill] sm:$0xff] %v12793_v19  ;;  %v4098_v32 = vadd.f32 %v12540_v62, %v12665_v0  ;;  %v3565_v17 = vpop.f32.mrf.mxu3  ;;  %v12848_v15 = vadd.f32 %v12158_v54, %v4100_v56 }
 0x544   : > { %9739 = vpow2.f32 %v4844_v49 }
 0x545   : > { %9741 = vpow2.f32 %v4842_v6  ;;  %v12808_v62 = vadd.f32 %v12111_v50, %v4098_v32  ;;  %v4101_v32 = vadd.f32 %v12576_v47, %v3563_v23  ;;  %v15165_v50 = vld [vmem:[#allocation81_spill] sm:$0xff] }
 0x546   : > { %v4717_v19 = vsub.f32 %v15166_v4, %v15165_v50  ;;  %15169 = vst [vmem:[#allocation81_spill] sm:$0xff] %v12848_v15 }
 0x547   : > { %4580 = vmax.xlane.f32.xlu2 %v4579_v31  ;;  %4583 = vmax.xlane.f32.xlu0 %v4582_v3  ;;  %v12788_v31 = vpop.xlane.xlu1 %4460  ;;  %v12803_v3 = vpop.f32.mrf.mxu0  ;;  %15162 = vst [vmem:[#allocation7_spill] sm:$0xff] %v12808_v62  ;;  %v12839_v4 = vadd.f32 %v12148_v11, %v4101_v32  ;;  %v4102_v32 = vadd.f32 %v12595_v10, %v3565_v17  ;;  %v4603_v11 = vsel %vm4329_vm3, %v12848_v15, -inf }
 0x548   : > { %v4848_v23 = vmul.f32 1.442695, %v4717_v19 }
 0x549   : > { %15168 = vst [vmem:[#allocation11_spill] sm:$0xff] %v12839_v4  ;;  %v4606_v19 = vsel %vm4329_vm3, %v12839_v4, -inf  ;;  %v15174_v4 = vld [vmem:[#allocation88_spill] sm:$0xff] }
 0x54a   : > { %v12783_v60 = vpop.xlane.xlu2 %4454  ;;  %v12790_v44 = vpop.xlane.xlu0 %4457 }
 0x54b   : > { %4595 = vmax.xlane.f32.xlu1 %v4594_v48  ;;  %v12812_v49 = vpop.eup %9739  ;;  %v4099_v48 = vadd.f32 %v12551_v59, %v12693_v35  ;;  %v4846_v59 = vmul.f32 1.442695, %v4716_v63  ;;  %v3568_v47 = vpop.f32.mrf.mxu3  ;;  %v15170_v63 = vld [vmem:[#allocation83_spill] sm:$0xff] }
 0x54c   : > { %v5101_v39 = vsel %vm4329_vm3, %v12812_v49, 0.0 }
 0x54d   : > { %v12834_v35 = vadd.f32 %v12142_v8, %v4099_v48  ;;  %9743 = vpow2.f32 %v4846_v59 }
 0x54e   : > { %9745 = vpow2.f32 %v4848_v23 }
 0x54f   : > { %4589 = vmax.xlane.f32.xlu2 %v4588_v14  ;;  %4592 = vmax.xlane.f32.xlu0 %v4591_v7  ;;  %v12810_v0 = vpop.xlane.xlu1 %4469  ;;  %v12816_v14 = vpop.eup %9741  ;;  %v4597_v7 = vsel %vm4329_vm3, %v12808_v62, -inf  ;;  %15167 = vst [vmem:[#allocation86_spill] sm:$0xff] %v12834_v35 }
 0x550   : > { %v5098_v52 = vsel %vm4329_vm3, %v12816_v14, 0.0  ;;  %v12841_v50 = vpop.f32.mrf.mxu0 }
 0x552   : > { %v12805_v30 = vpop.xlane.xlu2 %4463  ;;  %v12814_v6 = vpop.xlane.xlu0 %4466 }
 0x553   : > { %5102 = vadd.xlane.f32.xlu1 %v5101_v39  ;;  %v15171_v39 = vld [vmem:[#allocation10_spill] sm:$0xff]  ;;  %v12861_v54 = vpop.eup %9743  ;;  %v3570_v23 = vpop.f32.mrf.mxu3 }
 0x554   : > { %v4718_v48 = vsub.f32 %v15171_v39, %v15170_v63  ;;  %v12866_v39 = vadd.f32 %v12181_v27, %v4102_v32  ;;  %v12870_v17 = vpop.eup %9745  ;;  %v4104_v27 = vadd.f32 %v12612_v42, %v3570_v23 }
 0x555   : > { %v5107_v8 = vsel %vm4329_vm3, %v12870_v17, 0.0 }
 0x556   : > { %v4850_v56 = vmul.f32 1.442695, %v4718_v48  ;;  %15173 = vst [vmem:[#allocation83_spill] sm:$0xff] %v12866_v39  ;;  %v5104_v48 = vsel %vm4329_vm3, %v12861_v54, 0.0  ;;  %v4609_v32 = vsel %vm4329_vm3, %v12866_v39, -inf  ;;  %v12901_v39 = vadd.f32 %v15125_v36, %v4104_v27 }
 0x557   : > { %4598 = vmax.xlane.f32.xlu2 %v4597_v7  ;;  %5099 = vadd.xlane.f32.xlu0 %v5098_v52  ;;  %v12843_v7 = vpop.xlane.xlu1 %4478  ;;  %v4600_v52 = vsel %vm4329_vm3, %v12834_v35, -inf  ;;  %v15175_v35 = vld [vmem:[#allocation13_spill] sm:$0xff] }
 0x558   : > { %9747 = vpow2.f32 %v4850_v56  ;;  %15182 = vst [vmem:[#allocation145_spill] sm:$0xff] %v12901_v39 }
 0x55a   : > { %v12836_v9 = vpop.xlane.xlu2 %4472  ;;  %v12845_v53 = vpop.xlane.xlu0 %4475 }
 0x55b   : > { %4607 = vmax.xlane.f32.xlu1 %v4606_v19  ;;  %v4719_v19 = vsub.f32 %v15175_v35, %v15174_v4  ;;  %v9682_v35 = vld [vmem:[%s14842_s5 + $0x60] sm:$0xff]  }
 0x55c   : > { %v12890_v56 = vunpack.c.h.bf16 %v9682_v35  ;;  %v12896_v23 = vunpack.c.l.bf16 %v9682_v35  ;;  %v9683_v35 = vld [vmem:[%s14842_s5 + $0x68] sm:$0xff]  }
 0x55d   : > { %v4852_v4 = vmul.f32 1.442695, %v4719_v19 }
 0x55e   : > { %15178 = vst [vmem:[#allocation13_spill] sm:$0xff] %v12890_v56  ;;  %v12894_v42 = vpop.eup %9747 }
 0x55f   : > { %4601 = vmax.xlane.f32.xlu2 %v4600_v52  ;;  %4604 = vmax.xlane.f32.xlu0 %v4603_v11  ;;  %v12863_v63 = vpop.xlane.xlu1 %4487  ;;  %v3653_v52 = vpop.f32.mrf.mxu0  ;;  %v4103_v11 = vadd.f32 %v12583_v45, %v3568_v47  ;;  %15180 = vst [vmem:[#allocation143_spill] sm:$0xff] %v12896_v23  ;;  %9749 = vpow2.f32 %v4852_v4  ;;  %v5110_v27 = vsel %vm4329_vm3, %v12894_v42, 0.0  ;;  %v4105_v4 = vadd.f32 %v12896_v23, %v12771_v58 }
 0x560   : > { %15172 = vst [vmem:[#allocation9_spill] sm:$0xff] %v12863_v63  ;;  %v12932_v58 = vunpack.c.h.bf16 %v9683_v35 }
 0x561   : > { %v12886_v45 = vadd.f32 %v12194_v22, %v4103_v11  ;;  %v4106_v22 = vadd.f32 %v12890_v56, %v12803_v3  ;;  %v12930_v40 = vadd.f32 %v11757_v5, %v4105_v4 }
 0x562   : > { %v12859_v59 = vpop.xlane.xlu2 %4481  ;;  %v12868_v10 = vpop.xlane.xlu0 %4484  ;;  %15187 = vst [vmem:[#allocation148_spill] sm:$0xff] %v12932_v58  ;;  %v4108_v5 = vadd.f32 %v12932_v58, %v3653_v52 }
 0x563   : > { %4610 = vmax.xlane.f32.xlu1 %v4609_v32  ;;  %15176 = vst [vmem:[#allocation10_spill] sm:$0xff] %v12886_v45  ;;  %v4612_v11 = vsel %vm4329_vm3, %v12886_v45, -inf }
 0x565   : > { %v12922_v45 = vpop.eup %9749 }
 0x567   : > { %5105 = vadd.xlane.f32.xlu2 %v5104_v48  ;;  %5108 = vadd.xlane.f32.xlu0 %v5107_v8  ;;  %v12892_v48 = vpop.xlane.xlu1 %4496  ;;  %v15183_v8 = vld [vmem:[#allocation64_spill] sm:$0xff]  ;;  %v3656_v15 = vpop.f32.mrf.mxu0 }
 0x568   : > { %15179 = vst [vmem:[#allocation142_spill] sm:$0xff] %v12892_v48  ;;  %v4746_v19 = vsub.f32 %v15183_v8, %v12695_v16  ;;  %v4615_v16 = vsel %vm4329_vm3, %v12901_v39, -inf  ;;  %v12918_v8 = vunpack.c.l.bf16 %v9683_v35 }
 0x56a   : > { %v12888_v47 = vpop.xlane.xlu2 %4490  ;;  %v12898_v32 = vpop.xlane.xlu0 %4493  ;;  %15184 = vst [vmem:[#allocation64_spill] sm:$0xff] %v12918_v8  ;;  %v4906_v3 = vmul.f32 1.442695, %v4746_v19  ;;  %v4107_v19 = vadd.f32 %v12918_v8, %v12841_v50 }
 0x56b   : > { %15177 = vst [vmem:[#allocation88_spill] sm:$0xff] %v12888_v47  ;;  %5111 = vadd.xlane.f32.xlu1 %v5110_v27  ;;  %v15189_v27 = vld [vmem:[#allocation66_spill] sm:$0xff] }
 0x56c   : > { %15181 = vst [vmem:[#allocation144_spill] sm:$0xff] %v12898_v32  ;;  %9751 = vpow2.f32 %v4906_v3  ;;  %v12951_v4 = vadd.f32 %v15131_v46, %v4107_v19  ;;  %v15207_v32 = vld [vmem:[#allocation15_spill] sm:$0xff] }
 0x56e   : > { %15190 = vst [vmem:[#allocation66_spill] sm:$0xff] %v12951_v4  ;;  %v4624_v19 = vsel %vm4329_vm3, %v12951_v4, -inf  ;;  %v15228_v4 = vld [vmem:[#allocation27_spill] sm:$0xff] }
 0x56f   : > { %4613 = vmax.xlane.f32.xlu2 %v4612_v11  ;;  %4616 = vmax.xlane.f32.xlu0 %v4615_v16  ;;  %v12924_v62 = vpop.xlane.xlu1 %4505  ;;  %v12927_v11 = vadd.f32 %v11753_v18, %v4106_v22  ;;  %v4747_v16 = vsub.f32 %v15189_v27, %v12708_v38  ;;  %v4618_v22 = vsel %vm4329_vm3, %v12930_v40, -inf  ;;  %v9684_v38 = vld [vmem:[%s14842_s5 + $0x70] sm:$0xff]   ;;  %v3658_v35 = vpop.f32.mrf.mxu0 }
 0x570   : > { %15186 = vst [vmem:[#allocation147_spill] sm:$0xff] %v12924_v62  ;;  %v5113_v62 = vsel %vm4329_vm3, %v12922_v45, 0.0  ;;  %v12955_v3 = vunpack.c.h.bf16 %v9684_v38 }
 0x571   : > { %v4621_v18 = vsel %vm4329_vm3, %v12927_v11, -inf  ;;  %v4908_v50 = vmul.f32 1.442695, %v4747_v16  ;;  %v15197_v16 = vld [vmem:[#allocation21_spill] sm:$0xff] }
 0x572   : > { %v12920_v36 = vpop.xlane.xlu2 %4499  ;;  %v12934_v39 = vpop.xlane.xlu0 %4502  ;;  %15192 = vst [vmem:[#allocation151_spill] sm:$0xff] %v12955_v3  ;;  %v4723_v46 = vsub.f32 %v15197_v16, %v12454_v57 }
 0x573   : > { %15185 = vst [vmem:[#allocation146_spill] sm:$0xff] %v12920_v36  ;;  %4622 = vmax.xlane.f32.xlu1 %v4621_v18  ;;  %v12959_v52 = vpop.eup %9751  ;;  %v12966_v36 = vadd.f32 %v11800_v34, %v4108_v5  ;;  %9753 = vpow2.f32 %v4908_v50 }
 0x574   : > { %15188 = vst [vmem:[#allocation149_spill] sm:$0xff] %v12934_v39  ;;  %v12961_v39 = vunpack.c.l.bf16 %v9684_v38  ;;  %v12978_v38 = vld [vmem:[%s14842_s5 + $0x78] sm:$0xff]   ;;  %v5194_v34 = vsel %vm4329_vm3, %v12959_v52, 0.0 }
 0x575   : > { %15196 = vst [vmem:[#allocation155_spill] sm:$0xff] %v12966_v36  ;;  %v4627_v57 = vsel %vm4329_vm3, %v12966_v36, -inf  ;;  %v12986_v50 = vunpack.c.l.bf16 %v12978_v38 }
 0x576   : > { %15194 = vst [vmem:[#allocation153_spill] sm:$0xff] %v12961_v39  ;;  %v4109_v5 = vadd.f32 %v12961_v39, %v3656_v15  ;;  %v15206_v39 = vld [vmem:[#allocation91_spill] sm:$0xff] }
 0x577   : > { %5114 = vadd.xlane.f32.xlu2 %v5113_v62  ;;  %4619 = vmax.xlane.f32.xlu0 %v4618_v22  ;;  %v12957_v27 = vpop.xlane.xlu1 %4514  ;;  %v4110_v22 = vadd.f32 %v12955_v3, %v3658_v35  ;;  %v4860_v35 = vmul.f32 1.442695, %v4723_v46  ;;  %15200 = vst [vmem:[#allocation21_spill] sm:$0xff] %v12986_v50  ;;  %v15205_v46 = vld [vmem:[#allocation65_spill] sm:$0xff] }
 0x578   : > { %15193 = vst [vmem:[#allocation152_spill] sm:$0xff] %v12957_v27  ;;  %v15199_v27 = vld [vmem:[#allocation19_spill] sm:$0xff]  ;;  %v12998_v15 = vadd.f32 %v11804_v21, %v4109_v5 }
 0x579   : > { %v12995_v3 = vadd.f32 %v11849_v25, %v4110_v22  ;;  %9755 = vpow2.f32 %v4860_v35  ;;  %v15208_v25 = vld [vmem:[#allocation67_spill] sm:$0xff] }
 0x57a   : > { %v12953_v62 = vpop.xlane.xlu2 %4508  ;;  %v12963_v18 = vpop.xlane.xlu0 %4511  ;;  %15203 = vst [vmem:[#allocation156_spill] sm:$0xff] %v12998_v15  ;;  %v4749_v22 = vsub.f32 %v15208_v25, %v12725_v28  ;;  %v15210_v25 = vld [vmem:[#allocation90_spill] sm:$0xff] }
 0x57b   : > { %15191 = vst [vmem:[#allocation150_spill] sm:$0xff] %v12953_v62  ;;  %v15198_v62 = vld [vmem:[#allocation93_spill] sm:$0xff]  ;;  %5195 = vadd.xlane.f32.xlu1 %v5194_v34  ;;  %v4633_v21 = vsel %vm4329_vm3, %v12995_v3, -inf }
 0x57c   : > { %15195 = vst [vmem:[#allocation154_spill] sm:$0xff] %v12963_v18  ;;  %v4722_v48 = vsub.f32 %v15199_v27, %v15198_v62  ;;  %v12990_v27 = vpop.eup %9753 }
 0x57d   : > { %15202 = vst [vmem:[#allocation19_spill] sm:$0xff] %v12995_v3  ;;  %v5197_v58 = vsel %vm4329_vm3, %v12990_v27, 0.0 }
 0x57e   : > { %v4858_v16 = vmul.f32 1.442695, %v4722_v48 }
 0x57f   : > { %4625 = vmax.xlane.f32.xlu2 %v4624_v19  ;;  %4628 = vmax.xlane.f32.xlu0 %v4627_v57  ;;  %v3661_v19 = vpop.f32.mrf.mxu0  ;;  %v12992_v18 = vpop.xlane.xlu1 %4523  ;;  %v4748_v57 = vsub.f32 %v15205_v46, %v12700_v33  ;;  %v4630_v33 = vsel %vm4329_vm3, %v12998_v15, -inf }
 0x580   : > { %v4111_v48 = vadd.f32 %v12986_v50, %v3661_v19  ;;  %9757 = vpow2.f32 %v4858_v16  ;;  %v4912_v16 = vmul.f32 1.442695, %v4749_v22  ;;  %v13022_v28 = vpop.eup %9755  ;;  %v15214_v22 = vld [vmem:[#allocation95_spill] sm:$0xff] }
 0x581   : > { %v4910_v5 = vmul.f32 1.442695, %v4748_v57  ;;  %v15213_v57 = vld [vmem:[#allocation25_spill] sm:$0xff]  ;;  %v5125_v3 = vsel %vm4329_vm3, %v13022_v28, 0.0 }
 0x582   : > { %v12988_v62 = vpop.xlane.xlu2 %4517  ;;  %v13000_v34 = vpop.xlane.xlu0 %4520 }
 0x583   : > { %15201 = vst [vmem:[#allocation93_spill] sm:$0xff] %v12988_v62  ;;  %v4720_v62 = vsub.f32 %v15207_v32, %v15206_v39  ;;  %4634 = vmax.xlane.f32.xlu1 %v4633_v21  ;;  %v13016_v32 = vadd.f32 %v11861_v41, %v4111_v48  ;;  %9759 = vpow2.f32 %v4910_v5 }
 0x584   : > { %15204 = vst [vmem:[#allocation157_spill] sm:$0xff] %v13000_v34  ;;  %v15211_v34 = vld [vmem:[#allocation14_spill] sm:$0xff] }
 0x585   : > { %v4854_v39 = vmul.f32 1.442695, %v4720_v62  ;;  %15209 = vst [vmem:[#allocation65_spill] sm:$0xff] %v13016_v32  ;;  %v4721_v21 = vsub.f32 %v15211_v34, %v15210_v25  ;;  %v15212_v62 = vld [vmem:[#allocation99_spill] sm:$0xff]  ;;  %v4636_v48 = vsel %vm4329_vm3, %v13016_v32, -inf }
 0x586   : > { %v13026_v46 = vpop.eup %9757  ;;  %v4725_v41 = vsub.f32 %v15213_v57, %v15212_v62 }
 0x587   : > { %5198 = vadd.xlane.f32.xlu2 %v5197_v58  ;;  %4631 = vmax.xlane.f32.xlu0 %v4630_v33  ;;  %v13020_v19 = vpop.xlane.xlu1 %4532  ;;  %9761 = vpow2.f32 %v4854_v39  ;;  %v15215_v33 = vld [vmem:[#allocation20_spill] sm:$0xff]  ;;  %v5122_v8 = vsel %vm4329_vm3, %v13026_v46, 0.0  ;;  %v4856_v34 = vmul.f32 1.442695, %v4721_v21  ;;  %v15219_v21 = vld [vmem:[#allocation31_spill] sm:$0xff] }
 0x588   : > { %v4724_v50 = vsub.f32 %v15215_v33, %v15214_v22  ;;  %9763 = vpow2.f32 %v4912_v16  ;;  %v4864_v5 = vmul.f32 1.442695, %v4725_v41  ;;  %v15217_v33 = vld [vmem:[#allocation69_spill] sm:$0xff] }
 0x589   : > { %v13042_v25 = vpop.eup %9759  ;;  %9765 = vpow2.f32 %v4856_v34 }
 0x58a   : > { %v13018_v35 = vpop.xlane.xlu2 %4526  ;;  %v13024_v58 = vpop.xlane.xlu0 %4529  ;;  %v4862_v62 = vmul.f32 1.442695, %v4724_v50  ;;  %9767 = vpow2.f32 %v4864_v5  ;;  %v5200_v32 = vsel %vm4329_vm3, %v13042_v25, 0.0  ;;  %v15220_v50 = vld [vmem:[#allocation68_spill] sm:$0xff] }
 0x58b   : > { %5126 = vadd.xlane.f32.xlu1 %v5125_v3  ;;  %v4750_v3 = vsub.f32 %v15217_v33, %v12734_v43  ;;  %v4751_v15 = vsub.f32 %v15220_v50, %v12730_v2  ;;  %v15223_v50 = vld [vmem:[#allocation109_spill] sm:$0xff] }
 0x58c   : > { %9769 = vpow2.f32 %v4862_v62  ;;  %v4729_v63 = vsub.f32 %v15224_v51, %v15223_v50 }
 0x58d   : > { %v13046_v22 = vpop.eup %9761  ;;  %v4914_v43 = vmul.f32 1.442695, %v4750_v3  ;;  %v15226_v3 = vld [vmem:[#allocation26_spill] sm:$0xff] }
 0x58e   : > { %15216 = vst [vmem:[#allocation91_spill] sm:$0xff] %v13046_v22  ;;  %v5116_v24 = vsel %vm4329_vm3, %v13046_v22, 0.0  ;;  %v4872_v51 = vmul.f32 1.442695, %v4729_v63  ;;  %v15235_v63 = vld [vmem:[#allocation32_spill] sm:$0xff] }
 0x58f   : > { %4637 = vmax.xlane.f32.xlu2 %v4636_v48  ;;  %5123 = vadd.xlane.f32.xlu0 %v5122_v8  ;;  %v13044_v57 = vpop.xlane.xlu1 %4541  ;;  %v13050_v48 = vpop.eup %9763  ;;  %v15218_v8 = vld [vmem:[#allocation104_spill] sm:$0xff]  ;;  %9771 = vpow2.f32 %v4914_v43 }
 0x590   : > { %v4728_v41 = vsub.f32 %v15219_v21, %v15218_v8  ;;  %v5203_v34 = vsel %vm4329_vm3, %v13050_v48, 0.0  ;;  %v13066_v8 = vpop.eup %9765  ;;  %v4916_v21 = vmul.f32 1.442695, %v4751_v15  ;;  %v15227_v15 = vld [vmem:[#allocation102_spill] sm:$0xff] }
 0x591   : > { %v13070_v47 = vpop.eup %9767  ;;  %v4726_v56 = vsub.f32 %v15228_v4, %v15227_v15  ;;  %v15233_v15 = vld [vmem:[#allocation70_spill] sm:$0xff] }
 0x592   : > { %v13040_v39 = vpop.xlane.xlu2 %4535  ;;  %v13048_v16 = vpop.xlane.xlu0 %4538  ;;  %v4870_v5 = vmul.f32 1.442695, %v4728_v41  ;;  %15221 = vst [vmem:[#allocation15_spill] sm:$0xff] %v13070_v47  ;;  %v5131_v22 = vsel %vm4329_vm3, %v13070_v47, 0.0 }
 0x593   : > { %5117 = vadd.xlane.f32.xlu1 %v5116_v24  ;;  %v15225_v24 = vld [vmem:[#allocation101_spill] sm:$0xff] }
 0x594   : > { %v4727_v41 = vsub.f32 %v15226_v3, %v15225_v24  ;;  %9773 = vpow2.f32 %v4870_v5  ;;  %v4866_v24 = vmul.f32 1.442695, %v4726_v56  ;;  %v15236_v56 = vld [vmem:[#allocation72_spill] sm:$0xff] }
 0x595   : > { %9775 = vpow2.f32 %v4916_v21 }
 0x596   : > { %v4868_v43 = vmul.f32 1.442695, %v4727_v41  ;;  %9777 = vpow2.f32 %v4872_v51 }
 0x597   : > { %5201 = vadd.xlane.f32.xlu2 %v5200_v32  ;;  %5204 = vadd.xlane.f32.xlu0 %v5203_v34  ;;  %v13068_v62 = vpop.xlane.xlu1 %4550  ;;  %v13074_v32 = vpop.eup %9769  ;;  %v5119_v34 = vsel %vm4329_vm3, %v13066_v8, 0.0 }
 0x598   : > { %15222 = vst [vmem:[#allocation67_spill] sm:$0xff] %v13074_v32  ;;  %v5128_v36 = vsel %vm4329_vm3, %v13074_v32, 0.0  ;;  %v13090_v5 = vpop.eup %9771  ;;  %9779 = vpow2.f32 %v4868_v43 }
 0x599   : > { %15229 = vst [vmem:[#allocation90_spill] sm:$0xff] %v13090_v5  ;;  %v5206_v32 = vsel %vm4329_vm3, %v13090_v5, 0.0  ;;  %9781 = vpow2.f32 %v4866_v24 }
 0x59a   : > { %v13064_v33 = vpop.xlane.xlu2 %4544  ;;  %v13072_v2 = vpop.xlane.xlu0 %4547 }
 0x59b   : > { %5132 = vadd.xlane.f32.xlu1 %v5131_v22  ;;  %v13094_v4 = vpop.eup %9773  ;;  %v4752_v22 = vsub.f32 %v15233_v15, %v12749_v29 }
 0x59c   : > { %15231 = vst [vmem:[#allocation99_spill] sm:$0xff] %v13094_v4  ;;  %v5140_v47 = vsel %vm4329_vm3, %v13094_v4, 0.0  ;;  %v15240_v4 = vld [vmem:[#allocation37_spill] sm:$0xff] }
 0x59d   : > { %v4918_v29 = vmul.f32 1.442695, %v4752_v22 }
 0x59f   : > { %5120 = vadd.xlane.f32.xlu2 %v5119_v34  ;;  %5129 = vadd.xlane.f32.xlu0 %v5128_v36  ;;  %v13092_v3 = vpop.xlane.xlu1 %4559  ;;  %v13098_v34 = vpop.eup %9775  ;;  %v15234_v36 = vld [vmem:[#allocation106_spill] sm:$0xff]  ;;  %9783 = vpow2.f32 %v4918_v29 }
 0x5a0   : > { %15230 = vst [vmem:[#allocation14_spill] sm:$0xff] %v13092_v3  ;;  %v4730_v41 = vsub.f32 %v15235_v63, %v15234_v36  ;;  %v4753_v3 = vsub.f32 %v15236_v56, %v12762_v26  ;;  %v5209_v51 = vsel %vm4329_vm3, %v13098_v34, 0.0  ;;  %v13114_v36 = vpop.eup %9777  ;;  %v15239_v56 = vld [vmem:[#allocation111_spill] sm:$0xff] }
 0x5a1   : > { %15232 = vst [vmem:[#allocation25_spill] sm:$0xff] %v13098_v34  ;;  %v13118_v5 = vpop.eup %9779  ;;  %v4731_v34 = vsub.f32 %v15240_v4, %v15239_v56 }
 0x5a2   : > { %v13088_v50 = vpop.xlane.xlu2 %4553  ;;  %v13096_v21 = vpop.xlane.xlu0 %4556  ;;  %v4874_v43 = vmul.f32 1.442695, %v4730_v41  ;;  %v4920_v63 = vmul.f32 1.442695, %v4753_v3  ;;  %v5143_v41 = vsel %vm4329_vm3, %v13114_v36, 0.0  ;;  %v15242_v3 = vld [vmem:[#allocation71_spill] sm:$0xff] }
 0x5a3   : > { %5141 = vadd.xlane.f32.xlu1 %v5140_v47  ;;  %v15241_v47 = vld [vmem:[#allocation73_spill] sm:$0xff]  ;;  %v4876_v4 = vmul.f32 1.442695, %v4731_v34  ;;  %v15250_v34 = vld [vmem:[#allocation114_spill] sm:$0xff] }
 0x5a4   : > { %9785 = vpow2.f32 %v4874_v43  ;;  %v4755_v22 = vsub.f32 %v15241_v47, %v12783_v60 }
 0x5a5   : > { %9787 = vpow2.f32 %v4920_v63 }
 0x5a6   : > { %v4924_v29 = vmul.f32 1.442695, %v4755_v22  ;;  %9789 = vpow2.f32 %v4876_v4 }
 0x5a7   : > { %5207 = vadd.xlane.f32.xlu2 %v5206_v32  ;;  %5210 = vadd.xlane.f32.xlu0 %v5209_v51  ;;  %v13116_v24 = vpop.xlane.xlu1 %4568  ;;  %v13122_v32 = vpop.eup %9781  ;;  %v4754_v51 = vsub.f32 %v15242_v3, %v12754_v20  ;;  %v15249_v3 = vld [vmem:[#allocation112_spill] sm:$0xff] }
 0x5a8   : > { %15237 = vst [vmem:[#allocation95_spill] sm:$0xff] %v13116_v24  ;;  %v5134_v24 = vsel %vm4329_vm3, %v13122_v32, 0.0  ;;  %v13138_v60 = vpop.eup %9783  ;;  %9791 = vpow2.f32 %v4924_v29 }
 0x5a9   : > { %15244 = vst [vmem:[#allocation104_spill] sm:$0xff] %v13138_v60  ;;  %v4922_v56 = vmul.f32 1.442695, %v4754_v51  ;;  %v15252_v51 = vld [vmem:[#allocation117_spill] sm:$0xff] }
 0x5aa   : > { %v13112_v15 = vpop.xlane.xlu2 %4562  ;;  %v13120_v26 = vpop.xlane.xlu0 %4565 }
 0x5ab   : > { %15238 = vst [vmem:[#allocation20_spill] sm:$0xff] %v13120_v26  ;;  %v5137_v26 = vsel %vm4329_vm3, %v13118_v5, 0.0  ;;  %v13142_v47 = vpop.eup %9785  ;;  %9793 = vpow2.f32 %v4922_v56 }
 0x5ac   : > { %5138 = vadd.xlane.f32.xlu1 %v5137_v26  ;;  %15246 = vst [vmem:[#allocation68_spill] sm:$0xff] %v13142_v47  ;;  %v4778_v26 = vsub.f32 %v15249_v3, %v12992_v18 }
 0x5ae   : > { %v4970_v18 = vmul.f32 1.442695, %v4778_v26 }
 0x5af   : > { %5144 = vadd.xlane.f32.xlu2 %v5143_v41  ;;  %5135 = vadd.xlane.f32.xlu0 %v5134_v24  ;;  %v13140_v63 = vpop.xlane.xlu1 %4577  ;;  %v13146_v41 = vpop.eup %9787  ;;  %v15251_v24 = vld [vmem:[#allocation39_spill] sm:$0xff] }
 0x5b0   : > { %15245 = vst [vmem:[#allocation31_spill] sm:$0xff] %v13140_v63  ;;  %v4732_v22 = vsub.f32 %v15251_v24, %v15250_v34  ;;  %v4779_v63 = vsub.f32 %v15252_v51, %v13018_v35  ;;  %v5215_v4 = vsel %vm4329_vm3, %v13146_v41, 0.0  ;;  %v13162_v29 = vpop.eup %9789  ;;  %v15256_v51 = vld [vmem:[#allocation113_spill] sm:$0xff]  ;;  %9795 = vpow2.f32 %v4970_v18 }
 0x5b1   : > { %15248 = vst [vmem:[#allocation33_spill] sm:$0xff] %v13146_v41 }
 0x5b2   : > { %v13136_v43 = vpop.xlane.xlu2 %4571  ;;  %v13144_v20 = vpop.xlane.xlu0 %4574  ;;  %v4878_v3 = vmul.f32 1.442695, %v4732_v22  ;;  %v4972_v24 = vmul.f32 1.442695, %v4779_v63  ;;  %v5149_v22 = vsel %vm4329_vm3, %v13162_v29, 0.0  ;;  %v15259_v63 = vld [vmem:[#allocation75_spill] sm:$0xff] }
 0x5b3   : > { %15243 = vst [vmem:[#allocation69_spill] sm:$0xff] %v13136_v43  ;;  %v5212_v43 = vsel %vm4329_vm3, %v13138_v60, 0.0  ;;  %v13166_v60 = vpop.eup %9791 }
 0x5b4   : > { %15247 = vst [vmem:[#allocation109_spill] sm:$0xff] %v13144_v20  ;;  %v5146_v20 = vsel %vm4329_vm3, %v13142_v47, 0.0  ;;  %v15257_v47 = vld [vmem:[#allocation38_spill] sm:$0xff]  ;;  %9797 = vpow2.f32 %v4878_v3 }
 0x5b5   : > { %5147 = vadd.xlane.f32.xlu1 %v5146_v20  ;;  %v4733_v41 = vsub.f32 %v15257_v47, %v15256_v51  ;;  %v15258_v20 = vld [vmem:[#allocation74_spill] sm:$0xff]  ;;  %9799 = vpow2.f32 %v4972_v24 }
 0x5b6   : > { %v4757_v26 = vsub.f32 %v15258_v20, %v12788_v31  ;;  %v15261_v20 = vld [vmem:[#allocation8_spill] sm:$0xff] }
 0x5b7   : > { %5213 = vadd.xlane.f32.xlu2 %v5212_v43  ;;  %5216 = vadd.xlane.f32.xlu0 %v5215_v4  ;;  %v13164_v56 = vpop.xlane.xlu1 %4586  ;;  %v13170_v43 = vpop.eup %9793  ;;  %v4756_v4 = vsub.f32 %v15259_v63, %v12790_v44  ;;  %v4880_v47 = vmul.f32 1.442695, %v4733_v41  ;;  %v4780_v44 = vsub.f32 %v15261_v20, %v13024_v58  ;;  %v15265_v41 = vld [vmem:[#allocation116_spill] sm:$0xff]  ;;  %v15267_v58 = vld [vmem:[#allocation119_spill] sm:$0xff] }
 0x5b8   : > { %15254 = vst [vmem:[#allocation26_spill] sm:$0xff] %v13164_v56  ;;  %v5218_v56 = vsel %vm4329_vm3, %v13170_v43, 0.0  ;;  %v4928_v18 = vmul.f32 1.442695, %v4757_v26  ;;  %v13186_v31 = vpop.eup %9795  ;;  %v4781_v20 = vsub.f32 %v15267_v58, %v13020_v19  ;;  %v15272_v58 = vld [vmem:[#allocation120_spill] sm:$0xff] }
 0x5b9   : > { %v4926_v51 = vmul.f32 1.442695, %v4756_v4  ;;  %9801 = vpow2.f32 %v4880_v47  ;;  %v5290_v26 = vsel %vm4329_vm3, %v13186_v31, 0.0  ;;  %v4974_v4 = vmul.f32 1.442695, %v4780_v44 }
 0x5ba   : > { %v13160_v34 = vpop.xlane.xlu2 %4580  ;;  %v13168_v35 = vpop.xlane.xlu0 %4583  ;;  %9803 = vpow2.f32 %v4928_v18 }
 0x5bb   : > { %15253 = vst [vmem:[#allocation101_spill] sm:$0xff] %v13160_v34  ;;  %9805 = vpow2.f32 %v4926_v51  ;;  %v4976_v51 = vmul.f32 1.442695, %v4781_v20 }
 0x5bc   : > { %15255 = vst [vmem:[#allocation102_spill] sm:$0xff] %v13168_v35  ;;  %v5221_v35 = vsel %vm4329_vm3, %v13166_v60, 0.0  ;;  %9807 = vpow2.f32 %v4974_v4  ;;  %v15275_v4 = vld [vmem:[#allocation76_spill] sm:$0xff] }
 0x5bd   : > { %5222 = vadd.xlane.f32.xlu1 %v5221_v35  ;;  %v4758_v20 = vsub.f32 %v15275_v4, %v12805_v30  ;;  %v15278_v4 = vld [vmem:[#allocation121_spill] sm:$0xff] }
 0x5bf   : > { %5150 = vadd.xlane.f32.xlu2 %v5149_v22  ;;  %5219 = vadd.xlane.f32.xlu0 %v5218_v56  ;;  %v13190_v24 = vpop.xlane.xlu1 %4595  ;;  %v13192_v22 = vpop.eup %9797  ;;  %v15266_v56 = vld [vmem:[#allocation43_spill] sm:$0xff] }
 0x5c0   : > { %15262 = vst [vmem:[#allocation70_spill] sm:$0xff] %v13190_v24  ;;  %v13196_v34 = vpop.eup %9799  ;;  %v4734_v35 = vsub.f32 %v15266_v56, %v15265_v41  ;;  %v5152_v24 = vsel %vm4329_vm3, %v13192_v22, 0.0 }
 0x5c1   : > { %15263 = vst [vmem:[#allocation106_spill] sm:$0xff] %v13192_v22  ;;  %v13210_v18 = vpop.eup %9801 }
 0x5c2   : > { %v13184_v3 = vpop.xlane.xlu2 %4589  ;;  %v13194_v63 = vpop.xlane.xlu0 %4592  ;;  %v4882_v47 = vmul.f32 1.442695, %v4734_v35  ;;  %15269 = vst [vmem:[#allocation111_spill] sm:$0xff] %v13210_v18  ;;  %v5155_v35 = vsel %vm4329_vm3, %v13210_v18, 0.0  ;;  %v4930_v18 = vmul.f32 1.442695, %v4758_v20 }
 0x5c3   : > { %15260 = vst [vmem:[#allocation27_spill] sm:$0xff] %v13184_v3  ;;  %v13212_v56 = vpop.eup %9803  ;;  %v15273_v3 = vld [vmem:[#allocation45_spill] sm:$0xff] }
 0x5c4   : > { %15264 = vst [vmem:[#allocation32_spill] sm:$0xff] %v13194_v63  ;;  %v5293_v63 = vsel %vm4329_vm3, %v13196_v34, 0.0  ;;  %v4735_v22 = vsub.f32 %v15273_v3, %v15272_v58 }
 0x5c5   : > { %5153 = vadd.xlane.f32.xlu1 %v5152_v24  ;;  %15270 = vst [vmem:[#allocation37_spill] sm:$0xff] %v13212_v56  ;;  %v15274_v24 = vld [vmem:[#allocation80_spill] sm:$0xff] }
 0x5c7   : > { %5291 = vadd.xlane.f32.xlu2 %v5290_v26  ;;  %5294 = vadd.xlane.f32.xlu0 %v5293_v63  ;;  %v5103_v44 = vpop.xlane.xlu1 %5102  ;;  %v13214_v26 = vpop.eup %9805  ;;  %v4759_v63 = vsub.f32 %v15274_v24, %v12814_v6 }
 0x5c8   : > { %9809 = vrcp.f32 %v5103_v44  ;;  %15271 = vst [vmem:[#allocation73_spill] sm:$0xff] %v13214_v26  ;;  %v5227_v44 = vsel %vm4329_vm3, %v13212_v56, 0.0  ;;  %v13228_v3 = vpop.eup %9807 }
 0x5ca   : > { %v13208_v41 = vpop.xlane.xlu2 %4598  ;;  %v5100_v19 = vpop.xlane.xlu0 %5099 }
 0x5cb   : > { %15268 = vst [vmem:[#allocation72_spill] sm:$0xff] %v13208_v41  ;;  %9811 = vrcp.f32 %v5100_v19  ;;  %v5224_v41 = vsel %vm4329_vm3, %v13214_v26, 0.0  ;;  %v4932_v19 = vmul.f32 1.442695, %v4759_v63  ;;  %v4782_v26 = vsub.f32 %v15278_v4, %v13040_v39  ;;  %v15280_v63 = vld [vmem:[#allocation118_spill] sm:$0xff] }
 0x5cc   : > { %9813 = vpow2.f32 %v4882_v47  ;;  %v4884_v47 = vmul.f32 1.442695, %v4735_v22  ;;  %v4783_v39 = vsub.f32 %v12624_v1, %v13048_v16  ;;  %v9496_v1 = vld [vmem:[#allocation4 + $0x118] sm:$0xff] }
 0x5cd   : > { %9815 = vpow2.f32 %v4976_v51  ;;  %5228 = vadd.xlane.f32.xlu1 %v5227_v44 }
 0x5ce   : > { %v9810_v6 = vpop.eup %9809  ;;  %9817 = vpow2.f32 %v4884_v47 }
 0x5cf   : > { %5156 = vadd.xlane.f32.xlu2 %v5155_v35  ;;  %5225 = vadd.xlane.f32.xlu0 %v5224_v41  ;;  %v5611_v30 = vmul.f32 %v9810_v6, %v12812_v49  ;;  %v13233_v51 = vpop.xlane.xlu1 %4607  ;;  %9819 = vpow2.f32 %v4932_v19  ;;  %v5296_v6 = vsel %vm4329_vm3, %v13228_v3, 0.0 }
 0x5d0   : > { %15277 = vst [vmem:[#allocation112_spill] sm:$0xff] %v13233_v51  ;;  %9821 = vpow2.f32 %v4930_v18  ;;  %v4980_v18 = vmul.f32 1.442695, %v4783_v39 }
 0x5d1   : > { %v9812_v24 = vpop.eup %9811  ;;  %v5739_v41 = vpack.c.bf16 %v5611_v30, %v5611_v30 }
 0x5d2   : > { %v13230_v58 = vpop.xlane.xlu2 %4601  ;;  %v13235_v35 = vpop.eup %9813  ;;  %v5610_v44 = vmul.f32 %v9812_v24, %v12816_v14  ;;  %v4978_v24 = vmul.f32 1.442695, %v4782_v26  ;;  %v15284_v26 = vld [vmem:[#allocation49_spill] sm:$0xff] }
 0x5d3   : > { %15276 = vst [vmem:[#allocation71_spill] sm:$0xff] %v13230_v58  ;;  %v13240_v56 = vpop.xlane.xlu0 %4604  ;;  %v13242_v22 = vpop.eup %9815  ;;  %v15281_v58 = vld [vmem:[#allocation44_spill] sm:$0xff]  ;;  %v5875_v4 = vunpack.c.l.b16 %v5739_v41  ;;  %v5158_v14 = vsel %vm4329_vm3, %v13235_v35, 0.0 }
 0x5d4   : > { %15279 = vst [vmem:[#allocation114_spill] sm:$0xff] %v13240_v56  ;;  %v4736_v20 = vsub.f32 %v15281_v58, %v15280_v63  ;;  %v5738_v49 = vpack.c.bf16 %v5610_v44, %v5610_v44  ;;  %v5299_v30 = vsel %vm4329_vm3, %v13242_v22, 0.0  ;;  %v13254_v63 = vpop.eup %9817 }
 0x5d5   : > { %5159 = vadd.xlane.f32.xlu1 %v5158_v14  ;;  %v13258_v41 = vpop.eup %9819 }
 0x5d6   : > { %v5874_v47 = vunpack.c.l.b16 %v5738_v49  ;;  %v4886_v19 = vmul.f32 1.442695, %v4736_v20  ;;  %v13263_v14 = vpop.eup %9821  ;;  %v15285_v20 = vld [vmem:[#allocation82_spill] sm:$0xff] }
 0x5d7   : > { %5297 = vadd.xlane.f32.xlu2 %v5296_v6  ;;  %5300 = vadd.xlane.f32.xlu0 %v5299_v30  ;;  %v13256_v16 = vpop.xlane.xlu1 %4610  ;;  %v15283_v6 = vld [vmem:[#allocation122_spill] sm:$0xff]  ;;  %v4761_v39 = vsub.f32 %v15285_v20, %v12836_v9  ;;  %v9494_v20 = vld [vmem:[#allocation4 + $0x108] sm:$0xff] }
 0x5d8   : > { %v5882_v58 = vpack.c.b16 %v5875_v4, %v5874_v47  ;;  %15282 = vst [vmem:[#allocation39_spill] sm:$0xff] %v13256_v16  ;;  %v4737_v49 = vsub.f32 %v15284_v26, %v15283_v6  ;;  %v5161_v4 = vsel %vm4329_vm3, %v13254_v63, 0.0  ;;  %v15286_v47 = vld [vmem:[#allocation78_spill] sm:$0xff]  ;;  %v15289_v16 = vld [vmem:[#allocation124_spill] sm:$0xff] }
 0x5d9   : > { %v4760_v30 = vsub.f32 %v15286_v47, %v12810_v0 }
 0x5da   : > { %v5106_v44 = vpop.xlane.xlu2 %5105  ;;  %8919 = vmatmul.msk.bf16.vlgmr.msra.gmra.mxu0 %vm4329_vm3, %v5882_v58  ;;  %v5233_v58 = vsel %vm4329_vm3, %v13258_v41, 0.0 }
 0x5db   : > { %9823 = vrcp.f32 %v5106_v44  ;;  %v5109_v51 = vpop.xlane.xlu0 %5108  ;;  %6606 = vmatpush.bf16.msra.mxu0 %v9496_v1  ;;  %v4888_v44 = vmul.f32 1.442695, %v4737_v49  ;;  %v4936_v1 = vmul.f32 1.442695, %v4761_v39  ;;  %v4934_v26 = vmul.f32 1.442695, %v4760_v30 }
 0x5dc   : > { %9825 = vpow2.f32 %v4978_v24  ;;  %v9495_v24 = vld [vmem:[#allocation4 + $0x110] sm:$0xff]  ;;  %v15290_v39 = vld [vmem:[#allocation51_spill] sm:$0xff] }
 0x5dd   : > { %9827 = vrcp.f32 %v5109_v51  ;;  %v5230_v51 = vsel %vm4329_vm3, %v13263_v14, 0.0  ;;  %5234 = vadd.xlane.f32.xlu1 %v5233_v58  ;;  %v4738_v56 = vsub.f32 %v15290_v39, %v15289_v16 }
 0x5de   : > { %9829 = vpow2.f32 %v4886_v19 }
 0x5df   : > { %9831 = vpow2.f32 %v4980_v18  ;;  %5162 = vadd.xlane.f32.xlu2 %v5161_v4  ;;  %6607 = vmatpush.bf16.msra.mxu0 %v9495_v24  ;;  %v5112_v4 = vpop.xlane.xlu1 %5111 }
 0x5e0   : > { %5231 = vadd.xlane.f32.xlu0 %v5230_v51  ;;  %9833 = vpow2.f32 %v4888_v44 }
 0x5e1   : > { %v9824_v19 = vpop.eup %9823  ;;  %9835 = vrcp.f32 %v5112_v4 }
 0x5e2   : > { %v13275_v9 = vpop.eup %9825  ;;  %v13277_v6 = vpop.xlane.xlu2 %4613  ;;  %v5612_v0 = vmul.f32 %v9824_v19, %v12861_v54  ;;  %v4784_v54 = vsub.f32 %v12617_v13, %v13044_v57  ;;  %9837 = vpow2.f32 %v4936_v1 }
 0x5e3   : > { %15287 = vst [vmem:[#allocation117_spill] sm:$0xff] %v13277_v6  ;;  %v9828_v18 = vpop.eup %9827  ;;  %v13282_v49 = vpop.xlane.xlu0 %4616  ;;  %6608 = vmatpush.bf16.msra.mxu0 %v9494_v20  ;;  %v5302_v30 = vsel %vm4329_vm3, %v13275_v9, 0.0  ;;  %9839 = vpow2.f32 %v4934_v26  ;;  %v4890_v20 = vmul.f32 1.442695, %v4738_v56 }
 0x5e4   : > { %v13280_v47 = vpop.eup %9829  ;;  %15288 = vst [vmem:[#allocation113_spill] sm:$0xff] %v13282_v49  ;;  %v5613_v58 = vmul.f32 %v9828_v18, %v12870_v17  ;;  %v5740_v24 = vpack.c.bf16 %v5612_v0, %v5612_v0  ;;  %v4785_v17 = vsub.f32 %v12644_v55, %v13064_v33  ;;  %v9493_v0 = vld [vmem:[#allocation4 + $0x100] sm:$0xff]  ;;  %v4982_v1 = vmul.f32 1.442695, %v4784_v54  ;;  %v15291_v55 = vld [vmem:[#allocation123_spill] sm:$0xff] }
 0x5e5   : > { %v13285_v51 = vpop.eup %9831  ;;  %v5164_v16 = vsel %vm4329_vm3, %v13280_v47, 0.0  ;;  %v15292_v33 = vld [vmem:[#allocation50_spill] sm:$0xff] }
 0x5e6   : > { %v5741_v44 = vpack.c.bf16 %v5613_v58, %v5613_v58  ;;  %v5876_v19 = vunpack.c.l.b16 %v5740_v24  ;;  %v5305_v13 = vsel %vm4329_vm3, %v13285_v51, 0.0  ;;  %5165 = vadd.xlane.f32.xlu1 %v5164_v16  ;;  %v13299_v18 = vpop.eup %9833  ;;  %v4739_v24 = vsub.f32 %v15292_v33, %v15291_v55 }
 0x5e7   : > { %5303 = vadd.xlane.f32.xlu2 %v5302_v30  ;;  %6609 = vmatpush.bf16.msra.mxu0 %v9493_v0  ;;  %v9836_v58 = vpop.eup %9835  ;;  %v4984_v39 = vmul.f32 1.442695, %v4785_v17  ;;  %v13303_v30 = vpop.xlane.xlu1 %4622 }
 0x5e8   : > { %v5877_v57 = vunpack.c.l.b16 %v5741_v44  ;;  %5306 = vadd.xlane.f32.xlu0 %v5305_v13  ;;  %v13305_v6 = vpop.eup %9837  ;;  %v15293_v44 = vld [vmem:[#allocation84_spill] sm:$0xff]  ;;  %v5614_v17 = vmul.f32 %v9836_v58, %v12894_v42  ;;  %v4892_v16 = vmul.f32 1.442695, %v4739_v24  ;;  %v15294_v13 = vld [vmem:[#allocation85_spill] sm:$0xff] }
 0x5e9   : > { %v4763_v54 = vsub.f32 %v15293_v44, %v12843_v7  ;;  %v13312_v56 = vpop.eup %9839  ;;  %v5239_v7 = vsel %vm4329_vm3, %v13305_v6, 0.0 }
 0x5ea   : > { %v5115_v26 = vpop.xlane.xlu2 %5114  ;;  %v5883_v4 = vpack.c.b16 %v5877_v57, %v5876_v19  ;;  %v5167_v19 = vsel %vm4329_vm3, %v13299_v18, 0.0  ;;  %v4762_v57 = vsub.f32 %v15294_v13, %v12845_v53  ;;  %v5742_v58 = vpack.c.bf16 %v5614_v17, %v5614_v17 }
 0x5eb   : > { %9841 = vrcp.f32 %v5115_v26  ;;  %v13309_v0 = vpop.xlane.xlu0 %4619  ;;  %v4940_v26 = vmul.f32 1.442695, %v4763_v54 }
 0x5ec   : > { %8920 = vmatmul.msk.bf16.gmra.mxu0 %vm4329_vm3, %v5883_v4  ;;  %9843 = vpow2.f32 %v4982_v1  ;;  %v5236_v4 = vsel %vm4329_vm3, %v13312_v56, 0.0  ;;  %v4938_v53 = vmul.f32 1.442695, %v4762_v57  ;;  %v5878_v17 = vunpack.c.l.b16 %v5742_v58  ;;  %v15297_v58 = vld [vmem:[#allocation125_spill] sm:$0xff] }
 0x5ed   : > { %9845 = vpow2.f32 %v4890_v20 }
 0x5ee   : > { %9847 = vpow2.f32 %v4984_v39  ;;  %5240 = vadd.xlane.f32.xlu1 %v5239_v7 }
 0x5ef   : > { %5168 = vadd.xlane.f32.xlu2 %v5167_v19  ;;  %9849 = vpow2.f32 %v4892_v16  ;;  %v5196_v33 = vpop.xlane.xlu1 %5195  ;;  %v4787_v19 = vsub.f32 %v12649_v61, %v13068_v62  ;;  %v15295_v16 = vld [vmem:[#allocation127_spill] sm:$0xff]  ;;  %v13347_v61 = vunpack.c.h.bf16 %v12978_v38 }
 0x5f0   : > { %5237 = vadd.xlane.f32.xlu0 %v5236_v4  ;;  %9851 = vpow2.f32 %v4940_v26  ;;  %v4786_v57 = vsub.f32 %v15295_v16, %v13072_v2  ;;  %v15298_v2 = vld [vmem:[#allocation55_spill] sm:$0xff] }
 0x5f1   : > { %v9842_v1 = vpop.eup %9841  ;;  %9853 = vrcp.f32 %v5196_v33  ;;  %15296 = vst [vmem:[#allocation38_spill] sm:$0xff] %v13347_v61  ;;  %v4988_v33 = vmul.f32 1.442695, %v4787_v19 }
 0x5f2   : > { %v13323_v20 = vpop.xlane.xlu2 %4625  ;;  %v5615_v42 = vmul.f32 %v9842_v1, %v12922_v45  ;;  %v13326_v55 = vpop.eup %9843  ;;  %9855 = vpow2.f32 %v4938_v53  ;;  %v4740_v53 = vsub.f32 %v15298_v2, %v15297_v58  ;;  %v4986_v16 = vmul.f32 1.442695, %v4786_v57  ;;  %v15299_v2 = vld [vmem:[#allocation12_spill] sm:$0xff] }
 0x5f3   : > { %v13328_v24 = vpop.eup %9845  ;;  %v13330_v39 = vpop.xlane.xlu0 %4628  ;;  %v5308_v45 = vsel %vm4329_vm3, %v13326_v55, 0.0 }
 0x5f4   : > { %v5743_v44 = vpack.c.bf16 %v5615_v42, %v5615_v42  ;;  %v13332_v54 = vpop.eup %9847  ;;  %v5170_v7 = vsel %vm4329_vm3, %v13328_v24, 0.0  ;;  %v3663_v42 = vpop.f32.mrf.mxu0  ;;  %v4894_v49 = vmul.f32 1.442695, %v4740_v53  ;;  %v15300_v53 = vld [vmem:[#allocation128_spill] sm:$0xff] }
 0x5f5   : > { %v5311_v26 = vsel %vm4329_vm3, %v13332_v54, 0.0  ;;  %v13344_v1 = vpop.eup %9849 }
 0x5f6   : > { %v5879_v13 = vunpack.c.l.b16 %v5743_v44  ;;  %5171 = vadd.xlane.f32.xlu1 %v5170_v7  ;;  %v13349_v62 = vpop.eup %9851  ;;  %v4810_v7 = vsub.f32 %v12930_v40, %v13309_v0  ;;  %v5173_v57 = vsel %vm4329_vm3, %v13344_v1, 0.0  ;;  %v4811_v0 = vsub.f32 %v12927_v11, %v13303_v30 }
 0x5f7   : > { %5309 = vadd.xlane.f32.xlu2 %v5308_v45  ;;  %v9854_v45 = vpop.eup %9853 }
 0x5f8   : > { %v5884_v4 = vpack.c.b16 %v5879_v13, %v5878_v17  ;;  %5312 = vadd.xlane.f32.xlu0 %v5311_v26  ;;  %v13355_v17 = vpop.xlane.xlu1 %4634  ;;  %v13360_v38 = vpop.eup %9855  ;;  %v4112_v26 = vadd.f32 %v13347_v61, %v3663_v42  ;;  %v5642_v19 = vmul.f32 %v9854_v45, %v12959_v52  ;;  %v5034_v40 = vmul.f32 1.442695, %v4810_v7 }
 0x5f9   : > { %v5242_v58 = vsel %vm4329_vm3, %v13360_v38, 0.0 }
 0x5fa   : > { %v5199_v44 = vpop.xlane.xlu2 %5198  ;;  %v13373_v52 = vadd.f32 %v15299_v2, %v4112_v26  ;;  %v5770_v45 = vpack.c.bf16 %v5642_v19, %v5642_v19  ;;  %v15302_v19 = vld [vmem:[#allocation92_spill] sm:$0xff] }
 0x5fb   : > { %9857 = vrcp.f32 %v5199_v44  ;;  %v13357_v13 = vpop.xlane.xlu0 %4631 }
 0x5fc   : > { %8921 = vmatmul.msk.bf16.gmra.mxu0 %vm4329_vm3, %v5884_v4  ;;  %9859 = vpow2.f32 %v4988_v33  ;;  %v5245_v4 = vsel %vm4329_vm3, %v13349_v62, 0.0  ;;  %v15301_v33 = vld [vmem:[#allocation57_spill] sm:$0xff] }
 0x5fd   : > { %9861 = vpow2.f32 %v4986_v16  ;;  %v4741_v44 = vsub.f32 %v15301_v33, %v15300_v53  ;;  %v5036_v16 = vmul.f32 1.442695, %v4811_v0  ;;  %v15304_v53 = vld [vmem:[#allocation87_spill] sm:$0xff] }
 0x5fe   : > { %5246 = vadd.xlane.f32.xlu1 %v5245_v4  ;;  %9863 = vpow2.f32 %v4894_v49  ;;  %v4639_v49 = vsel %vm4329_vm3, %v13373_v52, -inf  ;;  %v4764_v33 = vsub.f32 %v15304_v53, %v12859_v59  ;;  %v9512_v59 = vld [vmem:[#allocation4 + $0x198] sm:$0xff] }
 0x5ff   : > { %5174 = vadd.xlane.f32.xlu2 %v5173_v57  ;;  %9865 = vpow2.f32 %v5034_v40  ;;  %v4896_v26 = vmul.f32 1.442695, %v4741_v44 }
 0x600   : > { %5243 = vadd.xlane.f32.xlu0 %v5242_v58  ;;  %v5127_v7 = vpop.xlane.xlu1 %5126 }
 0x601   : > { %v9858_v42 = vpop.eup %9857  ;;  %9867 = vrcp.f32 %v5127_v7  ;;  %v4788_v7 = vsub.f32 %v12670_v37, %v13088_v50 }
 0x602   : > { %v5643_v11 = vmul.f32 %v9858_v42, %v12990_v27  ;;  %v13378_v30 = vpop.xlane.xlu2 %4637  ;;  %v13380_v57 = vpop.eup %9859  ;;  %v4765_v27 = vsub.f32 %v15302_v19, %v12868_v10  ;;  %v6214_v42 = vunpack.c.l.b16 %v5770_v45 }
 0x603   : > { %v5124_v61 = vpop.xlane.xlu0 %5123  ;;  %v13382_v58 = vpop.eup %9861  ;;  %v5317_v40 = vsel %vm4329_vm3, %v13380_v57, 0.0  ;;  %v4990_v37 = vmul.f32 1.442695, %v4788_v7  ;;  %v4789_v7 = vsub.f32 %v12682_v12, %v13096_v21 }
 0x604   : > { %v5771_v4 = vpack.c.bf16 %v5643_v11, %v5643_v11  ;;  %9869 = vrcp.f32 %v5124_v61  ;;  %v13390_v0 = vpop.eup %9863  ;;  %v5314_v11 = vsel %vm4329_vm3, %v13382_v58, 0.0  ;;  %v3739_v45 = vpop.f32.mrf.mxu1 }
 0x605   : > { %9871 = vpow2.f32 %v5036_v16  ;;  %15303 = vst [vmem:[#allocation74_spill] sm:$0xff] %v13390_v0  ;;  %v13396_v44 = vpop.eup %9865  ;;  %v4944_v16 = vmul.f32 1.442695, %v4765_v27 }
 0x606   : > { %v6215_v2 = vunpack.c.l.b16 %v5771_v4  ;;  %5318 = vadd.xlane.f32.xlu1 %v5317_v40  ;;  %9873 = vpow2.f32 %v4896_v26 }
 0x607   : > { %4640 = vmax.xlane.f32.xlu2 %v4639_v49  ;;  %v9868_v10 = vpop.eup %9867 }
 0x608   : > { %v6222_v61 = vpack.c.b16 %v6215_v2, %v6214_v42  ;;  %5315 = vadd.xlane.f32.xlu0 %v5314_v11  ;;  %v5619_v19 = vmul.f32 %v9868_v10, %v13022_v28  ;;  %v5118_v42 = vpop.xlane.xlu1 %5117  ;;  %v4942_v2 = vmul.f32 1.442695, %v4764_v33  ;;  %v5386_v28 = vsel %vm4329_vm3, %v13396_v44, 0.0  ;;  %v9511_v33 = vld [vmem:[#allocation4 + $0x190] sm:$0xff] }
 0x60a   : > { %v5202_v4 = vpop.xlane.xlu2 %5201  ;;  %v9870_v49 = vpop.eup %9869  ;;  %v5747_v26 = vpack.c.bf16 %v5619_v19, %v5619_v19 }
 0x60b   : > { %9875 = vrcp.f32 %v5202_v4  ;;  %v5618_v40 = vmul.f32 %v9870_v49, %v13026_v46  ;;  %v5205_v53 = vpop.xlane.xlu0 %5204  ;;  %v13403_v11 = vpop.eup %9871  ;;  %v5176_v46 = vsel %vm4329_vm3, %v13390_v0, 0.0 }
 0x60c   : > { %8999 = vmatmul.msk.bf16.vlgmr.msrb.gmra.mxu0 %vm4329_vm3, %v6222_v61  ;;  %9877 = vrcp.f32 %v5118_v42  ;;  %v5960_v27 = vunpack.c.l.b16 %v5747_v26  ;;  %v13409_v10 = vpop.eup %9873  ;;  %v5389_v4 = vsel %vm4329_vm3, %v13403_v11, 0.0  ;;  %v9510_v26 = vld [vmem:[#allocation4 + $0x188] sm:$0xff] }
 0x60d   : > { %9879 = vrcp.f32 %v5205_v53  ;;  %6946 = vmatpush.bf16.msrb.mxu0 %v9512_v59  ;;  %v5746_v50 = vpack.c.bf16 %v5618_v40, %v5618_v40  ;;  %15305 = vst [vmem:[#allocation75_spill] sm:$0xff] %v13409_v10  ;;  %v9500_v53 = vld [vmem:[#allocation4 + $0x138] sm:$0xff] }
 0x60e   : > { %9881 = vpow2.f32 %v4944_v16  ;;  %5177 = vadd.xlane.f32.xlu1 %v5176_v46  ;;  %v3741_v46 = vpop.f32.mrf.mxu1 }
 0x60f   : > { %5387 = vadd.xlane.f32.xlu2 %v5386_v28  ;;  %9883 = vpow2.f32 %v4942_v2  ;;  %v5959_v61 = vunpack.c.l.b16 %v5746_v50  ;;  %v4113_v2 = vadd.f32 %v12896_v23, %v3739_v45 }
 0x610   : > { %5390 = vadd.xlane.f32.xlu0 %v5389_v4  ;;  %9885 = vpow2.f32 %v4990_v37  ;;  %v5133_v50 = vpop.xlane.xlu1 %5132  ;;  %v4992_v37 = vmul.f32 1.442695, %v4789_v7  ;;  %v15309_v4 = vld [vmem:[#allocation91_spill] sm:$0xff] }
 0x611   : > { %v9876_v16 = vpop.eup %9875  ;;  %6947 = vmatpush.bf16.msrb.mxu0 %v9511_v33  ;;  %v5967_v19 = vpack.c.b16 %v5960_v27, %v5959_v61  ;;  %v15308_v27 = vld [vmem:[#allocation155_spill] sm:$0xff] }
 0x612   : > { %v9878_v49 = vpop.eup %9877  ;;  %v5644_v59 = vmul.f32 %v9876_v16, %v13042_v25  ;;  %v5121_v42 = vpop.xlane.xlu2 %5120  ;;  %v5179_v25 = vsel %vm4329_vm3, %v13409_v10, 0.0  ;;  %v4813_v33 = vsub.f32 %v15308_v27, %v13330_v39  ;;  %v15314_v27 = vld [vmem:[#allocation56_spill] sm:$0xff]  ;;  %v15317_v10 = vld [vmem:[#allocation15_spill] sm:$0xff] }
 0x613   : > { %v9880_v40 = vpop.eup %9879  ;;  %9887 = vrcp.f32 %v5121_v42  ;;  %v5130_v21 = vpop.xlane.xlu0 %5129  ;;  %8939 = vmatmul.msk.bf16.vlgmr.msra.gmra.mxu1 %vm4329_vm3, %v5967_v19  ;;  %v5616_v16 = vmul.f32 %v9878_v49, %v15309_v4  ;;  %v15311_v19 = vld [vmem:[#allocation13_spill] sm:$0xff] }
 0x614   : > { %v13417_v28 = vpop.eup %9881  ;;  %v5772_v0 = vpack.c.bf16 %v5644_v59, %v5644_v59  ;;  %v5645_v12 = vmul.f32 %v9880_v40, %v13050_v48  ;;  %9889 = vrcp.f32 %v5133_v50  ;;  %6691 = vmatpush.bf16.msra.mxu1 %v9500_v53  ;;  %v15310_v59 = vld [vmem:[#allocation16_spill] sm:$0xff]  ;;  %v4114_v7 = vadd.f32 %v15311_v19, %v3741_v46  ;;  %v9509_v53 = vld [vmem:[#allocation4 + $0x180] sm:$0xff]  ;;  %v15315_v4 = vld [vmem:[#allocation9_spill] sm:$0xff] }
 0x615   : > { %15306 = vst [vmem:[#allocation8_spill] sm:$0xff] %v13417_v28  ;;  %9891 = vrcp.f32 %v5130_v21  ;;  %6948 = vmatpush.bf16.msrb.mxu0 %v9510_v26  ;;  %v13423_v45 = vpop.eup %9883  ;;  %v13429_v42 = vadd.f32 %v15310_v59, %v4113_v2  ;;  %v9499_v40 = vld [vmem:[#allocation4 + $0x130] sm:$0xff]  ;;  %v5251_v26 = vsel %vm4329_vm3, %v13417_v28, 0.0  ;;  %v15312_v21 = vld [vmem:[#allocation66_spill] sm:$0xff]  ;;  %v15316_v59 = vld [vmem:[#allocation89_spill] sm:$0xff]  ;;  %v5744_v28 = vpack.c.bf16 %v5616_v16, %v5616_v16 }
 0x616   : > { %15307 = vst [vmem:[#allocation116_spill] sm:$0xff] %v13423_v45  ;;  %v5773_v61 = vpack.c.bf16 %v5645_v12, %v5645_v12  ;;  %v6216_v48 = vunpack.c.l.b16 %v5772_v0  ;;  %v13434_v50 = vpop.eup %9885  ;;  %v4812_v39 = vsub.f32 %v15312_v21, %v13323_v20  ;;  %5252 = vadd.xlane.f32.xlu1 %v5251_v26  ;;  %v15313_v0 = vld [vmem:[#allocation126_spill] sm:$0xff]  ;;  %v4766_v46 = vsub.f32 %v15316_v59, %v15315_v4  ;;  %v15319_v16 = vld [vmem:[#allocation67_spill] sm:$0xff] }
 0x617   : > { %5180 = vadd.xlane.f32.xlu2 %v5179_v25  ;;  %v4742_v2 = vsub.f32 %v15314_v27, %v15313_v0  ;;  %9893 = vpow2.f32 %v4992_v37  ;;  %v5248_v25 = vsel %vm4329_vm3, %v13423_v45, 0.0  ;;  %v5040_v23 = vmul.f32 1.442695, %v4813_v33  ;;  %v9498_v27 = vld [vmem:[#allocation4 + $0x128] sm:$0xff] }
 0x618   : > { %v6217_v12 = vunpack.c.l.b16 %v5773_v61  ;;  %6692 = vmatpush.bf16.msra.mxu1 %v9499_v40  ;;  %5249 = vadd.xlane.f32.xlu0 %v5248_v25  ;;  %v5142_v4 = vpop.xlane.xlu1 %5141  ;;  %v4642_v37 = vsel %vm4329_vm3, %v13429_v42, -inf  ;;  %v15318_v40 = vld [vmem:[#allocation18_spill] sm:$0xff]  ;;  %v5038_v59 = vmul.f32 1.442695, %v4812_v39  ;;  %v5320_v39 = vsel %vm4329_vm3, %v13434_v50, 0.0 }
 0x619   : > { %v9888_v49 = vpop.eup %9887  ;;  %6949 = vmatpush.bf16.msrb.mxu0 %v9509_v53  ;;  %v13449_v53 = vadd.f32 %v15318_v40, %v4114_v7  ;;  %v9497_v7 = vld [vmem:[#allocation4 + $0x120] sm:$0xff] }
 0x61a   : > { %v9890_v19 = vpop.eup %9889  ;;  %v5617_v20 = vmul.f32 %v9888_v49, %v13066_v8  ;;  %v5208_v61 = vpop.xlane.xlu2 %5207  ;;  %v6223_v26 = vpack.c.b16 %v6217_v12, %v6216_v48  ;;  %v4898_v48 = vmul.f32 1.442695, %v4742_v2  ;;  %v4946_v12 = vmul.f32 1.442695, %v4766_v46 }
 0x61b   : > { %v9892_v21 = vpop.eup %9891  ;;  %v5621_v0 = vmul.f32 %v9890_v19, %v15317_v10  ;;  %9895 = vrcp.f32 %v5208_v61  ;;  %v5211_v8 = vpop.xlane.xlu0 %5210  ;;  %v5880_v19 = vunpack.c.l.b16 %v5744_v28  ;;  %v15323_v28 = vld [vmem:[#allocation94_spill] sm:$0xff] }
 0x61c   : > { %v5745_v33 = vpack.c.bf16 %v5617_v20, %v5617_v20  ;;  %v5620_v45 = vmul.f32 %v9892_v21, %v15319_v16  ;;  %9000 = vmatmul.msk.bf16.gmra.mxu0 %vm4329_vm3, %v6223_v26  ;;  %9897 = vrcp.f32 %v5142_v4  ;;  %6693 = vmatpush.bf16.msra.mxu1 %v9498_v27  ;;  %v15320_v21 = vld [vmem:[#allocation129_spill] sm:$0xff]  ;;  %v4645_v27 = vsel %vm4329_vm3, %v13449_v53, -inf  ;;  %v15324_v16 = vld [vmem:[#allocation90_spill] sm:$0xff] }
 0x61d   : > { %v5749_v10 = vpack.c.bf16 %v5621_v0, %v5621_v0  ;;  %9899 = vrcp.f32 %v5211_v8  ;;  %v13453_v61 = vpop.eup %9893  ;;  %v15321_v26 = vld [vmem:[#allocation61_spill] sm:$0xff] }
 0x61e   : > { %9901 = vpow2.f32 %v5040_v23  ;;  %v5881_v49 = vunpack.c.l.b16 %v5745_v33  ;;  %v5748_v25 = vpack.c.bf16 %v5620_v45, %v5620_v45  ;;  %v4743_v4 = vsub.f32 %v15321_v26, %v15320_v21  ;;  %5321 = vadd.xlane.f32.xlu1 %v5320_v39  ;;  %v15322_v23 = vld [vmem:[#allocation88_spill] sm:$0xff]  ;;  %v13463_v33 = vpop.f32.mrf.mxu1  ;;  %v15325_v39 = vld [vmem:[#allocation25_spill] sm:$0xff] }
 0x61f   : > { %4643 = vmax.xlane.f32.xlu2 %v4642_v37  ;;  %v5962_v20 = vunpack.c.l.b16 %v5749_v10  ;;  %9903 = vpow2.f32 %v5038_v59  ;;  %v4767_v45 = vsub.f32 %v15323_v28, %v15322_v23  ;;  %v9472_v37 = vld [vmem:[#allocation4 + $0x58] sm:$0xff]  ;;  %v5323_v28 = vsel %vm4329_vm3, %v13453_v61, 0.0 }
 0x620   : > { %v5885_v2 = vpack.c.b16 %v5881_v49, %v5880_v19  ;;  %v5961_v46 = vunpack.c.l.b16 %v5748_v25  ;;  %9905 = vpow2.f32 %v4898_v48  ;;  %6694 = vmatpush.bf16.msra.mxu1 %v9497_v7  ;;  %4646 = vmax.xlane.f32.xlu0 %v4645_v27  ;;  %v5139_v19 = vpop.xlane.xlu1 %5138  ;;  %v4900_v25 = vmul.f32 1.442695, %v4743_v4 }
 0x621   : > { %v9896_v0 = vpop.eup %9895  ;;  %9907 = vpow2.f32 %v4946_v12  ;;  %v4948_v12 = vmul.f32 1.442695, %v4767_v45 }
 0x622   : > { %v9898_v40 = vpop.eup %9897  ;;  %v5646_v8 = vmul.f32 %v9896_v0, %v15324_v16  ;;  %v5145_v59 = vpop.xlane.xlu2 %5144  ;;  %8922 = vmatmul.msk.bf16.vlgmr.msra.gmra.mxu2 %vm4329_vm3, %v5885_v2  ;;  %v5968_v10 = vpack.c.b16 %v5962_v20, %v5961_v46  ;;  %v9471_v0 = vld [vmem:[#allocation4 + $0x50] sm:$0xff]  ;;  %v15326_v2 = vld [vmem:[#allocation99_spill] sm:$0xff] }
 0x623   : > { %v9900_v48 = vpop.eup %9899  ;;  %9909 = vrcp.f32 %v5145_v59  ;;  %6096 = vmatpush.bf16.msra.mxu2 %v9472_v37  ;;  %v5136_v26 = vpop.xlane.xlu0 %5135  ;;  %v5624_v46 = vmul.f32 %v9898_v40, %v15326_v2  ;;  %v15329_v59 = vld [vmem:[#allocation14_spill] sm:$0xff] }
 0x624   : > { %v13467_v49 = vpop.eup %9901  ;;  %v5774_v7 = vpack.c.bf16 %v5646_v8, %v5646_v8  ;;  %v5647_v21 = vmul.f32 %v9900_v48, %v15325_v39  ;;  %8940 = vmatmul.msk.bf16.gmra.mxu1 %vm4329_vm3, %v5968_v10  ;;  %9911 = vrcp.f32 %v5139_v19  ;;  %v15330_v10 = vld [vmem:[#allocation130_spill] sm:$0xff]  ;;  %v9470_v19 = vld [vmem:[#allocation4 + $0x48] sm:$0xff] }
 0x625   : > { %9913 = vrcp.f32 %v5136_v26  ;;  %v13471_v23 = vpop.eup %9903  ;;  %v5395_v37 = vsel %vm4329_vm3, %v13467_v49, 0.0  ;;  %v4790_v40 = vsub.f32 %v15330_v10, %v15329_v59  ;;  %v5752_v39 = vpack.c.bf16 %v5624_v46, %v5624_v46 }
 0x626   : > { %v5775_v20 = vpack.c.bf16 %v5647_v21, %v5647_v21  ;;  %v6218_v27 = vunpack.c.l.b16 %v5774_v7  ;;  %v13476_v4 = vpop.eup %9905  ;;  %9915 = vpow2.f32 %v4900_v25  ;;  %5396 = vadd.xlane.f32.xlu1 %v5395_v37  ;;  %v5392_v48 = vsel %vm4329_vm3, %v13471_v23, 0.0 }
 0x627   : > { %15327 = vst [vmem:[#allocation43_spill] sm:$0xff] %v13476_v4  ;;  %6097 = vmatpush.bf16.msra.mxu2 %v9471_v0  ;;  %5324 = vadd.xlane.f32.xlu2 %v5323_v28  ;;  %v13480_v16 = vpop.eup %9907  ;;  %9917 = vpow2.f32 %v4948_v12  ;;  %v3746_v28 = vpop.f32.mrf.mxu1  ;;  %v4994_v12 = vmul.f32 1.442695, %v4790_v40 }
 0x628   : > { %15328 = vst [vmem:[#allocation119_spill] sm:$0xff] %v13480_v16  ;;  %v6219_v45 = vunpack.c.l.b16 %v5775_v20  ;;  %5393 = vadd.xlane.f32.xlu0 %v5392_v48  ;;  %v5148_v20 = vpop.xlane.xlu1 %5147  ;;  %v5965_v48 = vunpack.c.l.b16 %v5752_v39  ;;  %v5254_v40 = vsel %vm4329_vm3, %v13480_v16, 0.0  ;;  %v15338_v16 = vld [vmem:[#allocation104_spill] sm:$0xff] }
 0x629   : > { %v9910_v8 = vpop.eup %9909 }
 0x62a   : > { %v9912_v7 = vpop.eup %9911  ;;  %v5625_v21 = vmul.f32 %v9910_v8, %v13114_v36  ;;  %v5214_v26 = vpop.xlane.xlu2 %5213  ;;  %v6224_v0 = vpack.c.b16 %v6219_v45, %v6218_v27  ;;  %v9469_v36 = vld [vmem:[#allocation4 + $0x40] sm:$0xff]  ;;  %v5182_v27 = vsel %vm4329_vm3, %v13476_v4, 0.0 }
 0x62b   : > { %v9914_v2 = vpop.eup %9913  ;;  %v5623_v25 = vmul.f32 %v9912_v7, %v13118_v5  ;;  %9919 = vrcp.f32 %v5214_v26  ;;  %6098 = vmatpush.bf16.msra.mxu2 %v9470_v19  ;;  %v5217_v10 = vpop.xlane.xlu0 %5216  ;;  %v15331_v5 = vld [vmem:[#allocation156_spill] sm:$0xff] }
 0x62c   : > { %v5753_v37 = vpack.c.bf16 %v5625_v21, %v5625_v21  ;;  %v5622_v59 = vmul.f32 %v9914_v2, %v13122_v32  ;;  %9001 = vmatmul.msk.bf16.gmra.mxu0 %vm4329_vm3, %v6224_v0  ;;  %9921 = vrcp.f32 %v5148_v20  ;;  %v13492_v45 = vpop.eup %9915  ;;  %v4814_v8 = vsub.f32 %v15331_v5, %v13357_v13  ;;  %v15332_v32 = vld [vmem:[#allocation64_spill] sm:$0xff]  ;;  %v15334_v20 = vld [vmem:[#allocation133_spill] sm:$0xff]  ;;  %v15336_v5 = vld [vmem:[#allocation62_spill] sm:$0xff] }
 0x62d   : > { %v5751_v46 = vpack.c.bf16 %v5623_v25, %v5623_v25  ;;  %9923 = vrcp.f32 %v5217_v10  ;;  %v4115_v21 = vadd.f32 %v15332_v32, %v13463_v33  ;;  %v15333_v26 = vld [vmem:[#allocation148_spill] sm:$0xff]  ;;  %v13501_v25 = vpop.eup %9917  ;;  %v4791_v10 = vsub.f32 %v15334_v20, %v13112_v15  ;;  %v15340_v20 = vld [vmem:[#allocation22_spill] sm:$0xff] }
 0x62e   : > { %v5966_v19 = vunpack.c.l.b16 %v5753_v37  ;;  %v5750_v7 = vpack.c.bf16 %v5622_v59, %v5622_v59  ;;  %v4116_v0 = vadd.f32 %v15333_v26, %v3746_v28  ;;  %5255 = vadd.xlane.f32.xlu1 %v5254_v40  ;;  %v15335_v59 = vld [vmem:[#allocation131_spill] sm:$0xff]  ;;  %v9488_v26 = vld [vmem:[#allocation4 + $0xd8] sm:$0xff]  ;;  %9925 = vpow2.f32 %v4994_v12 }
 0x62f   : > { %6099 = vmatpush.bf16.msra.mxu2 %v9469_v36  ;;  %5183 = vadd.xlane.f32.xlu2 %v5182_v27  ;;  %v5964_v2 = vunpack.c.l.b16 %v5751_v46  ;;  %v4745_v33 = vsub.f32 %v15336_v5, %v15335_v59  ;;  %v15337_v28 = vld [vmem:[#allocation19_spill] sm:$0xff]  ;;  %v5185_v27 = vsel %vm4329_vm3, %v13492_v45, 0.0  ;;  %v5042_v32 = vmul.f32 1.442695, %v4814_v8  ;;  %v15341_v8 = vld [vmem:[#allocation33_spill] sm:$0xff] }
 0x630   : > { %v5970_v13 = vpack.c.b16 %v5966_v19, %v5965_v48  ;;  %v5963_v39 = vunpack.c.l.b16 %v5750_v7  ;;  %v4815_v36 = vsub.f32 %v15337_v28, %v13355_v17  ;;  %5186 = vadd.xlane.f32.xlu0 %v5185_v27  ;;  %v15339_v7 = vld [vmem:[#allocation17_spill] sm:$0xff]  ;;  %v5223_v17 = vpop.xlane.xlu1 %5222  ;;  %v13517_v59 = vadd.f32 %v15340_v20, %v4116_v0  ;;  %v9486_v20 = vld [vmem:[#allocation4 + $0xc8] sm:$0xff] }
 0x631   : > { %v9920_v37 = vpop.eup %9919  ;;  %v13514_v40 = vadd.f32 %v15339_v7, %v4115_v21  ;;  %v4996_v5 = vmul.f32 1.442695, %v4791_v10  ;;  %v5257_v21 = vsel %vm4329_vm3, %v13501_v25, 0.0  ;;  %v15346_v7 = vld [vmem:[#allocation97_spill] sm:$0xff] }
 0x632   : > { %v9922_v46 = vpop.eup %9921  ;;  %v5648_v4 = vmul.f32 %v9920_v37, %v15338_v16  ;;  %v5151_v15 = vpop.xlane.xlu2 %5150  ;;  %8942 = vmatmul.msk.bf16.vlgmr.msrb.gmra.mxu2 %vm4329_vm3, %v5970_v13  ;;  %v5969_v48 = vpack.c.b16 %v5964_v2, %v5963_v39  ;;  %v4904_v13 = vmul.f32 1.442695, %v4745_v33  ;;  %v5044_v2 = vmul.f32 1.442695, %v4815_v36  ;;  %v9487_v39 = vld [vmem:[#allocation4 + $0xd0] sm:$0xff]  ;;  %v15344_v33 = vld [vmem:[#allocation63_spill] sm:$0xff] }
 0x633   : > { %v9924_v19 = vpop.eup %9923  ;;  %9927 = vrcp.f32 %v5151_v15  ;;  %6436 = vmatpush.bf16.msrb.mxu2 %v9488_v26  ;;  %v5220_v16 = vpop.xlane.xlu0 %5219  ;;  %v15342_v37 = vld [vmem:[#allocation68_spill] sm:$0xff] }
 0x634   : > { %v5776_v12 = vpack.c.bf16 %v5648_v4, %v5648_v4  ;;  %v5649_v28 = vmul.f32 %v9924_v19, %v15341_v8  ;;  %8941 = vmatmul.msk.bf16.gmra.mxu1 %vm4329_vm3, %v5969_v48  ;;  %9929 = vrcp.f32 %v5223_v17  ;;  %v5626_v0 = vmul.f32 %v9922_v46, %v15342_v37  ;;  %v13526_v10 = vpop.eup %9925  ;;  %v15343_v15 = vld [vmem:[#allocation132_spill] sm:$0xff] }
 0x635   : > { %9931 = vrcp.f32 %v5220_v16  ;;  %v4651_v4 = vsel %vm4329_vm3, %v13517_v59, -inf  ;;  %v4744_v36 = vsub.f32 %v15344_v33, %v15343_v15  ;;  %v4648_v46 = vsel %vm4329_vm3, %v13514_v40, -inf }
 0x636   : > { %9933 = vpow2.f32 %v5042_v32  ;;  %v5777_v26 = vpack.c.bf16 %v5649_v28, %v5649_v28  ;;  %v6220_v27 = vunpack.c.l.b16 %v5776_v12  ;;  %4652 = vmax.xlane.f32.xlu1 %v4651_v4  ;;  %v15345_v32 = vld [vmem:[#allocation144_spill] sm:$0xff]  ;;  %v5754_v8 = vpack.c.bf16 %v5626_v0, %v5626_v0  ;;  %v9485_v0 = vld [vmem:[#allocation4 + $0xc0] sm:$0xff] }
 0x637   : > { %6437 = vmatpush.bf16.msrb.mxu2 %v9487_v39  ;;  %5258 = vadd.xlane.f32.xlu2 %v5257_v21  ;;  %9935 = vpow2.f32 %v4996_v5  ;;  %v4768_v17 = vsub.f32 %v15346_v7, %v15345_v32  ;;  %v4902_v37 = vmul.f32 1.442695, %v4744_v36  ;;  %v5326_v36 = vsel %vm4329_vm3, %v13526_v10, 0.0 }
 0x638   : > { %v6221_v48 = vunpack.c.l.b16 %v5777_v26  ;;  %9937 = vpow2.f32 %v4904_v13  ;;  %4649 = vmax.xlane.f32.xlu0 %v4648_v46  ;;  %v5154_v13 = vpop.xlane.xlu1 %5153 }
 0x639   : > { %v9928_v19 = vpop.eup %9927  ;;  %9939 = vpow2.f32 %v5044_v2 }
 0x63a   : > { %v9930_v12 = vpop.eup %9929  ;;  %v5627_v28 = vmul.f32 %v9928_v19, %v13162_v29  ;;  %v5292_v16 = vpop.xlane.xlu2 %5291  ;;  %v6225_v39 = vpack.c.b16 %v6221_v48, %v6220_v27  ;;  %v4950_v29 = vmul.f32 1.442695, %v4768_v17  ;;  %v6044_v48 = vunpack.c.l.b16 %v5754_v8 }
 0x63b   : > { %v9932_v5 = vpop.eup %9931  ;;  %v5651_v21 = vmul.f32 %v9930_v12, %v13166_v60  ;;  %9941 = vrcp.f32 %v5292_v16  ;;  %6438 = vmatpush.bf16.msrb.mxu2 %v9486_v20  ;;  %v5295_v33 = vpop.xlane.xlu0 %5294  ;;  %v15350_v20 = vld [vmem:[#allocation142_spill] sm:$0xff]  ;;  %v15351_v12 = vld [vmem:[#allocation96_spill] sm:$0xff] }
 0x63c   : > { %v13536_v26 = vpop.eup %9933  ;;  %v5755_v4 = vpack.c.bf16 %v5627_v28, %v5627_v28  ;;  %v5650_v15 = vmul.f32 %v9932_v5, %v13170_v43  ;;  %9002 = vmatmul.msk.bf16.gmra.mxu0 %vm4329_vm3, %v6225_v39  ;;  %9943 = vrcp.f32 %v5154_v13  ;;  %v3749_v60 = vpop.f32.mrf.mxu1  ;;  %v4769_v28 = vsub.f32 %v15351_v12, %v15350_v20  ;;  %v15352_v5 = vld [vmem:[#allocation95_spill] sm:$0xff] }
 0x63d   : > { %15347 = vst [vmem:[#allocation120_spill] sm:$0xff] %v13536_v26  ;;  %v5779_v2 = vpack.c.bf16 %v5651_v21, %v5651_v21  ;;  %9945 = vrcp.f32 %v5295_v33  ;;  %v13540_v27 = vpop.eup %9935  ;;  %v5398_v17 = vsel %vm4329_vm3, %v13536_v26, 0.0  ;;  %v15353_v21 = vld [vmem:[#allocation134_spill] sm:$0xff] }
 0x63e   : > { %v6045_v19 = vunpack.c.l.b16 %v5755_v4  ;;  %v5778_v32 = vpack.c.bf16 %v5650_v15, %v5650_v15  ;;  %v13544_v7 = vpop.eup %9937  ;;  %9947 = vpow2.f32 %v4902_v37  ;;  %5399 = vadd.xlane.f32.xlu1 %v5398_v17  ;;  %v4793_v13 = vsub.f32 %v15353_v21, %v15352_v5  ;;  %v9504_v15 = vld [vmem:[#allocation4 + $0x158] sm:$0xff] }
 0x63f   : > { %15348 = vst [vmem:[#allocation45_spill] sm:$0xff] %v13544_v7  ;;  %v6300_v43 = vunpack.c.l.b16 %v5779_v2  ;;  %6439 = vmatpush.bf16.msrb.mxu2 %v9485_v0  ;;  %5327 = vadd.xlane.f32.xlu2 %v5326_v36  ;;  %v13548_v46 = vpop.eup %9939  ;;  %v5329_v4 = vsel %vm4329_vm3, %v13540_v27, 0.0  ;;  %9949 = vpow2.f32 %v4950_v29  ;;  %v4952_v36 = vmul.f32 1.442695, %v4769_v28  ;;  %v15356_v21 = vld [vmem:[#allocation153_spill] sm:$0xff] }
 0x640   : > { %15349 = vst [vmem:[#allocation80_spill] sm:$0xff] %v13548_v46  ;;  %v6052_v8 = vpack.c.b16 %v6045_v19, %v6044_v48  ;;  %v6299_v16 = vunpack.c.l.b16 %v5778_v32  ;;  %5330 = vadd.xlane.f32.xlu0 %v5329_v4  ;;  %v9516_v19 = vld [vmem:[#allocation4 + $0x1b8] sm:$0xff]  ;;  %v5229_v32 = vpop.xlane.xlu1 %5228  ;;  %v5000_v29 = vmul.f32 1.442695, %v4793_v13  ;;  %v5401_v28 = vsel %vm4329_vm3, %v13548_v46, 0.0 }
 0x641   : > { %v9942_v39 = vpop.eup %9941  ;;  %v4117_v4 = vadd.f32 %v15356_v21, %v3749_v60  ;;  %v5191_v13 = vsel %vm4329_vm3, %v13544_v7, 0.0 }
 0x642   : > { %v9944_v33 = vpop.eup %9943  ;;  %v6307_v2 = vpack.c.b16 %v6300_v43, %v6299_v16  ;;  %v5674_v0 = vmul.f32 %v9942_v39, %v13186_v31  ;;  %v5157_v37 = vpop.xlane.xlu2 %5156  ;;  %8959 = vmatmul.msk.bf16.vlgmr.msra.gmra.mxu2 %vm4329_vm3, %v6052_v8  ;;  %v9503_v31 = vld [vmem:[#allocation4 + $0x150] sm:$0xff]  ;;  %v15355_v39 = vld [vmem:[#allocation106_spill] sm:$0xff] }
 0x643   : > { %v9946_v48 = vpop.eup %9945  ;;  %9951 = vrcp.f32 %v5157_v37  ;;  %6776 = vmatpush.bf16.msra.mxu2 %v9504_v15  ;;  %v5226_v12 = vpop.xlane.xlu0 %5225  ;;  %v5628_v5 = vmul.f32 %v9944_v33, %v15355_v39  ;;  %v15358_v37 = vld [vmem:[#allocation135_spill] sm:$0xff] }
 0x644   : > { %v5802_v17 = vpack.c.bf16 %v5674_v0, %v5674_v0  ;;  %v5675_v20 = vmul.f32 %v9946_v48, %v13196_v34  ;;  %9019 = vmatmul.msk.bf16.vlgmr.msrb.gmra.mxu1 %vm4329_vm3, %v6307_v2  ;;  %9953 = vrcp.f32 %v5229_v32  ;;  %v13560_v43 = vpop.eup %9947  ;;  %v9515_v34 = vld [vmem:[#allocation4 + $0x1b0] sm:$0xff]  ;;  %v3751_v2 = vpop.f32.mrf.mxu1  ;;  %v9502_v32 = vld [vmem:[#allocation4 + $0x148] sm:$0xff] }
 0x645   : > { %9955 = vrcp.f32 %v5226_v12  ;;  %7031 = vmatpush.bf16.msrb.mxu1 %v9516_v19  ;;  %15354 = vst [vmem:[#allocation76_spill] sm:$0xff] %v13560_v43  ;;  %v13568_v15 = vpop.eup %9949  ;;  %v15357_v0 = vld [vmem:[#allocation20_spill] sm:$0xff]  ;;  %v5188_v60 = vsel %vm4329_vm3, %v13560_v43, 0.0  ;;  %v5756_v39 = vpack.c.bf16 %v5628_v5, %v5628_v5  ;;  %v9514_v43 = vld [vmem:[#allocation4 + $0x1a8] sm:$0xff] }
 0x646   : > { %v6554_v8 = vunpack.c.l.b16 %v5802_v17  ;;  %v5803_v16 = vpack.c.bf16 %v5675_v20, %v5675_v20  ;;  %9957 = vpow2.f32 %v4952_v36  ;;  %v4792_v48 = vsub.f32 %v15358_v37, %v15357_v0  ;;  %5192 = vadd.xlane.f32.xlu1 %v5191_v13  ;;  %v15359_v20 = vld [vmem:[#allocation65_spill] sm:$0xff] }
 0x647   : > { %6777 = vmatpush.bf16.msra.mxu2 %v9503_v31  ;;  %5402 = vadd.xlane.f32.xlu2 %v5401_v28  ;;  %9959 = vpow2.f32 %v5000_v29  ;;  %v4816_v12 = vsub.f32 %v15359_v20, %v13378_v30  ;;  %v15360_v28 = vld [vmem:[#allocation111_spill] sm:$0xff]  ;;  %v15363_v37 = vld [vmem:[#allocation37_spill] sm:$0xff] }
 0x648   : > { %v6555_v19 = vunpack.c.l.b16 %v5803_v16  ;;  %5189 = vadd.xlane.f32.xlu0 %v5188_v60  ;;  %v15361_v16 = vld [vmem:[#allocation24_spill] sm:$0xff]  ;;  %v15362_v29 = vld [vmem:[#allocation151_spill] sm:$0xff]  ;;  %v5160_v46 = vpop.xlane.xlu1 %5159  ;;  %v4998_v26 = vmul.f32 1.442695, %v4792_v48  ;;  %v15366_v60 = vld [vmem:[#allocation98_spill] sm:$0xff] }
 0x649   : > { %v9952_v33 = vpop.eup %9951  ;;  %7032 = vmatpush.bf16.msrb.mxu1 %v9515_v34  ;;  %v13578_v13 = vadd.f32 %v15361_v16, %v4117_v4  ;;  %v4118_v34 = vadd.f32 %v15362_v29, %v3751_v2  ;;  %v9501_v2 = vld [vmem:[#allocation4 + $0x140] sm:$0xff]  ;;  %v5046_v48 = vmul.f32 1.442695, %v4816_v12  ;;  %v15368_v16 = vld [vmem:[#allocation103_spill] sm:$0xff] }
 0x64a   : > { %v9954_v17 = vpop.eup %9953  ;;  %v6562_v31 = vpack.c.b16 %v6555_v19, %v6554_v8  ;;  %v5629_v36 = vmul.f32 %v9952_v33, %v15360_v28  ;;  %v5298_v21 = vpop.xlane.xlu2 %5297  ;;  %v15364_v8 = vld [vmem:[#allocation73_spill] sm:$0xff]  ;;  %v15365_v33 = vld [vmem:[#allocation146_spill] sm:$0xff]  ;;  %v6046_v28 = vunpack.c.l.b16 %v5756_v39 }
 0x64b   : > { %v9956_v0 = vpop.eup %9955  ;;  %v5653_v7 = vmul.f32 %v9954_v17, %v15363_v37  ;;  %9961 = vrcp.f32 %v5298_v21  ;;  %6778 = vmatpush.bf16.msra.mxu2 %v9502_v32  ;;  %v5301_v19 = vpop.xlane.xlu0 %5300  ;;  %v4770_v4 = vsub.f32 %v15366_v60, %v15365_v33  ;;  %v5260_v21 = vsel %vm4329_vm3, %v13568_v15, 0.0  ;;  %v15370_v39 = vld [vmem:[#allocation138_spill] sm:$0xff]  ;;  %v15371_v60 = vld [vmem:[#allocation23_spill] sm:$0xff] }
 0x64c   : > { %v5757_v30 = vpack.c.bf16 %v5629_v36, %v5629_v36  ;;  %v5652_v5 = vmul.f32 %v9956_v0, %v15364_v8  ;;  %9079 = vmatmul.msk.bf16.vlgmr.msra.gmra.mxu0 %vm4329_vm3, %v6562_v31  ;;  %9963 = vrcp.f32 %v5160_v46  ;;  %v13588_v32 = vpop.eup %9957  ;;  %v9513_v46 = vld [vmem:[#allocation4 + $0x1a0] sm:$0xff] }
 0x64d   : > { %v5781_v20 = vpack.c.bf16 %v5653_v7, %v5653_v7  ;;  %9965 = vrcp.f32 %v5301_v19  ;;  %7033 = vmatpush.bf16.msrb.mxu1 %v9514_v43  ;;  %v13590_v0 = vpop.eup %9959  ;;  %v4654_v7 = vsel %vm4329_vm3, %v13578_v13, -inf  ;;  %v15367_v43 = vld [vmem:[#allocation149_spill] sm:$0xff]  ;;  %v5263_v33 = vsel %vm4329_vm3, %v13588_v32, 0.0 }
 0x64e   : > { %v5780_v17 = vpack.c.bf16 %v5652_v5, %v5652_v5  ;;  %v6047_v36 = vunpack.c.l.b16 %v5757_v30  ;;  %v4771_v37 = vsub.f32 %v15368_v16, %v15367_v43  ;;  %9967 = vpow2.f32 %v4998_v26  ;;  %4655 = vmax.xlane.f32.xlu1 %v4654_v7  ;;  %v15369_v5 = vld [vmem:[#allocation109_spill] sm:$0xff] }
 0x64f   : > { %6779 = vmatpush.bf16.msra.mxu2 %v9501_v2  ;;  %5261 = vadd.xlane.f32.xlu2 %v5260_v21  ;;  %v6302_v31 = vunpack.c.l.b16 %v5781_v20  ;;  %v4795_v30 = vsub.f32 %v15370_v39, %v15369_v5  ;;  %v13601_v2 = vadd.f32 %v15371_v60, %v4118_v34  ;;  %v4954_v20 = vmul.f32 1.442695, %v4770_v4 }
 0x650   : > { %v6053_v8 = vpack.c.b16 %v6047_v36, %v6046_v28  ;;  %v6301_v19 = vunpack.c.l.b16 %v5780_v17  ;;  %9969 = vpow2.f32 %v5046_v48  ;;  %5264 = vadd.xlane.f32.xlu0 %v5263_v33  ;;  %v5235_v36 = vpop.xlane.xlu1 %5234 }
 0x651   : > { %v9962_v12 = vpop.eup %9961  ;;  %7034 = vmatpush.bf16.msrb.mxu1 %v9513_v46  ;;  %v4956_v46 = vmul.f32 1.442695, %v4771_v37  ;;  %v5004_v34 = vmul.f32 1.442695, %v4795_v30  ;;  %v13612_v37 = vpop.f32.mrf.mxu2 }
 0x652   : > { %v9964_v21 = vpop.eup %9963  ;;  %v5676_v43 = vmul.f32 %v9962_v12, %v13228_v3  ;;  %v5163_v26 = vpop.xlane.xlu2 %5162  ;;  %8960 = vmatmul.msk.bf16.gmra.mxu2 %vm4329_vm3, %v6053_v8  ;;  %v6308_v17 = vpack.c.b16 %v6302_v31, %v6301_v19  ;;  %v4657_v3 = vsel %vm4329_vm3, %v13601_v2, -inf }
 0x653   : > { %v9966_v28 = vpop.eup %9965  ;;  %9971 = vrcp.f32 %v5163_v26  ;;  %v5232_v5 = vpop.xlane.xlu0 %5231  ;;  %v5630_v31 = vmul.f32 %v9964_v21, %v13235_v35 }
 0x654   : > { %v5804_v7 = vpack.c.bf16 %v5676_v43, %v5676_v43  ;;  %v5677_v16 = vmul.f32 %v9966_v28, %v13242_v22  ;;  %9020 = vmatmul.msk.bf16.gmra.mxu1 %vm4329_vm3, %v6308_v17  ;;  %9973 = vrcp.f32 %v5235_v36  ;;  %v13609_v4 = vpop.eup %9967  ;;  %v5335_v22 = vsel %vm4329_vm3, %v13590_v0, 0.0 }
 0x655   : > { %9975 = vrcp.f32 %v5232_v5  ;;  %v5332_v33 = vsel %vm4329_vm3, %v13609_v4, 0.0  ;;  %v5758_v35 = vpack.c.bf16 %v5630_v31, %v5630_v31 }
 0x656   : > { %9977 = vpow2.f32 %v4954_v20  ;;  %v5805_v48 = vpack.c.bf16 %v5677_v16, %v5677_v16  ;;  %v6556_v8 = vunpack.c.l.b16 %v5804_v7  ;;  %v13616_v19 = vpop.eup %9969  ;;  %5336 = vadd.xlane.f32.xlu1 %v5335_v22 }
 0x657   : > { %4658 = vmax.xlane.f32.xlu2 %v4657_v3  ;;  %9979 = vpow2.f32 %v4956_v46  ;;  %v5931_v30 = vpop.f32.mrf.mxu0 }
 0x658   : > { %v6557_v12 = vunpack.c.l.b16 %v5805_v48  ;;  %9981 = vpow2.f32 %v5004_v34  ;;  %v7226_v20 = vpack.c.bf16 %v5931_v30, %v5931_v30  ;;  %5333 = vadd.xlane.f32.xlu0 %v5332_v33  ;;  %v6048_v48 = vunpack.c.l.b16 %v5758_v35 }
 0x659   : > { %v9972_v39 = vpop.eup %9971  ;;  %v5166_v36 = vpop.xlane.xlu1 %5165 }
 0x65a   : > { %v9974_v60 = vpop.eup %9973  ;;  %v5631_v21 = vmul.f32 %v9972_v39, %v13254_v63  ;;  %v5304_v43 = vpop.xlane.xlu2 %5303  ;;  %v6563_v26 = vpack.c.b16 %v6557_v12, %v6556_v8  ;;  %7258 = vst.msk [vmem:[#allocation5] sm:$0xf] %vm590_vm1, %v7226_v20 }
 0x65b   : > { %v9976_v17 = vpop.eup %9975  ;;  %v5655_v28 = vmul.f32 %v9974_v60, %v13258_v41  ;;  %9983 = vrcp.f32 %v5304_v43  ;;  %v5307_v5 = vpop.xlane.xlu0 %5306  ;;  %v5404_v41 = vsel %vm4329_vm3, %v13616_v19, 0.0 }
 0x65c   : > { %v13622_v46 = vpop.eup %9977  ;;  %v5759_v7 = vpack.c.bf16 %v5631_v21, %v5631_v21  ;;  %v5654_v16 = vmul.f32 %v9976_v17, %v13263_v14  ;;  %9080 = vmatmul.msk.bf16.gmra.mxu0 %vm4329_vm3, %v6563_v26  ;;  %9985 = vrcp.f32 %v5166_v36  ;;  %v13635_v33 = vpop.f32.mrf.mxu2 }
 0x65d   : > { %v5783_v63 = vpack.c.bf16 %v5655_v28, %v5655_v28  ;;  %9987 = vrcp.f32 %v5307_v5  ;;  %v13627_v34 = vpop.eup %9979  ;;  %v5266_v14 = vsel %vm4329_vm3, %v13622_v46, 0.0  ;;  %v3754_v20 = vpop.f32.mrf.mxu1 }
 0x65e   : > { %v5782_v3 = vpack.c.bf16 %v5654_v16, %v5654_v16  ;;  %v6049_v31 = vunpack.c.l.b16 %v5759_v7  ;;  %v13631_v8 = vpop.eup %9981  ;;  %5267 = vadd.xlane.f32.xlu1 %v5266_v14 }
 0x65f   : > { %5405 = vadd.xlane.f32.xlu2 %v5404_v41  ;;  %v6304_v22 = vunpack.c.l.b16 %v5783_v63  ;;  %v5933_v60 = vpop.f32.mrf.mxu0  ;;  %v15372_v63 = vld [vmem:[#allocation21_spill] sm:$0xff] }
 0x660   : > { %v6054_v12 = vpack.c.b16 %v6049_v31, %v6048_v48  ;;  %v6303_v39 = vunpack.c.l.b16 %v5782_v3  ;;  %v7227_v35 = vpack.c.bf16 %v5933_v60, %v5933_v60  ;;  %v4119_v3 = vadd.f32 %v15372_v63, %v3754_v20 }
 0x661   : > { %v9984_v30 = vpop.eup %9983  ;;  %v5241_v36 = vpop.xlane.xlu1 %5240  ;;  %v5269_v48 = vsel %vm4329_vm3, %v13627_v34, 0.0 }
 0x662   : > { %v9986_v21 = vpop.eup %9985  ;;  %v5678_v43 = vmul.f32 %v9984_v30, %v13275_v9  ;;  %v5169_v26 = vpop.xlane.xlu2 %5168  ;;  %8961 = vmatmul.msk.bf16.gmra.mxu2 %vm4329_vm3, %v6054_v12  ;;  %v6309_v17 = vpack.c.b16 %v6304_v22, %v6303_v39  ;;  %7259 = vst.msk [vmem:[#allocation5 + $0x4] sm:$0xf] %vm590_vm1, %v7227_v35  ;;  %v15373_v12 = vld [vmem:[#allocation28_spill] sm:$0xff] }
 0x663   : > { %v9988_v28 = vpop.eup %9987  ;;  %9989 = vrcp.f32 %v5169_v26  ;;  %v5238_v5 = vpop.xlane.xlu0 %5237  ;;  %v5632_v41 = vmul.f32 %v9986_v21, %v13280_v47  ;;  %v13649_v39 = vadd.f32 %v15373_v12, %v4119_v3 }
 0x664   : > { %v5806_v7 = vpack.c.bf16 %v5678_v43, %v5678_v43  ;;  %v5679_v16 = vmul.f32 %v9988_v28, %v13285_v51  ;;  %9021 = vmatmul.msk.bf16.gmra.mxu1 %vm4329_vm3, %v6309_v17  ;;  %9991 = vrcp.f32 %v5241_v36  ;;  %v5341_v51 = vsel %vm4329_vm3, %v13631_v8, 0.0  ;;  %v13652_v17 = vpop.f32.mrf.mxu2 }
 0x665   : > { %9993 = vrcp.f32 %v5238_v5  ;;  %v5760_v20 = vpack.c.bf16 %v5632_v41, %v5632_v41 }
 0x666   : > { %v5807_v9 = vpack.c.bf16 %v5679_v16, %v5679_v16  ;;  %v6558_v31 = vunpack.c.l.b16 %v5806_v7  ;;  %5342 = vadd.xlane.f32.xlu1 %v5341_v51 }
 0x667   : > { %5270 = vadd.xlane.f32.xlu2 %v5269_v48  ;;  %v6050_v41 = vunpack.c.l.b16 %v5760_v20 }
 0x668   : > { %v6559_v14 = vunpack.c.l.b16 %v5807_v9  ;;  %v4660_v9 = vsel %vm4329_vm3, %v13649_v39, -inf }
 0x669   : > { %v9990_v22 = vpop.eup %9989  ;;  %v5936_v30 = vpop.f32.mrf.mxu0 }
 0x66a   : > { %v9992_v60 = vpop.eup %9991  ;;  %v5633_v43 = vmul.f32 %v9990_v22, %v13299_v18  ;;  %v7228_v47 = vpack.c.bf16 %v5936_v30, %v5936_v30  ;;  %v5310_v21 = vpop.xlane.xlu2 %5309  ;;  %v6564_v35 = vpack.c.b16 %v6559_v14, %v6558_v31 }
 0x66b   : > { %v9994_v26 = vpop.eup %9993  ;;  %v5657_v28 = vmul.f32 %v9992_v60, %v13305_v6  ;;  %9995 = vrcp.f32 %v5310_v21  ;;  %v5172_v36 = vpop.xlane.xlu1 %5171 }
 0x66c   : > { %v5761_v7 = vpack.c.bf16 %v5633_v43, %v5633_v43  ;;  %v5656_v16 = vmul.f32 %v9994_v26, %v13312_v56  ;;  %7260 = vst.msk [vmem:[#allocation5 + $0x8] sm:$0xf] %vm590_vm1, %v7228_v47  ;;  %v5313_v5 = vpop.xlane.xlu0 %5312  ;;  %9081 = vmatmul.msk.bf16.gmra.mxu0 %vm4329_vm3, %v6564_v35  ;;  %9997 = vrcp.f32 %v5172_v36 }
 0x66d   : > { %v5785_v18 = vpack.c.bf16 %v5657_v28, %v5657_v28  ;;  %9999 = vrcp.f32 %v5313_v5  ;;  %v13665_v28 = vpop.f32.mrf.mxu2 }
 0x66e   : > { %v5784_v3 = vpack.c.bf16 %v5656_v16, %v5656_v16  ;;  %v6051_v48 = vunpack.c.l.b16 %v5761_v7 }
 0x66f   : > { %4661 = vmax.xlane.f32.xlu2 %v4660_v9  ;;  %v6306_v6 = vunpack.c.l.b16 %v5785_v18  ;;  %v15374_v18 = vld [vmem:[#allocation69_spill] sm:$0xff] }
 0x670   : > { %v6055_v31 = vpack.c.b16 %v6051_v48, %v6050_v41  ;;  %v6305_v51 = vunpack.c.l.b16 %v5784_v3  ;;  %v15375_v3 = vld [vmem:[#allocation136_spill] sm:$0xff] }
 0x671   : > { %v9996_v14 = vpop.eup %9995  ;;  %v5938_v56 = vpop.f32.mrf.mxu0  ;;  %v4794_v9 = vsub.f32 %v15375_v3, %v15374_v18 }
 0x672   : > { %v9998_v22 = vpop.eup %9997  ;;  %v5680_v12 = vmul.f32 %v9996_v14, %v13326_v55  ;;  %v7229_v30 = vpack.c.bf16 %v5938_v56, %v5938_v56  ;;  %v5175_v60 = vpop.xlane.xlu2 %5174  ;;  %8962 = vmatmul.msk.bf16.gmra.mxu2 %vm4329_vm3, %v6055_v31  ;;  %v6310_v43 = vpack.c.b16 %v6306_v6, %v6305_v51 }
 0x673   : > { %v10000_v47 = vpop.eup %9999  ;;  %10001 = vrcp.f32 %v5175_v60  ;;  %v5247_v21 = vpop.xlane.xlu1 %5246  ;;  %v5634_v36 = vmul.f32 %v9998_v22, %v13328_v24 }
 0x674   : > { %v5808_v35 = vpack.c.bf16 %v5680_v12, %v5680_v12  ;;  %v5681_v20 = vmul.f32 %v10000_v47, %v13332_v54  ;;  %7261 = vst.msk [vmem:[#allocation5 + $0xc] sm:$0xf] %vm590_vm1, %v7229_v30  ;;  %v5244_v26 = vpop.xlane.xlu0 %5243  ;;  %9022 = vmatmul.msk.bf16.gmra.mxu1 %vm4329_vm3, %v6310_v43  ;;  %10003 = vrcp.f32 %v5247_v21  ;;  %v5002_v21 = vmul.f32 1.442695, %v4794_v9 }
 0x675   : > { %10005 = vrcp.f32 %v5244_v26  ;;  %v5762_v48 = vpack.c.bf16 %v5634_v36, %v5634_v36 }
 0x676   : > { %v5809_v55 = vpack.c.bf16 %v5681_v20, %v5681_v20  ;;  %v6560_v7 = vunpack.c.l.b16 %v5808_v35 }
 0x677   : > { %v6129_v35 = vunpack.c.l.b16 %v5762_v48 }
 0x678   : > { %v6561_v16 = vunpack.c.l.b16 %v5809_v55 }
 0x679   : > { %v10002_v5 = vpop.eup %10001  ;;  %v5941_v41 = vpop.f32.mrf.mxu0 }
 0x67a   : > { %v10004_v54 = vpop.eup %10003  ;;  %v5635_v6 = vmul.f32 %v10002_v5, %v13344_v1  ;;  %v7230_v31 = vpack.c.bf16 %v5941_v41, %v5941_v41  ;;  %v4641_v51 = vpop.xlane.xlu2 %4640  ;;  %v6565_v14 = vpack.c.b16 %v6561_v16, %v6560_v7  ;;  %v9508_v7 = vld [vmem:[#allocation4 + $0x178] sm:$0xff] }
 0x67b   : > { %v10006_v56 = vpop.eup %10005  ;;  %v5659_v12 = vmul.f32 %v10004_v54, %v13349_v62  ;;  %v4817_v30 = vsub.f32 %v13373_v52, %v4641_v51  ;;  %v5319_v24 = vpop.xlane.xlu1 %5318  ;;  %v9520_v54 = vld [vmem:[#allocation4 + $0x1d8] sm:$0xff] }
 0x67c   : > { %v5763_v22 = vpack.c.bf16 %v5635_v6, %v5635_v6  ;;  %v5658_v60 = vmul.f32 %v10006_v56, %v13360_v38  ;;  %7262 = vst.msk [vmem:[#allocation5 + $0x10] sm:$0xf] %vm590_vm1, %v7230_v31  ;;  %v5316_v43 = vpop.xlane.xlu0 %5315  ;;  %9082 = vmatmul.msk.bf16.gmra.mxu0 %vm4329_vm3, %v6565_v14  ;;  %10007 = vrcp.f32 %v5319_v24  ;;  %v13676_v62 = vpop.f32.mrf.mxu2  ;;  %v9507_v56 = vld [vmem:[#allocation4 + $0x170] sm:$0xff] }
 0x67d   : > { %v5787_v47 = vpack.c.bf16 %v5659_v12, %v5659_v12  ;;  %v5048_v1 = vmul.f32 1.442695, %v4817_v30  ;;  %10009 = vrcp.f32 %v5316_v43  ;;  %v9519_v24 = vld [vmem:[#allocation4 + $0x1d0] sm:$0xff]  ;;  %v3756_v43 = vpop.f32.mrf.mxu1 }
 0x67e   : > { %v6130_v20 = vunpack.c.l.b16 %v5763_v22  ;;  %v5786_v26 = vpack.c.bf16 %v5658_v60, %v5658_v60 }
 0x67f   : > { %v6385_v52 = vunpack.c.l.b16 %v5787_v47  ;;  %10011 = vpow2.f32 %v5048_v1  ;;  %v9506_v1 = vld [vmem:[#allocation4 + $0x168] sm:$0xff] }
 0x680   : > { %v6137_v55 = vpack.c.b16 %v6130_v20, %v6129_v35  ;;  %v6384_v36 = vunpack.c.l.b16 %v5786_v26  ;;  %10013 = vpow2.f32 %v5002_v21 }
 0x681   : > { %v5943_v38 = vpop.f32.mrf.mxu0 }
 0x682   : > { %v10008_v16 = vpop.eup %10007  ;;  %v6392_v5 = vpack.c.b16 %v6385_v52, %v6384_v36  ;;  %v7231_v18 = vpack.c.bf16 %v5943_v38, %v5943_v38  ;;  %v5388_v3 = vpop.xlane.xlu2 %5387  ;;  %8979 = vmatmul.msk.bf16.vlgmr.msra.gmra.mxu3 %vm4329_vm3, %v6137_v55  ;;  %v9518_v55 = vld [vmem:[#allocation4 + $0x1c8] sm:$0xff] }
 0x683   : > { %v10010_v41 = vpop.eup %10009  ;;  %v5683_v9 = vmul.f32 %v10008_v16, %v13380_v57  ;;  %10015 = vrcp.f32 %v5388_v3  ;;  %6861 = vmatpush.bf16.msra.mxu3 %v9508_v7  ;;  %v5178_v48 = vpop.xlane.xlu1 %5177  ;;  %v15376_v16 = vld [vmem:[#allocation38_spill] sm:$0xff] }
 0x684   : > { %v5682_v6 = vmul.f32 %v10010_v41, %v13382_v58  ;;  %7263 = vst.msk [vmem:[#allocation5 + $0x14] sm:$0xf] %vm590_vm1, %v7231_v18  ;;  %v5391_v31 = vpop.xlane.xlu0 %5390  ;;  %9039 = vmatmul.msk.bf16.vlgmr.msrb.gmra.mxu2 %vm4329_vm3, %v6392_v5  ;;  %10017 = vrcp.f32 %v5178_v48  ;;  %v13689_v47 = vpop.f32.mrf.mxu2  ;;  %v4120_v5 = vadd.f32 %v15376_v16, %v3756_v43  ;;  %v9505_v3 = vld [vmem:[#allocation4 + $0x160] sm:$0xff] }
 0x685   : > { %v13683_v51 = vpop.eup %10011  ;;  %v5811_v14 = vpack.c.bf16 %v5683_v9, %v5683_v9  ;;  %10019 = vrcp.f32 %v5391_v31  ;;  %7116 = vmatpush.bf16.msrb.mxu2 %v9520_v54  ;;  %v15377_v54 = vld [vmem:[#allocation74_spill] sm:$0xff]  ;;  %v15379_v31 = vld [vmem:[#allocation105_spill] sm:$0xff] }
 0x686   : > { %v5810_v12 = vpack.c.bf16 %v5682_v6, %v5682_v6  ;;  %v5407_v57 = vsel %vm4329_vm3, %v13683_v51, 0.0  ;;  %v13687_v58 = vpop.eup %10013  ;;  %v9517_v6 = vld [vmem:[#allocation4 + $0x1c0] sm:$0xff] }
 0x687   : > { %v6640_v30 = vunpack.c.l.b16 %v5811_v14  ;;  %6862 = vmatpush.bf16.msra.mxu3 %v9507_v56  ;;  %5408 = vadd.xlane.f32.xlu0 %v5407_v57 }
 0x688   : > { %v6639_v22 = vunpack.c.l.b16 %v5810_v12 }
 0x689   : > { %v10016_v60 = vpop.eup %10015  ;;  %7117 = vmatpush.bf16.msrb.mxu2 %v9519_v24 }
 0x68a   : > { %v10018_v21 = vpop.eup %10017  ;;  %v6647_v35 = vpack.c.b16 %v6640_v30, %v6639_v22  ;;  %v5706_v20 = vmul.f32 %v10016_v60, %v13396_v44  ;;  %v5181_v26 = vpop.xlane.xlu2 %5180  ;;  %v5338_v44 = vsel %vm4329_vm3, %v13687_v58, 0.0  ;;  %v15380_v30 = vld [vmem:[#allocation30_spill] sm:$0xff] }
 0x68b   : > { %v10020_v52 = vpop.eup %10019  ;;  %10021 = vrcp.f32 %v5181_v26  ;;  %6863 = vmatpush.bf16.msra.mxu3 %v9506_v1  ;;  %v5253_v36 = vpop.xlane.xlu1 %5252  ;;  %v5636_v48 = vmul.f32 %v10018_v21, %v15377_v54  ;;  %v13701_v24 = vadd.f32 %v15380_v30, %v4120_v5  ;;  %v15381_v1 = vld [vmem:[#allocation75_spill] sm:$0xff] }
 0x68c   : > { %v5834_v38 = vpack.c.bf16 %v5706_v20, %v5706_v20  ;;  %v5707_v7 = vmul.f32 %v10020_v52, %v13403_v11  ;;  %9099 = vmatmul.msk.bf16.vlgmr.msra.gmra.mxu1 %vm4329_vm3, %v6647_v35  ;;  %10023 = vrcp.f32 %v5253_v36  ;;  %v5250_v18 = vpop.xlane.xlu0 %5249  ;;  %v15378_v11 = vld [vmem:[#allocation150_spill] sm:$0xff]  ;;  %v13704_v26 = vpop.f32.mrf.mxu2  ;;  %v15382_v52 = vld [vmem:[#allocation8_spill] sm:$0xff] }
 0x68d   : > { %7118 = vmatpush.bf16.msrb.mxu2 %v9518_v55  ;;  %10025 = vrcp.f32 %v5250_v18  ;;  %v4773_v14 = vsub.f32 %v15379_v31, %v15378_v11  ;;  %v5764_v43 = vpack.c.bf16 %v5636_v48, %v5636_v48  ;;  %v15383_v18 = vld [vmem:[#allocation143_spill] sm:$0xff] }
 0x68e   : > { %v6894_v41 = vunpack.c.l.b16 %v5834_v38  ;;  %v5835_v9 = vpack.c.bf16 %v5707_v7, %v5707_v7 }
 0x68f   : > { %6864 = vmatpush.bf16.msra.mxu3 %v9505_v3  ;;  %5339 = vadd.xlane.f32.xlu0 %v5338_v44  ;;  %v4121_v3 = vadd.f32 %v15383_v18, %v13612_v37  ;;  %v4960_v5 = vmul.f32 1.442695, %v4773_v14  ;;  %v6131_v31 = vunpack.c.l.b16 %v5764_v43 }
 0x690   : > { %v6895_v56 = vunpack.c.l.b16 %v5835_v9  ;;  %v6016_v57 = vpop.f32.mrf.mxu1 }
 0x691   : > { %v10022_v12 = vpop.eup %10021  ;;  %7119 = vmatpush.bf16.msrb.mxu2 %v9517_v6  ;;  %v7234_v21 = vpack.c.bf16 %v6016_v57, %v6016_v57  ;;  %v15386_v57 = vld [vmem:[#allocation100_spill] sm:$0xff] }
 0x692   : > { %v10024_v22 = vpop.eup %10023  ;;  %v6902_v60 = vpack.c.b16 %v6895_v56, %v6894_v41  ;;  %v5637_v35 = vmul.f32 %v10022_v12, %v15381_v1  ;;  %v4644_v20 = vpop.xlane.xlu2 %4643  ;;  %v15384_v41 = vld [vmem:[#allocation116_spill] sm:$0xff]  ;;  %v15385_v12 = vld [vmem:[#allocation147_spill] sm:$0xff] }
 0x693   : > { %v5661_v55 = vmul.f32 %v10024_v22, %v15382_v52  ;;  %v4818_v36 = vsub.f32 %v13429_v42, %v4644_v20  ;;  %v5322_v38 = vpop.xlane.xlu1 %5321  ;;  %v10026_v7 = vpop.eup %10025  ;;  %7266 = vst.msk [vmem:[#allocation5 + $0x20] sm:$0xf] %vm590_vm1, %v7234_v21  ;;  %v4663_v42 = vsel %vm4329_vm3, %v13701_v24, -inf  ;;  %v4772_v30 = vsub.f32 %v15386_v57, %v15385_v12  ;;  %v15387_v21 = vld [vmem:[#allocation29_spill] sm:$0xff]  ;;  %v15393_v57 = vld [vmem:[#allocation34_spill] sm:$0xff] }
 0x694   : > { %v5765_v44 = vpack.c.bf16 %v5637_v35, %v5637_v35  ;;  %9159 = vmatmul.msk.bf16.vlgmr.msrb.gmra.mxu0 %vm4329_vm3, %v6902_v60  ;;  %v5660_v9 = vmul.f32 %v10026_v7, %v15384_v41  ;;  %10027 = vrcp.f32 %v5322_v38  ;;  %v4647_v6 = vpop.xlane.xlu0 %4646  ;;  %v13719_v20 = vadd.f32 %v15387_v21, %v4121_v3  ;;  %v15388_v38 = vld [vmem:[#allocation13_spill] sm:$0xff]  ;;  %v15389_v41 = vld [vmem:[#allocation31_spill] sm:$0xff] }
 0x695   : > { %v5789_v54 = vpack.c.bf16 %v5661_v55, %v5661_v55  ;;  %v5050_v48 = vmul.f32 1.442695, %v4818_v36  ;;  %v4819_v11 = vsub.f32 %v13449_v53, %v4647_v6  ;;  %v4122_v7 = vadd.f32 %v15388_v38, %v13635_v33 }
 0x696   : > { %v6132_v56 = vunpack.c.l.b16 %v5765_v44  ;;  %v5788_v37 = vpack.c.bf16 %v5660_v9, %v5660_v9  ;;  %v4958_v44 = vmul.f32 1.442695, %v4772_v30 }
 0x697   : > { %10029 = vpow2.f32 %v5050_v48  ;;  %4664 = vmax.xlane.f32.xlu0 %v4663_v42  ;;  %v6387_v14 = vunpack.c.l.b16 %v5789_v54  ;;  %v5052_v22 = vmul.f32 1.442695, %v4819_v11  ;;  %v13729_v54 = vpop.f32.mrf.mxu2  ;;  %v4666_v11 = vsel %vm4329_vm3, %v13719_v20, -inf }
 0x698   : > { %v6138_v60 = vpack.c.b16 %v6132_v56, %v6131_v31  ;;  %10031 = vpow2.f32 %v4960_v5  ;;  %v6018_v1 = vpop.f32.mrf.mxu1  ;;  %v6386_v35 = vunpack.c.l.b16 %v5788_v37  ;;  %v15390_v5 = vld [vmem:[#allocation137_spill] sm:$0xff] }
 0x699   : > { %10033 = vpow2.f32 %v5052_v22  ;;  %v7235_v53 = vpack.c.bf16 %v6018_v1, %v6018_v1  ;;  %v4796_v9 = vsub.f32 %v15390_v5, %v15389_v41  ;;  %v15391_v37 = vld [vmem:[#allocation101_spill] sm:$0xff] }
 0x69a   : > { %8980 = vmatmul.msk.bf16.gmra.mxu3 %vm4329_vm3, %v6138_v60  ;;  %v5325_v43 = vpop.xlane.xlu2 %5324  ;;  %v10028_v52 = vpop.eup %10027  ;;  %v6393_v55 = vpack.c.b16 %v6387_v14, %v6386_v35  ;;  %v15392_v14 = vld [vmem:[#allocation139_spill] sm:$0xff] }
 0x69b   : > { %10035 = vrcp.f32 %v5325_v43  ;;  %v5397_v36 = vpop.xlane.xlu1 %5396  ;;  %7267 = vst.msk [vmem:[#allocation5 + $0x24] sm:$0xf] %vm590_vm1, %v7235_v53  ;;  %v5684_v6 = vmul.f32 %v10028_v52, %v13434_v50  ;;  %v5006_v56 = vmul.f32 1.442695, %v4796_v9  ;;  %v4797_v12 = vsub.f32 %v15392_v14, %v15391_v37 }
 0x69c   : > { %10037 = vrcp.f32 %v5397_v36  ;;  %9040 = vmatmul.msk.bf16.gmra.mxu2 %vm4329_vm3, %v6393_v55  ;;  %v5394_v48 = vpop.xlane.xlu0 %5393  ;;  %v13744_v50 = vadd.f32 %v15393_v57, %v4122_v7 }
 0x69d   : > { %v13727_v3 = vpop.eup %10029  ;;  %10039 = vrcp.f32 %v5394_v48  ;;  %v5812_v35 = vpack.c.bf16 %v5684_v6, %v5684_v6  ;;  %v5008_v7 = vmul.f32 1.442695, %v4797_v12 }
 0x69e   : > { %v5410_v33 = vsel %vm4329_vm3, %v13727_v3, 0.0  ;;  %v13737_v42 = vpop.eup %10031  ;;  %10041 = vpow2.f32 %v4958_v44  ;;  %v4669_v41 = vsel %vm4329_vm3, %v13744_v50, -inf }
 0x69f   : > { %5411 = vadd.xlane.f32.xlu1 %v5410_v33  ;;  %4667 = vmax.xlane.f32.xlu0 %v4666_v11  ;;  %v13739_v31 = vpop.eup %10033  ;;  %v6641_v11 = vunpack.c.l.b16 %v5812_v35 }
 0x6a0   : > { %v5413_v22 = vsel %vm4329_vm3, %v13739_v31, 0.0 }
 0x6a1   : > { %v10036_v30 = vpop.eup %10035  ;;  %v6021_v60 = vpop.f32.mrf.mxu1  ;;  %5414 = vadd.xlane.f32.xlu2 %v5413_v22 }
 0x6a2   : > { %v10038_v1 = vpop.eup %10037  ;;  %v5685_v21 = vmul.f32 %v10036_v30, %v13453_v61  ;;  %v7236_v53 = vpack.c.bf16 %v6021_v60, %v6021_v60  ;;  %v5184_v43 = vpop.xlane.xlu2 %5183 }
 0x6a3   : > { %v5709_v52 = vmul.f32 %v10038_v1, %v13467_v49  ;;  %10043 = vrcp.f32 %v5184_v43  ;;  %v5256_v55 = vpop.xlane.xlu1 %5255  ;;  %v10040_v36 = vpop.eup %10039  ;;  %v5275_v49 = vsel %vm4329_vm3, %v13737_v42, 0.0  ;;  %v15394_v1 = vld [vmem:[#allocation43_spill] sm:$0xff] }
 0x6a4   : > { %10045 = vpow2.f32 %v5006_v56  ;;  %v5813_v44 = vpack.c.bf16 %v5685_v21, %v5685_v21  ;;  %7268 = vst.msk [vmem:[#allocation5 + $0x28] sm:$0xf] %vm590_vm1, %v7236_v53  ;;  %v5708_v9 = vmul.f32 %v10040_v36, %v13471_v23  ;;  %v5187_v61 = vpop.xlane.xlu0 %5186  ;;  %v13756_v6 = vpop.eup %10041 }
 0x6a5   : > { %v5837_v5 = vpack.c.bf16 %v5709_v52, %v5709_v52  ;;  %10047 = vrcp.f32 %v5256_v55  ;;  %v5946_v48 = vpop.f32.mrf.mxu2  ;;  %v5272_v57 = vsel %vm4329_vm3, %v13756_v6, 0.0 }
 0x6a6   : > { %10049 = vrcp.f32 %v5187_v61  ;;  %v7232_v33 = vpack.c.bf16 %v5946_v48, %v5946_v48  ;;  %v6642_v56 = vunpack.c.l.b16 %v5813_v44  ;;  %v5836_v37 = vpack.c.bf16 %v5708_v9, %v5708_v9 }
 0x6a7   : > { %4670 = vmax.xlane.f32.xlu1 %v4669_v41  ;;  %5276 = vadd.xlane.f32.xlu0 %v5275_v49  ;;  %v6897_v14 = vunpack.c.l.b16 %v5837_v5  ;;  %10051 = vpow2.f32 %v5008_v7  ;;  %v15395_v41 = vld [vmem:[#allocation154_spill] sm:$0xff]  ;;  %v15396_v5 = vld [vmem:[#allocation108_spill] sm:$0xff] }
 0x6a8   : > { %7264 = vst.msk [vmem:[#allocation5 + $0x18] sm:$0xf] %vm590_vm1, %v7232_v33  ;;  %v6648_v23 = vpack.c.b16 %v6642_v56, %v6641_v11  ;;  %v6896_v22 = vunpack.c.l.b16 %v5836_v37  ;;  %v4774_v9 = vsub.f32 %v15396_v5, %v15395_v41  ;;  %v15397_v56 = vld [vmem:[#allocation119_spill] sm:$0xff] }
 0x6a9   : > { %v10044_v12 = vpop.eup %10043  ;;  %v6023_v30 = vpop.f32.mrf.mxu1  ;;  %5273 = vadd.xlane.f32.xlu2 %v5272_v57 }
 0x6aa   : > { %v13761_v60 = vpop.eup %10045  ;;  %v5638_v21 = vmul.f32 %v10044_v12, %v15394_v1  ;;  %v7237_v35 = vpack.c.bf16 %v6023_v30, %v6023_v30  ;;  %v5259_v53 = vpop.xlane.xlu2 %5258  ;;  %9100 = vmatmul.msk.bf16.gmra.mxu1 %vm4329_vm3, %v6648_v23  ;;  %v6903_v52 = vpack.c.b16 %v6897_v14, %v6896_v22  ;;  %v15398_v30 = vld [vmem:[#allocation152_spill] sm:$0xff] }
 0x6ab   : > { %v10048_v43 = vpop.eup %10047  ;;  %10053 = vrcp.f32 %v5259_v53  ;;  %v4653_v55 = vpop.xlane.xlu1 %4652  ;;  %v5344_v33 = vsel %vm4329_vm3, %v13761_v60, 0.0 }
 0x6ac   : > { %v10050_v36 = vpop.eup %10049  ;;  %v5766_v7 = vpack.c.bf16 %v5638_v21, %v5638_v21  ;;  %7269 = vst.msk [vmem:[#allocation5 + $0x2c] sm:$0xf] %vm590_vm1, %v7237_v35  ;;  %v4821_v44 = vsub.f32 %v13517_v59, %v4653_v55  ;;  %9160 = vmatmul.msk.bf16.gmra.mxu0 %vm4329_vm3, %v6903_v52  ;;  %v4650_v48 = vpop.xlane.xlu0 %4649  ;;  %v5662_v37 = vmul.f32 %v10048_v43, %v15397_v56  ;;  %v15400_v35 = vld [vmem:[#allocation64_spill] sm:$0xff]  ;;  %v4962_v52 = vmul.f32 1.442695, %v4774_v9 }
 0x6ad   : > { %v5639_v61 = vmul.f32 %v10050_v36, %v13492_v45  ;;  %v5948_v49 = vpop.f32.mrf.mxu2  ;;  %v13773_v11 = vpop.eup %10051  ;;  %v4820_v14 = vsub.f32 %v13514_v40, %v4650_v48  ;;  %v15399_v45 = vld [vmem:[#allocation107_spill] sm:$0xff]  ;;  %v4123_v53 = vadd.f32 %v15400_v35, %v13652_v17  ;;  %v15401_v17 = vld [vmem:[#allocation36_spill] sm:$0xff] }
 0x6ae   : > { %v5056_v23 = vmul.f32 1.442695, %v4821_v44  ;;  %v7233_v59 = vpack.c.bf16 %v5948_v49, %v5948_v49  ;;  %v6133_v57 = vunpack.c.l.b16 %v5766_v7  ;;  %v4775_v22 = vsub.f32 %v15399_v45, %v15398_v30  ;;  %v15403_v56 = vld [vmem:[#allocation140_spill] sm:$0xff]  ;;  %v13794_v30 = vpop.f32.mrf.mxu3 }
 0x6af   : > { %v5767_v12 = vpack.c.bf16 %v5639_v61, %v5639_v61  ;;  %5345 = vadd.xlane.f32.xlu1 %v5344_v33  ;;  %v5054_v1 = vmul.f32 1.442695, %v4820_v14  ;;  %v5347_v40 = vsel %vm4329_vm3, %v13773_v11, 0.0  ;;  %v5790_v36 = vpack.c.bf16 %v5662_v37, %v5662_v37  ;;  %v15402_v33 = vld [vmem:[#allocation26_spill] sm:$0xff] }
 0x6b0   : > { %10055 = vpow2.f32 %v5056_v23  ;;  %7265 = vst.msk [vmem:[#allocation5 + $0x1c] sm:$0xf] %vm590_vm1, %v7233_v59  ;;  %v4964_v48 = vmul.f32 1.442695, %v4775_v22  ;;  %v13787_v9 = vadd.f32 %v15401_v17, %v4123_v53  ;;  %v4799_v37 = vsub.f32 %v15403_v56, %v15402_v33 }
 0x6b1   : > { %v10054_v21 = vpop.eup %10053  ;;  %v6026_v43 = vpop.f32.mrf.mxu1  ;;  %v6134_v55 = vunpack.c.l.b16 %v5767_v12  ;;  %10057 = vpow2.f32 %v5054_v1  ;;  %5348 = vadd.xlane.f32.xlu2 %v5347_v40  ;;  %v6388_v12 = vunpack.c.l.b16 %v5790_v36  ;;  %v15404_v1 = vld [vmem:[#allocation102_spill] sm:$0xff] }
 0x6b2   : > { %v5663_v7 = vmul.f32 %v10054_v21, %v13501_v25  ;;  %v7238_v44 = vpack.c.bf16 %v6026_v43, %v6026_v43  ;;  %v5328_v41 = vpop.xlane.xlu2 %5327  ;;  %v15405_v21 = vld [vmem:[#allocation141_spill] sm:$0xff]  ;;  %v15406_v43 = vld [vmem:[#allocation148_spill] sm:$0xff]  ;;  %v5012_v36 = vmul.f32 1.442695, %v4799_v37 }
 0x6b3   : > { %10059 = vrcp.f32 %v5328_v41  ;;  %v6139_v5 = vpack.c.b16 %v6134_v55, %v6133_v57  ;;  %v5400_v61 = vpop.xlane.xlu1 %5399  ;;  %v4798_v53 = vsub.f32 %v15405_v21, %v15404_v1  ;;  %v4124_v55 = vadd.f32 %v15406_v43, %v13665_v28 }
 0x6b4   : > { %v5791_v49 = vpack.c.bf16 %v5663_v7, %v5663_v7  ;;  %7270 = vst.msk [vmem:[#allocation5 + $0x30] sm:$0xf] %vm590_vm1, %v7238_v44  ;;  %10061 = vrcp.f32 %v5400_v61  ;;  %v5331_v25 = vpop.xlane.xlu0 %5330  ;;  %v4672_v7 = vsel %vm4329_vm3, %v13787_v9, -inf }
 0x6b5   : > { %10063 = vpow2.f32 %v4962_v52  ;;  %8981 = vmatmul.msk.bf16.gmra.mxu3 %vm4329_vm3, %v6139_v5  ;;  %v6031_v14 = vpop.f32.mrf.mxu2  ;;  %v5010_v56 = vmul.f32 1.442695, %v4798_v53 }
 0x6b6   : > { %v13792_v23 = vpop.eup %10055  ;;  %10065 = vrcp.f32 %v5331_v25  ;;  %v7240_v59 = vpack.c.bf16 %v6031_v14, %v6031_v14  ;;  %v6389_v57 = vunpack.c.l.b16 %v5791_v49 }
 0x6b7   : > { %v5419_v45 = vsel %vm4329_vm3, %v13792_v23, 0.0  ;;  %v13798_v22 = vpop.eup %10057  ;;  %10067 = vpow2.f32 %v4964_v48 }
 0x6b8   : > { %7272 = vst.msk [vmem:[#allocation5 + $0x38] sm:$0xf] %vm590_vm1, %v7240_v59  ;;  %5420 = vadd.xlane.f32.xlu1 %v5419_v45  ;;  %v6394_v52 = vpack.c.b16 %v6389_v57, %v6388_v12  ;;  %v5416_v41 = vsel %vm4329_vm3, %v13798_v22, 0.0  ;;  %v15408_v57 = vld [vmem:[#allocation35_spill] sm:$0xff] }
 0x6b9   : > { %v10060_v40 = vpop.eup %10059  ;;  %v6028_v44 = vpop.f32.mrf.mxu1  ;;  %4673 = vmax.xlane.f32.xlu2 %v4672_v7  ;;  %5417 = vadd.xlane.f32.xlu0 %v5416_v41  ;;  %v13817_v45 = vadd.f32 %v15408_v57, %v4124_v55 }
 0x6ba   : > { %v10062_v5 = vpop.eup %10061  ;;  %v5686_v61 = vmul.f32 %v10060_v40, %v13526_v10  ;;  %v7239_v48 = vpack.c.bf16 %v6028_v44, %v6028_v44  ;;  %v5403_v49 = vpop.xlane.xlu2 %5402  ;;  %9041 = vmatmul.msk.bf16.gmra.mxu2 %vm4329_vm3, %v6394_v52  ;;  %v15407_v10 = vld [vmem:[#allocation120_spill] sm:$0xff] }
 0x6bb   : > { %v13810_v17 = vpop.eup %10063  ;;  %10069 = vrcp.f32 %v5403_v49  ;;  %v5193_v28 = vpop.xlane.xlu1 %5192  ;;  %v5710_v14 = vmul.f32 %v10062_v5, %v15407_v10  ;;  %v4675_v44 = vsel %vm4329_vm3, %v13817_v45, -inf }
 0x6bc   : > { %v10066_v33 = vpop.eup %10065  ;;  %v5814_v37 = vpack.c.bf16 %v5686_v61, %v5686_v61  ;;  %7271 = vst.msk [vmem:[#allocation5 + $0x34] sm:$0xf] %vm590_vm1, %v7239_v48  ;;  %10071 = vrcp.f32 %v5193_v28  ;;  %v5190_v59 = vpop.xlane.xlu0 %5189  ;;  %v5278_v53 = vsel %vm4329_vm3, %v13810_v17, 0.0  ;;  %v15409_v61 = vld [vmem:[#allocation80_spill] sm:$0xff] }
 0x6bd   : > { %10073 = vpow2.f32 %v5012_v36  ;;  %v5687_v25 = vmul.f32 %v10066_v33, %v13540_v27  ;;  %v6033_v12 = vpop.f32.mrf.mxu2  ;;  %v13819_v1 = vpop.eup %10067  ;;  %v5838_v7 = vpack.c.bf16 %v5710_v14, %v5710_v14  ;;  %v15410_v33 = vld [vmem:[#allocation45_spill] sm:$0xff] }
 0x6be   : > { %10075 = vrcp.f32 %v5190_v59  ;;  %v7241_v21 = vpack.c.bf16 %v6033_v12, %v6033_v12  ;;  %v6643_v40 = vunpack.c.l.b16 %v5814_v37  ;;  %v13824_v36 = vpop.f32.mrf.mxu3  ;;  %v5281_v55 = vsel %vm4329_vm3, %v13819_v1, 0.0  ;;  %v15411_v14 = vld [vmem:[#allocation153_spill] sm:$0xff] }
 0x6bf   : > { %v5815_v52 = vpack.c.bf16 %v5687_v25, %v5687_v25  ;;  %10077 = vpow2.f32 %v5010_v56  ;;  %v4125_v59 = vadd.f32 %v15411_v14, %v13676_v62 }
 0x6c0   : > { %7273 = vst.msk [vmem:[#allocation5 + $0x3c] sm:$0xf] %vm590_vm1, %v7241_v21  ;;  %5279 = vadd.xlane.f32.xlu1 %v5278_v53  ;;  %v15412_v21 = vld [vmem:[#allocation157_spill] sm:$0xff] }
 0x6c1   : > { %v10070_v27 = vpop.eup %10069  ;;  %v6644_v41 = vunpack.c.l.b16 %v5815_v52  ;;  %5282 = vadd.xlane.f32.xlu2 %v5281_v55  ;;  %4676 = vmax.xlane.f32.xlu0 %v4675_v44  ;;  %v15413_v52 = vld [vmem:[#allocation115_spill] sm:$0xff] }
 0x6c2   : > { %v10072_v5 = vpop.eup %10071  ;;  %v5711_v48 = vmul.f32 %v10070_v27, %v15409_v61  ;;  %v5262_v49 = vpop.xlane.xlu2 %5261  ;;  %v4777_v53 = vsub.f32 %v15413_v52, %v15412_v21  ;;  %v15414_v27 = vld [vmem:[#allocation76_spill] sm:$0xff] }
 0x6c3   : > { %v13831_v28 = vpop.eup %10073  ;;  %v5641_v56 = vmul.f32 %v10072_v5, %v15410_v33  ;;  %10079 = vrcp.f32 %v5262_v49  ;;  %v6649_v37 = vpack.c.b16 %v6644_v41, %v6643_v40  ;;  %v4656_v25 = vpop.xlane.xlu1 %4655  ;;  %v6898_v49 = vunpack.c.l.b16 %v5838_v7 }
 0x6c4   : > { %v10076_v10 = vpop.eup %10075  ;;  %v5839_v12 = vpack.c.bf16 %v5711_v48, %v5711_v48  ;;  %v4822_v57 = vsub.f32 %v13578_v13, %v4656_v25  ;;  %v5265_v61 = vpop.xlane.xlu0 %5264  ;;  %v5353_v13 = vsel %vm4329_vm3, %v13831_v28, 0.0  ;;  %v4968_v7 = vmul.f32 1.442695, %v4777_v53 }
 0x6c5   : > { %v5640_v55 = vmul.f32 %v10076_v10, %v15414_v27  ;;  %v5769_v44 = vpack.c.bf16 %v5641_v56, %v5641_v56  ;;  %9101 = vmatmul.msk.bf16.gmra.mxu1 %vm4329_vm3, %v6649_v37  ;;  %v6101_v5 = vpop.f32.mrf.mxu2  ;;  %v13841_v40 = vpop.eup %10077  ;;  %10081 = vrcp.f32 %v5265_v61  ;;  %v15415_v37 = vld [vmem:[#allocation40_spill] sm:$0xff] }
 0x6c6   : > { %v5058_v41 = vmul.f32 1.442695, %v4822_v57  ;;  %v7242_v33 = vpack.c.bf16 %v6101_v5, %v6101_v5  ;;  %v6899_v62 = vunpack.c.l.b16 %v5839_v12  ;;  %v13847_v21 = vadd.f32 %v15415_v37, %v4125_v59  ;;  %v15416_v59 = vld [vmem:[#allocation93_spill] sm:$0xff] }
 0x6c7   : > { %v5768_v48 = vpack.c.bf16 %v5640_v55, %v5640_v55  ;;  %v6136_v25 = vunpack.c.l.b16 %v5769_v44  ;;  %v5350_v57 = vsel %vm4329_vm3, %v13841_v40, 0.0  ;;  %v13853_v55 = vpop.f32.mrf.mxu3  ;;  %v15419_v37 = vld [vmem:[#allocation77_spill] sm:$0xff] }
 0x6c8   : > { %10083 = vpow2.f32 %v5058_v41  ;;  %7274 = vst.msk [vmem:[#allocation5 + $0x40] sm:$0xf] %vm590_vm1, %v7242_v33  ;;  %5354 = vadd.xlane.f32.xlu1 %v5353_v13  ;;  %v6904_v56 = vpack.c.b16 %v6899_v62, %v6898_v49  ;;  %v15417_v41 = vld [vmem:[#allocation110_spill] sm:$0xff] }
 0x6c9   : > { %v10080_v10 = vpop.eup %10079  ;;  %v6135_v52 = vunpack.c.l.b16 %v5768_v48  ;;  %5351 = vadd.xlane.f32.xlu0 %v5350_v57  ;;  %v4776_v53 = vsub.f32 %v15417_v41, %v15416_v59 }
 0x6ca   : > { %v5664_v12 = vmul.f32 %v10080_v10, %v13568_v15  ;;  %9161 = vmatmul.msk.bf16.gmra.mxu0 %vm4329_vm3, %v6904_v56  ;;  %v4659_v27 = vpop.xlane.xlu2 %4658  ;;  %v4678_v56 = vsel %vm4329_vm3, %v13847_v21, -inf  ;;  %v15418_v10 = vld [vmem:[#allocation27_spill] sm:$0xff] }
 0x6cb   : > { %v4823_v44 = vsub.f32 %v13601_v2, %v4659_v27  ;;  %v6140_v61 = vpack.c.b16 %v6136_v25, %v6135_v52  ;;  %v5337_v5 = vpop.xlane.xlu1 %5336  ;;  %v10082_v49 = vpop.eup %10081  ;;  %v4126_v25 = vadd.f32 %v15362_v29, %v13689_v47  ;;  %v4800_v57 = vsub.f32 %v15419_v37, %v15418_v10  ;;  %v15422_v10 = vld [vmem:[#allocation79_spill] sm:$0xff] }
 0x6cc   : > { %v5792_v33 = vpack.c.bf16 %v5664_v12, %v5664_v12  ;;  %10085 = vrcp.f32 %v5337_v5  ;;  %v5665_v62 = vmul.f32 %v10082_v49, %v13588_v32  ;;  %v5334_v48 = vpop.xlane.xlu0 %5333  ;;  %v4966_v27 = vmul.f32 1.442695, %v4776_v53 }
 0x6cd   : > { %10087 = vpow2.f32 %v4968_v7  ;;  %v5060_v15 = vmul.f32 1.442695, %v4823_v44  ;;  %8982 = vmatmul.msk.bf16.gmra.mxu3 %vm4329_vm3, %v6140_v61  ;;  %v6103_v13 = vpop.f32.mrf.mxu2  ;;  %v5014_v5 = vmul.f32 1.442695, %v4800_v57 }
 0x6ce   : > { %v13862_v2 = vpop.eup %10083  ;;  %10089 = vrcp.f32 %v5334_v48  ;;  %v7243_v7 = vpack.c.bf16 %v6103_v13, %v6103_v13  ;;  %v5793_v52 = vpack.c.bf16 %v5665_v62, %v5665_v62  ;;  %v6390_v12 = vunpack.c.l.b16 %v5792_v33 }
 0x6cf   : > { %10091 = vpow2.f32 %v5060_v15  ;;  %v5422_v32 = vsel %vm4329_vm3, %v13862_v2, 0.0  ;;  %v15420_v15 = vld [vmem:[#allocation42_spill] sm:$0xff]  ;;  %v13881_v13 = vpop.f32.mrf.mxu3 }
 0x6d0   : > { %7275 = vst.msk [vmem:[#allocation5 + $0x44] sm:$0xf] %vm590_vm1, %v7243_v7  ;;  %4679 = vmax.xlane.f32.xlu1 %v4678_v56  ;;  %5423 = vadd.xlane.f32.xlu2 %v5422_v32  ;;  %v6391_v44 = vunpack.c.l.b16 %v5793_v52  ;;  %v13877_v48 = vadd.f32 %v15420_v15, %v4126_v25  ;;  %10093 = vpow2.f32 %v4966_v27  ;;  %v15421_v56 = vld [vmem:[#allocation32_spill] sm:$0xff] }
 0x6d1   : > { %v4801_v37 = vsub.f32 %v15422_v10, %v15421_v56 }
 0x6d2   : > { %v10086_v61 = vpop.eup %10085  ;;  %v13871_v47 = vpop.xlane.xlu2 %5405  ;;  %v6395_v41 = vpack.c.b16 %v6391_v44, %v6390_v12  ;;  %v4681_v27 = vsel %vm4329_vm3, %v13877_v48, -inf }
 0x6d3   : > { %v13873_v49 = vpop.eup %10087  ;;  %v5689_v59 = vmul.f32 %v10086_v61, %v13590_v0  ;;  %v5268_v62 = vpop.xlane.xlu1 %5267 }
 0x6d4   : > { %v10090_v33 = vpop.eup %10089  ;;  %9042 = vmatmul.msk.bf16.gmra.mxu2 %vm4329_vm3, %v6395_v41  ;;  %10095 = vrcp.f32 %v5268_v62  ;;  %v5287_v12 = vsel %vm4329_vm3, %v13873_v49, 0.0 }
 0x6d5   : > { %v13879_v53 = vpop.eup %10091  ;;  %v5688_v57 = vmul.f32 %v10090_v33, %v13609_v4  ;;  %v5817_v7 = vpack.c.bf16 %v5689_v59, %v5689_v59  ;;  %v6106_v0 = vpop.f32.mrf.mxu2  ;;  %10097 = vpow2.f32 %v5014_v5  ;;  %v5016_v4 = vmul.f32 1.442695, %v4801_v37 }
 0x6d6   : > { %v7244_v52 = vpack.c.bf16 %v6106_v0, %v6106_v0  ;;  %v5425_v25 = vsel %vm4329_vm3, %v13879_v53, 0.0  ;;  %v13894_v5 = vpop.eup %10093 }
 0x6d7   : > { %v5816_v32 = vpack.c.bf16 %v5688_v57, %v5688_v57  ;;  %5426 = vadd.xlane.f32.xlu0 %v5425_v25  ;;  %v6646_v44 = vunpack.c.l.b16 %v5817_v7  ;;  %v5284_v57 = vsel %vm4329_vm3, %v13894_v5, 0.0  ;;  %v13902_v37 = vpop.f32.mrf.mxu3 }
 0x6d8   : > { %7276 = vst.msk [vmem:[#allocation5 + $0x48] sm:$0xf] %vm590_vm1, %v7244_v52  ;;  %5288 = vadd.xlane.f32.xlu1 %v5287_v12  ;;  %4682 = vmax.xlane.f32.xlu2 %v4681_v27 }
 0x6d9   : > { %v6645_v61 = vunpack.c.l.b16 %v5816_v32 }
 0x6da   : > { %v5271_v59 = vpop.xlane.xlu2 %5270  ;;  %v10096_v41 = vpop.eup %10095 }
 0x6db   : > { %10099 = vrcp.f32 %v5271_v59  ;;  %v6650_v62 = vpack.c.b16 %v6646_v44, %v6645_v61  ;;  %v13896_v15 = vpop.eup %10097  ;;  %v5666_v56 = vmul.f32 %v10096_v41, %v13622_v46  ;;  %v15423_v44 = vld [vmem:[#allocation72_spill] sm:$0xff] }
 0x6dc   : > { %10101 = vpow2.f32 %v5016_v4  ;;  %v5356_v7 = vsel %vm4329_vm3, %v13896_v15, 0.0  ;;  %v15424_v4 = vld [vmem:[#allocation7_spill] sm:$0xff] }
 0x6dd   : > { %9102 = vmatmul.msk.bf16.gmra.mxu1 %vm4329_vm3, %v6650_v62  ;;  %v6108_v33 = vpop.f32.mrf.mxu2  ;;  %v5794_v52 = vpack.c.bf16 %v5666_v56, %v5666_v56  ;;  %v4803_v61 = vsub.f32 %v15424_v4, %v15423_v44 }
 0x6de   : > { %v7245_v10 = vpack.c.bf16 %v6108_v33, %v6108_v33 }
 0x6df   : > { %5285 = vadd.xlane.f32.xlu0 %v5284_v57  ;;  %v6469_v62 = vunpack.c.l.b16 %v5794_v52  ;;  %v15425_v52 = vld [vmem:[#allocation41_spill] sm:$0xff] }
 0x6e0   : > { %7277 = vst.msk [vmem:[#allocation5 + $0x4c] sm:$0xf] %vm590_vm1, %v7245_v10  ;;  %5357 = vadd.xlane.f32.xlu2 %v5356_v7  ;;  %v9524_v7 = vld [vmem:[#allocation4 + $0x1f8] sm:$0xff] }
 0x6e1   : > { %v10100_v0 = vpop.eup %10099 }
 0x6e2   : > { %v5667_v25 = vmul.f32 %v10100_v0, %v13627_v34  ;;  %v4662_v32 = vpop.xlane.xlu2 %4661  ;;  %v13908_v12 = vpop.eup %10101  ;;  %v4127_v34 = vadd.f32 %v15372_v63, %v13704_v26  ;;  %v5020_v0 = vmul.f32 1.442695, %v4803_v61  ;;  %v4128_v26 = vadd.f32 %v15376_v16, %v13729_v54 }
 0x6e3   : > { %v4824_v46 = vsub.f32 %v13649_v39, %v4662_v32  ;;  %v5359_v10 = vsel %vm4329_vm3, %v13908_v12, 0.0  ;;  %v13918_v39 = vpop.f32.mrf.mxu3 }
 0x6e4   : > { %v5795_v27 = vpack.c.bf16 %v5667_v25, %v5667_v25  ;;  %v13922_v25 = vadd.f32 %v15425_v52, %v4127_v34  ;;  %v9521_v34 = vld [vmem:[#allocation4 + $0x1e0] sm:$0xff] }
 0x6e5   : > { %v5062_v59 = vmul.f32 1.442695, %v4824_v46  ;;  %v6111_v41 = vpop.f32.mrf.mxu2 }
 0x6e6   : > { %v6470_v33 = vunpack.c.l.b16 %v5795_v27  ;;  %v7246_v57 = vpack.c.bf16 %v6111_v41, %v6111_v41  ;;  %v9523_v27 = vld [vmem:[#allocation4 + $0x1f0] sm:$0xff]  ;;  %v4684_v61 = vsel %vm4329_vm3, %v13922_v25, -inf  ;;  %v9522_v41 = vld [vmem:[#allocation4 + $0x1e8] sm:$0xff] }
 0x6e7   : > { %10103 = vpow2.f32 %v5062_v59  ;;  %5360 = vadd.xlane.f32.xlu0 %v5359_v10  ;;  %v13933_v59 = vpop.f32.mrf.mxu0 }
 0x6e8   : > { %v6477_v56 = vpack.c.b16 %v6470_v33, %v6469_v62  ;;  %7278 = vst.msk [vmem:[#allocation5 + $0x50] sm:$0xf] %vm590_vm1, %v7246_v57  ;;  %10105 = vpow2.f32 %v5020_v0  ;;  %v15426_v62 = vld [vmem:[#allocation46_spill] sm:$0xff] }
 0x6e9   : > { %v13936_v33 = vadd.f32 %v15426_v62, %v4128_v26  ;;  %10107 = vrcp.f32 %v13871_v47 }
 0x6ea   : > { %9059 = vmatmul.msk.bf16.vlgmr.msrb.gmra.mxu3 %vm4329_vm3, %v6477_v56  ;;  %v15428_v56 = vld [vmem:[#allocation114_spill] sm:$0xff] }
 0x6eb   : > { %7201 = vmatpush.bf16.msrb.mxu3 %v9524_v7  ;;  %v13938_v54 = vpop.f32.mrf.mxu3  ;;  %v15429_v7 = vld [vmem:[#allocation81_spill] sm:$0xff] }
 0x6ec   : > { %v4805_v0 = vsub.f32 %v15429_v7, %v15428_v56 }
 0x6ed   : > { %v13924_v32 = vpop.eup %10103  ;;  %v6113_v46 = vpop.f32.mrf.mxu2 }
 0x6ee   : > { %v7247_v44 = vpack.c.bf16 %v6113_v46, %v6113_v46  ;;  %v5428_v4 = vsel %vm4329_vm3, %v13924_v32, 0.0  ;;  %v13940_v57 = vpop.eup %10105  ;;  %v4687_v46 = vsel %vm4329_vm3, %v13936_v33, -inf  ;;  %v5024_v47 = vmul.f32 1.442695, %v4805_v0 }
 0x6ef   : > { %7202 = vmatpush.bf16.msrb.mxu3 %v9523_v27  ;;  %5429 = vadd.xlane.f32.xlu1 %v5428_v4  ;;  %15427 = vst [vmem:[#allocation121_spill] sm:$0xff] %v13940_v57  ;;  %v4129_v27 = vadd.f32 %v15383_v18, %v13794_v30  ;;  %v5365_v26 = vsel %vm4329_vm3, %v13940_v57, 0.0 }
 0x6f0   : > { %7279 = vst.msk [vmem:[#allocation5 + $0x54] sm:$0xf] %vm590_vm1, %v7247_v44  ;;  %4685 = vmax.xlane.f32.xlu0 %v4684_v61  ;;  %v5343_v44 = vpop.xlane.xlu1 %5342  ;;  %v10108_v61 = vpop.eup %10107 }
 0x6f1   : > { %v5712_v30 = vmul.f32 %v10108_v61, %v13616_v19 }
 0x6f3   : > { %7203 = vmatpush.bf16.msrb.mxu3 %v9522_v41  ;;  %v15430_v41 = vld [vmem:[#allocation48_spill] sm:$0xff]  ;;  %v13957_v56 = vpop.f32.mrf.mxu3 }
 0x6f4   : > { %v13953_v62 = vadd.f32 %v15430_v41, %v4129_v27  ;;  %v15434_v41 = vld [vmem:[#allocation83_spill] sm:$0xff] }
 0x6f5   : > { %v6116_v10 = vpop.f32.mrf.mxu2 }
 0x6f6   : > { %v7248_v52 = vpack.c.bf16 %v6116_v10, %v6116_v10  ;;  %v13955_v10 = vpop.f32.mrf.mxu0  ;;  %v4690_v7 = vsel %vm4329_vm3, %v13953_v62, -inf }
 0x6f7   : > { %7204 = vmatpush.bf16.msrb.mxu3 %v9521_v34  ;;  %4688 = vmax.xlane.f32.xlu1 %v4687_v46  ;;  %15431 = vst [vmem:[#allocation118_spill] sm:$0xff] %v13955_v10 }
 0x6f8   : > { %7280 = vst.msk [vmem:[#allocation5 + $0x58] sm:$0xf] %vm590_vm1, %v7248_v52  ;;  %5366 = vadd.xlane.f32.xlu0 %v5365_v26  ;;  %v5840_v52 = vpack.c.bf16 %v5712_v30, %v5712_v30 }
 0x6fa   : > { %v5409_v4 = vpop.xlane.xlu0 %5408 }
 0x6fb   : > { %10109 = vrcp.f32 %v5409_v4 }
 0x6fc   : > { %10111 = vrcp.f32 %v5343_v44 }
 0x6fd   : > { %v6118_v18 = vpop.f32.mrf.mxu2  ;;  %10113 = vpow2.f32 %v5024_v47  ;;  %v15433_v47 = vld [vmem:[#allocation39_spill] sm:$0xff] }
 0x6fe   : > { %v7249_v34 = vpack.c.bf16 %v6118_v18, %v6118_v18  ;;  %v4807_v19 = vsub.f32 %v15434_v41, %v15433_v47  ;;  %v13968_v61 = vpop.f32.mrf.mxu0 }
 0x700   : > { %7281 = vst.msk [vmem:[#allocation5 + $0x5c] sm:$0xf] %vm590_vm1, %v7249_v34  ;;  %4691 = vmax.xlane.f32.xlu0 %v4690_v7  ;;  %v6900_v7 = vunpack.c.l.b16 %v5840_v52  ;;  %v15435_v52 = vld [vmem:[#allocation52_spill] sm:$0xff] }
 0x701   : > { %v10110_v0 = vpop.eup %10109 }
 0x702   : > { %v5713_v46 = vmul.f32 %v10110_v0, %v13683_v51  ;;  %v5340_v27 = vpop.xlane.xlu0 %5339  ;;  %v10112_v26 = vpop.eup %10111  ;;  %v4131_v51 = vadd.f32 %v15400_v35, %v13853_v55 }
 0x703   : > { %10115 = vrcp.f32 %v5340_v27  ;;  %v13964_v4 = vpop.eup %10113  ;;  %v5691_v57 = vmul.f32 %v10112_v26, %v13631_v8  ;;  %v5028_v27 = vmul.f32 1.442695, %v4807_v19 }
 0x704   : > { %15432 = vst [vmem:[#allocation44_spill] sm:$0xff] %v13964_v4  ;;  %v5841_v44 = vpack.c.bf16 %v5713_v46, %v5713_v46  ;;  %v5371_v30 = vsel %vm4329_vm3, %v13964_v4, 0.0  ;;  %v13979_v26 = vadd.f32 %v15435_v52, %v4131_v51  ;;  %v15439_v52 = vld [vmem:[#allocation145_spill] sm:$0xff] }
 0x705   : > { %v6186_v18 = vpop.f32.mrf.mxu3  ;;  %v5819_v47 = vpack.c.bf16 %v5691_v57, %v5691_v57  ;;  %10117 = vpow2.f32 %v5028_v27 }
 0x706   : > { %v7250_v34 = vpack.c.bf16 %v6186_v18, %v6186_v18  ;;  %v6901_v10 = vunpack.c.l.b16 %v5841_v44  ;;  %v15436_v44 = vld [vmem:[#allocation70_spill] sm:$0xff] }
 0x707   : > { %v15437_v18 = vld [vmem:[#allocation6_spill] sm:$0xff] }
 0x708   : > { %7282 = vst.msk [vmem:[#allocation5 + $0x60] sm:$0xf] %vm590_vm1, %v7250_v34  ;;  %5372 = vadd.xlane.f32.xlu0 %v5371_v30  ;;  %v6905_v0 = vpack.c.b16 %v6901_v10, %v6900_v7  ;;  %v4802_v4 = vsub.f32 %v15437_v18, %v15436_v44  ;;  %v6725_v10 = vunpack.c.l.b16 %v5819_v47  ;;  %v13984_v7 = vpop.f32.mrf.mxu0  ;;  %v4133_v18 = vadd.f32 %v15411_v14, %v13902_v37 }
 0x709   : > { %v10116_v46 = vpop.eup %10115 }
 0x70a   : > { %v5690_v41 = vmul.f32 %v10116_v46, %v13687_v58  ;;  %9162 = vmatmul.msk.bf16.gmra.mxu0 %vm4329_vm3, %v6905_v0  ;;  %v4665_v8 = vpop.xlane.xlu0 %4664  ;;  %v4696_v58 = vsel %vm4329_vm3, %v13979_v26, -inf }
 0x70b   : > { %v4825_v35 = vsub.f32 %v13701_v24, %v4665_v8  ;;  %v5018_v24 = vmul.f32 1.442695, %v4802_v4  ;;  %v13991_v47 = vpop.eup %10117  ;;  %v15438_v8 = vld [vmem:[#allocation113_spill] sm:$0xff] }
 0x70c   : > { %v5818_v55 = vpack.c.bf16 %v5690_v41, %v5690_v41 }
 0x70d   : > { %v5064_v34 = vmul.f32 1.442695, %v4825_v35  ;;  %v6188_v30 = vpop.f32.mrf.mxu3  ;;  %v4809_v35 = vsub.f32 %v15439_v52, %v15438_v8  ;;  %v15441_v52 = vld [vmem:[#allocation71_spill] sm:$0xff] }
 0x70e   : > { %v6724_v19 = vunpack.c.l.b16 %v5818_v55  ;;  %v7251_v57 = vpack.c.bf16 %v6188_v30, %v6188_v30 }
 0x70f   : > { %10119 = vpow2.f32 %v5064_v34  ;;  %v5032_v30 = vmul.f32 1.442695, %v4809_v35  ;;  %v15442_v35 = vld [vmem:[#allocation86_spill] sm:$0xff] }
 0x710   : > { %v6732_v51 = vpack.c.b16 %v6725_v10, %v6724_v19  ;;  %7283 = vst.msk [vmem:[#allocation5 + $0x64] sm:$0xf] %vm590_vm1, %v7251_v57  ;;  %4697 = vmax.xlane.f32.xlu0 %v4696_v58  ;;  %v14003_v10 = vpop.f32.mrf.mxu0 }
 0x712   : > { %9119 = vmatmul.msk.bf16.vlgmr.msra.gmra.mxu2 %vm4329_vm3, %v6732_v51  ;;  %v5412_v0 = vpop.xlane.xlu1 %5411  ;;  %v4668_v46 = vpop.xlane.xlu0 %4667 }
 0x713   : > { %10121 = vrcp.f32 %v5412_v0  ;;  %v4826_v27 = vsub.f32 %v13719_v20, %v4668_v46  ;;  %v5377_v20 = vsel %vm4329_vm3, %v13991_v47, 0.0  ;;  %v4130_v46 = vadd.f32 %v15388_v38, %v13824_v36 }
 0x714   : > { %10123 = vpow2.f32 %v5018_v24  ;;  %v5415_v44 = vpop.xlane.xlu2 %5414  ;;  %v15440_v24 = vld [vmem:[#allocation53_spill] sm:$0xff] }
 0x715   : > { %v13993_v41 = vpop.eup %10119  ;;  %v5066_v55 = vmul.f32 1.442695, %v4826_v27  ;;  %10125 = vrcp.f32 %v5415_v44  ;;  %v14009_v0 = vadd.f32 %v15440_v24, %v4133_v18 }
 0x716   : > { %v5431_v4 = vsel %vm4329_vm3, %v13993_v41, 0.0 }
 0x717   : > { %10127 = vpow2.f32 %v5066_v55  ;;  %5432 = vadd.xlane.f32.xlu2 %v5431_v4 }
 0x718   : > { %5378 = vadd.xlane.f32.xlu0 %v5377_v20 }
 0x719   : > { %v10122_v34 = vpop.eup %10121 }
 0x71a   : > { %v5714_v19 = vmul.f32 %v10122_v34, %v13727_v3  ;;  %v4671_v57 = vpop.xlane.xlu1 %4670  ;;  %v5277_v58 = vpop.xlane.xlu0 %5276  ;;  %v4804_v3 = vsub.f32 %v15442_v35, %v15441_v52 }
 0x71b   : > { %v14006_v51 = vpop.eup %10123  ;;  %v4827_v14 = vsub.f32 %v13744_v50, %v4671_v57  ;;  %10129 = vrcp.f32 %v5277_v58 }
 0x71c   : > { %v10126_v37 = vpop.eup %10125  ;;  %v5842_v27 = vpack.c.bf16 %v5714_v19, %v5714_v19  ;;  %10131 = vpow2.f32 %v5032_v30  ;;  %v5274_v4 = vpop.xlane.xlu2 %5273  ;;  %v5362_v50 = vsel %vm4329_vm3, %v14006_v51, 0.0  ;;  %v4702_v19 = vsel %vm4329_vm3, %v14009_v0, -inf }
 0x71d   : > { %v14014_v8 = vpop.eup %10127  ;;  %v5715_v55 = vmul.f32 %v10126_v37, %v13739_v31  ;;  %v5068_v44 = vmul.f32 1.442695, %v4827_v14  ;;  %v6191_v18 = vpop.f32.mrf.mxu3  ;;  %10133 = vrcp.f32 %v5274_v4  ;;  %v5022_v30 = vmul.f32 1.442695, %v4804_v3  ;;  %v15443_v14 = vld [vmem:[#allocation47_spill] sm:$0xff] }
 0x71e   : > { %v7252_v20 = vpack.c.bf16 %v6191_v18, %v6191_v18  ;;  %v5434_v38 = vsel %vm4329_vm3, %v14014_v8, 0.0  ;;  %v6979_v36 = vunpack.c.l.b16 %v5842_v27  ;;  %v14028_v37 = vadd.f32 %v15443_v14, %v4130_v46 }
 0x71f   : > { %v5843_v34 = vpack.c.bf16 %v5715_v55, %v5715_v55  ;;  %10135 = vpow2.f32 %v5068_v44  ;;  %5363 = vadd.xlane.f32.xlu2 %v5362_v50  ;;  %5435 = vadd.xlane.f32.xlu1 %v5434_v38  ;;  %v14032_v55 = vpop.f32.mrf.mxu0  ;;  %v4135_v38 = vadd.f32 %v15372_v63, %v13938_v54 }
 0x720   : > { %7284 = vst.msk [vmem:[#allocation5 + $0x68] sm:$0xf] %vm590_vm1, %v7252_v20  ;;  %4703 = vmax.xlane.f32.xlu0 %v4702_v19  ;;  %v4693_v50 = vsel %vm4329_vm3, %v14028_v37, -inf }
 0x721   : > { %v10130_v31 = vpop.eup %10129  ;;  %v6980_v57 = vunpack.c.l.b16 %v5843_v34 }
 0x722   : > { %v5669_v58 = vmul.f32 %v10130_v31, %v13737_v42  ;;  %v5346_v24 = vpop.xlane.xlu1 %5345  ;;  %v14030_v27 = vpop.eup %10131 }
 0x723   : > { %v6987_v52 = vpack.c.b16 %v6980_v57, %v6979_v36  ;;  %10137 = vrcp.f32 %v5346_v24  ;;  %v10134_v35 = vpop.eup %10133 }
 0x724   : > { %v5797_v44 = vpack.c.bf16 %v5669_v58, %v5669_v58  ;;  %10139 = vpow2.f32 %v5022_v30  ;;  %v5668_v3 = vmul.f32 %v10134_v35, %v13756_v6  ;;  %v5349_v18 = vpop.xlane.xlu2 %5348  ;;  %v5383_v6 = vsel %vm4329_vm3, %v14030_v27, 0.0  ;;  %v15444_v58 = vld [vmem:[#allocation60_spill] sm:$0xff] }
 0x725   : > { %v14034_v4 = vpop.eup %10135  ;;  %9179 = vmatmul.msk.bf16.vlgmr.msrb.gmra.mxu1 %vm4329_vm3, %v6987_v52  ;;  %v6193_v42 = vpop.f32.mrf.mxu3  ;;  %10141 = vrcp.f32 %v5349_v18  ;;  %v14051_v24 = vadd.f32 %v15444_v58, %v4135_v38 }
 0x726   : > { %v7253_v46 = vpack.c.bf16 %v6193_v42, %v6193_v42  ;;  %v5437_v20 = vsel %vm4329_vm3, %v14034_v4, 0.0  ;;  %v6472_v36 = vunpack.c.l.b16 %v5797_v44  ;;  %v5796_v34 = vpack.c.bf16 %v5668_v3, %v5668_v3 }
 0x727   : > { %5438 = vadd.xlane.f32.xlu2 %v5437_v20  ;;  %4694 = vmax.xlane.f32.xlu1 %v4693_v50  ;;  %v14055_v18 = vpop.f32.mrf.mxu0  ;;  %v4708_v20 = vsel %vm4329_vm3, %v14051_v24, -inf }
 0x728   : > { %7285 = vst.msk [vmem:[#allocation5 + $0x6c] sm:$0xf] %vm590_vm1, %v7253_v46  ;;  %5384 = vadd.xlane.f32.xlu0 %v5383_v6  ;;  %v6471_v31 = vunpack.c.l.b16 %v5796_v34 }
 0x729   : > { %v10138_v19 = vpop.eup %10137 }
 0x72a   : > { %v5692_v30 = vmul.f32 %v10138_v19, %v13761_v60  ;;  %v14048_v57 = vpop.eup %10139  ;;  %v6478_v54 = vpack.c.b16 %v6472_v36, %v6471_v31 }
 0x72b   : > { %v5421_v63 = vpop.xlane.xlu1 %5420  ;;  %v10142_v14 = vpop.eup %10141  ;;  %v5368_v42 = vsel %vm4329_vm3, %v14048_v57, 0.0 }
 0x72c   : > { %v5820_v52 = vpack.c.bf16 %v5692_v30, %v5692_v30  ;;  %10143 = vrcp.f32 %v5421_v63  ;;  %v5693_v35 = vmul.f32 %v10142_v14, %v13773_v11  ;;  %v4674_v44 = vpop.xlane.xlu2 %4673  ;;  %9060 = vmatmul.msk.bf16.gmra.mxu3 %vm4329_vm3, %v6478_v54  ;;  %v5418_v3 = vpop.xlane.xlu0 %5417 }
 0x72d   : > { %v4828_v60 = vsub.f32 %v13787_v9, %v4674_v44  ;;  %10145 = vrcp.f32 %v5418_v3  ;;  %v15445_v44 = vld [vmem:[#allocation112_spill] sm:$0xff] }
 0x72e   : > { %v5821_v46 = vpack.c.bf16 %v5693_v35, %v5693_v35  ;;  %v6726_v50 = vunpack.c.l.b16 %v5820_v52 }
 0x72f   : > { %5369 = vadd.xlane.f32.xlu2 %v5368_v42  ;;  %v5070_v38 = vmul.f32 1.442695, %v4828_v60  ;;  %v14070_v60 = vpop.f32.mrf.mxu0 }
 0x730   : > { %4709 = vmax.xlane.f32.xlu0 %v4708_v20  ;;  %v6727_v11 = vunpack.c.l.b16 %v5821_v46 }
 0x731   : > { %10147 = vpow2.f32 %v5070_v38 }
 0x732   : > { %v10144_v36 = vpop.eup %10143  ;;  %v6733_v19 = vpack.c.b16 %v6727_v11, %v6726_v50 }
 0x733   : > { %v5717_v34 = vmul.f32 %v10144_v36, %v13792_v23  ;;  %v5280_v6 = vpop.xlane.xlu1 %5279  ;;  %v10146_v9 = vpop.eup %10145  ;;  %v15446_v23 = vld [vmem:[#allocation11_spill] sm:$0xff] }
 0x734   : > { %10149 = vrcp.f32 %v5280_v6  ;;  %v5716_v30 = vmul.f32 %v10146_v9, %v13798_v22  ;;  %9120 = vmatmul.msk.bf16.gmra.mxu2 %vm4329_vm3, %v6733_v19  ;;  %v5283_v58 = vpop.xlane.xlu2 %5282  ;;  %v4677_v63 = vpop.xlane.xlu0 %4676  ;;  %v4806_v3 = vsub.f32 %v15446_v23, %v15445_v44  ;;  %v4132_v22 = vadd.f32 %v15406_v43, %v13881_v13 }
 0x735   : > { %v5845_v31 = vpack.c.bf16 %v5717_v34, %v5717_v34  ;;  %10151 = vrcp.f32 %v5283_v58  ;;  %v4829_v54 = vsub.f32 %v13817_v45, %v4677_v63 }
 0x736   : > { %v5844_v14 = vpack.c.bf16 %v5716_v30, %v5716_v30  ;;  %v5026_v19 = vmul.f32 1.442695, %v4806_v3 }
 0x737   : > { %v6982_v52 = vunpack.c.l.b16 %v5845_v31  ;;  %v14066_v35 = vpop.eup %10147  ;;  %v5072_v42 = vmul.f32 1.442695, %v4829_v54  ;;  %v15447_v31 = vld [vmem:[#allocation54_spill] sm:$0xff]  ;;  %v14089_v3 = vpop.f32.mrf.mxu0 }
 0x738   : > { %v6196_v46 = vpop.f32.mrf.mxu3  ;;  %v6981_v20 = vunpack.c.l.b16 %v5844_v14  ;;  %v5440_v38 = vsel %vm4329_vm3, %v14066_v35, 0.0  ;;  %v14081_v30 = vadd.f32 %v15447_v31, %v4132_v22 }
 0x739   : > { %v7254_v50 = vpack.c.bf16 %v6196_v46, %v6196_v46  ;;  %10153 = vpow2.f32 %v5072_v42  ;;  %5441 = vadd.xlane.f32.xlu1 %v5440_v38 }
 0x73a   : > { %v10150_v45 = vpop.eup %10149  ;;  %v6988_v34 = vpack.c.b16 %v6982_v52, %v6981_v20  ;;  %v4699_v44 = vsel %vm4329_vm3, %v14081_v30, -inf }
 0x73b   : > { %v5670_v11 = vmul.f32 %v10150_v45, %v13810_v17  ;;  %7286 = vst.msk [vmem:[#allocation5 + $0x70] sm:$0xf] %vm590_vm1, %v7254_v50  ;;  %v5355_v36 = vpop.xlane.xlu1 %5354  ;;  %v10152_v6 = vpop.eup %10151 }
 0x73c   : > { %10155 = vrcp.f32 %v5355_v36  ;;  %v5671_v43 = vmul.f32 %v10152_v6, %v13819_v1  ;;  %9180 = vmatmul.msk.bf16.gmra.mxu1 %vm4329_vm3, %v6988_v34  ;;  %v5352_v13 = vpop.xlane.xlu0 %5351 }
 0x73d   : > { %v5798_v9 = vpack.c.bf16 %v5670_v11, %v5670_v11  ;;  %10157 = vrcp.f32 %v5352_v13 }
 0x73e   : > { %v5799_v58 = vpack.c.bf16 %v5671_v43, %v5671_v43  ;;  %10159 = vpow2.f32 %v5026_v19 }
 0x73f   : > { %v6473_v63 = vunpack.c.l.b16 %v5798_v9  ;;  %v14083_v17 = vpop.eup %10153 }
 0x740   : > { %v6198_v54 = vpop.f32.mrf.mxu3  ;;  %v6474_v14 = vunpack.c.l.b16 %v5799_v58  ;;  %v5443_v1 = vsel %vm4329_vm3, %v14083_v17, 0.0 }
 0x741   : > { %v7255_v52 = vpack.c.bf16 %v6198_v54, %v6198_v54  ;;  %4700 = vmax.xlane.f32.xlu1 %v4699_v44  ;;  %5444 = vadd.xlane.f32.xlu2 %v5443_v1 }
 0x742   : > { %v10156_v23 = vpop.eup %10155  ;;  %v6479_v20 = vpack.c.b16 %v6474_v14, %v6473_v63  ;;  %v14101_v63 = vpop.f32.mrf.mxu0  ;;  %v15448_v14 = vld [vmem:[#allocation117_spill] sm:$0xff] }
 0x743   : > { %v5695_v42 = vmul.f32 %v10156_v23, %v13831_v28  ;;  %7287 = vst.msk [vmem:[#allocation5 + $0x74] sm:$0xf] %vm590_vm1, %v7255_v52  ;;  %v4680_v46 = vpop.xlane.xlu1 %4679  ;;  %v5424_v22 = vpop.xlane.xlu2 %5423  ;;  %v15449_v52 = vld [vmem:[#allocation10_spill] sm:$0xff] }
 0x744   : > { %v10158_v50 = vpop.eup %10157  ;;  %v4830_v38 = vsub.f32 %v13847_v21, %v4680_v46  ;;  %10161 = vrcp.f32 %v5424_v22  ;;  %9061 = vmatmul.msk.bf16.gmra.mxu3 %vm4329_vm3, %v6479_v20  ;;  %v4808_v44 = vsub.f32 %v15449_v52, %v15448_v14 }
 0x745   : > { %v5823_v45 = vpack.c.bf16 %v5695_v42, %v5695_v42  ;;  %v5694_v11 = vmul.f32 %v10158_v50, %v13841_v40  ;;  %v14096_v36 = vpop.eup %10159  ;;  %v4134_v42 = vadd.f32 %v15362_v29, %v13918_v39 }
 0x746   : > { %v5074_v34 = vmul.f32 1.442695, %v4830_v38  ;;  %v5374_v9 = vsel %vm4329_vm3, %v14096_v36, 0.0  ;;  %v5030_v50 = vmul.f32 1.442695, %v4808_v44 }
 0x747   : > { %v6729_v6 = vunpack.c.l.b16 %v5823_v45  ;;  %v5822_v19 = vpack.c.bf16 %v5694_v11, %v5694_v11 }
 0x748   : > { %10163 = vpow2.f32 %v5074_v34 }
 0x749   : > { %v6728_v28 = vunpack.c.l.b16 %v5822_v19  ;;  %5375 = vadd.xlane.f32.xlu2 %v5374_v9 }
 0x74a   : > { %v5427_v43 = vpop.xlane.xlu0 %5426  ;;  %v10162_v13 = vpop.eup %10161 }
 0x74b   : > { %10165 = vrcp.f32 %v5427_v43  ;;  %v5289_v21 = vpop.xlane.xlu1 %5288  ;;  %v4683_v31 = vpop.xlane.xlu2 %4682  ;;  %v6734_v40 = vpack.c.b16 %v6729_v6, %v6728_v28  ;;  %v5718_v1 = vmul.f32 %v10162_v13, %v13862_v2  ;;  %v15450_v6 = vld [vmem:[#allocation58_spill] sm:$0xff] }
 0x74c   : > { %v4831_v58 = vsub.f32 %v13877_v48, %v4683_v31  ;;  %10167 = vrcp.f32 %v5289_v21  ;;  %v14116_v29 = vadd.f32 %v15450_v6, %v4134_v42  ;;  %v14121_v13 = vpop.f32.mrf.mxu0 }
 0x74d   : > { %9121 = vmatmul.msk.bf16.gmra.mxu2 %vm4329_vm3, %v6734_v40  ;;  %v5846_v38 = vpack.c.bf16 %v5718_v1, %v5718_v1 }
 0x74e   : > { %v14104_v54 = vpop.eup %10163  ;;  %v5076_v23 = vmul.f32 1.442695, %v4831_v58 }
 0x74f   : > { %v5446_v46 = vsel %vm4329_vm3, %v14104_v54, 0.0  ;;  %v6983_v28 = vunpack.c.l.b16 %v5846_v38 }
 0x750   : > { %10169 = vpow2.f32 %v5076_v23  ;;  %v6201_v48 = vpop.f32.mrf.mxu3  ;;  %5447 = vadd.xlane.f32.xlu1 %v5446_v46 }
 0x751   : > { %v10166_v22 = vpop.eup %10165  ;;  %v7256_v20 = vpack.c.bf16 %v6201_v48, %v6201_v48 }
 0x752   : > { %v5719_v45 = vmul.f32 %v10166_v22, %v13879_v53  ;;  %v5286_v11 = vpop.xlane.xlu0 %5285  ;;  %v10168_v34 = vpop.eup %10167  ;;  %v4705_v53 = vsel %vm4329_vm3, %v14116_v29, -inf }
 0x753   : > { %7288 = vst.msk [vmem:[#allocation5 + $0x78] sm:$0xf] %vm590_vm1, %v7256_v20  ;;  %10171 = vrcp.f32 %v5286_v11  ;;  %v5358_v2 = vpop.xlane.xlu2 %5357  ;;  %v5673_v43 = vmul.f32 %v10168_v34, %v13873_v49 }
 0x754   : > { %v5847_v39 = vpack.c.bf16 %v5719_v45, %v5719_v45  ;;  %10173 = vrcp.f32 %v5358_v2  ;;  %v14135_v38 = vpop.f32.mrf.mxu0 }
 0x755   : > { %10175 = vpow2.f32 %v5030_v50  ;;  %v5801_v52 = vpack.c.bf16 %v5673_v43, %v5673_v43 }
 0x756   : > { %v14118_v19 = vpop.eup %10169  ;;  %v6984_v9 = vunpack.c.l.b16 %v5847_v39 }
 0x757   : > { %v5449_v21 = vsel %vm4329_vm3, %v14118_v19, 0.0  ;;  %v6476_v46 = vunpack.c.l.b16 %v5801_v52 }
 0x758   : > { %v6203_v31 = vpop.f32.mrf.mxu3  ;;  %4706 = vmax.xlane.f32.xlu1 %v4705_v53  ;;  %5450 = vadd.xlane.f32.xlu2 %v5449_v21  ;;  %v6989_v40 = vpack.c.b16 %v6984_v9, %v6983_v28 }
 0x759   : > { %v10172_v58 = vpop.eup %10171  ;;  %v7257_v14 = vpack.c.bf16 %v6203_v31, %v6203_v31 }
 0x75a   : > { %v5672_v44 = vmul.f32 %v10172_v58, %v13894_v5  ;;  %9181 = vmatmul.msk.bf16.gmra.mxu1 %vm4329_vm3, %v6989_v40  ;;  %v5361_v49 = vpop.xlane.xlu0 %5360  ;;  %v10174_v1 = vpop.eup %10173 }
 0x75b   : > { %7289 = vst.msk [vmem:[#allocation5 + $0x7c] sm:$0xf] %vm590_vm1, %v7257_v14  ;;  %10177 = vrcp.f32 %v5361_v49  ;;  %v14130_v23 = vpop.eup %10175  ;;  %v5696_v22 = vmul.f32 %v10174_v1, %v13896_v15  ;;  %v4136_v14 = vadd.f32 %v15376_v16, %v13957_v56 }
 0x75c   : > { %v5800_v42 = vpack.c.bf16 %v5672_v44, %v5672_v44  ;;  %v5380_v20 = vsel %vm4329_vm3, %v14130_v23, 0.0  ;;  %v14141_v21 = vpop.f32.mrf.mxu0  ;;  %v15451_v44 = vld [vmem:[#allocation59_spill] sm:$0xff] }
 0x75d   : > { %v5824_v45 = vpack.c.bf16 %v5696_v22, %v5696_v22  ;;  %v14151_v49 = vadd.f32 %v15451_v44, %v4136_v14 }
 0x75e   : > { %v6475_v48 = vunpack.c.l.b16 %v5800_v42 }
 0x75f   : > { %v6730_v28 = vunpack.c.l.b16 %v5824_v45  ;;  %v4711_v16 = vsel %vm4329_vm3, %v14151_v49, -inf }
 0x760   : > { %5381 = vadd.xlane.f32.xlu2 %v5380_v20  ;;  %v6480_v50 = vpack.c.b16 %v6476_v46, %v6475_v48  ;;  %v14168_v20 = vpop.f32.mrf.mxu1 }
 0x761   : > { %v10178_v5 = vpop.eup %10177 }
 0x762   : > { %v5697_v11 = vmul.f32 %v10178_v5, %v13908_v12  ;;  %v5430_v34 = vpop.xlane.xlu1 %5429  ;;  %9062 = vmatmul.msk.bf16.gmra.mxu3 %vm4329_vm3, %v6480_v50 }
 0x763   : > { %v4686_v2 = vpop.xlane.xlu0 %4685 }
 0x764   : > { %v5825_v6 = vpack.c.bf16 %v5697_v11, %v5697_v11  ;;  %v4832_v39 = vsub.f32 %v13922_v25, %v4686_v2  ;;  %v7290_v2 = vpack.c.bf16 %v13933_v59, %v13933_v59 }
 0x766   : > { %v6731_v15 = vunpack.c.l.b16 %v5825_v6  ;;  %v5078_v9 = vmul.f32 1.442695, %v4832_v39 }
 0x768   : > { %10179 = vpow2.f32 %v5078_v9  ;;  %v6735_v43 = vpack.c.b16 %v6731_v15, %v6730_v28  ;;  %v14175_v6 = vpop.f32.mrf.mxu1 }
 0x76a   : > { %v4689_v53 = vpop.xlane.xlu1 %4688  ;;  %9122 = vmatmul.msk.bf16.gmra.mxu2 %vm4329_vm3, %v6735_v43 }
 0x76b   : > { %v4833_v31 = vsub.f32 %v13936_v33, %v4689_v53  ;;  %v5367_v12 = vpop.xlane.xlu0 %5366  ;;  %v14156_v33 = vpop.f32.mrf.mxu0 }
 0x76d   : > { %v5080_v40 = vmul.f32 1.442695, %v4833_v31 }
 0x76e   : > { %v14144_v58 = vpop.eup %10179 }
 0x76f   : > { %10181 = vpow2.f32 %v5080_v40  ;;  %v5452_v25 = vsel %vm4329_vm3, %v14144_v58, 0.0  ;;  %v15453_v40 = vld [vmem:[#allocation121_spill] sm:$0xff] }
 0x770   : > { %5453 = vadd.xlane.f32.xlu1 %v5452_v25 }
 0x773   : > { %v4692_v52 = vpop.xlane.xlu0 %4691  ;;  %v14164_v22 = vpop.f32.mrf.mxu0 }
 0x774   : > { %v4834_v1 = vsub.f32 %v13953_v62, %v4692_v52  ;;  %v7484_v52 = vpack.c.bf16 %v14101_v63, %v14101_v63 }
 0x775   : > { %v14154_v42 = vpop.eup %10181 }
 0x776   : > { %v5082_v46 = vmul.f32 1.442695, %v4834_v1  ;;  %v5455_v48 = vsel %vm4329_vm3, %v14154_v42, 0.0  ;;  %v14187_v1 = vpop.f32.mrf.mxu1 }
 0x777   : > { %5456 = vadd.xlane.f32.xlu2 %v5455_v48 }
 0x778   : > { %10183 = vpow2.f32 %v5082_v46  ;;  %4712 = vmax.xlane.f32.xlu1 %v4711_v16 }
 0x779   : > { %10185 = vrcp.f32 %v5430_v34 }
 0x77b   : > { %v14170_v50 = vpop.f32.mrf.mxu0  ;;  %v5373_v46 = vpop.xlane.xlu0 %5372 }
 0x77e   : > { %v14162_v56 = vpop.eup %10183 }
 0x77f   : > { %v5458_v62 = vsel %vm4329_vm3, %v14162_v56, 0.0  ;;  %v10186_v45 = vpop.eup %10185 }
 0x780   : > { %5459 = vadd.xlane.f32.xlu2 %v5458_v62  ;;  %v5720_v11 = vmul.f32 %v10186_v45, %v13924_v32  ;;  %v15452_v32 = vld [vmem:[#allocation118_spill] sm:$0xff] }
 0x781   : > { %v7291_v59 = vpack.c.bf16 %v15452_v32, %v15452_v32 }
 0x782   : > { %v5848_v34 = vpack.c.bf16 %v5720_v11, %v5720_v11 }
 0x783   : > { %v14177_v28 = vpop.f32.mrf.mxu0 }
 0x78a   : > { %v5433_v5 = vpop.xlane.xlu2 %5432 }
 0x78b   : > { %10187 = vrcp.f32 %v5433_v5  ;;  %v6953_v11 = vpop.f32.mrf.mxu0 }
 0x78c   : > { %10189 = vrcp.f32 %v5367_v12  ;;  %v6985_v12 = vunpack.c.l.b16 %v5848_v34  ;;  %v7677_v34 = vpack.c.bf16 %v6953_v11, %v6953_v11  ;;  %v7293_v11 = vpack.c.bf16 %v13984_v7, %v13984_v7 }
 0x791   : > { %v10188_v39 = vpop.eup %10187  ;;  %7354 = vrot.lane.b32.xlu1 %v7290_v2, %s10271_s30 }
 0x792   : > { %v5721_v15 = vmul.f32 %v10188_v39, %v13993_v41  ;;  %v5364_v9 = vpop.xlane.xlu2 %5363  ;;  %v5436_v43 = vpop.xlane.xlu1 %5435 }
 0x793   : > { %v10190_v53 = vpop.eup %10189  ;;  %10191 = vrcp.f32 %v5364_v9 }
 0x794   : > { %v5849_v31 = vpack.c.bf16 %v5721_v15, %v5721_v15  ;;  %10193 = vrcp.f32 %v5436_v43  ;;  %v5699_v14 = vmul.f32 %v10190_v53, %v15453_v40 }
 0x796   : > { %v6986_v25 = vunpack.c.l.b16 %v5849_v31  ;;  %v5827_v48 = vpack.c.bf16 %v5699_v14, %v5699_v14 }
 0x798   : > { %7356 = vrot.lane.b32.xlu2 %v7291_v59, %s10271_s30  ;;  %v6990_v44 = vpack.c.b16 %v6986_v25, %v6985_v12  ;;  %v6810_v15 = vunpack.c.l.b16 %v5827_v48  ;;  %v14197_v12 = vpop.f32.mrf.mxu1  ;;  %v15454_v25 = vld [vmem:[#allocation44_spill] sm:$0xff] }
 0x799   : > { %v10192_v41 = vpop.eup %10191  ;;  %7549 = vrot.lane.b32.xlu1 %v7484_v52, %s10272_s8 }
 0x79a   : > { %v5698_v16 = vmul.f32 %v10192_v41, %v14006_v51  ;;  %v5439_v62 = vpop.xlane.xlu2 %5438  ;;  %v4695_v5 = vpop.xlane.xlu1 %4694  ;;  %9182 = vmatmul.msk.bf16.gmra.mxu1 %vm4329_vm3, %v6990_v44 }
 0x79b   : > { %v10194_v45 = vpop.eup %10193  ;;  %10195 = vrcp.f32 %v5439_v62  ;;  %v4835_v63 = vsub.f32 %v14028_v37, %v4695_v5  ;;  %v4698_v5 = vpop.xlane.xlu0 %4697 }
 0x79c   : > { %v5826_v2 = vpack.c.bf16 %v5698_v16, %v5698_v16  ;;  %10197 = vrcp.f32 %v5373_v46  ;;  %v5722_v43 = vmul.f32 %v10194_v45, %v14014_v8  ;;  %v7292_v8 = vpack.c.bf16 %v13968_v61, %v13968_v61 }
 0x79d   : > { %v5084_v39 = vmul.f32 1.442695, %v4835_v63 }
 0x79e   : > { %v6809_v9 = vunpack.c.l.b16 %v5826_v2  ;;  %v5850_v31 = vpack.c.bf16 %v5722_v43, %v5722_v43 }
 0x79f   : > { %10199 = vpow2.f32 %v5084_v39 }
 0x7a0   : > { %v6817_v53 = vpack.c.b16 %v6810_v15, %v6809_v9  ;;  %7742 = vrot.lane.b32.xlu2 %v7677_v34, %s10273_s9  ;;  %v7064_v44 = vunpack.c.l.b16 %v5850_v31  ;;  %v14211_v63 = vpop.f32.mrf.mxu1  ;;  %v4836_v15 = vsub.f32 %v13979_v26, %v4698_v5  ;;  %v7483_v31 = vpack.c.bf16 %v14089_v3, %v14089_v3 }
 0x7a1   : > { %v10196_v51 = vpop.eup %10195 }
 0x7a2   : > { %v5723_v32 = vmul.f32 %v10196_v51, %v14034_v4  ;;  %v5370_v59 = vpop.xlane.xlu2 %5369  ;;  %9139 = vmatmul.msk.bf16.vlgmr.msra.gmra.mxu3 %vm4329_vm3, %v6817_v53  ;;  %v10198_v37 = vpop.eup %10197  ;;  %v7485_v51 = vpack.c.bf16 %v14121_v13, %v14121_v13 }
 0x7a3   : > { %10201 = vrcp.f32 %v5370_v59  ;;  %v5701_v52 = vmul.f32 %v10198_v37, %v15454_v25  ;;  %v5379_v9 = vpop.xlane.xlu0 %5378  ;;  %v7486_v25 = vpack.c.bf16 %v14135_v38, %v14135_v38 }
 0x7a4   : > { %v5851_v40 = vpack.c.bf16 %v5723_v32, %v5723_v32 }
 0x7a5   : > { %v14199_v14 = vpop.eup %10199  ;;  %v5829_v16 = vpack.c.bf16 %v5701_v52, %v5701_v52 }
 0x7a6   : > { %v7065_v41 = vunpack.c.l.b16 %v5851_v40  ;;  %v5461_v4 = vsel %vm4329_vm3, %v14199_v14, 0.0 }
 0x7a7   : > { %5462 = vadd.xlane.f32.xlu0 %v5461_v4  ;;  %v6812_v2 = vunpack.c.l.b16 %v5829_v16 }
 0x7a8   : > { %v7072_v46 = vpack.c.b16 %v7065_v41, %v7064_v44  ;;  %7358 = vrot.lane.b32.xlu2 %v7292_v8, %s10271_s30  ;;  %v14218_v7 = vpop.f32.mrf.mxu1 }
 0x7a9   : > { %v10202_v48 = vpop.eup %10201 }
 0x7aa   : > { %v5700_v62 = vmul.f32 %v10202_v48, %v14048_v57  ;;  %9199 = vmatmul.msk.bf16.vlgmr.msrb.gmra.mxu2 %vm4329_vm3, %v7072_v46  ;;  %v5086_v57 = vmul.f32 1.442695, %v4836_v15  ;;  %v6956_v48 = vpop.f32.mrf.mxu0 }
 0x7ab   : > { %v14236_v41 = vpop.xlane.xlu0 %4703 }
 0x7ac   : > { %v5828_v45 = vpack.c.bf16 %v5700_v62, %v5700_v62  ;;  %v5442_v61 = vpop.xlane.xlu1 %5441 }
 0x7ad   : > { %10203 = vrcp.f32 %v5442_v61 }
 0x7ae   : > { %v6811_v39 = vunpack.c.l.b16 %v5828_v45 }
 0x7b0   : > { %7360 = vrot.lane.b32.xlu2 %v7293_v11, %s10271_s30  ;;  %v6818_v34 = vpack.c.b16 %v6812_v2, %v6811_v39  ;;  %v14238_v46 = vpop.f32.mrf.mxu1 }
 0x7b2   : > { %9140 = vmatmul.msk.bf16.gmra.mxu3 %vm4329_vm3, %v6818_v34 }
 0x7b3   : > { %v10204_v53 = vpop.eup %10203  ;;  %v5385_v39 = vpop.xlane.xlu0 %5384 }
 0x7b4   : > { %v5445_v43 = vpop.xlane.xlu2 %5444  ;;  %v5724_v26 = vmul.f32 %v10204_v53, %v14066_v35  ;;  %v14224_v32 = vpop.xlane.xlu1 %4700  ;;  %v7676_v35 = vpack.c.bf16 %v14177_v28, %v14177_v28 }
 0x7b5   : > { %10205 = vrcp.f32 %v5445_v43  ;;  %v14250_v43 = vpop.f32.mrf.mxu2 }
 0x7b6   : > { %10207 = vrcp.f32 %v5379_v9  ;;  %v5852_v37 = vpack.c.bf16 %v5724_v26, %v5724_v26 }
 0x7b7   : > { %10209 = vpow2.f32 %v5086_v57 }
 0x7b8   : > { %7551 = vrot.lane.b32.xlu2 %v7485_v51, %s10272_s8  ;;  %v7066_v4 = vunpack.c.l.b16 %v5852_v37  ;;  %v14246_v9 = vpop.f32.mrf.mxu1 }
 0x7bb   : > { %7547 = vrot.lane.b32.xlu0 %v7483_v31, %s10272_s8  ;;  %v10206_v59 = vpop.eup %10205 }
 0x7bc   : > { %v5725_v13 = vmul.f32 %v10206_v59, %v14083_v17  ;;  %v5376_v40 = vpop.xlane.xlu2 %5375  ;;  %v10208_v8 = vpop.eup %10207 }
 0x7bd   : > { %10211 = vrcp.f32 %v5376_v40  ;;  %v14230_v52 = vpop.eup %10209  ;;  %v5703_v44 = vmul.f32 %v10208_v8, %v13991_v47  ;;  %v7678_v47 = vpack.c.bf16 %v6956_v48, %v6956_v48  ;;  %v6958_v40 = vpop.f32.mrf.mxu0 }
 0x7be   : > { %v5853_v3 = vpack.c.bf16 %v5725_v13, %v5725_v13  ;;  %v5464_v38 = vsel %vm4329_vm3, %v14230_v52, 0.0 }
 0x7bf   : > { %v5831_v45 = vpack.c.bf16 %v5703_v44, %v5703_v44 }
 0x7c0   : > { %7553 = vrot.lane.b32.xlu2 %v7486_v25, %s10272_s8  ;;  %v7067_v17 = vunpack.c.l.b16 %v5853_v3  ;;  %v14253_v37 = vpop.f32.mrf.mxu1 }
 0x7c1   : > { %v6814_v11 = vunpack.c.l.b16 %v5831_v45 }
 0x7c2   : > { %v7073_v62 = vpack.c.b16 %v7067_v17, %v7066_v4  ;;  %v14256_v4 = vpop.f32.mrf.mxu2 }
 0x7c3   : > { %5465 = vadd.xlane.f32.xlu1 %v5464_v38  ;;  %7740 = vrot.lane.b32.xlu0 %v7676_v35, %s10273_s9  ;;  %v5448_v16 = vpop.xlane.xlu1 %5447  ;;  %v10212_v5 = vpop.eup %10211 }
 0x7c4   : > { %v5702_v28 = vmul.f32 %v10212_v5, %v14096_v36  ;;  %9200 = vmatmul.msk.bf16.gmra.mxu2 %vm4329_vm3, %v7073_v62  ;;  %10213 = vrcp.f32 %v5448_v16 }
 0x7c6   : > { %v5830_v61 = vpack.c.bf16 %v5702_v28, %v5702_v28 }
 0x7c8   : > { %7744 = vrot.lane.b32.xlu2 %v7678_v47, %s10273_s9  ;;  %v6813_v2 = vunpack.c.l.b16 %v5830_v61  ;;  %v7295_v61 = vpack.c.bf16 %v14032_v55, %v14032_v55 }
 0x7ca   : > { %v6819_v15 = vpack.c.b16 %v6814_v11, %v6813_v2  ;;  %v10214_v57 = vpop.eup %10213  ;;  %v4710_v2 = vpop.xlane.xlu0 %4709 }
 0x7cb   : > { %v5451_v34 = vpop.xlane.xlu2 %5450  ;;  %v5726_v36 = vmul.f32 %v10214_v57, %v14104_v54  ;;  %v7679_v54 = vpack.c.bf16 %v6958_v40, %v6958_v40  ;;  %v4707_v38 = vpop.xlane.xlu1 %4706  ;;  %v4840_v55 = vsub.f32 %v14051_v24, %v4710_v2  ;;  %v7490_v2 = vpack.c.bf16 %v14170_v50, %v14170_v50 }
 0x7cc   : > { %10215 = vrcp.f32 %v5451_v34  ;;  %9141 = vmatmul.msk.bf16.gmra.mxu3 %vm4329_vm3, %v6819_v15  ;;  %v4839_v45 = vsub.f32 %v14116_v29, %v4707_v38  ;;  %v7487_v50 = vpack.c.bf16 %v14141_v21, %v14141_v21 }
 0x7cd   : > { %10217 = vrcp.f32 %v5385_v39  ;;  %v5854_v51 = vpack.c.bf16 %v5726_v36, %v5726_v36  ;;  %v14274_v39 = vpop.f32.mrf.mxu0  ;;  %v5094_v36 = vmul.f32 1.442695, %v4840_v55 }
 0x7cf   : > { %v7068_v25 = vunpack.c.l.b16 %v5854_v51 }
 0x7d2   : > { %v10216_v53 = vpop.eup %10215 }
 0x7d3   : > { %v5727_v31 = vmul.f32 %v10216_v53, %v14118_v19  ;;  %v5382_v26 = vpop.xlane.xlu2 %5381  ;;  %v10218_v59 = vpop.eup %10217  ;;  %v4837_v19 = vsub.f32 %v14081_v30, %v14224_v32  ;;  %v4838_v30 = vsub.f32 %v14009_v0, %v14236_v41  ;;  %v5092_v32 = vmul.f32 1.442695, %v4839_v45 }
 0x7d4   : > { %10219 = vrcp.f32 %v5382_v26  ;;  %v5705_v8 = vmul.f32 %v10218_v59, %v14030_v27  ;;  %v14263_v27 = vpop.f32.mrf.mxu1  ;;  %v7488_v41 = vpack.c.bf16 %v14156_v33, %v14156_v33 }
 0x7d5   : > { %v5855_v13 = vpack.c.bf16 %v5727_v31, %v5727_v31  ;;  %v5088_v5 = vmul.f32 1.442695, %v4837_v19  ;;  %v5090_v34 = vmul.f32 1.442695, %v4838_v30  ;;  %v6963_v26 = vpop.f32.mrf.mxu0 }
 0x7d6   : > { %v5833_v17 = vpack.c.bf16 %v5705_v8, %v5705_v8  ;;  %v7681_v8 = vpack.c.bf16 %v6963_v26, %v6963_v26 }
 0x7d7   : > { %v7069_v3 = vunpack.c.l.b16 %v5855_v13  ;;  %10221 = vpow2.f32 %v5088_v5 }
 0x7d8   : > { %v6816_v62 = vunpack.c.l.b16 %v5833_v17 }
 0x7d9   : > { %v7074_v35 = vpack.c.b16 %v7069_v3, %v7068_v25 }
 0x7da   : > { %v10220_v44 = vpop.eup %10219 }
 0x7db   : > { %v5704_v48 = vmul.f32 %v10220_v44, %v14130_v23  ;;  %9201 = vmatmul.msk.bf16.gmra.mxu2 %vm4329_vm3, %v7074_v35  ;;  %v14270_v23 = vpop.f32.mrf.mxu2 }
 0x7dc   : > { %7746 = vrot.lane.b32.xlu1 %v7679_v54, %s10273_s9  ;;  %v14276_v29 = vpop.f32.mrf.mxu1 }
 0x7dd   : > { %v5832_v16 = vpack.c.bf16 %v5704_v48, %v5704_v48  ;;  %v14279_v0 = vpop.eup %10221 }
 0x7de   : > { %v5467_v53 = vsel %vm4329_vm3, %v14279_v0, 0.0 }
 0x7df   : > { %v6815_v28 = vunpack.c.l.b16 %v5832_v16 }
 0x7e1   : > { %v6820_v47 = vpack.c.b16 %v6816_v62, %v6815_v28  ;;  %v7296_v62 = vpack.c.bf16 %v14055_v18, %v14055_v18  ;;  %v7294_v18 = vpack.c.bf16 %v14003_v10, %v14003_v10  ;;  %v7297_v10 = vpack.c.bf16 %v14070_v60, %v14070_v60 }
 0x7e2   : > { %v7680_v60 = vpack.c.bf16 %v14274_v39, %v14274_v39 }
 0x7e3   : > { %v5454_v11 = vpop.xlane.xlu1 %5453  ;;  %9142 = vmatmul.msk.bf16.gmra.mxu3 %vm4329_vm3, %v6820_v47  ;;  %v14288_v31 = vpop.f32.mrf.mxu2  ;;  %v7489_v47 = vpack.c.bf16 %v14164_v22, %v14164_v22 }
 0x7e4   : > { %7364 = vrot.lane.b32.xlu1 %v7295_v61, %s10271_s30  ;;  %10223 = vrcp.f32 %v5454_v11  ;;  %v14293_v59 = vpop.f32.mrf.mxu1 }
 0x7e5   : > { %10225 = vpow2.f32 %v5092_v32 }
 0x7e6   : > { %10227 = vpow2.f32 %v5090_v34  ;;  %v6966_v34 = vpop.f32.mrf.mxu0 }
 0x7ea   : > { %v5457_v15 = vpop.xlane.xlu2 %5456  ;;  %v10224_v57 = vpop.eup %10223 }
 0x7eb   : > { %10229 = vrcp.f32 %v5457_v15  ;;  %v14286_v51 = vpop.eup %10225  ;;  %v5728_v24 = vmul.f32 %v10224_v57, %v14144_v58  ;;  %v14303_v17 = vpop.f32.mrf.mxu2  ;;  %v7682_v57 = vpack.c.bf16 %v6966_v34, %v6966_v34 }
 0x7ec   : > { %7557 = vrot.lane.b32.xlu1 %v7488_v41, %s10272_s8  ;;  %10231 = vpow2.f32 %v5094_v36  ;;  %v14291_v33 = vpop.eup %10227  ;;  %v5473_v13 = vsel %vm4329_vm3, %v14286_v51, 0.0  ;;  %v14305_v48 = vpop.f32.mrf.mxu1 }
 0x7ed   : > { %5468 = vadd.xlane.f32.xlu0 %v5467_v53  ;;  %v5856_v25 = vpack.c.bf16 %v5728_v24, %v5728_v24  ;;  %v5470_v58 = vsel %vm4329_vm3, %v14291_v33, 0.0  ;;  %v14312_v5 = vpop.xlane.xlu1 %4712 }
 0x7ee   : > { %v6968_v53 = vpop.f32.mrf.mxu0 }
 0x7ef   : > { %v7070_v19 = vunpack.c.l.b16 %v5856_v25  ;;  %v7683_v21 = vpack.c.bf16 %v6968_v53, %v6968_v53 }
 0x7f1   : > { %v10230_v40 = vpop.eup %10229  ;;  %5474 = vadd.xlane.f32.xlu2 %v5473_v13  ;;  %v9542_v13 = vld [vmem:[%s14840_s3 + $0x8] sm:$0xff] }
 0x7f2   : > { %v5729_v3 = vmul.f32 %v10230_v40, %v14154_v42  ;;  %v14301_v54 = vpop.eup %10231  ;;  %v7298_v40 = vpack.c.bf16 %v14168_v20, %v14168_v20  ;;  %8055 = vmatpush.bf16.msra.mxu0 %v9542_v13  ;;  %v7299_v20 = vpack.c.bf16 %v14175_v6, %v14175_v6 }
 0x7f3   : > { %v5460_v35 = vpop.xlane.xlu2 %5459  ;;  %v5476_v16 = vsel %vm4329_vm3, %v14301_v54, 0.0  ;;  %v14316_v28 = vpop.f32.mrf.mxu2 }
 0x7f4   : > { %v5857_v44 = vpack.c.bf16 %v5729_v3, %v5729_v3  ;;  %7750 = vrot.lane.b32.xlu1 %v7681_v8, %s10273_s9  ;;  %v14320_v61 = vpop.f32.mrf.mxu1  ;;  %10233 = vrcp.f32 %v5460_v35  ;;  %v14360_v3 = vpop.f32.mrf.mxu3 }
 0x7f5   : > { %5471 = vadd.xlane.f32.xlu0 %v5470_v58 }
 0x7f6   : > { %v7071_v38 = vunpack.c.l.b16 %v5857_v44  ;;  %v9541_v44 = vld [vmem:[%s14840_s3] sm:$0xff] }
 0x7f7   : > { %8056 = vmatpush.bf16.msra.mxu0 %v9541_v44 }
 0x7f8   : > { %v7075_v42 = vpack.c.b16 %v7071_v38, %v7070_v19  ;;  %v7492_v38 = vpack.c.bf16 %v14263_v27, %v14263_v27 }
 0x7f9   : > { %5477 = vadd.xlane.f32.xlu2 %v5476_v16 }
 0x7fa   : > { %9202 = vmatmul.msk.bf16.gmra.mxu2 %vm4329_vm3, %v7075_v42  ;;  %v10234_v25 = vpop.eup %10233 }
 0x7fb   : > { %v7357_v45 = vpop.permute.xlu2 %7356  ;;  %v14326_v11 = vpop.f32.mrf.mxu2  ;;  %v5730_v58 = vmul.f32 %v10234_v25, %v14162_v56 }
 0x7fc   : > { %7452 = vst.msk [vmem:[#allocation5 + $0x4] sm:$0xf] %vm7450_vm4, %v7357_v45  ;;  %7366 = vrot.lane.b32.xlu1 %v7296_v62, %s10271_s30  ;;  %v14331_v22 = vpop.f32.mrf.mxu1  ;;  %v14378_v56 = vpop.f32.mrf.mxu3 }
 0x7fd   : > { %v5858_v16 = vpack.c.bf16 %v5730_v58, %v5730_v58 }
 0x7ff   : > { %v7149_v6 = vunpack.c.l.b16 %v5858_v16  ;;  %v7304_v16 = vpack.c.bf16 %v14238_v46, %v14238_v46 }
 0x803   : > { %v7355_v30 = vpop.permute.xlu1 %7354  ;;  %v7743_v32 = vpop.permute.xlu2 %7742 }
 0x804   : > { %7451 = vst.msk [vmem:[#allocation5] sm:$0xf] %vm7450_vm4, %v7355_v30  ;;  %7559 = vrot.lane.b32.xlu1 %v7489_v47, %s10272_s8  ;;  %v14341_v15 = vpop.f32.mrf.mxu2  ;;  %v14347_v24 = vpop.f32.mrf.mxu1 }
 0x809   : > { %7362 = vrot.lane.b32.xlu0 %v7294_v18, %s10271_s30 }
 0x80b   : > { %v7550_v55 = vpop.permute.xlu1 %7549  ;;  %v7359_v41 = vpop.permute.xlu2 %7358 }
 0x80c   : > { %7645 = vst.msk [vmem:[#allocation5 + $0x4] sm:$0xf] %vm7643_vm5, %v7550_v55  ;;  %7561 = vrot.lane.b32.xlu1 %v7490_v2, %s10272_s8  ;;  %v14351_v26 = vpop.f32.mrf.mxu2  ;;  %v7036_v39 = vpop.f32.mrf.mxu1 }
 0x80d   : > { %7838 = vst.msk [vmem:[#allocation5 + $0x4] sm:$0xf] %vm7836_vm6, %v7743_v32  ;;  %v7684_v32 = vpack.c.bf16 %v7036_v39, %v7036_v39  ;;  %v14386_v55 = vpop.f32.mrf.mxu3 }
 0x80e   : > { %7453 = vst.msk [vmem:[#allocation5 + $0x8] sm:$0xf] %vm7450_vm4, %v7359_v41 }
 0x811   : > { %7368 = vrot.lane.b32.xlu2 %v7297_v10, %s10271_s30  ;;  %7555 = vrot.lane.b32.xlu0 %v7487_v50, %s10272_s8  ;;  %v7300_v10 = vpack.c.bf16 %v14187_v1, %v14187_v1  ;;  %v4841_v50 = vsub.f32 %v14151_v49, %v14312_v5  ;;  %v7494_v1 = vpack.c.bf16 %v14293_v59, %v14293_v59 }
 0x812   : > { %v7302_v59 = vpack.c.bf16 %v14211_v63, %v14211_v63  ;;  %v7496_v63 = vpack.c.bf16 %v14320_v61, %v14320_v61 }
 0x813   : > { %v7361_v36 = vpop.permute.xlu2 %7360 }
 0x814   : > { %7454 = vst.msk [vmem:[#allocation5 + $0xc] sm:$0xf] %vm7450_vm4, %v7361_v36  ;;  %7752 = vrot.lane.b32.xlu1 %v7682_v57, %s10273_s9  ;;  %v14374_v62 = vpop.f32.mrf.mxu2  ;;  %v7038_v18 = vpop.f32.mrf.mxu1  ;;  %v7301_v57 = vpack.c.bf16 %v14197_v12, %v14197_v12 }
 0x815   : > { %v7685_v27 = vpack.c.bf16 %v7038_v18, %v7038_v18  ;;  %v14401_v13 = vpop.f32.mrf.mxu3 }
 0x819   : > { %7754 = vrot.lane.b32.xlu2 %v7683_v21, %s10273_s9  ;;  %7748 = vrot.lane.b32.xlu0 %v7680_v60, %s10273_s9  ;;  %v5096_v60 = vmul.f32 1.442695, %v4841_v50 }
 0x81a   : > { %v5463_v8 = vpop.xlane.xlu0 %5462 }
 0x81b   : > { %v7552_v35 = vpop.permute.xlu2 %7551  ;;  %10235 = vrcp.f32 %v5463_v8 }
 0x81c   : > { %7646 = vst.msk [vmem:[#allocation5 + $0x8] sm:$0xf] %vm7643_vm5, %v7552_v35  ;;  %7370 = vrot.lane.b32.xlu1 %v7298_v40, %s10271_s30  ;;  %v7041_v36 = vpop.f32.mrf.mxu1  ;;  %10237 = vpow2.f32 %v5096_v60  ;;  %v7303_v35 = vpack.c.bf16 %v14218_v7, %v14218_v7 }
 0x81d   : > { %v7686_v49 = vpack.c.bf16 %v7041_v36, %v7041_v36  ;;  %v14414_v25 = vpop.f32.mrf.mxu3 }
 0x821   : > { %v10236_v19 = vpop.eup %10235  ;;  %7372 = vrot.lane.b32.xlu2 %v7299_v20, %s10271_s30 }
 0x822   : > { %v5731_v42 = vmul.f32 %v10236_v19, %v14199_v14  ;;  %v14382_v14 = vpop.f32.mrf.mxu2  ;;  %v14410_v8 = vpop.eup %10237 }
 0x823   : > { %v7554_v45 = vpop.permute.xlu2 %7553  ;;  %v5479_v39 = vsel %vm4329_vm3, %v14410_v8, 0.0 }
 0x824   : > { %v5859_v47 = vpack.c.bf16 %v5731_v42, %v5731_v42  ;;  %7647 = vst.msk [vmem:[#allocation5 + $0xc] sm:$0xf] %vm7643_vm5, %v7554_v45  ;;  %7565 = vrot.lane.b32.xlu1 %v7492_v38, %s10272_s8  ;;  %v14406_v12 = vpop.f32.mrf.mxu1 }
 0x825   : > { %v14427_v19 = vpop.f32.mrf.mxu3 }
 0x826   : > { %v7150_v30 = vunpack.c.l.b16 %v5859_v47  ;;  %v7305_v47 = vpack.c.bf16 %v14246_v9, %v14246_v9 }
 0x828   : > { %v7157_v2 = vpack.c.b16 %v7150_v30, %v7149_v6  ;;  %v7491_v6 = vpack.c.bf16 %v14253_v37, %v14253_v37  ;;  %v7493_v37 = vpack.c.bf16 %v14276_v29, %v14276_v29 }
 0x829   : > { %7756 = vrot.lane.b32.xlu2 %v7684_v32, %s10273_s9  ;;  %v7498_v32 = vpack.c.bf16 %v14347_v24, %v14347_v24 }
 0x82a   : > { %9219 = vmatmul.msk.bf16.vlgmr.msrb.gmra.mxu3 %vm4329_vm3, %v7157_v2  ;;  %v14397_v53 = vpop.f32.mrf.mxu2 }
 0x82b   : > { %v7745_v34 = vpop.permute.xlu2 %7744 }
 0x82c   : > { %7839 = vst.msk [vmem:[#allocation5 + $0x8] sm:$0xf] %vm7836_vm6, %v7745_v34  ;;  %7758 = vrot.lane.b32.xlu1 %v7685_v27, %s10273_s9  ;;  %v7046_v44 = vpop.f32.mrf.mxu1  ;;  %v7306_v34 = vpack.c.bf16 %v14250_v43, %v14250_v43  ;;  %v7687_v43 = vpack.c.bf16 %v14406_v12, %v14406_v12 }
 0x82d   : > { %v7548_v41 = vpop.permute.xlu0 %7547  ;;  %v7688_v38 = vpack.c.bf16 %v7046_v44, %v7046_v44  ;;  %v14438_v61 = vpop.f32.mrf.mxu3 }
 0x82e   : > { %7644 = vst.msk [vmem:[#allocation5] sm:$0xf] %vm7643_vm5, %v7548_v41 }
 0x831   : > { %7374 = vrot.lane.b32.xlu2 %v7300_v10, %s10271_s30 }
 0x832   : > { %v14408_v5 = vpop.f32.mrf.mxu2 }
 0x834   : > { %7376 = vrot.lane.b32.xlu1 %v7301_v57, %s10271_s30  ;;  %v14433_v42 = vpop.f32.mrf.mxu1  ;;  %v7307_v57 = vpack.c.bf16 %v14256_v4, %v14256_v4 }
 0x835   : > { %v7741_v21 = vpop.permute.xlu0 %7740  ;;  %v14454_v27 = vpop.f32.mrf.mxu3 }
 0x836   : > { %7837 = vst.msk [vmem:[#allocation5] sm:$0xf] %vm7836_vm6, %v7741_v21  ;;  %v5466_v58 = vpop.xlane.xlu1 %5465 }
 0x837   : > { %10239 = vrcp.f32 %v5466_v58  ;;  %v7495_v58 = vpack.c.bf16 %v14305_v48, %v14305_v48  ;;  %v7309_v48 = vpack.c.bf16 %v14288_v31, %v14288_v31 }
 0x839   : > { %7569 = vrot.lane.b32.xlu2 %v7494_v1, %s10272_s8 }
 0x83a   : > { %v14425_v20 = vpop.f32.mrf.mxu2 }
 0x83c   : > { %7760 = vrot.lane.b32.xlu1 %v7686_v49, %s10273_s9  ;;  %v7051_v18 = vpop.f32.mrf.mxu1  ;;  %v7500_v49 = vpack.c.bf16 %v14374_v62, %v14374_v62 }
 0x83d   : > { %v9525_v40 = vld [vmem:[#allocation5] sm:$0xff]  ;;  %v7690_v9 = vpack.c.bf16 %v7051_v18, %v7051_v18  ;;  %v10240_v10 = vpop.eup %10239  ;;  %v14466_v36 = vpop.f32.mrf.mxu3 }
 0x83e   : > { %9295 = vmatmul.msk.bf16.vlgmr.msra.gmra.mxu0 %vm420_vm0, %v9525_v40  ;;  %v5732_v29 = vmul.f32 %v10240_v10, %v14230_v52 }
 0x840   : > { %v5860_v4 = vpack.c.bf16 %v5732_v29, %v5732_v29  ;;  %v7310_v29 = vpack.c.bf16 %v14303_v17, %v14303_v17 }
 0x841   : > { %7378 = vrot.lane.b32.xlu2 %v7302_v59, %s10271_s30 }
 0x842   : > { %v14435_v45 = vpop.f32.mrf.mxu2  ;;  %v7151_v12 = vunpack.c.l.b16 %v5860_v4 }
 0x843   : > { %5480 = vadd.xlane.f32.xlu0 %v5479_v39 }
 0x844   : > { %7380 = vrot.lane.b32.xlu1 %v7303_v35, %s10271_s30 }
 0x849   : > { %7573 = vrot.lane.b32.xlu2 %v7496_v63, %s10272_s8  ;;  %v14485_v63 = vpop.f32.mrf.mxu3 }
 0x84a   : > { %v14451_v2 = vpop.f32.mrf.mxu2 }
 0x84c   : > { %7764 = vrot.lane.b32.xlu1 %v7688_v38, %s10273_s9 }
 0x84e   : > { %v7747_v7 = vpop.permute.xlu1 %7746 }
 0x84f   : > { %7840 = vst.msk [vmem:[#allocation5 + $0xc] sm:$0xf] %vm7836_vm6, %v7747_v7 }
 0x851   : > { %7382 = vrot.lane.b32.xlu2 %v7304_v16, %s10271_s30  ;;  %v7308_v16 = vpack.c.bf16 %v14270_v23, %v14270_v23 }
 0x852   : > { %v7121_v50 = vpop.f32.mrf.mxu2 }
 0x853   : > { %v7692_v52 = vpack.c.bf16 %v7121_v50, %v7121_v50 }
 0x854   : > { %7384 = vrot.lane.b32.xlu1 %v7305_v47, %s10271_s30 }
 0x856   : > { %v7365_v30 = vpop.permute.xlu1 %7364  ;;  %v9526_v46 = vld [vmem:[#allocation5 + $0x8] sm:$0xff] }
 0x857   : > { %7456 = vst.msk [vmem:[#allocation5 + $0x14] sm:$0xf] %vm7450_vm4, %v7365_v30  ;;  %7563 = vrot.lane.b32.xlu0 %v7491_v6, %s10272_s8  ;;  %9296 = vmatmul.msk.bf16.gmra.mxu0 %vm420_vm0, %v9526_v46 }
 0x859   : > { %7577 = vrot.lane.b32.xlu2 %v7498_v32, %s10272_s8  ;;  %v7689_v32 = vpack.c.bf16 %v14433_v42, %v14433_v42 }
 0x85a   : > { %v14478_v39 = vpop.f32.mrf.mxu2 }
 0x85c   : > { %7768 = vrot.lane.b32.xlu1 %v7690_v9, %s10273_s9 }
 0x85e   : > { %v7558_v24 = vpop.permute.xlu1 %7557 }
 0x85f   : > { %7649 = vst.msk [vmem:[#allocation5 + $0x14] sm:$0xf] %vm7643_vm5, %v7558_v24  ;;  %7567 = vrot.lane.b32.xlu0 %v7493_v37, %s10272_s8  ;;  %v7502_v37 = vpack.c.bf16 %v14397_v53, %v14397_v53  ;;  %v14503_v24 = vpop.f32.mrf.mxu3  ;;  %v7497_v53 = vpack.c.bf16 %v14331_v22, %v14331_v22  ;;  %v7311_v22 = vpack.c.bf16 %v14316_v28, %v14316_v28 }
 0x860   : > { %v5469_v41 = vpop.xlane.xlu0 %5468 }
 0x861   : > { %7386 = vrot.lane.b32.xlu2 %v7306_v34, %s10271_s30  ;;  %10241 = vrcp.f32 %v5469_v41 }
 0x862   : > { %v7126_v30 = vpop.f32.mrf.mxu2 }
 0x863   : > { %v7694_v31 = vpack.c.bf16 %v7126_v30, %v7126_v30  ;;  %v7501_v30 = vpack.c.bf16 %v14382_v14, %v14382_v14 }
 0x864   : > { %v5475_v60 = vpop.xlane.xlu2 %5474  ;;  %7388 = vrot.lane.b32.xlu1 %v7307_v57, %s10271_s30 }
 0x866   : > { %v7751_v21 = vpop.permute.xlu1 %7750 }
 0x867   : > { %v10242_v1 = vpop.eup %10241  ;;  %7842 = vst.msk [vmem:[#allocation5 + $0x14] sm:$0xf] %vm7836_vm6, %v7751_v21  ;;  %7762 = vrot.lane.b32.xlu0 %v7687_v43, %s10273_s9  ;;  %v7053_v43 = vpop.f32.mrf.mxu1 }
 0x868   : > { %v5733_v40 = vmul.f32 %v10242_v1, %v14279_v0  ;;  %v5472_v59 = vpop.xlane.xlu0 %5471  ;;  %v7691_v1 = vpack.c.bf16 %v7053_v43, %v7053_v43 }
 0x869   : > { %7581 = vrot.lane.b32.xlu2 %v7500_v49, %s10272_s8  ;;  %10243 = vrcp.f32 %v5472_v59 }
 0x86a   : > { %v5861_v35 = vpack.c.bf16 %v5733_v40, %v5733_v40  ;;  %10245 = vrcp.f32 %v5475_v60  ;;  %v14512_v10 = vpop.f32.mrf.mxu2  ;;  %v14520_v60 = vpop.f32.mrf.mxu3  ;;  %v7504_v40 = vpack.c.bf16 %v14425_v20, %v14425_v20 }
 0x86b   : > { %v7695_v14 = vpack.c.bf16 %v14512_v10, %v14512_v10 }
 0x86c   : > { %v7152_v44 = vunpack.c.l.b16 %v5861_v35  ;;  %7772 = vrot.lane.b32.xlu1 %v7692_v52, %s10273_s9  ;;  %v14481_v62 = vpop.xlane.xlu2 %5477 }
 0x86d   : > { %10247 = vrcp.f32 %v14481_v62 }
 0x86e   : > { %v7367_v0 = vpop.permute.xlu1 %7366  ;;  %v7158_v38 = vpack.c.b16 %v7152_v44, %v7151_v12  ;;  %v7499_v12 = vpack.c.bf16 %v14351_v26, %v14351_v26  ;;  %v7312_v44 = vpack.c.bf16 %v14326_v11, %v14326_v11 }
 0x86f   : > { %v10244_v7 = vpop.eup %10243  ;;  %7457 = vst.msk [vmem:[#allocation5 + $0x18] sm:$0xf] %vm7450_vm4, %v7367_v0  ;;  %7571 = vrot.lane.b32.xlu0 %v7495_v58, %s10272_s8  ;;  %v7313_v0 = vpack.c.bf16 %v14341_v15, %v14341_v15 }
 0x870   : > { %9220 = vmatmul.msk.bf16.gmra.mxu3 %vm4329_vm3, %v7158_v38  ;;  %v10246_v47 = vpop.eup %10245  ;;  %v5734_v6 = vmul.f32 %v10244_v7, %v14291_v33 }
 0x871   : > { %7390 = vrot.lane.b32.xlu2 %v7308_v16, %s10271_s30  ;;  %v5735_v46 = vmul.f32 %v10246_v47, %v14286_v51  ;;  %v7693_v16 = vpack.c.bf16 %v14478_v39, %v14478_v39  ;;  %v7506_v47 = vpack.c.bf16 %v14451_v2, %v14451_v2  ;;  %v7314_v2 = vpack.c.bf16 %v14360_v3, %v14360_v3 }
 0x872   : > { %v5862_v18 = vpack.c.bf16 %v5734_v6, %v5734_v6  ;;  %v7131_v49 = vpop.f32.mrf.mxu2  ;;  %v14532_v28 = vpop.f32.mrf.mxu3 }
 0x873   : > { %v5863_v51 = vpack.c.bf16 %v5735_v46, %v5735_v46  ;;  %v7696_v59 = vpack.c.bf16 %v7131_v49, %v7131_v49 }
 0x874   : > { %7392 = vrot.lane.b32.xlu1 %v7309_v48, %s10271_s30  ;;  %v7369_v23 = vpop.permute.xlu2 %7368  ;;  %v7153_v33 = vunpack.c.l.b16 %v5862_v18 }
 0x875   : > { %7458 = vst.msk [vmem:[#allocation5 + $0x1c] sm:$0xf] %vm7450_vm4, %v7369_v23  ;;  %v7154_v42 = vunpack.c.l.b16 %v5863_v51  ;;  %v7315_v23 = vpack.c.bf16 %v14378_v56, %v14378_v56  ;;  %v7503_v51 = vpack.c.bf16 %v14408_v5, %v14408_v5  ;;  %v7317_v5 = vpack.c.bf16 %v14401_v13, %v14401_v13  ;;  %v14610_v13 = vld [vmem:[%s14841_s4] ss:$0 sm:$0xff] }
 0x876   : > { %v7560_v9 = vpop.permute.xlu1 %7559 }
 0x877   : > { %7650 = vst.msk [vmem:[#allocation5 + $0x18] sm:$0xf] %vm7643_vm5, %v7560_v9  ;;  %7766 = vrot.lane.b32.xlu0 %v7689_v32, %s10273_s9  ;;  %v7159_v57 = vpack.c.b16 %v7154_v42, %v7153_v33  ;;  %v7316_v42 = vpack.c.bf16 %v14386_v55, %v14386_v55  ;;  %v7510_v55 = vpack.c.bf16 %v14520_v60, %v14520_v60 }
 0x878   : > { %v7505_v60 = vpack.c.bf16 %v14435_v45, %v14435_v45 }
 0x879   : > { %7585 = vrot.lane.b32.xlu2 %v7502_v37, %s10272_s8  ;;  %v7508_v37 = vpack.c.bf16 %v14485_v63, %v14485_v63 }
 0x87a   : > { %v7133_v58 = vpop.f32.mrf.mxu2  ;;  %v14548_v38 = vpop.f32.mrf.mxu3 }
 0x87b   : > { %v7363_v34 = vpop.permute.xlu0 %7362 }
 0x87c   : > { %7776 = vrot.lane.b32.xlu1 %v7694_v31, %s10273_s9  ;;  %v7755_v41 = vpop.permute.xlu2 %7754  ;;  %7455 = vst.msk [vmem:[#allocation5 + $0x10] sm:$0xf] %vm7450_vm4, %v7363_v34 }
 0x87e   : > { %v7562_v50 = vpop.permute.xlu1 %7561 }
 0x87f   : > { %7651 = vst.msk [vmem:[#allocation5 + $0x1c] sm:$0xf] %vm7643_vm5, %v7562_v50  ;;  %7575 = vrot.lane.b32.xlu0 %v7497_v53, %s10272_s8  ;;  %v10248_v50 = vpop.eup %10247 }
 0x880   : > { %7844 = vst.msk [vmem:[#allocation5 + $0x1c] sm:$0xf] %vm7836_vm6, %v7755_v41  ;;  %9221 = vmatmul.msk.bf16.gmra.mxu3 %vm4329_vm3, %v7159_v57  ;;  %v7697_v41 = vpack.c.bf16 %v7133_v58, %v7133_v58  ;;  %v5736_v62 = vmul.f32 %v10248_v50, %v14301_v54 }
 0x881   : > { %7394 = vrot.lane.b32.xlu2 %v7310_v29, %s10271_s30 }
 0x882   : > { %v7136_v48 = vpop.f32.mrf.mxu2  ;;  %v14560_v6 = vpop.f32.mrf.mxu3  ;;  %v5864_v43 = vpack.c.bf16 %v5736_v62, %v5736_v62 }
 0x883   : > { %v7556_v21 = vpop.permute.xlu0 %7555  ;;  %v7698_v15 = vpack.c.bf16 %v7136_v48, %v7136_v48 }
 0x884   : > { %7396 = vrot.lane.b32.xlu1 %v7311_v22, %s10271_s30  ;;  %v7373_v17 = vpop.permute.xlu2 %7372  ;;  %7648 = vst.msk [vmem:[#allocation5 + $0x10] sm:$0xf] %vm7643_vm5, %v7556_v21  ;;  %v7155_v49 = vunpack.c.l.b16 %v5864_v43 }
 0x885   : > { %7460 = vst.msk [vmem:[#allocation5 + $0x24] sm:$0xf] %vm7450_vm4, %v7373_v17 }
 0x886   : > { %v7753_v4 = vpop.permute.xlu1 %7752 }
 0x887   : > { %7843 = vst.msk [vmem:[#allocation5 + $0x18] sm:$0xf] %vm7836_vm6, %v7753_v4  ;;  %7770 = vrot.lane.b32.xlu0 %v7691_v1, %s10273_s9  ;;  %v7318_v1 = vpack.c.bf16 %v14414_v25, %v14414_v25 }
 0x889   : > { %7589 = vrot.lane.b32.xlu2 %v7504_v40, %s10272_s8 }
 0x88a   : > { %v14575_v9 = vpop.f32.mrf.mxu3  ;;  %v7138_v4 = vpop.f32.mrf.mxu2 }
 0x88b   : > { %v7749_v52 = vpop.permute.xlu0 %7748 }
 0x88c   : > { %7780 = vrot.lane.b32.xlu1 %v7696_v59, %s10273_s9  ;;  %v14536_v35 = vpop.permute.xlu2 %7756  ;;  %7841 = vst.msk [vmem:[#allocation5 + $0x10] sm:$0xf] %vm7836_vm6, %v7749_v52  ;;  %v7699_v52 = vpack.c.bf16 %v7138_v4, %v7138_v4 }
 0x88e   : > { %v7371_v20 = vpop.permute.xlu1 %7370  ;;  %v9528_v32 = vld [vmem:[#allocation5 + $0x18] sm:$0xff] }
 0x88f   : > { %7459 = vst.msk [vmem:[#allocation5 + $0x20] sm:$0xf] %vm7450_vm4, %v7371_v20  ;;  %7579 = vrot.lane.b32.xlu0 %v7499_v12, %s10272_s8 }
 0x891   : > { %7398 = vrot.lane.b32.xlu2 %v7312_v44, %s10271_s30  ;;  %v7512_v44 = vpack.c.bf16 %v14548_v38, %v14548_v38  ;;  %v7507_v38 = vpack.c.bf16 %v14466_v36, %v14466_v36 }
 0x893   : > { %v9527_v7 = vld [vmem:[#allocation5 + $0x10] sm:$0xff] }
 0x894   : > { %7400 = vrot.lane.b32.xlu1 %v7313_v0, %s10271_s30  ;;  %v7375_v26 = vpop.permute.xlu2 %7374  ;;  %9297 = vmatmul.msk.bf16.gmra.mxu0 %vm420_vm0, %v9527_v7 }
 0x895   : > { %7461 = vst.msk [vmem:[#allocation5 + $0x28] sm:$0xf] %vm7450_vm4, %v7375_v26  ;;  %v7320_v26 = vpack.c.bf16 %v14438_v61, %v14438_v61 }
 0x896   : > { %v7566_v11 = vpop.permute.xlu1 %7565 }
 0x897   : > { %7653 = vst.msk [vmem:[#allocation5 + $0x24] sm:$0xf] %vm7643_vm5, %v7566_v11  ;;  %7774 = vrot.lane.b32.xlu0 %v7693_v16, %s10273_s9 }
 0x899   : > { %7593 = vrot.lane.b32.xlu2 %v7506_v47, %s10272_s8 }
 0x89c   : > { %7784 = vrot.lane.b32.xlu1 %v7698_v15, %s10273_s9  ;;  %v7570_v39 = vpop.permute.xlu2 %7569 }
 0x89e   : > { %v7759_v46 = vpop.permute.xlu1 %7758 }
 0x89f   : > { %7846 = vst.msk [vmem:[#allocation5 + $0x24] sm:$0xf] %vm7836_vm6, %v7759_v46  ;;  %7583 = vrot.lane.b32.xlu0 %v7501_v30, %s10272_s8 }
 0x8a1   : > { %7402 = vrot.lane.b32.xlu2 %v7314_v2, %s10271_s30  ;;  %v7509_v2 = vpack.c.bf16 %v14503_v24, %v14503_v24 }
 0x8a4   : > { %7404 = vrot.lane.b32.xlu1 %v7315_v23, %s10271_s30  ;;  %v7379_v18 = vpop.permute.xlu2 %7378  ;;  %9298 = vmatmul.msk.bf16.gmra.mxu0 %vm420_vm0, %v9528_v32 }
 0x8a5   : > { %7463 = vst.msk [vmem:[#allocation5 + $0x30] sm:$0xf] %vm7450_vm4, %v7379_v18 }
 0x8a6   : > { %v7377_v3 = vpop.permute.xlu1 %7376 }
 0x8a7   : > { %7462 = vst.msk [vmem:[#allocation5 + $0x2c] sm:$0xf] %vm7450_vm4, %v7377_v3  ;;  %7778 = vrot.lane.b32.xlu0 %v7695_v14, %s10273_s9 }
 0x8a8   : > { %7655 = vst.msk [vmem:[#allocation5 + $0x2c] sm:$0xf] %vm7643_vm5, %v7570_v39  ;;  %v7514_v39 = vpack.c.bf16 %v14575_v9, %v14575_v9 }
 0x8a9   : > { %7597 = vrot.lane.b32.xlu2 %v7508_v37, %s10272_s8 }
 0x8ac   : > { %v7574_v56 = vpop.permute.xlu2 %7573 }
 0x8ad   : > { %v7206_v31 = vpop.f32.mrf.mxu3 }
 0x8ae   : > { %v14587_v33 = vpop.permute.xlu1 %7760  ;;  %v7700_v34 = vpack.c.bf16 %v7206_v31, %v7206_v31 }
 0x8af   : > { %7587 = vrot.lane.b32.xlu0 %v7503_v51, %s10272_s8 }
 0x8b0   : > { %7788 = vrot.lane.b32.xlu1 %v7700_v34, %s10273_s9 }
 0x8b1   : > { %7406 = vrot.lane.b32.xlu2 %v7316_v42, %s10271_s30 }
 0x8b4   : > { %v7383_v63 = vpop.permute.xlu2 %7382 }
 0x8b5   : > { %7465 = vst.msk [vmem:[#allocation5 + $0x38] sm:$0xf] %vm7450_vm4, %v7383_v63  ;;  %v7208_v11 = vpop.f32.mrf.mxu3 }
 0x8b6   : > { %v7381_v53 = vpop.permute.xlu1 %7380  ;;  %v5481_v10 = vpop.xlane.xlu0 %5480  ;;  %v7701_v36 = vpack.c.bf16 %v7208_v11, %v7208_v11 }
 0x8b7   : > { %7464 = vst.msk [vmem:[#allocation5 + $0x34] sm:$0xf] %vm7450_vm4, %v7381_v53  ;;  %10249 = vrcp.f32 %v5481_v10  ;;  %7782 = vrot.lane.b32.xlu0 %v7697_v41, %s10273_s9  ;;  %v7319_v10 = vpack.c.bf16 %v14427_v19, %v14427_v19 }
 0x8b8   : > { %7657 = vst.msk [vmem:[#allocation5 + $0x34] sm:$0xf] %vm7643_vm5, %v7574_v56  ;;  %7408 = vrot.lane.b32.xlu1 %v7317_v5, %s10271_s30 }
 0x8b9   : > { %7601 = vrot.lane.b32.xlu2 %v7510_v55, %s10272_s8 }
 0x8bb   : > { %v8058_v22 = vpop.f32.mrf.mxu0 }
 0x8bc   : > { %v7578_v57 = vpop.permute.xlu2 %7577  ;;  %v8059_v17 = vadd.f32 %v14610_v13, %v8058_v22  ;;  %v7511_v22 = vpack.c.bf16 %v14532_v28, %v14532_v28  ;;  %v7321_v28 = vpack.c.bf16 %v14454_v27, %v14454_v27  ;;  %v7513_v27 = vpack.c.bf16 %v14560_v6, %v14560_v6 }
 0x8bd   : > { %v10250_v29 = vpop.eup %10249 }
 0x8be   : > { %v5737_v54 = vmul.f32 %v10250_v29, %v14410_v8  ;;  %v14620_v21 = vpop.permute.xlu1 %7764  ;;  %8138 = vst.msk [vmem:[%s14617_s19] sm:$0xff] %vm420_vm0, %v8059_v17 }
 0x8bf   : > { %7591 = vrot.lane.b32.xlu0 %v7505_v60, %s10272_s8 }
 0x8c0   : > { %v5865_v45 = vpack.c.bf16 %v5737_v54, %v5737_v54 }
 0x8c1   : > { %7410 = vrot.lane.b32.xlu2 %v7318_v1, %s10271_s30 }
 0x8c2   : > { %v7156_v40 = vunpack.c.l.b16 %v5865_v45 }
 0x8c3   : > { %v8060_v12 = vpop.f32.mrf.mxu0 }
 0x8c4   : > { %v7387_v59 = vpop.permute.xlu2 %7386  ;;  %v7160_v8 = vpack.c.b16 %v7156_v40, %v7155_v49  ;;  %v8061_v25 = vadd.f32 %v14610_v13, %v8060_v12 }
 0x8c5   : > { %7467 = vst.msk [vmem:[#allocation5 + $0x40] sm:$0xf] %vm7450_vm4, %v7387_v59 }
 0x8c6   : > { %v7385_v20 = vpop.permute.xlu1 %7384  ;;  %9222 = vmatmul.msk.bf16.gmra.mxu3 %vm4329_vm3, %v7160_v8  ;;  %8139 = vst.msk [vmem:[%s14617_s19 + $0x8] sm:$0xff] %vm420_vm0, %v8061_v25 }
 0x8c7   : > { %7466 = vst.msk [vmem:[#allocation5 + $0x3c] sm:$0xf] %vm7450_vm4, %v7385_v20  ;;  %7786 = vrot.lane.b32.xlu0 %v7699_v52, %s10273_s9 }
 0x8c8   : > { %7659 = vst.msk [vmem:[#allocation5 + $0x3c] sm:$0xf] %vm7643_vm5, %v7578_v57 }
 0x8c9   : > { %7605 = vrot.lane.b32.xlu2 %v7512_v44, %s10272_s8  ;;  %v7564_v58 = vpop.permute.xlu0 %7563 }
 0x8ca   : > { %7652 = vst.msk [vmem:[#allocation5 + $0x20] sm:$0xf] %vm7643_vm5, %v7564_v58 }
 0x8cb   : > { %7845 = vst.msk [vmem:[#allocation5 + $0x20] sm:$0xf] %vm7836_vm6, %v14536_v35 }
 0x8cc   : > { %v7582_v0 = vpop.permute.xlu2 %7581 }
 0x8ce   : > { %v7769_v7 = vpop.permute.xlu1 %7768 }
 0x8cf   : > { %7595 = vrot.lane.b32.xlu0 %v7507_v38, %s10272_s8 }
 0x8d1   : > { %7414 = vrot.lane.b32.xlu2 %v7320_v26, %s10271_s30  ;;  %v7568_v16 = vpop.permute.xlu0 %7567 }
 0x8d2   : > { %7654 = vst.msk [vmem:[#allocation5 + $0x28] sm:$0xf] %vm7643_vm5, %v7568_v16  ;;  %v9529_v47 = vld [vmem:[#allocation5 + $0x20] sm:$0xff] }
 0x8d3   : > { %7847 = vst.msk [vmem:[#allocation5 + $0x28] sm:$0xf] %vm7836_vm6, %v14587_v33  ;;  %9299 = vmatmul.msk.bf16.gmra.mxu0 %vm420_vm0, %v9529_v47 }
 0x8d4   : > { %v7391_v35 = vpop.permute.xlu2 %7390  ;;  %v8063_v61 = vpop.f32.mrf.mxu0 }
 0x8d5   : > { %7469 = vst.msk [vmem:[#allocation5 + $0x48] sm:$0xf] %vm7450_vm4, %v7391_v35  ;;  %v8064_v15 = vadd.f32 %v14610_v13, %v8063_v61 }
 0x8d6   : > { %v7389_v48 = vpop.permute.xlu1 %7388 }
 0x8d7   : > { %7468 = vst.msk [vmem:[#allocation5 + $0x44] sm:$0xf] %vm7450_vm4, %v7389_v48  ;;  %7790 = vrot.lane.b32.xlu0 %v7701_v36, %s10273_s9 }
 0x8d8   : > { %7661 = vst.msk [vmem:[#allocation5 + $0x44] sm:$0xf] %vm7643_vm5, %v7582_v0 }
 0x8d9   : > { %8140 = vst.msk [vmem:[%s14617_s19 + $0x10] sm:$0xff] %vm420_vm0, %v8064_v15  ;;  %7609 = vrot.lane.b32.xlu2 %v7514_v39, %s10272_s8  ;;  %v7763_v30 = vpop.permute.xlu0 %7762 }
 0x8da   : > { %7848 = vst.msk [vmem:[#allocation5 + $0x2c] sm:$0xf] %vm7836_vm6, %v7763_v30 }
 0x8dc   : > { %v7586_v46 = vpop.permute.xlu2 %7585  ;;  %v8065_v23 = vpop.f32.mrf.mxu0 }
 0x8dd   : > { %v8066_v18 = vadd.f32 %v14610_v13, %v8065_v23 }
 0x8de   : > { %v7773_v32 = vpop.permute.xlu1 %7772 }
 0x8df   : > { %7599 = vrot.lane.b32.xlu0 %v7509_v2, %s10272_s8  ;;  %8141 = vst.msk [vmem:[%s14617_s19 + $0x18] sm:$0xff] %vm420_vm0, %v8066_v18 }
 0x8e1   : > { %v7572_v14 = vpop.permute.xlu0 %7571  ;;  %v9530_v9 = vld [vmem:[#allocation5 + $0x28] sm:$0xff] }
 0x8e2   : > { %7656 = vst.msk [vmem:[#allocation5 + $0x30] sm:$0xf] %vm7643_vm5, %v7572_v14 }
 0x8e3   : > { %7849 = vst.msk [vmem:[#allocation5 + $0x30] sm:$0xf] %vm7836_vm6, %v14620_v21  ;;  %9300 = vmatmul.msk.bf16.gmra.mxu0 %vm420_vm0, %v9530_v9 }
 0x8e4   : > { %v7395_v3 = vpop.permute.xlu2 %7394 }
 0x8e5   : > { %7471 = vst.msk [vmem:[#allocation5 + $0x50] sm:$0xf] %vm7450_vm4, %v7395_v3 }
 0x8e6   : > { %v7393_v24 = vpop.permute.xlu1 %7392 }
 0x8e7   : > { %7470 = vst.msk [vmem:[#allocation5 + $0x4c] sm:$0xf] %vm7450_vm4, %v7393_v24 }
 0x8e8   : > { %7663 = vst.msk [vmem:[#allocation5 + $0x4c] sm:$0xf] %vm7643_vm5, %v7586_v46 }
 0x8e9   : > { %v7767_v37 = vpop.permute.xlu0 %7766 }
 0x8ea   : > { %7850 = vst.msk [vmem:[#allocation5 + $0x34] sm:$0xf] %vm7836_vm6, %v7767_v37 }
 0x8ec   : > { %v7590_v56 = vpop.permute.xlu2 %7589 }
 0x8ee   : > { %v7777_v51 = vpop.permute.xlu1 %7776 }
 0x8f1   : > { %v7576_v31 = vpop.permute.xlu0 %7575  ;;  %v9531_v33 = vld [vmem:[#allocation5 + $0x30] sm:$0xff] }
 0x8f2   : > { %7658 = vst.msk [vmem:[#allocation5 + $0x38] sm:$0xf] %vm7643_vm5, %v7576_v31 }
 0x8f3   : > { %7851 = vst.msk [vmem:[#allocation5 + $0x38] sm:$0xf] %vm7836_vm6, %v7769_v7  ;;  %v7211_v34 = vpop.f32.mrf.mxu3  ;;  %9301 = vmatmul.msk.bf16.gmra.mxu0 %vm420_vm0, %v9531_v33 }
 0x8f4   : > { %v7399_v42 = vpop.permute.xlu2 %7398  ;;  %v7702_v63 = vpack.c.bf16 %v7211_v34, %v7211_v34 }
 0x8f5   : > { %7473 = vst.msk [vmem:[#allocation5 + $0x58] sm:$0xf] %vm7450_vm4, %v7399_v42 }
 0x8f6   : > { %v7397_v41 = vpop.permute.xlu1 %7396  ;;  %7792 = vrot.lane.b32.xlu1 %v7702_v63, %s10273_s9 }
 0x8f7   : > { %7472 = vst.msk [vmem:[#allocation5 + $0x54] sm:$0xf] %vm7450_vm4, %v7397_v41 }
 0x8f8   : > { %7665 = vst.msk [vmem:[#allocation5 + $0x54] sm:$0xf] %vm7643_vm5, %v7590_v56 }
 0x8f9   : > { %v7771_v5 = vpop.permute.xlu0 %7770 }
 0x8fa   : > { %7852 = vst.msk [vmem:[#allocation5 + $0x3c] sm:$0xf] %vm7836_vm6, %v7771_v5 }
 0x8fb   : > { %v7213_v53 = vpop.f32.mrf.mxu3 }
 0x8fc   : > { %v7594_v50 = vpop.permute.xlu2 %7593  ;;  %v7703_v55 = vpack.c.bf16 %v7213_v53, %v7213_v53 }
 0x8fe   : > { %v7781_v62 = vpop.permute.xlu1 %7780  ;;  %7412 = vrot.lane.b32.xlu1 %v7319_v10, %s10271_s30  ;;  %7794 = vrot.lane.b32.xlu0 %v7703_v55, %s10273_s9 }
 0x901   : > { %v7580_v57 = vpop.permute.xlu0 %7579  ;;  %v9532_v29 = vld [vmem:[#allocation5 + $0x38] sm:$0xff] }
 0x902   : > { %7660 = vst.msk [vmem:[#allocation5 + $0x40] sm:$0xf] %vm7643_vm5, %v7580_v57 }
 0x903   : > { %7853 = vst.msk [vmem:[#allocation5 + $0x40] sm:$0xf] %vm7836_vm6, %v7773_v32  ;;  %v7216_v60 = vpop.f32.mrf.mxu3  ;;  %9302 = vmatmul.msk.bf16.gmra.mxu0 %vm420_vm0, %v9532_v29 }
 0x904   : > { %v7403_v43 = vpop.permute.xlu2 %7402  ;;  %v7704_v54 = vpack.c.bf16 %v7216_v60, %v7216_v60 }
 0x905   : > { %7475 = vst.msk [vmem:[#allocation5 + $0x60] sm:$0xf] %vm7450_vm4, %v7403_v43 }
 0x906   : > { %v7401_v19 = vpop.permute.xlu1 %7400  ;;  %7603 = vrot.lane.b32.xlu0 %v7511_v22, %s10272_s8  ;;  %7796 = vrot.lane.b32.xlu1 %v7704_v54, %s10273_s9 }
 0x907   : > { %7474 = vst.msk [vmem:[#allocation5 + $0x5c] sm:$0xf] %vm7450_vm4, %v7401_v19 }
 0x908   : > { %7667 = vst.msk [vmem:[#allocation5 + $0x5c] sm:$0xf] %vm7643_vm5, %v7594_v50 }
 0x909   : > { %v7775_v21 = vpop.permute.xlu0 %7774 }
 0x90a   : > { %7854 = vst.msk [vmem:[#allocation5 + $0x44] sm:$0xf] %vm7836_vm6, %v7775_v21 }
 0x90b   : > { %v7218_v17 = vpop.f32.mrf.mxu3 }
 0x90c   : > { %v7598_v1 = vpop.permute.xlu2 %7597  ;;  %v7705_v45 = vpack.c.bf16 %v7218_v17, %v7218_v17 }
 0x90e   : > { %v7785_v49 = vpop.permute.xlu1 %7784  ;;  %7416 = vrot.lane.b32.xlu1 %v7321_v28, %s10271_s30  ;;  %7798 = vrot.lane.b32.xlu0 %v7705_v45, %s10273_s9 }
 0x911   : > { %v7584_v4 = vpop.permute.xlu0 %7583  ;;  %v9533_v40 = vld [vmem:[#allocation5 + $0x40] sm:$0xff]  ;;  %v8068_v59 = vpop.f32.mrf.mxu0 }
 0x912   : > { %7662 = vst.msk [vmem:[#allocation5 + $0x48] sm:$0xf] %vm7643_vm5, %v7584_v4  ;;  %v8069_v8 = vadd.f32 %v14610_v13, %v8068_v59 }
 0x913   : > { %7855 = vst.msk [vmem:[#allocation5 + $0x48] sm:$0xf] %vm7836_vm6, %v7777_v51  ;;  %9303 = vmatmul.msk.bf16.gmra.mxu0 %vm420_vm0, %v9533_v40 }
 0x914   : > { %v7407_v52 = vpop.permute.xlu2 %7406  ;;  %8142 = vst.msk [vmem:[%s14617_s19 + $0x20] sm:$0xff] %vm420_vm0, %v8069_v8 }
 0x915   : > { %7477 = vst.msk [vmem:[#allocation5 + $0x68] sm:$0xf] %vm7450_vm4, %v7407_v52 }
 0x916   : > { %v7405_v12 = vpop.permute.xlu1 %7404  ;;  %7607 = vrot.lane.b32.xlu0 %v7513_v27, %s10272_s8 }
 0x917   : > { %7476 = vst.msk [vmem:[#allocation5 + $0x64] sm:$0xf] %vm7450_vm4, %v7405_v12 }
 0x918   : > { %7669 = vst.msk [vmem:[#allocation5 + $0x64] sm:$0xf] %vm7643_vm5, %v7598_v1 }
 0x919   : > { %v7779_v20 = vpop.permute.xlu0 %7778  ;;  %v8070_v25 = vpop.f32.mrf.mxu0 }
 0x91a   : > { %7856 = vst.msk [vmem:[#allocation5 + $0x4c] sm:$0xf] %vm7836_vm6, %v7779_v20  ;;  %v8071_v6 = vadd.f32 %v14610_v13, %v8070_v25 }
 0x91c   : > { %v7602_v44 = vpop.permute.xlu2 %7601  ;;  %8143 = vst.msk [vmem:[%s14617_s19 + $0x28] sm:$0xff] %vm420_vm0, %v8071_v6 }
 0x921   : > { %v7588_v58 = vpop.permute.xlu0 %7587  ;;  %v9534_v0 = vld [vmem:[#allocation5 + $0x48] sm:$0xff]  ;;  %v8073_v7 = vpop.f32.mrf.mxu0 }
 0x922   : > { %7664 = vst.msk [vmem:[#allocation5 + $0x50] sm:$0xf] %vm7643_vm5, %v7588_v58  ;;  %v7789_v38 = vpop.permute.xlu1 %7788  ;;  %v8074_v26 = vadd.f32 %v14610_v13, %v8073_v7 }
 0x923   : > { %7857 = vst.msk [vmem:[#allocation5 + $0x50] sm:$0xf] %vm7836_vm6, %v7781_v62  ;;  %9304 = vmatmul.msk.bf16.gmra.mxu0 %vm420_vm0, %v9534_v0 }
 0x924   : > { %v7411_v16 = vpop.permute.xlu2 %7410  ;;  %8144 = vst.msk [vmem:[%s14617_s19 + $0x30] sm:$0xff] %vm420_vm0, %v8074_v26 }
 0x925   : > { %7479 = vst.msk [vmem:[#allocation5 + $0x70] sm:$0xf] %vm7450_vm4, %v7411_v16 }
 0x929   : > { %v7783_v11 = vpop.permute.xlu0 %7782  ;;  %v8075_v35 = vpop.f32.mrf.mxu0 }
 0x92a   : > { %7858 = vst.msk [vmem:[#allocation5 + $0x54] sm:$0xf] %vm7836_vm6, %v7783_v11  ;;  %v7409_v47 = vpop.permute.xlu1 %7408  ;;  %v8076_v36 = vadd.f32 %v14610_v13, %v8075_v35 }
 0x92b   : > { %7478 = vst.msk [vmem:[#allocation5 + $0x6c] sm:$0xf] %vm7450_vm4, %v7409_v47 }
 0x92c   : > { %7671 = vst.msk [vmem:[#allocation5 + $0x6c] sm:$0xf] %vm7643_vm5, %v7602_v44  ;;  %v7606_v61 = vpop.permute.xlu2 %7605 }
 0x92d   : > { %8145 = vst.msk [vmem:[%s14617_s19 + $0x38] sm:$0xff] %vm420_vm0, %v8076_v36 }
 0x931   : > { %v7592_v48 = vpop.permute.xlu0 %7591  ;;  %v9535_v15 = vld [vmem:[#allocation5 + $0x50] sm:$0xff] }
 0x932   : > { %7666 = vst.msk [vmem:[#allocation5 + $0x58] sm:$0xf] %vm7643_vm5, %v7592_v48 }
 0x933   : > { %7859 = vst.msk [vmem:[#allocation5 + $0x58] sm:$0xf] %vm7836_vm6, %v7785_v49  ;;  %9305 = vmatmul.msk.bf16.gmra.mxu0 %vm420_vm0, %v9535_v15 }
 0x934   : > { %v7415_v39 = vpop.permute.xlu2 %7414 }
 0x935   : > { %7481 = vst.msk [vmem:[#allocation5 + $0x78] sm:$0xf] %vm7450_vm4, %v7415_v39 }
 0x939   : > { %v7787_v30 = vpop.permute.xlu0 %7786 }
 0x93a   : > { %7860 = vst.msk [vmem:[#allocation5 + $0x5c] sm:$0xf] %vm7836_vm6, %v7787_v30 }
 0x93c   : > { %v7610_v54 = vpop.permute.xlu2 %7609 }
 0x941   : > { %v7596_v46 = vpop.permute.xlu0 %7595  ;;  %v9536_v2 = vld [vmem:[#allocation5 + $0x58] sm:$0xff] }
 0x942   : > { %7668 = vst.msk [vmem:[#allocation5 + $0x60] sm:$0xf] %vm7643_vm5, %v7596_v46 }
 0x943   : > { %7861 = vst.msk [vmem:[#allocation5 + $0x60] sm:$0xf] %vm7836_vm6, %v7789_v38  ;;  %9306 = vmatmul.msk.bf16.gmra.mxu0 %vm420_vm0, %v9536_v2 }
 0x949   : > { %v7221_v23 = vpop.f32.mrf.mxu3  ;;  %v7791_v32 = vpop.permute.xlu0 %7790 }
 0x94a   : > { %v7706_v18 = vpack.c.bf16 %v7221_v23, %v7221_v23  ;;  %7862 = vst.msk [vmem:[#allocation5 + $0x64] sm:$0xf] %vm7836_vm6, %v7791_v32 }
 0x94c   : > { %7800 = vrot.lane.b32.xlu1 %v7706_v18, %s10273_s9 }
 0x950   : > { %v8078_v37 = vpop.f32.mrf.mxu0 }
 0x951   : > { %v7223_v14 = vpop.f32.mrf.mxu3  ;;  %v7600_v9 = vpop.permute.xlu0 %7599  ;;  %v9537_v3 = vld [vmem:[#allocation5 + $0x60] sm:$0xff]  ;;  %v8079_v56 = vadd.f32 %v14610_v13, %v8078_v37 }
 0x952   : > { %v7707_v24 = vpack.c.bf16 %v7223_v14, %v7223_v14  ;;  %7670 = vst.msk [vmem:[#allocation5 + $0x68] sm:$0xf] %vm7643_vm5, %v7600_v9 }
 0x953   : > { %9307 = vmatmul.msk.bf16.gmra.mxu0 %vm420_vm0, %v9537_v3  ;;  %8146 = vst.msk [vmem:[%s14617_s19 + $0x40] sm:$0xff] %vm420_vm0, %v8079_v56 }
 0x954   : > { %7802 = vrot.lane.b32.xlu0 %v7707_v24, %s10273_s9 }
 0x958   : > { %v8080_v51 = vpop.f32.mrf.mxu0 }
 0x959   : > { %v8081_v31 = vadd.f32 %v14610_v13, %v8080_v51 }
 0x95b   : > { %8147 = vst.msk [vmem:[%s14617_s19 + $0x48] sm:$0xff] %vm420_vm0, %v8081_v31 }
 0x960   : > { %v8083_v33 = vpop.f32.mrf.mxu0 }
 0x961   : > { %v8084_v34 = vadd.f32 %v14610_v13, %v8083_v33 }
 0x963   : > { %8148 = vst.msk [vmem:[%s14617_s19 + $0x50] sm:$0xff] %vm420_vm0, %v8084_v34 }
 0x968   : > { %v7793_v42 = vpop.permute.xlu1 %7792  ;;  %v8085_v63 = vpop.f32.mrf.mxu0 }
 0x969   : > { %7863 = vst.msk [vmem:[#allocation5 + $0x68] sm:$0xf] %vm7836_vm6, %v7793_v42  ;;  %v8086_v41 = vadd.f32 %v14610_v13, %v8085_v63 }
 0x96b   : > { %8149 = vst.msk [vmem:[%s14617_s19 + $0x58] sm:$0xff] %vm420_vm0, %v8086_v41 }
 0x970   : > { %v7413_v5 = vpop.permute.xlu1 %7412  ;;  %v7795_v53 = vpop.permute.xlu0 %7794 }
 0x971   : > { %7480 = vst.msk [vmem:[#allocation5 + $0x74] sm:$0xf] %vm7450_vm4, %v7413_v5  ;;  %v8088_v10 = vpop.f32.mrf.mxu0 }
 0x972   : > { %7673 = vst.msk [vmem:[#allocation5 + $0x74] sm:$0xf] %vm7643_vm5, %v7606_v61  ;;  %v8089_v50 = vadd.f32 %v14610_v13, %v8088_v10 }
 0x973   : > { %7864 = vst.msk [vmem:[#allocation5 + $0x6c] sm:$0xf] %vm7836_vm6, %v7795_v53 }
 0x974   : > { %8150 = vst.msk [vmem:[%s14617_s19 + $0x60] sm:$0xff] %vm420_vm0, %v8089_v50 }
 0x978   : > { %v7797_v55 = vpop.permute.xlu1 %7796  ;;  %v7604_v62 = vpop.permute.xlu0 %7603 }
 0x979   : > { %7672 = vst.msk [vmem:[#allocation5 + $0x70] sm:$0xf] %vm7643_vm5, %v7604_v62  ;;  %v8090_v57 = vpop.f32.mrf.mxu0 }
 0x97a   : > { %7865 = vst.msk [vmem:[#allocation5 + $0x70] sm:$0xf] %vm7836_vm6, %v7797_v55  ;;  %v9538_v29 = vld [vmem:[#allocation5 + $0x68] sm:$0xff]  ;;  %v8091_v60 = vadd.f32 %v14610_v13, %v8090_v57 }
 0x97b   : > { %9308 = vmatmul.msk.bf16.gmra.mxu0 %vm420_vm0, %v9538_v29 }
 0x97c   : > { %8151 = vst.msk [vmem:[%s14617_s19 + $0x68] sm:$0xff] %vm420_vm0, %v8091_v60 }
 0x980   : > { %v7417_v22 = vpop.permute.xlu1 %7416  ;;  %v7799_v43 = vpop.permute.xlu0 %7798 }
 0x981   : > { %7482 = vst.msk [vmem:[#allocation5 + $0x7c] sm:$0xf] %vm7450_vm4, %v7417_v22  ;;  %v8093_v19 = vpop.f32.mrf.mxu0 }
 0x982   : > { %7675 = vst.msk [vmem:[#allocation5 + $0x7c] sm:$0xf] %vm7643_vm5, %v7610_v54  ;;  %v8094_v21 = vadd.f32 %v14610_v13, %v8093_v19 }
 0x983   : > { %7866 = vst.msk [vmem:[#allocation5 + $0x74] sm:$0xf] %vm7836_vm6, %v7799_v43 }
 0x984   : > { %8152 = vst.msk [vmem:[%s14617_s19 + $0x70] sm:$0xff] %vm420_vm0, %v8094_v21 }
 0x988   : > { %v7608_v17 = vpop.permute.xlu0 %7607 }
 0x989   : > { %7674 = vst.msk [vmem:[#allocation5 + $0x78] sm:$0xf] %vm7643_vm5, %v7608_v17  ;;  %v8095_v28 = vpop.f32.mrf.mxu0 }
 0x98a   : > { %v9539_v1 = vld [vmem:[#allocation5 + $0x70] sm:$0xff]  ;;  %v8096_v45 = vadd.f32 %v14610_v13, %v8095_v28 }
 0x98b   : > { %9309 = vmatmul.msk.bf16.gmra.mxu0 %vm420_vm0, %v9539_v1 }
 0x98c   : > { %8153 = vst.msk [vmem:[%s14617_s19 + $0x78] sm:$0xff] %vm420_vm0, %v8096_v45 }
 0x991   : > { %v8098_v49 = vpop.f32.mrf.mxu0 }
 0x992   : > { %v8099_v4 = vadd.f32 %v14610_v13, %v8098_v49 }
 0x994   : > { %8154 = vst.msk [vmem:[%s14617_s19 + $0x80] sm:$0xff] %vm420_vm0, %v8099_v4 }
 0x999   : > { %v8100_v40 = vpop.f32.mrf.mxu0 }
 0x99a   : > { %v8101_v59 = vadd.f32 %v14610_v13, %v8100_v40 }
 0x99c   : > { %8155 = vst.msk [vmem:[%s14617_s19 + $0x88] sm:$0xff] %vm420_vm0, %v8101_v59 }
 0x9a1   : > { %v8103_v8 = vpop.f32.mrf.mxu0 }
 0x9a2   : > { %v8104_v27 = vadd.f32 %v14610_v13, %v8103_v8 }
 0x9a4   : > { %8156 = vst.msk [vmem:[%s14617_s19 + $0x90] sm:$0xff] %vm420_vm0, %v8104_v27 }
 0x9a9   : > { %v8105_v52 = vpop.f32.mrf.mxu0 }
 0x9aa   : > { %v8106_v12 = vadd.f32 %v14610_v13, %v8105_v52 }
 0x9ac   : > { %8157 = vst.msk [vmem:[%s14617_s19 + $0x98] sm:$0xff] %vm420_vm0, %v8106_v12 }
 0x9b1   : > { %v8108_v20 = vpop.f32.mrf.mxu0 }
 0x9b2   : > { %v8109_v25 = vadd.f32 %v14610_v13, %v8108_v20 }
 0x9b4   : > { %8158 = vst.msk [vmem:[%s14617_s19 + $0xa0] sm:$0xff] %vm420_vm0, %v8109_v25 }
 0x9b9   : > { %v8110_v6 = vpop.f32.mrf.mxu0 }
 0x9ba   : > { %v8111_v44 = vadd.f32 %v14610_v13, %v8110_v6 }
 0x9bc   : > { %8159 = vst.msk [vmem:[%s14617_s19 + $0xa8] sm:$0xff] %vm420_vm0, %v8111_v44 }
 0x9be   : > { %v7801_v58 = vpop.permute.xlu1 %7800 }
 0x9bf   : > { %7867 = vst.msk [vmem:[#allocation5 + $0x78] sm:$0xf] %vm7836_vm6, %v7801_v58 }
 0x9c1   : > { %v8113_v0 = vpop.f32.mrf.mxu0 }
 0x9c2   : > { %v8114_v38 = vadd.f32 %v14610_v13, %v8113_v0 }
 0x9c4   : > { %8160 = vst.msk [vmem:[%s14617_s19 + $0xb0] sm:$0xff] %vm420_vm0, %v8114_v38 }
 0x9c6   : > { %v7803_v7 = vpop.permute.xlu0 %7802 }
 0x9c7   : > { %7868 = vst.msk [vmem:[#allocation5 + $0x7c] sm:$0xf] %vm7836_vm6, %v7803_v7 }
 0x9c9   : > { %v8115_v26 = vpop.f32.mrf.mxu0 }
 0x9ca   : > { %v8116_v16 = vadd.f32 %v14610_v13, %v8115_v26 }
 0x9cc   : > { %8161 = vst.msk [vmem:[%s14617_s19 + $0xb8] sm:$0xff] %vm420_vm0, %v8116_v16 }
 0x9ce   : > { %v9540_v11 = vld [vmem:[#allocation5 + $0x78] sm:$0xff] }
 0x9cf   : > { %9310 = vmatmul.msk.bf16.gmra.mxu0 %vm420_vm0, %v9540_v11 }
 0x9d1   : > { %v8118_v47 = vpop.f32.mrf.mxu0 }
 0x9d2   : > { %v8119_v35 = vadd.f32 %v14610_v13, %v8118_v47 }
 0x9d4   : > { %8162 = vst.msk [vmem:[%s14617_s19 + $0xc0] sm:$0xff] %vm420_vm0, %v8119_v35 }
 0x9d9   : > { %v8120_v36 = vpop.f32.mrf.mxu0 }
 0x9da   : > { %v8121_v61 = vadd.f32 %v14610_v13, %v8120_v36 }
 0x9dc   : > { %8163 = vst.msk [vmem:[%s14617_s19 + $0xc8] sm:$0xff] %vm420_vm0, %v8121_v61 }
 0x9f8   : > { %v8123_v48 = vpop.f32.mrf.mxu0 }
 0x9f9   : > { %v8124_v15 = vadd.f32 %v14610_v13, %v8123_v48 }
 0x9fb   : > { %8164 = vst.msk [vmem:[%s14617_s19 + $0xd0] sm:$0xff] %vm420_vm0, %v8124_v15 }
 0xa00   : > { %v8125_v39 = vpop.f32.mrf.mxu0 }
 0xa01   : > { %v8126_v30 = vadd.f32 %v14610_v13, %v8125_v39 }
 0xa03   : > { %8165 = vst.msk [vmem:[%s14617_s19 + $0xd8] sm:$0xff] %vm420_vm0, %v8126_v30 }
 0xa08   : > { %v8128_v46 = vpop.f32.mrf.mxu0 }
 0xa09   : > { %v8129_v2 = vadd.f32 %v14610_v13, %v8128_v46 }
 0xa0b   : > { %8166 = vst.msk [vmem:[%s14617_s19 + $0xe0] sm:$0xff] %vm420_vm0, %v8129_v2 }
 0xa10   : > { %v8130_v23 = vpop.f32.mrf.mxu0 }
 0xa11   : > { %v8131_v32 = vadd.f32 %v14610_v13, %v8130_v23 }
 0xa13   : > { %8167 = vst.msk [vmem:[%s14617_s19 + $0xe8] sm:$0xff] %vm420_vm0, %v8131_v32 }
 0xa4c   : > { %v8133_v18 = vpop.f32.mrf.mxu0 }
 0xa4d   : > { %v8134_v14 = vadd.f32 %v14610_v13, %v8133_v18 }
 0xa4f   : > { %8168 = vst.msk [vmem:[%s14617_s19 + $0xf0] sm:$0xff] %vm420_vm0, %v8134_v14 }
 0xa54   : > { %v8135_v9 = vpop.f32.mrf.mxu0 }
 0xa55   : > { %v8136_v3 = vadd.f32 %v14610_v13, %v8135_v9 }
 0xa57   : > { %8169 = vst.msk [vmem:[%s14617_s19 + $0xf8] sm:$0xff] %vm420_vm0, %v8136_v3 }
 0xa58 PF: > { %s17_s24 = sadd.s32 1, %s10258_s24  }
 0xa59   : > { %p14_p4 = scmp.ge.s32.totalorder %s17_s24, 4  }
 0xa5b   :  { %16 = sbr.rel (!%p14_p4) target bundleno = 1 (0x1), region = 87 }

</bundles_post_ra>
